<compile_context>
chip_gen: v7x
topology: tpu7x:2x2x1
jax: 0.10.0
libtpu: 0.0.40
codegen_flags: <defaults>
</compile_context>

<pallas_src>
import math
import types

import numpy as np
import jax
import jax.numpy as jnp
from jax import lax
from jax.experimental import pallas as pl
from jax.experimental.pallas import tpu as pltpu

EPS = 1e-5  # GroupNorm default eps


# ----------------------------- host-side weight packing -----------------------------

class _SlabPacker:
    """Packs many small 2-D arrays into one lane-dense (rows, width) slab."""

    def __init__(self, row_align):
        self.row_align = row_align
        self.items = []

    def add(self, name, arr):
        a = np.asarray(arr, np.float32)
        assert a.ndim == 2, name
        self.items.append((name, a))

    def finish(self):
        width = max(a.shape[1] for _, a in self.items)
        width = ((width + 127) // 128) * 128
        index, blocks, off = {}, [], 0
        for name, a in self.items:
            r, c = a.shape
            rp = ((r + self.row_align - 1) // self.row_align) * self.row_align
            blk = np.zeros((rp, width), np.float32)
            blk[:r, :c] = a
            index[name] = (off, r, c)
            blocks.append(blk)
            off += rp
        return np.concatenate(blocks, axis=0), index


def pack_params(params, *, B, T, ltl_dim, n_groups=8, global_cond_dim=0,
                samples_per_step=None):
    """Flattens the parameter pytree + host constants into three packed slabs."""
    SB = B if samples_per_step is None else samples_per_step
    assert B % SB == 0
    downs = params["downs"]
    n_levels = len(downs)
    K = int(params["downs"][0]["res1"]["w1"].shape[0])
    assert K == 3, "fused conv assumes kernel_size=3 (module default)"
    in_out = [(int(m["res1"]["w1"].shape[1]), int(m["res1"]["w1"].shape[2]))
              for m in downs]
    channels = [c for _, c in in_out]
    input_dim = in_out[0][0]
    dsed = int(params["dse_w1"].shape[0])
    cond_dim = dsed + global_cond_dim
    fc = channels[-1]
    assert int(params["fin_w1"].shape[0]) == fc + ltl_dim + cond_dim

    # per-level per-sample temporal lengths (Downsample1d: k=3, stride=2, pad=1)
    Ts = [T]
    for _ in range(n_levels - 1):
        Ts.append((Ts[-1] - 1) // 2 + 1)

    # ---------------- bf16 matmul-weight slab (K taps pre-fused) ----------------
    wm = _SlabPacker(row_align=16)
    wm.add("dse_w1", params["dse_w1"])
    wm.add("dse_w2", params["dse_w2"])
    for lvl, m in enumerate(downs):
        for key, ridx in (("res1", 1), ("res2", 2)):
            q = m[key]
            pre = f"d{lvl}_r{ridx}_"
            k_, cin, cout = (int(s) for s in q["w1"].shape)
            wm.add(pre + "w1", np.asarray(q["w1"], np.float32).reshape(k_ * cin, cout))
            wm.add(pre + "w2", np.asarray(q["w2"], np.float32).reshape(k_ * cout, cout))
            if "wres" in q:
                wm.add(pre + "wres", q["wres"])
        if "down" in m:
            k_, cd, _ = (int(s) for s in m["down"]["w"].shape)
            wm.add(f"down_w_{lvl}",
                   np.asarray(m["down"]["w"], np.float32).reshape(k_ * cd, cd))
    fw1 = np.asarray(params["fin_w1"], np.float32)
    wm.add("fin_w1_trj", fw1[:fc])
    wm.add("fin_w1_ltl", fw1[fc:fc + ltl_dim])
    wm.add("fin_w1_gf", fw1[fc + ltl_dim:])
    fw2 = np.asarray(params["fin_w2"], np.float32)            # (fc//2, 1)
    fw2p = np.zeros((fw2.shape[0], 128), np.float32)          # lane-dense output head
    fw2p[:, :1] = fw2
    wm.add("fin_w2", fw2p)
    wm_slab, wm_idx = wm.finish()

    # --------- FiLM weights: one wide matrix, per-block 128-aligned segments ---------
    film_offs, off = [], 0
    for cout in [c for c in channels for _ in range(2)]:
        film_offs.append((off, cout))
        off += ((cout + 127) // 128) * 128
    condw = np.zeros((cond_dim, off), np.float32)
    blk = 0
    for m in downs:
        for key in ("res1", "res2"):
            cwb = np.asarray(m[key]["cond_w"], np.float32)
            o, cout = film_offs[blk]
            condw[:, o:o + cout] = cwb
            blk += 1

    # ---------------- f32 slab: biases / GN affine / host constants ----------------
    wv = _SlabPacker(row_align=8)
    wv.add("dse_b1", params["dse_b1"])
    wv.add("dse_b2", params["dse_b2"])
    for lvl, m in enumerate(downs):
        for key, ridx in (("res1", 1), ("res2", 2)):
            q = m[key]
            pre = f"d{lvl}_r{ridx}_"
            for nm in ("b1", "g1", "be1", "b2", "g2", "be2"):
                wv.add(pre + nm, q[nm])
            wv.add(pre + "condb", q["cond_b"])
            if "bres" in q:
                wv.add(pre + "bres", q["bres"])
        if "down" in m:
            wv.add(f"down_b_{lvl}", m["down"]["b"])
    wv.add("fin_b1", params["fin_b1"])
    fb2 = np.zeros((1, 128), np.float32)
    fb2[0, 0] = float(np.asarray(params["fin_b2"]).reshape(-1)[0])
    wv.add("fin_b2", fb2)

    # host constants: per-sample conv edge masks, stride-2 row selection, GN group-avg
    maxc = max([input_dim] + channels)
    for lvl, Tl in enumerate(Ts):
        n = SB * Tl
        lo = np.ones((n, maxc), np.float32)
        hi = np.ones((n, maxc), np.float32)
        lo[0::Tl, :] = 0.0          # zero-pad rows for the x[t-1] copy
        hi[Tl - 1::Tl, :] = 0.0     # zero-pad rows for the x[t+1] copy
        wv.add(f"mask_lo_{lvl}", lo)
        wv.add(f"mask_hi_{lvl}", hi)
    for lvl in range(n_levels - 1):
        Tin, Tout = Ts[lvl], Ts[lvl + 1]
        D = np.zeros((SB * Tout, SB * Tin), np.float32)
        for s in range(SB):
            for r in range(Tout):
                D[s * Tout + r, s * Tin + 2 * r] = 1.0
        wv.add(f"dsel_{lvl}", D)
    for lvl, (Tl, C) in enumerate(zip(Ts, channels)):
        gs = C // n_groups
        M = np.zeros((C, C), np.float32)
        for g in range(n_groups):
            M[g * gs:(g + 1) * gs, g * gs:(g + 1) * gs] = 1.0 / (Tl * gs)
        wv.add(f"mavg_{lvl}", M)
    wv_slab, wv_idx = wv.finish()

    packed = {
        "wmat": jnp.asarray(wm_slab, dtype=jnp.bfloat16),
        "condw": jnp.asarray(condw, dtype=jnp.bfloat16),
        "wvec": jnp.asarray(wv_slab, dtype=jnp.float32),
    }
    meta = types.SimpleNamespace(
        SB=SB, T=T, Ts=Ts, K=K, dsed=dsed, gcd=global_cond_dim,
        cond_dim=cond_dim, ltl_dim=ltl_dim, input_dim=input_dim,
        in_out=in_out, film_offs=film_offs, wm=wm_idx, wv=wv_idx)
    return packed, meta


# ------------------------------ fused forward kernel ------------------------------

def _make_kernel(meta):
    SB, Ts, dsed, gcd = meta.SB, meta.Ts, meta.dsed, meta.gcd
    in_out, film_offs = meta.in_out, meta.film_offs
    wm_idx, wv_idx = dict(meta.wm), dict(meta.wv)
    n_levels = len(in_out)
    f32, bf16 = jnp.float32, jnp.bfloat16

    def mish(x):
        # x * tanh(softplus(x)) == x * (t^2 - 1)/(t^2 + 1), t = 1 + exp(x)
        t = 1.0 + jnp.exp(jnp.minimum(x, 20.0))
        tt = t * t
        return x * (tt - 1.0) * pl.reciprocal(tt + 1.0, approx=True)

    def kernel(sample_ref, feat_ref, formula_ref, wmat_ref, condw_ref, wvec_ref,
               out_ref):
        def mat(name):                       # bf16 matmul-weight block (static offsets)
            off, r, c = wm_idx[name]
            return wmat_ref[off:off + r, :c]

        def vec(name, cols=None):            # f32 vector / constant block
            off, r, c = wv_idx[name]
            return wvec_ref[off:off + r, :(c if cols is None else cols)]

        def dotw(x, name):                   # bf16 MXU matmul, f32 accumulate
            return jnp.dot(x.astype(bf16), mat(name), preferred_element_type=f32)

        def shifted_cat(x, lvl, cin):
            # (N, 3*cin): [x[t-1], x[t], x[t+1]] with per-sample zero padding.
            n = SB * Ts[lvl]
            x_m1 = pltpu.roll(x, 1, axis=0) * vec(f"mask_lo_{lvl}", cin)
            x_p1 = pltpu.roll(x, n - 1, axis=0) * vec(f"mask_hi_{lvl}", cin)
            return jnp.concatenate([x_m1, x, x_p1], axis=1)

        def conv_same(x, wname, bname, lvl, cin):
            # k=3, stride-1, 'same' conv as ONE (N, 3*cin) @ (3*cin, cout) matmul.
            return dotw(shifted_cat(x, lvl, cin), wname) + vec(bname)

        def gn_mish(h, pre, which, lvl, C, film=None):
            # One-pass per-sample GroupNorm -> Mish -> optional per-sample FiLM bias.
            Tl = Ts[lvl]
            gamma = vec(pre + f"g{which}")
            beta = vec(pre + f"be{which}")
            stats = []
            for s in range(SB):
                hs = h[s * Tl:(s + 1) * Tl, :]
                stats.append(jnp.sum(hs, axis=0, keepdims=True))
                stats.append(jnp.sum(hs * hs, axis=0, keepdims=True))
            mq = jnp.dot(jnp.concatenate(stats, axis=0), vec(f"mavg_{lvl}"),
                         preferred_element_type=f32)          # (2*SB, C): mean | E[x^2]
            outs = []
            for s in range(SB):
                m = mq[2 * s:2 * s + 1, :]
                q = mq[2 * s + 1:2 * s + 2, :]
                a = gamma * lax.rsqrt(jnp.maximum(q - m * m, 0.0) + EPS)
                b = beta - m * a
                y = mish(h[s * Tl:(s + 1) * Tl, :] * a + b)
                if film is not None:
                    y = y + film[s:s + 1, :]
                outs.append(y)
            return jnp.concatenate(outs, axis=0)

        def res_block(x, pre, lvl, cin, cout, film):
            h = conv_same(x, pre + "w1", pre + "b1", lvl, cin)
            h = gn_mish(h, pre, 1, lvl, cout, film=film)      # FiLM (cond_predict_scale=False)
            h = conv_same(h, pre + "w2", pre + "b2", lvl, cout)
            h = gn_mish(h, pre, 2, lvl, cout)
            res = (dotw(x, pre + "wres") + vec(pre + "bres")) if cin != cout else x
            return h + res

        def downsample(x, lvl, cin):
            # k=3, stride-2, pad-1: per-sample even-row selection dot + one fused matmul.
            xc = shifted_cat(x, lvl, cin)
            xs = jnp.dot(vec(f"dsel_{lvl}"), xc, preferred_element_type=f32)
            return dotw(xs, f"down_w_{lvl}") + vec(f"down_b_{lvl}")

        # ---- diffusion step encoder: Linear -> Mish -> Linear (+ optional global_cond) ----
        feat = feat_ref[0].astype(f32)                         # (SB, dsed [+ gcd])
        h1 = mish(dotw(feat[:, :dsed], "dse_w1") + vec("dse_b1"))
        gf = dotw(h1, "dse_w2") + vec("dse_b2")                # (SB, dsed)
        if gcd:
            gf = jnp.concatenate([gf, feat[:, dsed:]], axis=1)  # (SB, cond_dim)

        # ---- FiLM biases of ALL res blocks in one lane-dense matmul ----
        cond_all = jnp.dot(mish(gf).astype(bf16), condw_ref[...],
                           preferred_element_type=f32)         # (SB, n_blocks*128)

        # ---- down path (all SB samples sublane-stacked) ----
        x = sample_ref[0].astype(f32)                          # (SB*T, input_dim)
        blk = 0
        for lvl, (cin0, cout) in enumerate(in_out):
            for ridx, cin in ((1, cin0), (2, cout)):
                pre = f"d{lvl}_r{ridx}_"
                o, _ = film_offs[blk]
                film = cond_all[:, o:o + cout] + vec(pre + "condb")   # (SB, cout)
                blk += 1
                x = res_block(x, pre, lvl, cin, cout, film)
            if lvl < n_levels - 1:
                x = downsample(x, lvl, cout)

        # ---- head: per-sample temporal mean, Linear -> Mish -> Linear (lane-padded) ----
        T_last = Ts[-1]
        trj = jnp.concatenate(
            [jnp.mean(x[s * T_last:(s + 1) * T_last, :], axis=0, keepdims=True)
             for s in range(SB)], axis=0)                      # (SB, fc)
        fe = formula_ref[0].astype(f32)                        # (SB, ltl)
        hh = mish(dotw(trj, "fin_w1_trj") + dotw(fe, "fin_w1_ltl")
                  + dotw(gf, "fin_w1_gf") + vec("fin_b1"))
        val = dotw(hh, "fin_w2") + vec("fin_b2")               # (SB, 128); lane 0 = value
        out_ref[0] = val.astype(out_ref.dtype)

    return kernel


# ----------------------------------- forward wrapper -----------------------------------

def sinusoidal_pos_emb(t, dim):
    half = dim // 2
    scale = math.log(10000.0) / (half - 1)
    freqs = jnp.exp(-scale * jnp.arange(half, dtype=jnp.float32))
    arg = t.astype(jnp.float32)[:, None] * freqs[None, :]
    return jnp.concatenate([jnp.sin(arg), jnp.cos(arg)], axis=-1)


def make_forward(meta):
    kernel = _make_kernel(meta)
    SB, T, in_dim = meta.SB, meta.T, meta.input_dim

    def forward(packed, sample, timestep, formula_embed, global_cond=None):
        """sample: (B, T, input_dim); timestep: scalar or (B,);
        formula_embed: (B, ltl_embed_output_dim); returns (B, 1)."""
        B, T_, ci = sample.shape
        assert T_ == T and ci == in_dim and B % SB == 0
        n_blk = B // SB

        ts = jnp.broadcast_to(jnp.asarray(timestep, jnp.float32).reshape(-1), (B,))
        feat = sinusoidal_pos_emb(ts, meta.dsed)
        if meta.gcd:
            feat = jnp.concatenate([feat, global_cond.astype(jnp.float32)], axis=-1)

        sample_s = sample.astype(jnp.float32).reshape(n_blk, SB * T, in_dim)
        feat_s = feat.reshape(n_blk, SB, feat.shape[-1])
        form_s = formula_embed.astype(jnp.float32).reshape(n_blk, SB, meta.ltl_dim)
        fdim = feat_s.shape[-1]

        out = pl.pallas_call(
            kernel,
            grid=(n_blk,),
            in_specs=[
                pl.BlockSpec((1, SB * T, in_dim), lambda b: (b, 0, 0)),
                pl.BlockSpec((1, SB, fdim), lambda b: (b, 0, 0)),
                pl.BlockSpec((1, SB, meta.ltl_dim), lambda b: (b, 0, 0)),
                pl.BlockSpec(packed["wmat"].shape, lambda b: (0, 0)),
                pl.BlockSpec(packed["condw"].shape, lambda b: (0, 0)),
                pl.BlockSpec(packed["wvec"].shape, lambda b: (0, 0)),
            ],
            out_specs=pl.BlockSpec((1, SB, 128), lambda b: (b, 0, 0)),
            out_shape=jax.ShapeDtypeStruct((n_blk, SB, 128), jnp.float32),
            compiler_params=pltpu.CompilerParams(
                dimension_semantics=("parallel",),
                vmem_limit_bytes=32 * 1024 * 1024),
        )(sample_s, feat_s, form_s, packed["wmat"], packed["condw"], packed["wvec"])
        return out.reshape(B, 128)[:, :1]

    return forward


# ------------------------------- parameter initialization -------------------------------

def _normal(key, shape, scale=0.1):
    return scale * jax.random.normal(key, shape, jnp.float32)


def init_resblock(key, cin, cout, cond_dim, K=3):
    ks = jax.random.split(key, 8)
    # conv weights stored as (K, Cin, Cout) == transpose of PyTorch's (Cout, Cin, K)
    p = {
        "w1": _normal(ks[0], (K, cin, cout)),
        "b1": _normal(ks[1], (1, cout)),
        "g1": jnp.ones((1, cout), jnp.float32),
        "be1": jnp.zeros((1, cout), jnp.float32),
        "w2": _normal(ks[2], (K, cout, cout)),
        "b2": _normal(ks[3], (1, cout)),
        "g2": jnp.ones((1, cout), jnp.float32),
        "be2": jnp.zeros((1, cout), jnp.float32),
        "cond_w": _normal(ks[4], (cond_dim, cout)),
        "cond_b": _normal(ks[5], (1, cout)),
    }
    if cin != cout:
        p["wres"] = _normal(ks[6], (cin, cout))
        p["bres"] = _normal(ks[7], (1, cout))
    return p


def init_params(key, input_dim, down_dims, dsed, cond_dim, ltl_out, K=3):
    all_dims = [input_dim] + list(down_dims)
    in_out = list(zip(all_dims[:-1], all_dims[1:]))
    keys = jax.random.split(key, 2 + len(in_out))
    params = {}
    k0, k1 = jax.random.split(keys[0])
    params["dse_w1"] = _normal(k0, (dsed, dsed * 4))
    params["dse_b1"] = jnp.zeros((1, dsed * 4), jnp.float32)
    params["dse_w2"] = _normal(k1, (dsed * 4, dsed))
    params["dse_b2"] = jnp.zeros((1, dsed), jnp.float32)
    downs = []
    for i, (din, dout) in enumerate(in_out):
        ka, kb, kc, kd = jax.random.split(keys[1 + i], 4)
        mod = {"res1": init_resblock(ka, din, dout, cond_dim, K),
               "res2": init_resblock(kb, dout, dout, cond_dim, K)}
        if i < len(in_out) - 1:
            mod["down"] = {"w": _normal(kc, (K, dout, dout)),
                           "b": _normal(kd, (1, dout))}
        downs.append(mod)
    params["downs"] = downs
    fc = down_dims[-1]
    kf1, kf2 = jax.random.split(keys[-1])
    params["fin_w1"] = _normal(kf1, (fc + ltl_out + cond_dim, fc // 2))
    params["fin_b1"] = jnp.zeros((1, fc // 2), jnp.float32)
    params["fin_w2"] = _normal(kf2, (fc // 2, 1))
    params["fin_b2"] = jnp.zeros((1, 1), jnp.float32)
    return params


# ------------------------------------------ main ------------------------------------------

if __name__ == "__main__":
    key = jax.random.PRNGKey(0)
    B, T, input_dim = 2, 16, 4
    down_dims = [32, 64, 128]
    dsed = 32                     # diffusion_step_embed_dim (small for demo)
    ltl_out = 32                  # ltl_embed_output_dim
    n_groups = 8

    kp, kx, kf = jax.random.split(key, 3)
    params = init_params(kp, input_dim, down_dims, dsed, cond_dim=dsed, ltl_out=ltl_out)
    sample = jax.random.normal(kx, (B, T, input_dim), jnp.float32)
    # TODO(synk): the RGCNRootShared LTL encoder runs on variable DGL graphs and has no
    # clean Pallas equivalent; a deterministic synthetic formula embedding is used instead.
    formula_embed = jax.random.normal(kf, (B, ltl_out), jnp.float32)

    packed, meta = pack_params(params, B=B, T=T, ltl_dim=ltl_out, n_groups=n_groups)
    fwd = jax.jit(make_forward(meta))
    out = fwd(packed, sample, 10, formula_embed)
    out = jax.block_until_ready(out)
    assert out.shape == (B, 1) and out.dtype == jnp.float32
    assert bool(jnp.all(jnp.isfinite(out)))
    print("KERNEL_OK")
</pallas_src>

<mosaic_0001>
module attributes {stable_mosaic.version = 11 : i64} {
  func.func @kernel(%arg0: i32, %arg1: memref<1x32x4xf32, #tpu.memory_space<vmem>>, %arg2: memref<1x2x32xf32, #tpu.memory_space<vmem>>, %arg3: memref<1x2x32xf32, #tpu.memory_space<vmem>>, %arg4: memref<3136x128xbf16, #tpu.memory_space<vmem>>, %arg5: memref<32x768xbf16, #tpu.memory_space<vmem>>, %arg6: memref<768x128xf32, #tpu.memory_space<vmem>>, %arg7: memref<1x2x128xf32, #tpu.memory_space<vmem>>) attributes {dimension_semantics = [#tpu.dimension_semantics<parallel>], iteration_bounds = array<i64: 1>, scalar_prefetch = 0 : i64, scratch_operands = 0 : i64, tpu.core_type = #tpu.core_type<tc>, window_params = [{transform_indices = @transform_0, window_bounds = array<i64: 1, 32, 4>}, {transform_indices = @transform_1, window_bounds = array<i64: 1, 2, 32>}, {transform_indices = @transform_2, window_bounds = array<i64: 1, 2, 32>}, {pipeline_mode = #tpu.pipeline_mode<synchronous>, transform_indices = @transform_3, window_bounds = array<i64: 3136, 128>}, {pipeline_mode = #tpu.pipeline_mode<synchronous>, transform_indices = @transform_4, window_bounds = array<i64: 32, 768>}, {pipeline_mode = #tpu.pipeline_mode<synchronous>, transform_indices = @transform_5, window_bounds = array<i64: 768, 128>}, {transform_indices = @transform_6, window_bounds = array<i64: 1, 2, 128>}]} {
    %c0 = arith.constant 0 : index
    %c0_0 = arith.constant 0 : index
    %c0_1 = arith.constant 0 : index
    %0 = vector.load %arg2[%c0, %c0_0, %c0_1] : memref<1x2x32xf32, #tpu.memory_space<vmem>>, vector<1x2x32xf32>
    %1 = vector.shape_cast %0 : vector<1x2x32xf32> to vector<2x32xf32>
    %2 = arith.truncf %1 : vector<2x32xf32> to vector<2x32xbf16>
    %c0_2 = arith.constant 0 : index
    %c0_3 = arith.constant 0 : index
    %3 = vector.load %arg4[%c0_2, %c0_3] : memref<3136x128xbf16, #tpu.memory_space<vmem>>, vector<32x128xbf16>
    %cst = arith.constant dense<0.000000e+00> : vector<2x128xf32>
    %4 = tpu.matmul %2, %3, %cst {dimension_numbers = #tpu.dot_dimension_numbers<[1], [0], [0], [1], [0, 0, 1, 1], [], []>} : vector<2x32xbf16>, vector<32x128xbf16>, vector<2x128xf32> -> vector<2x128xf32>
    %c0_4 = arith.constant 0 : index
    %c0_5 = arith.constant 0 : index
    %5 = vector.load %arg6[%c0_4, %c0_5] : memref<768x128xf32, #tpu.memory_space<vmem>>, vector<1x128xf32>
    %6 = vector.broadcast %5 : vector<1x128xf32> to vector<2x128xf32>
    %7 = arith.addf %4, %6 : vector<2x128xf32>
    %cst_6 = arith.constant 2.000000e+01 : f32
    %8 = vector.broadcast %cst_6 : f32 to vector<2x128xf32>
    %9 = arith.minimumf %7, %8 : vector<2x128xf32>
    %10 = math.exp %9 : vector<2x128xf32>
    %cst_7 = arith.constant 1.000000e+00 : f32
    %11 = vector.broadcast %cst_7 : f32 to vector<2x128xf32>
    %12 = arith.addf %11, %10 : vector<2x128xf32>
    %13 = arith.mulf %12, %12 : vector<2x128xf32>
    %cst_8 = arith.constant 1.000000e+00 : f32
    %14 = vector.broadcast %cst_8 : f32 to vector<2x128xf32>
    %15 = arith.subf %13, %14 : vector<2x128xf32>
    %16 = arith.mulf %7, %15 : vector<2x128xf32>
    %cst_9 = arith.constant 1.000000e+00 : f32
    %17 = vector.broadcast %cst_9 : f32 to vector<2x128xf32>
    %18 = arith.addf %13, %17 : vector<2x128xf32>
    %19 = tpu.reciprocal %18 {approx = true} : vector<2x128xf32> -> vector<2x128xf32>
    %20 = arith.mulf %16, %19 : vector<2x128xf32>
    %21 = arith.truncf %20 : vector<2x128xf32> to vector<2x128xbf16>
    %c32 = arith.constant 32 : index
    %c0_10 = arith.constant 0 : index
    %22 = vector.load %arg4[%c32, %c0_10] : memref<3136x128xbf16, #tpu.memory_space<vmem>>, vector<128x32xbf16>
    %cst_11 = arith.constant dense<0.000000e+00> : vector<2x32xf32>
    %23 = tpu.matmul %21, %22, %cst_11 {dimension_numbers = #tpu.dot_dimension_numbers<[1], [0], [0], [1], [0, 0, 1, 1], [], []>} : vector<2x128xbf16>, vector<128x32xbf16>, vector<2x32xf32> -> vector<2x32xf32>
    %c8 = arith.constant 8 : index
    %c0_12 = arith.constant 0 : index
    %24 = vector.load %arg6[%c8, %c0_12] : memref<768x128xf32, #tpu.memory_space<vmem>>, vector<1x32xf32>
    %25 = vector.broadcast %24 : vector<1x32xf32> to vector<2x32xf32>
    %26 = arith.addf %23, %25 : vector<2x32xf32>
    %cst_13 = arith.constant 2.000000e+01 : f32
    %27 = vector.broadcast %cst_13 : f32 to vector<2x32xf32>
    %28 = arith.minimumf %26, %27 : vector<2x32xf32>
    %29 = math.exp %28 : vector<2x32xf32>
    %cst_14 = arith.constant 1.000000e+00 : f32
    %30 = vector.broadcast %cst_14 : f32 to vector<2x32xf32>
    %31 = arith.addf %30, %29 : vector<2x32xf32>
    %32 = arith.mulf %31, %31 : vector<2x32xf32>
    %cst_15 = arith.constant 1.000000e+00 : f32
    %33 = vector.broadcast %cst_15 : f32 to vector<2x32xf32>
    %34 = arith.subf %32, %33 : vector<2x32xf32>
    %35 = arith.mulf %26, %34 : vector<2x32xf32>
    %cst_16 = arith.constant 1.000000e+00 : f32
    %36 = vector.broadcast %cst_16 : f32 to vector<2x32xf32>
    %37 = arith.addf %32, %36 : vector<2x32xf32>
    %38 = tpu.reciprocal %37 {approx = true} : vector<2x32xf32> -> vector<2x32xf32>
    %39 = arith.mulf %35, %38 : vector<2x32xf32>
    %40 = arith.truncf %39 : vector<2x32xf32> to vector<2x32xbf16>
    %c0_17 = arith.constant 0 : index
    %c0_18 = arith.constant 0 : index
    %41 = vector.load %arg5[%c0_17, %c0_18] : memref<32x768xbf16, #tpu.memory_space<vmem>>, vector<32x768xbf16>
    %cst_19 = arith.constant dense<0.000000e+00> : vector<2x768xf32>
    %42 = tpu.matmul %40, %41, %cst_19 {dimension_numbers = #tpu.dot_dimension_numbers<[1], [0], [0], [1], [0, 0, 1, 1], [], []>} : vector<2x32xbf16>, vector<32x768xbf16>, vector<2x768xf32> -> vector<2x768xf32>
    %c0_20 = arith.constant 0 : index
    %c0_21 = arith.constant 0 : index
    %c0_22 = arith.constant 0 : index
    %43 = vector.load %arg1[%c0_20, %c0_21, %c0_22] : memref<1x32x4xf32, #tpu.memory_space<vmem>>, vector<1x32x4xf32>
    %44 = vector.shape_cast %43 : vector<1x32x4xf32> to vector<32x4xf32>
    %45 = vector.extract_strided_slice %42 {offsets = [0, 0], sizes = [2, 32], strides = [1, 1]} : vector<2x768xf32> to vector<2x32xf32>
    %c64 = arith.constant 64 : index
    %c0_23 = arith.constant 0 : index
    %46 = vector.load %arg6[%c64, %c0_23] : memref<768x128xf32, #tpu.memory_space<vmem>>, vector<1x32xf32>
    %47 = vector.broadcast %46 : vector<1x32xf32> to vector<2x32xf32>
    %48 = arith.addf %45, %47 : vector<2x32xf32>
    %c1_i32 = arith.constant 1 : i32
    %49 = tpu.dynamic_rotate %44 by %c1_i32 dim 0 : vector<32x4xf32>, i32 -> vector<32x4xf32>
    %c408 = arith.constant 408 : index
    %c0_24 = arith.constant 0 : index
    %50 = vector.load %arg6[%c408, %c0_24] : memref<768x128xf32, #tpu.memory_space<vmem>>, vector<32x4xf32>
    %51 = arith.mulf %49, %50 : vector<32x4xf32>
    %c31_i32 = arith.constant 31 : i32
    %52 = tpu.dynamic_rotate %44 by %c31_i32 dim 0 : vector<32x4xf32>, i32 -> vector<32x4xf32>
    %c440 = arith.constant 440 : index
    %c0_25 = arith.constant 0 : index
    %53 = vector.load %arg6[%c440, %c0_25] : memref<768x128xf32, #tpu.memory_space<vmem>>, vector<32x4xf32>
    %54 = arith.mulf %52, %53 : vector<32x4xf32>
    %55 = tpu.concatenate %51, %44, %54 in 1 : vector<32x4xf32>, vector<32x4xf32>, vector<32x4xf32> -> vector<32x12xf32>
    %56 = arith.truncf %55 : vector<32x12xf32> to vector<32x12xbf16>
    %c160 = arith.constant 160 : index
    %c0_26 = arith.constant 0 : index
    %57 = vector.load %arg4[%c160, %c0_26] : memref<3136x128xbf16, #tpu.memory_space<vmem>>, vector<12x32xbf16>
    %cst_27 = arith.constant dense<0.000000e+00> : vector<32x32xf32>
    %58 = tpu.matmul %56, %57, %cst_27 {dimension_numbers = #tpu.dot_dimension_numbers<[1], [0], [0], [1], [0, 0, 1, 1], [], []>} : vector<32x12xbf16>, vector<12x32xbf16>, vector<32x32xf32> -> vector<32x32xf32>
    %c16 = arith.constant 16 : index
    %c0_28 = arith.constant 0 : index
    %59 = vector.load %arg6[%c16, %c0_28] : memref<768x128xf32, #tpu.memory_space<vmem>>, vector<1x32xf32>
    %60 = vector.broadcast %59 : vector<1x32xf32> to vector<32x32xf32>
    %61 = arith.addf %58, %60 : vector<32x32xf32>
    %c24 = arith.constant 24 : index
    %c0_29 = arith.constant 0 : index
    %62 = vector.load %arg6[%c24, %c0_29] : memref<768x128xf32, #tpu.memory_space<vmem>>, vector<1x32xf32>
    %c32_30 = arith.constant 32 : index
    %c0_31 = arith.constant 0 : index
    %63 = vector.load %arg6[%c32_30, %c0_31] : memref<768x128xf32, #tpu.memory_space<vmem>>, vector<1x32xf32>
    %64 = vector.extract_strided_slice %61 {offsets = [0, 0], sizes = [16, 32], strides = [1, 1]} : vector<32x32xf32> to vector<16x32xf32>
    %cst_32 = arith.constant dense<0.000000e+00> : vector<32xf32>
    %65 = vector.multi_reduction <add>, %64, %cst_32 [0] : vector<16x32xf32> to vector<32xf32>
    %66 = vector.shape_cast %65 : vector<32xf32> to vector<1x32xf32>
    %67 = arith.mulf %64, %64 : vector<16x32xf32>
    %cst_33 = arith.constant dense<0.000000e+00> : vector<32xf32>
    %68 = vector.multi_reduction <add>, %67, %cst_33 [0] : vector<16x32xf32> to vector<32xf32>
    %69 = vector.shape_cast %68 : vector<32xf32> to vector<1x32xf32>
    %70 = vector.extract_strided_slice %61 {offsets = [16, 0], sizes = [16, 32], strides = [1, 1]} : vector<32x32xf32> to vector<16x32xf32>
    %cst_34 = arith.constant dense<0.000000e+00> : vector<32xf32>
    %71 = vector.multi_reduction <add>, %70, %cst_34 [0] : vector<16x32xf32> to vector<32xf32>
    %72 = vector.shape_cast %71 : vector<32xf32> to vector<1x32xf32>
    %73 = arith.mulf %70, %70 : vector<16x32xf32>
    %cst_35 = arith.constant dense<0.000000e+00> : vector<32xf32>
    %74 = vector.multi_reduction <add>, %73, %cst_35 [0] : vector<16x32xf32> to vector<32xf32>
    %75 = vector.shape_cast %74 : vector<32xf32> to vector<1x32xf32>
    %76 = tpu.concatenate %66, %69, %72, %75 in 0 : vector<1x32xf32>, vector<1x32xf32>, vector<1x32xf32>, vector<1x32xf32> -> vector<4x32xf32>
    %c544 = arith.constant 544 : index
    %c0_36 = arith.constant 0 : index
    %77 = vector.load %arg6[%c544, %c0_36] : memref<768x128xf32, #tpu.memory_space<vmem>>, vector<32x32xf32>
    %cst_37 = arith.constant dense<0.000000e+00> : vector<4x32xf32>
    %78 = tpu.matmul %76, %77, %cst_37 {dimension_numbers = #tpu.dot_dimension_numbers<[1], [0], [0], [1], [0, 0, 1, 1], [], []>} : vector<4x32xf32>, vector<32x32xf32>, vector<4x32xf32> -> vector<4x32xf32>
    %79 = vector.extract_strided_slice %78 {offsets = [0, 0], sizes = [1, 32], strides = [1, 1]} : vector<4x32xf32> to vector<1x32xf32>
    %80 = vector.extract_strided_slice %78 {offsets = [1, 0], sizes = [1, 32], strides = [1, 1]} : vector<4x32xf32> to vector<1x32xf32>
    %81 = arith.mulf %79, %79 : vector<1x32xf32>
    %82 = arith.subf %80, %81 : vector<1x32xf32>
    %cst_38 = arith.constant 0.000000e+00 : f32
    %83 = vector.broadcast %cst_38 : f32 to vector<1x32xf32>
    %84 = arith.maximumf %82, %83 : vector<1x32xf32>
    %cst_39 = arith.constant 9.99999974E-6 : f32
    %85 = vector.broadcast %cst_39 : f32 to vector<1x32xf32>
    %86 = arith.addf %84, %85 : vector<1x32xf32>
    %87 = math.rsqrt %86 : vector<1x32xf32>
    %88 = arith.mulf %62, %87 : vector<1x32xf32>
    %89 = arith.mulf %79, %88 : vector<1x32xf32>
    %90 = arith.subf %63, %89 : vector<1x32xf32>
    %91 = vector.extract_strided_slice %61 {offsets = [0, 0], sizes = [16, 32], strides = [1, 1]} : vector<32x32xf32> to vector<16x32xf32>
    %92 = vector.broadcast %88 : vector<1x32xf32> to vector<16x32xf32>
    %93 = arith.mulf %91, %92 : vector<16x32xf32>
    %94 = vector.broadcast %90 : vector<1x32xf32> to vector<16x32xf32>
    %95 = arith.addf %93, %94 : vector<16x32xf32>
    %cst_40 = arith.constant 2.000000e+01 : f32
    %96 = vector.broadcast %cst_40 : f32 to vector<16x32xf32>
    %97 = arith.minimumf %95, %96 : vector<16x32xf32>
    %98 = math.exp %97 : vector<16x32xf32>
    %cst_41 = arith.constant 1.000000e+00 : f32
    %99 = vector.broadcast %cst_41 : f32 to vector<16x32xf32>
    %100 = arith.addf %99, %98 : vector<16x32xf32>
    %101 = arith.mulf %100, %100 : vector<16x32xf32>
    %cst_42 = arith.constant 1.000000e+00 : f32
    %102 = vector.broadcast %cst_42 : f32 to vector<16x32xf32>
    %103 = arith.subf %101, %102 : vector<16x32xf32>
    %104 = arith.mulf %95, %103 : vector<16x32xf32>
    %cst_43 = arith.constant 1.000000e+00 : f32
    %105 = vector.broadcast %cst_43 : f32 to vector<16x32xf32>
    %106 = arith.addf %101, %105 : vector<16x32xf32>
    %107 = tpu.reciprocal %106 {approx = true} : vector<16x32xf32> -> vector<16x32xf32>
    %108 = arith.mulf %104, %107 : vector<16x32xf32>
    %109 = vector.extract_strided_slice %48 {offsets = [0, 0], sizes = [1, 32], strides = [1, 1]} : vector<2x32xf32> to vector<1x32xf32>
    %110 = vector.broadcast %109 : vector<1x32xf32> to vector<16x32xf32>
    %111 = arith.addf %108, %110 : vector<16x32xf32>
    %112 = vector.extract_strided_slice %78 {offsets = [2, 0], sizes = [1, 32], strides = [1, 1]} : vector<4x32xf32> to vector<1x32xf32>
    %113 = vector.extract_strided_slice %78 {offsets = [3, 0], sizes = [1, 32], strides = [1, 1]} : vector<4x32xf32> to vector<1x32xf32>
    %114 = arith.mulf %112, %112 : vector<1x32xf32>
    %115 = arith.subf %113, %114 : vector<1x32xf32>
    %cst_44 = arith.constant 0.000000e+00 : f32
    %116 = vector.broadcast %cst_44 : f32 to vector<1x32xf32>
    %117 = arith.maximumf %115, %116 : vector<1x32xf32>
    %cst_45 = arith.constant 9.99999974E-6 : f32
    %118 = vector.broadcast %cst_45 : f32 to vector<1x32xf32>
    %119 = arith.addf %117, %118 : vector<1x32xf32>
    %120 = math.rsqrt %119 : vector<1x32xf32>
    %121 = arith.mulf %62, %120 : vector<1x32xf32>
    %122 = arith.mulf %112, %121 : vector<1x32xf32>
    %123 = arith.subf %63, %122 : vector<1x32xf32>
    %124 = vector.extract_strided_slice %61 {offsets = [16, 0], sizes = [16, 32], strides = [1, 1]} : vector<32x32xf32> to vector<16x32xf32>
    %125 = vector.broadcast %121 : vector<1x32xf32> to vector<16x32xf32>
    %126 = arith.mulf %124, %125 : vector<16x32xf32>
    %127 = vector.broadcast %123 : vector<1x32xf32> to vector<16x32xf32>
    %128 = arith.addf %126, %127 : vector<16x32xf32>
    %cst_46 = arith.constant 2.000000e+01 : f32
    %129 = vector.broadcast %cst_46 : f32 to vector<16x32xf32>
    %130 = arith.minimumf %128, %129 : vector<16x32xf32>
    %131 = math.exp %130 : vector<16x32xf32>
    %cst_47 = arith.constant 1.000000e+00 : f32
    %132 = vector.broadcast %cst_47 : f32 to vector<16x32xf32>
    %133 = arith.addf %132, %131 : vector<16x32xf32>
    %134 = arith.mulf %133, %133 : vector<16x32xf32>
    %cst_48 = arith.constant 1.000000e+00 : f32
    %135 = vector.broadcast %cst_48 : f32 to vector<16x32xf32>
    %136 = arith.subf %134, %135 : vector<16x32xf32>
    %137 = arith.mulf %128, %136 : vector<16x32xf32>
    %cst_49 = arith.constant 1.000000e+00 : f32
    %138 = vector.broadcast %cst_49 : f32 to vector<16x32xf32>
    %139 = arith.addf %134, %138 : vector<16x32xf32>
    %140 = tpu.reciprocal %139 {approx = true} : vector<16x32xf32> -> vector<16x32xf32>
    %141 = arith.mulf %137, %140 : vector<16x32xf32>
    %142 = vector.extract_strided_slice %48 {offsets = [1, 0], sizes = [1, 32], strides = [1, 1]} : vector<2x32xf32> to vector<1x32xf32>
    %143 = vector.broadcast %142 : vector<1x32xf32> to vector<16x32xf32>
    %144 = arith.addf %141, %143 : vector<16x32xf32>
    %145 = tpu.concatenate %111, %144 in 0 : vector<16x32xf32>, vector<16x32xf32> -> vector<32x32xf32>
    %c1_i32_50 = arith.constant 1 : i32
    %146 = tpu.dynamic_rotate %145 by %c1_i32_50 dim 0 : vector<32x32xf32>, i32 -> vector<32x32xf32>
    %c408_51 = arith.constant 408 : index
    %c0_52 = arith.constant 0 : index
    %147 = vector.load %arg6[%c408_51, %c0_52] : memref<768x128xf32, #tpu.memory_space<vmem>>, vector<32x32xf32>
    %148 = arith.mulf %146, %147 : vector<32x32xf32>
    %c31_i32_53 = arith.constant 31 : i32
    %149 = tpu.dynamic_rotate %145 by %c31_i32_53 dim 0 : vector<32x32xf32>, i32 -> vector<32x32xf32>
    %c440_54 = arith.constant 440 : index
    %c0_55 = arith.constant 0 : index
    %150 = vector.load %arg6[%c440_54, %c0_55] : memref<768x128xf32, #tpu.memory_space<vmem>>, vector<32x32xf32>
    %151 = arith.mulf %149, %150 : vector<32x32xf32>
    %152 = tpu.concatenate %148, %145, %151 in 1 : vector<32x32xf32>, vector<32x32xf32>, vector<32x32xf32> -> vector<32x96xf32>
    %153 = arith.truncf %152 : vector<32x96xf32> to vector<32x96xbf16>
    %c176 = arith.constant 176 : index
    %c0_56 = arith.constant 0 : index
    %154 = vector.load %arg4[%c176, %c0_56] : memref<3136x128xbf16, #tpu.memory_space<vmem>>, vector<96x32xbf16>
    %cst_57 = arith.constant dense<0.000000e+00> : vector<32x32xf32>
    %155 = tpu.matmul %153, %154, %cst_57 {dimension_numbers = #tpu.dot_dimension_numbers<[1], [0], [0], [1], [0, 0, 1, 1], [], []>} : vector<32x96xbf16>, vector<96x32xbf16>, vector<32x32xf32> -> vector<32x32xf32>
    %c40 = arith.constant 40 : index
    %c0_58 = arith.constant 0 : index
    %156 = vector.load %arg6[%c40, %c0_58] : memref<768x128xf32, #tpu.memory_space<vmem>>, vector<1x32xf32>
    %157 = vector.broadcast %156 : vector<1x32xf32> to vector<32x32xf32>
    %158 = arith.addf %155, %157 : vector<32x32xf32>
    %c48 = arith.constant 48 : index
    %c0_59 = arith.constant 0 : index
    %159 = vector.load %arg6[%c48, %c0_59] : memref<768x128xf32, #tpu.memory_space<vmem>>, vector<1x32xf32>
    %c56 = arith.constant 56 : index
    %c0_60 = arith.constant 0 : index
    %160 = vector.load %arg6[%c56, %c0_60] : memref<768x128xf32, #tpu.memory_space<vmem>>, vector<1x32xf32>
    %161 = vector.extract_strided_slice %158 {offsets = [0, 0], sizes = [16, 32], strides = [1, 1]} : vector<32x32xf32> to vector<16x32xf32>
    %cst_61 = arith.constant dense<0.000000e+00> : vector<32xf32>
    %162 = vector.multi_reduction <add>, %161, %cst_61 [0] : vector<16x32xf32> to vector<32xf32>
    %163 = vector.shape_cast %162 : vector<32xf32> to vector<1x32xf32>
    %164 = arith.mulf %161, %161 : vector<16x32xf32>
    %cst_62 = arith.constant dense<0.000000e+00> : vector<32xf32>
    %165 = vector.multi_reduction <add>, %164, %cst_62 [0] : vector<16x32xf32> to vector<32xf32>
    %166 = vector.shape_cast %165 : vector<32xf32> to vector<1x32xf32>
    %167 = vector.extract_strided_slice %158 {offsets = [16, 0], sizes = [16, 32], strides = [1, 1]} : vector<32x32xf32> to vector<16x32xf32>
    %cst_63 = arith.constant dense<0.000000e+00> : vector<32xf32>
    %168 = vector.multi_reduction <add>, %167, %cst_63 [0] : vector<16x32xf32> to vector<32xf32>
    %169 = vector.shape_cast %168 : vector<32xf32> to vector<1x32xf32>
    %170 = arith.mulf %167, %167 : vector<16x32xf32>
    %cst_64 = arith.constant dense<0.000000e+00> : vector<32xf32>
    %171 = vector.multi_reduction <add>, %170, %cst_64 [0] : vector<16x32xf32> to vector<32xf32>
    %172 = vector.shape_cast %171 : vector<32xf32> to vector<1x32xf32>
    %173 = tpu.concatenate %163, %166, %169, %172 in 0 : vector<1x32xf32>, vector<1x32xf32>, vector<1x32xf32>, vector<1x32xf32> -> vector<4x32xf32>
    %c544_65 = arith.constant 544 : index
    %c0_66 = arith.constant 0 : index
    %174 = vector.load %arg6[%c544_65, %c0_66] : memref<768x128xf32, #tpu.memory_space<vmem>>, vector<32x32xf32>
    %cst_67 = arith.constant dense<0.000000e+00> : vector<4x32xf32>
    %175 = tpu.matmul %173, %174, %cst_67 {dimension_numbers = #tpu.dot_dimension_numbers<[1], [0], [0], [1], [0, 0, 1, 1], [], []>} : vector<4x32xf32>, vector<32x32xf32>, vector<4x32xf32> -> vector<4x32xf32>
    %176 = vector.extract_strided_slice %175 {offsets = [0, 0], sizes = [1, 32], strides = [1, 1]} : vector<4x32xf32> to vector<1x32xf32>
    %177 = vector.extract_strided_slice %175 {offsets = [1, 0], sizes = [1, 32], strides = [1, 1]} : vector<4x32xf32> to vector<1x32xf32>
    %178 = arith.mulf %176, %176 : vector<1x32xf32>
    %179 = arith.subf %177, %178 : vector<1x32xf32>
    %cst_68 = arith.constant 0.000000e+00 : f32
    %180 = vector.broadcast %cst_68 : f32 to vector<1x32xf32>
    %181 = arith.maximumf %179, %180 : vector<1x32xf32>
    %cst_69 = arith.constant 9.99999974E-6 : f32
    %182 = vector.broadcast %cst_69 : f32 to vector<1x32xf32>
    %183 = arith.addf %181, %182 : vector<1x32xf32>
    %184 = math.rsqrt %183 : vector<1x32xf32>
    %185 = arith.mulf %159, %184 : vector<1x32xf32>
    %186 = arith.mulf %176, %185 : vector<1x32xf32>
    %187 = arith.subf %160, %186 : vector<1x32xf32>
    %188 = vector.extract_strided_slice %158 {offsets = [0, 0], sizes = [16, 32], strides = [1, 1]} : vector<32x32xf32> to vector<16x32xf32>
    %189 = vector.broadcast %185 : vector<1x32xf32> to vector<16x32xf32>
    %190 = arith.mulf %188, %189 : vector<16x32xf32>
    %191 = vector.broadcast %187 : vector<1x32xf32> to vector<16x32xf32>
    %192 = arith.addf %190, %191 : vector<16x32xf32>
    %cst_70 = arith.constant 2.000000e+01 : f32
    %193 = vector.broadcast %cst_70 : f32 to vector<16x32xf32>
    %194 = arith.minimumf %192, %193 : vector<16x32xf32>
    %195 = math.exp %194 : vector<16x32xf32>
    %cst_71 = arith.constant 1.000000e+00 : f32
    %196 = vector.broadcast %cst_71 : f32 to vector<16x32xf32>
    %197 = arith.addf %196, %195 : vector<16x32xf32>
    %198 = arith.mulf %197, %197 : vector<16x32xf32>
    %cst_72 = arith.constant 1.000000e+00 : f32
    %199 = vector.broadcast %cst_72 : f32 to vector<16x32xf32>
    %200 = arith.subf %198, %199 : vector<16x32xf32>
    %201 = arith.mulf %192, %200 : vector<16x32xf32>
    %cst_73 = arith.constant 1.000000e+00 : f32
    %202 = vector.broadcast %cst_73 : f32 to vector<16x32xf32>
    %203 = arith.addf %198, %202 : vector<16x32xf32>
    %204 = tpu.reciprocal %203 {approx = true} : vector<16x32xf32> -> vector<16x32xf32>
    %205 = arith.mulf %201, %204 : vector<16x32xf32>
    %206 = vector.extract_strided_slice %175 {offsets = [2, 0], sizes = [1, 32], strides = [1, 1]} : vector<4x32xf32> to vector<1x32xf32>
    %207 = vector.extract_strided_slice %175 {offsets = [3, 0], sizes = [1, 32], strides = [1, 1]} : vector<4x32xf32> to vector<1x32xf32>
    %208 = arith.mulf %206, %206 : vector<1x32xf32>
    %209 = arith.subf %207, %208 : vector<1x32xf32>
    %cst_74 = arith.constant 0.000000e+00 : f32
    %210 = vector.broadcast %cst_74 : f32 to vector<1x32xf32>
    %211 = arith.maximumf %209, %210 : vector<1x32xf32>
    %cst_75 = arith.constant 9.99999974E-6 : f32
    %212 = vector.broadcast %cst_75 : f32 to vector<1x32xf32>
    %213 = arith.addf %211, %212 : vector<1x32xf32>
    %214 = math.rsqrt %213 : vector<1x32xf32>
    %215 = arith.mulf %159, %214 : vector<1x32xf32>
    %216 = arith.mulf %206, %215 : vector<1x32xf32>
    %217 = arith.subf %160, %216 : vector<1x32xf32>
    %218 = vector.extract_strided_slice %158 {offsets = [16, 0], sizes = [16, 32], strides = [1, 1]} : vector<32x32xf32> to vector<16x32xf32>
    %219 = vector.broadcast %215 : vector<1x32xf32> to vector<16x32xf32>
    %220 = arith.mulf %218, %219 : vector<16x32xf32>
    %221 = vector.broadcast %217 : vector<1x32xf32> to vector<16x32xf32>
    %222 = arith.addf %220, %221 : vector<16x32xf32>
    %cst_76 = arith.constant 2.000000e+01 : f32
    %223 = vector.broadcast %cst_76 : f32 to vector<16x32xf32>
    %224 = arith.minimumf %222, %223 : vector<16x32xf32>
    %225 = math.exp %224 : vector<16x32xf32>
    %cst_77 = arith.constant 1.000000e+00 : f32
    %226 = vector.broadcast %cst_77 : f32 to vector<16x32xf32>
    %227 = arith.addf %226, %225 : vector<16x32xf32>
    %228 = arith.mulf %227, %227 : vector<16x32xf32>
    %cst_78 = arith.constant 1.000000e+00 : f32
    %229 = vector.broadcast %cst_78 : f32 to vector<16x32xf32>
    %230 = arith.subf %228, %229 : vector<16x32xf32>
    %231 = arith.mulf %222, %230 : vector<16x32xf32>
    %cst_79 = arith.constant 1.000000e+00 : f32
    %232 = vector.broadcast %cst_79 : f32 to vector<16x32xf32>
    %233 = arith.addf %228, %232 : vector<16x32xf32>
    %234 = tpu.reciprocal %233 {approx = true} : vector<16x32xf32> -> vector<16x32xf32>
    %235 = arith.mulf %231, %234 : vector<16x32xf32>
    %236 = tpu.concatenate %205, %235 in 0 : vector<16x32xf32>, vector<16x32xf32> -> vector<32x32xf32>
    %237 = arith.truncf %44 : vector<32x4xf32> to vector<32x4xbf16>
    %c272 = arith.constant 272 : index
    %c0_80 = arith.constant 0 : index
    %238 = vector.load %arg4[%c272, %c0_80] : memref<3136x128xbf16, #tpu.memory_space<vmem>>, vector<4x32xbf16>
    %cst_81 = arith.constant dense<0.000000e+00> : vector<32x32xf32>
    %239 = tpu.matmul %237, %238, %cst_81 {dimension_numbers = #tpu.dot_dimension_numbers<[1], [0], [0], [1], [0, 0, 1, 1], [], []>} : vector<32x4xbf16>, vector<4x32xbf16>, vector<32x32xf32> -> vector<32x32xf32>
    %c72 = arith.constant 72 : index
    %c0_82 = arith.constant 0 : index
    %240 = vector.load %arg6[%c72, %c0_82] : memref<768x128xf32, #tpu.memory_space<vmem>>, vector<1x32xf32>
    %241 = vector.broadcast %240 : vector<1x32xf32> to vector<32x32xf32>
    %242 = arith.addf %239, %241 : vector<32x32xf32>
    %243 = arith.addf %236, %242 : vector<32x32xf32>
    %244 = vector.extract_strided_slice %42 {offsets = [0, 128], sizes = [2, 32], strides = [1, 1]} : vector<2x768xf32> to vector<2x32xf32>
    %c128 = arith.constant 128 : index
    %c0_83 = arith.constant 0 : index
    %245 = vector.load %arg6[%c128, %c0_83] : memref<768x128xf32, #tpu.memory_space<vmem>>, vector<1x32xf32>
    %246 = vector.broadcast %245 : vector<1x32xf32> to vector<2x32xf32>
    %247 = arith.addf %244, %246 : vector<2x32xf32>
    %c1_i32_84 = arith.constant 1 : i32
    %248 = tpu.dynamic_rotate %243 by %c1_i32_84 dim 0 : vector<32x32xf32>, i32 -> vector<32x32xf32>
    %c408_85 = arith.constant 408 : index
    %c0_86 = arith.constant 0 : index
    %249 = vector.load %arg6[%c408_85, %c0_86] : memref<768x128xf32, #tpu.memory_space<vmem>>, vector<32x32xf32>
    %250 = arith.mulf %248, %249 : vector<32x32xf32>
    %c31_i32_87 = arith.constant 31 : i32
    %251 = tpu.dynamic_rotate %243 by %c31_i32_87 dim 0 : vector<32x32xf32>, i32 -> vector<32x32xf32>
    %c440_88 = arith.constant 440 : index
    %c0_89 = arith.constant 0 : index
    %252 = vector.load %arg6[%c440_88, %c0_89] : memref<768x128xf32, #tpu.memory_space<vmem>>, vector<32x32xf32>
    %253 = arith.mulf %251, %252 : vector<32x32xf32>
    %254 = tpu.concatenate %250, %243, %253 in 1 : vector<32x32xf32>, vector<32x32xf32>, vector<32x32xf32> -> vector<32x96xf32>
    %255 = arith.truncf %254 : vector<32x96xf32> to vector<32x96xbf16>
    %c288 = arith.constant 288 : index
    %c0_90 = arith.constant 0 : index
    %256 = vector.load %arg4[%c288, %c0_90] : memref<3136x128xbf16, #tpu.memory_space<vmem>>, vector<96x32xbf16>
    %cst_91 = arith.constant dense<0.000000e+00> : vector<32x32xf32>
    %257 = tpu.matmul %255, %256, %cst_91 {dimension_numbers = #tpu.dot_dimension_numbers<[1], [0], [0], [1], [0, 0, 1, 1], [], []>} : vector<32x96xbf16>, vector<96x32xbf16>, vector<32x32xf32> -> vector<32x32xf32>
    %c80 = arith.constant 80 : index
    %c0_92 = arith.constant 0 : index
    %258 = vector.load %arg6[%c80, %c0_92] : memref<768x128xf32, #tpu.memory_space<vmem>>, vector<1x32xf32>
    %259 = vector.broadcast %258 : vector<1x32xf32> to vector<32x32xf32>
    %260 = arith.addf %257, %259 : vector<32x32xf32>
    %c88 = arith.constant 88 : index
    %c0_93 = arith.constant 0 : index
    %261 = vector.load %arg6[%c88, %c0_93] : memref<768x128xf32, #tpu.memory_space<vmem>>, vector<1x32xf32>
    %c96 = arith.constant 96 : index
    %c0_94 = arith.constant 0 : index
    %262 = vector.load %arg6[%c96, %c0_94] : memref<768x128xf32, #tpu.memory_space<vmem>>, vector<1x32xf32>
    %263 = vector.extract_strided_slice %260 {offsets = [0, 0], sizes = [16, 32], strides = [1, 1]} : vector<32x32xf32> to vector<16x32xf32>
    %cst_95 = arith.constant dense<0.000000e+00> : vector<32xf32>
    %264 = vector.multi_reduction <add>, %263, %cst_95 [0] : vector<16x32xf32> to vector<32xf32>
    %265 = vector.shape_cast %264 : vector<32xf32> to vector<1x32xf32>
    %266 = arith.mulf %263, %263 : vector<16x32xf32>
    %cst_96 = arith.constant dense<0.000000e+00> : vector<32xf32>
    %267 = vector.multi_reduction <add>, %266, %cst_96 [0] : vector<16x32xf32> to vector<32xf32>
    %268 = vector.shape_cast %267 : vector<32xf32> to vector<1x32xf32>
    %269 = vector.extract_strided_slice %260 {offsets = [16, 0], sizes = [16, 32], strides = [1, 1]} : vector<32x32xf32> to vector<16x32xf32>
    %cst_97 = arith.constant dense<0.000000e+00> : vector<32xf32>
    %270 = vector.multi_reduction <add>, %269, %cst_97 [0] : vector<16x32xf32> to vector<32xf32>
    %271 = vector.shape_cast %270 : vector<32xf32> to vector<1x32xf32>
    %272 = arith.mulf %269, %269 : vector<16x32xf32>
    %cst_98 = arith.constant dense<0.000000e+00> : vector<32xf32>
    %273 = vector.multi_reduction <add>, %272, %cst_98 [0] : vector<16x32xf32> to vector<32xf32>
    %274 = vector.shape_cast %273 : vector<32xf32> to vector<1x32xf32>
    %275 = tpu.concatenate %265, %268, %271, %274 in 0 : vector<1x32xf32>, vector<1x32xf32>, vector<1x32xf32>, vector<1x32xf32> -> vector<4x32xf32>
    %c544_99 = arith.constant 544 : index
    %c0_100 = arith.constant 0 : index
    %276 = vector.load %arg6[%c544_99, %c0_100] : memref<768x128xf32, #tpu.memory_space<vmem>>, vector<32x32xf32>
    %cst_101 = arith.constant dense<0.000000e+00> : vector<4x32xf32>
    %277 = tpu.matmul %275, %276, %cst_101 {dimension_numbers = #tpu.dot_dimension_numbers<[1], [0], [0], [1], [0, 0, 1, 1], [], []>} : vector<4x32xf32>, vector<32x32xf32>, vector<4x32xf32> -> vector<4x32xf32>
    %278 = vector.extract_strided_slice %277 {offsets = [0, 0], sizes = [1, 32], strides = [1, 1]} : vector<4x32xf32> to vector<1x32xf32>
    %279 = vector.extract_strided_slice %277 {offsets = [1, 0], sizes = [1, 32], strides = [1, 1]} : vector<4x32xf32> to vector<1x32xf32>
    %280 = arith.mulf %278, %278 : vector<1x32xf32>
    %281 = arith.subf %279, %280 : vector<1x32xf32>
    %cst_102 = arith.constant 0.000000e+00 : f32
    %282 = vector.broadcast %cst_102 : f32 to vector<1x32xf32>
    %283 = arith.maximumf %281, %282 : vector<1x32xf32>
    %cst_103 = arith.constant 9.99999974E-6 : f32
    %284 = vector.broadcast %cst_103 : f32 to vector<1x32xf32>
    %285 = arith.addf %283, %284 : vector<1x32xf32>
    %286 = math.rsqrt %285 : vector<1x32xf32>
    %287 = arith.mulf %261, %286 : vector<1x32xf32>
    %288 = arith.mulf %278, %287 : vector<1x32xf32>
    %289 = arith.subf %262, %288 : vector<1x32xf32>
    %290 = vector.extract_strided_slice %260 {offsets = [0, 0], sizes = [16, 32], strides = [1, 1]} : vector<32x32xf32> to vector<16x32xf32>
    %291 = vector.broadcast %287 : vector<1x32xf32> to vector<16x32xf32>
    %292 = arith.mulf %290, %291 : vector<16x32xf32>
    %293 = vector.broadcast %289 : vector<1x32xf32> to vector<16x32xf32>
    %294 = arith.addf %292, %293 : vector<16x32xf32>
    %cst_104 = arith.constant 2.000000e+01 : f32
    %295 = vector.broadcast %cst_104 : f32 to vector<16x32xf32>
    %296 = arith.minimumf %294, %295 : vector<16x32xf32>
    %297 = math.exp %296 : vector<16x32xf32>
    %cst_105 = arith.constant 1.000000e+00 : f32
    %298 = vector.broadcast %cst_105 : f32 to vector<16x32xf32>
    %299 = arith.addf %298, %297 : vector<16x32xf32>
    %300 = arith.mulf %299, %299 : vector<16x32xf32>
    %cst_106 = arith.constant 1.000000e+00 : f32
    %301 = vector.broadcast %cst_106 : f32 to vector<16x32xf32>
    %302 = arith.subf %300, %301 : vector<16x32xf32>
    %303 = arith.mulf %294, %302 : vector<16x32xf32>
    %cst_107 = arith.constant 1.000000e+00 : f32
    %304 = vector.broadcast %cst_107 : f32 to vector<16x32xf32>
    %305 = arith.addf %300, %304 : vector<16x32xf32>
    %306 = tpu.reciprocal %305 {approx = true} : vector<16x32xf32> -> vector<16x32xf32>
    %307 = arith.mulf %303, %306 : vector<16x32xf32>
    %308 = vector.extract_strided_slice %247 {offsets = [0, 0], sizes = [1, 32], strides = [1, 1]} : vector<2x32xf32> to vector<1x32xf32>
    %309 = vector.broadcast %308 : vector<1x32xf32> to vector<16x32xf32>
    %310 = arith.addf %307, %309 : vector<16x32xf32>
    %311 = vector.extract_strided_slice %277 {offsets = [2, 0], sizes = [1, 32], strides = [1, 1]} : vector<4x32xf32> to vector<1x32xf32>
    %312 = vector.extract_strided_slice %277 {offsets = [3, 0], sizes = [1, 32], strides = [1, 1]} : vector<4x32xf32> to vector<1x32xf32>
    %313 = arith.mulf %311, %311 : vector<1x32xf32>
    %314 = arith.subf %312, %313 : vector<1x32xf32>
    %cst_108 = arith.constant 0.000000e+00 : f32
    %315 = vector.broadcast %cst_108 : f32 to vector<1x32xf32>
    %316 = arith.maximumf %314, %315 : vector<1x32xf32>
    %cst_109 = arith.constant 9.99999974E-6 : f32
    %317 = vector.broadcast %cst_109 : f32 to vector<1x32xf32>
    %318 = arith.addf %316, %317 : vector<1x32xf32>
    %319 = math.rsqrt %318 : vector<1x32xf32>
    %320 = arith.mulf %261, %319 : vector<1x32xf32>
    %321 = arith.mulf %311, %320 : vector<1x32xf32>
    %322 = arith.subf %262, %321 : vector<1x32xf32>
    %323 = vector.extract_strided_slice %260 {offsets = [16, 0], sizes = [16, 32], strides = [1, 1]} : vector<32x32xf32> to vector<16x32xf32>
    %324 = vector.broadcast %320 : vector<1x32xf32> to vector<16x32xf32>
    %325 = arith.mulf %323, %324 : vector<16x32xf32>
    %326 = vector.broadcast %322 : vector<1x32xf32> to vector<16x32xf32>
    %327 = arith.addf %325, %326 : vector<16x32xf32>
    %cst_110 = arith.constant 2.000000e+01 : f32
    %328 = vector.broadcast %cst_110 : f32 to vector<16x32xf32>
    %329 = arith.minimumf %327, %328 : vector<16x32xf32>
    %330 = math.exp %329 : vector<16x32xf32>
    %cst_111 = arith.constant 1.000000e+00 : f32
    %331 = vector.broadcast %cst_111 : f32 to vector<16x32xf32>
    %332 = arith.addf %331, %330 : vector<16x32xf32>
    %333 = arith.mulf %332, %332 : vector<16x32xf32>
    %cst_112 = arith.constant 1.000000e+00 : f32
    %334 = vector.broadcast %cst_112 : f32 to vector<16x32xf32>
    %335 = arith.subf %333, %334 : vector<16x32xf32>
    %336 = arith.mulf %327, %335 : vector<16x32xf32>
    %cst_113 = arith.constant 1.000000e+00 : f32
    %337 = vector.broadcast %cst_113 : f32 to vector<16x32xf32>
    %338 = arith.addf %333, %337 : vector<16x32xf32>
    %339 = tpu.reciprocal %338 {approx = true} : vector<16x32xf32> -> vector<16x32xf32>
    %340 = arith.mulf %336, %339 : vector<16x32xf32>
    %341 = vector.extract_strided_slice %247 {offsets = [1, 0], sizes = [1, 32], strides = [1, 1]} : vector<2x32xf32> to vector<1x32xf32>
    %342 = vector.broadcast %341 : vector<1x32xf32> to vector<16x32xf32>
    %343 = arith.addf %340, %342 : vector<16x32xf32>
    %344 = tpu.concatenate %310, %343 in 0 : vector<16x32xf32>, vector<16x32xf32> -> vector<32x32xf32>
    %c1_i32_114 = arith.constant 1 : i32
    %345 = tpu.dynamic_rotate %344 by %c1_i32_114 dim 0 : vector<32x32xf32>, i32 -> vector<32x32xf32>
    %c408_115 = arith.constant 408 : index
    %c0_116 = arith.constant 0 : index
    %346 = vector.load %arg6[%c408_115, %c0_116] : memref<768x128xf32, #tpu.memory_space<vmem>>, vector<32x32xf32>
    %347 = arith.mulf %345, %346 : vector<32x32xf32>
    %c31_i32_117 = arith.constant 31 : i32
    %348 = tpu.dynamic_rotate %344 by %c31_i32_117 dim 0 : vector<32x32xf32>, i32 -> vector<32x32xf32>
    %c440_118 = arith.constant 440 : index
    %c0_119 = arith.constant 0 : index
    %349 = vector.load %arg6[%c440_118, %c0_119] : memref<768x128xf32, #tpu.memory_space<vmem>>, vector<32x32xf32>
    %350 = arith.mulf %348, %349 : vector<32x32xf32>
    %351 = tpu.concatenate %347, %344, %350 in 1 : vector<32x32xf32>, vector<32x32xf32>, vector<32x32xf32> -> vector<32x96xf32>
    %352 = arith.truncf %351 : vector<32x96xf32> to vector<32x96xbf16>
    %c384 = arith.constant 384 : index
    %c0_120 = arith.constant 0 : index
    %353 = vector.load %arg4[%c384, %c0_120] : memref<3136x128xbf16, #tpu.memory_space<vmem>>, vector<96x32xbf16>
    %cst_121 = arith.constant dense<0.000000e+00> : vector<32x32xf32>
    %354 = tpu.matmul %352, %353, %cst_121 {dimension_numbers = #tpu.dot_dimension_numbers<[1], [0], [0], [1], [0, 0, 1, 1], [], []>} : vector<32x96xbf16>, vector<96x32xbf16>, vector<32x32xf32> -> vector<32x32xf32>
    %c104 = arith.constant 104 : index
    %c0_122 = arith.constant 0 : index
    %355 = vector.load %arg6[%c104, %c0_122] : memref<768x128xf32, #tpu.memory_space<vmem>>, vector<1x32xf32>
    %356 = vector.broadcast %355 : vector<1x32xf32> to vector<32x32xf32>
    %357 = arith.addf %354, %356 : vector<32x32xf32>
    %c112 = arith.constant 112 : index
    %c0_123 = arith.constant 0 : index
    %358 = vector.load %arg6[%c112, %c0_123] : memref<768x128xf32, #tpu.memory_space<vmem>>, vector<1x32xf32>
    %c120 = arith.constant 120 : index
    %c0_124 = arith.constant 0 : index
    %359 = vector.load %arg6[%c120, %c0_124] : memref<768x128xf32, #tpu.memory_space<vmem>>, vector<1x32xf32>
    %360 = vector.extract_strided_slice %357 {offsets = [0, 0], sizes = [16, 32], strides = [1, 1]} : vector<32x32xf32> to vector<16x32xf32>
    %cst_125 = arith.constant dense<0.000000e+00> : vector<32xf32>
    %361 = vector.multi_reduction <add>, %360, %cst_125 [0] : vector<16x32xf32> to vector<32xf32>
    %362 = vector.shape_cast %361 : vector<32xf32> to vector<1x32xf32>
    %363 = arith.mulf %360, %360 : vector<16x32xf32>
    %cst_126 = arith.constant dense<0.000000e+00> : vector<32xf32>
    %364 = vector.multi_reduction <add>, %363, %cst_126 [0] : vector<16x32xf32> to vector<32xf32>
    %365 = vector.shape_cast %364 : vector<32xf32> to vector<1x32xf32>
    %366 = vector.extract_strided_slice %357 {offsets = [16, 0], sizes = [16, 32], strides = [1, 1]} : vector<32x32xf32> to vector<16x32xf32>
    %cst_127 = arith.constant dense<0.000000e+00> : vector<32xf32>
    %367 = vector.multi_reduction <add>, %366, %cst_127 [0] : vector<16x32xf32> to vector<32xf32>
    %368 = vector.shape_cast %367 : vector<32xf32> to vector<1x32xf32>
    %369 = arith.mulf %366, %366 : vector<16x32xf32>
    %cst_128 = arith.constant dense<0.000000e+00> : vector<32xf32>
    %370 = vector.multi_reduction <add>, %369, %cst_128 [0] : vector<16x32xf32> to vector<32xf32>
    %371 = vector.shape_cast %370 : vector<32xf32> to vector<1x32xf32>
    %372 = tpu.concatenate %362, %365, %368, %371 in 0 : vector<1x32xf32>, vector<1x32xf32>, vector<1x32xf32>, vector<1x32xf32> -> vector<4x32xf32>
    %c544_129 = arith.constant 544 : index
    %c0_130 = arith.constant 0 : index
    %373 = vector.load %arg6[%c544_129, %c0_130] : memref<768x128xf32, #tpu.memory_space<vmem>>, vector<32x32xf32>
    %cst_131 = arith.constant dense<0.000000e+00> : vector<4x32xf32>
    %374 = tpu.matmul %372, %373, %cst_131 {dimension_numbers = #tpu.dot_dimension_numbers<[1], [0], [0], [1], [0, 0, 1, 1], [], []>} : vector<4x32xf32>, vector<32x32xf32>, vector<4x32xf32> -> vector<4x32xf32>
    %375 = vector.extract_strided_slice %374 {offsets = [0, 0], sizes = [1, 32], strides = [1, 1]} : vector<4x32xf32> to vector<1x32xf32>
    %376 = vector.extract_strided_slice %374 {offsets = [1, 0], sizes = [1, 32], strides = [1, 1]} : vector<4x32xf32> to vector<1x32xf32>
    %377 = arith.mulf %375, %375 : vector<1x32xf32>
    %378 = arith.subf %376, %377 : vector<1x32xf32>
    %cst_132 = arith.constant 0.000000e+00 : f32
    %379 = vector.broadcast %cst_132 : f32 to vector<1x32xf32>
    %380 = arith.maximumf %378, %379 : vector<1x32xf32>
    %cst_133 = arith.constant 9.99999974E-6 : f32
    %381 = vector.broadcast %cst_133 : f32 to vector<1x32xf32>
    %382 = arith.addf %380, %381 : vector<1x32xf32>
    %383 = math.rsqrt %382 : vector<1x32xf32>
    %384 = arith.mulf %358, %383 : vector<1x32xf32>
    %385 = arith.mulf %375, %384 : vector<1x32xf32>
    %386 = arith.subf %359, %385 : vector<1x32xf32>
    %387 = vector.extract_strided_slice %357 {offsets = [0, 0], sizes = [16, 32], strides = [1, 1]} : vector<32x32xf32> to vector<16x32xf32>
    %388 = vector.broadcast %384 : vector<1x32xf32> to vector<16x32xf32>
    %389 = arith.mulf %387, %388 : vector<16x32xf32>
    %390 = vector.broadcast %386 : vector<1x32xf32> to vector<16x32xf32>
    %391 = arith.addf %389, %390 : vector<16x32xf32>
    %cst_134 = arith.constant 2.000000e+01 : f32
    %392 = vector.broadcast %cst_134 : f32 to vector<16x32xf32>
    %393 = arith.minimumf %391, %392 : vector<16x32xf32>
    %394 = math.exp %393 : vector<16x32xf32>
    %cst_135 = arith.constant 1.000000e+00 : f32
    %395 = vector.broadcast %cst_135 : f32 to vector<16x32xf32>
    %396 = arith.addf %395, %394 : vector<16x32xf32>
    %397 = arith.mulf %396, %396 : vector<16x32xf32>
    %cst_136 = arith.constant 1.000000e+00 : f32
    %398 = vector.broadcast %cst_136 : f32 to vector<16x32xf32>
    %399 = arith.subf %397, %398 : vector<16x32xf32>
    %400 = arith.mulf %391, %399 : vector<16x32xf32>
    %cst_137 = arith.constant 1.000000e+00 : f32
    %401 = vector.broadcast %cst_137 : f32 to vector<16x32xf32>
    %402 = arith.addf %397, %401 : vector<16x32xf32>
    %403 = tpu.reciprocal %402 {approx = true} : vector<16x32xf32> -> vector<16x32xf32>
    %404 = arith.mulf %400, %403 : vector<16x32xf32>
    %405 = vector.extract_strided_slice %374 {offsets = [2, 0], sizes = [1, 32], strides = [1, 1]} : vector<4x32xf32> to vector<1x32xf32>
    %406 = vector.extract_strided_slice %374 {offsets = [3, 0], sizes = [1, 32], strides = [1, 1]} : vector<4x32xf32> to vector<1x32xf32>
    %407 = arith.mulf %405, %405 : vector<1x32xf32>
    %408 = arith.subf %406, %407 : vector<1x32xf32>
    %cst_138 = arith.constant 0.000000e+00 : f32
    %409 = vector.broadcast %cst_138 : f32 to vector<1x32xf32>
    %410 = arith.maximumf %408, %409 : vector<1x32xf32>
    %cst_139 = arith.constant 9.99999974E-6 : f32
    %411 = vector.broadcast %cst_139 : f32 to vector<1x32xf32>
    %412 = arith.addf %410, %411 : vector<1x32xf32>
    %413 = math.rsqrt %412 : vector<1x32xf32>
    %414 = arith.mulf %358, %413 : vector<1x32xf32>
    %415 = arith.mulf %405, %414 : vector<1x32xf32>
    %416 = arith.subf %359, %415 : vector<1x32xf32>
    %417 = vector.extract_strided_slice %357 {offsets = [16, 0], sizes = [16, 32], strides = [1, 1]} : vector<32x32xf32> to vector<16x32xf32>
    %418 = vector.broadcast %414 : vector<1x32xf32> to vector<16x32xf32>
    %419 = arith.mulf %417, %418 : vector<16x32xf32>
    %420 = vector.broadcast %416 : vector<1x32xf32> to vector<16x32xf32>
    %421 = arith.addf %419, %420 : vector<16x32xf32>
    %cst_140 = arith.constant 2.000000e+01 : f32
    %422 = vector.broadcast %cst_140 : f32 to vector<16x32xf32>
    %423 = arith.minimumf %421, %422 : vector<16x32xf32>
    %424 = math.exp %423 : vector<16x32xf32>
    %cst_141 = arith.constant 1.000000e+00 : f32
    %425 = vector.broadcast %cst_141 : f32 to vector<16x32xf32>
    %426 = arith.addf %425, %424 : vector<16x32xf32>
    %427 = arith.mulf %426, %426 : vector<16x32xf32>
    %cst_142 = arith.constant 1.000000e+00 : f32
    %428 = vector.broadcast %cst_142 : f32 to vector<16x32xf32>
    %429 = arith.subf %427, %428 : vector<16x32xf32>
    %430 = arith.mulf %421, %429 : vector<16x32xf32>
    %cst_143 = arith.constant 1.000000e+00 : f32
    %431 = vector.broadcast %cst_143 : f32 to vector<16x32xf32>
    %432 = arith.addf %427, %431 : vector<16x32xf32>
    %433 = tpu.reciprocal %432 {approx = true} : vector<16x32xf32> -> vector<16x32xf32>
    %434 = arith.mulf %430, %433 : vector<16x32xf32>
    %435 = tpu.concatenate %404, %434 in 0 : vector<16x32xf32>, vector<16x32xf32> -> vector<32x32xf32>
    %436 = arith.addf %435, %243 : vector<32x32xf32>
    %c1_i32_144 = arith.constant 1 : i32
    %437 = tpu.dynamic_rotate %436 by %c1_i32_144 dim 0 : vector<32x32xf32>, i32 -> vector<32x32xf32>
    %c408_145 = arith.constant 408 : index
    %c0_146 = arith.constant 0 : index
    %438 = vector.load %arg6[%c408_145, %c0_146] : memref<768x128xf32, #tpu.memory_space<vmem>>, vector<32x32xf32>
    %439 = arith.mulf %437, %438 : vector<32x32xf32>
    %c31_i32_147 = arith.constant 31 : i32
    %440 = tpu.dynamic_rotate %436 by %c31_i32_147 dim 0 : vector<32x32xf32>, i32 -> vector<32x32xf32>
    %c440_148 = arith.constant 440 : index
    %c0_149 = arith.constant 0 : index
    %441 = vector.load %arg6[%c440_148, %c0_149] : memref<768x128xf32, #tpu.memory_space<vmem>>, vector<32x32xf32>
    %442 = arith.mulf %440, %441 : vector<32x32xf32>
    %443 = tpu.concatenate %439, %436, %442 in 1 : vector<32x32xf32>, vector<32x32xf32>, vector<32x32xf32> -> vector<32x96xf32>
    %c520 = arith.constant 520 : index
    %c0_150 = arith.constant 0 : index
    %444 = vector.load %arg6[%c520, %c0_150] : memref<768x128xf32, #tpu.memory_space<vmem>>, vector<16x32xf32>
    %cst_151 = arith.constant dense<0.000000e+00> : vector<16x96xf32>
    %445 = tpu.matmul %444, %443, %cst_151 {dimension_numbers = #tpu.dot_dimension_numbers<[1], [0], [0], [1], [0, 0, 1, 1], [], []>} : vector<16x32xf32>, vector<32x96xf32>, vector<16x96xf32> -> vector<16x96xf32>
    %446 = arith.truncf %445 : vector<16x96xf32> to vector<16x96xbf16>
    %c480 = arith.constant 480 : index
    %c0_152 = arith.constant 0 : index
    %447 = vector.load %arg4[%c480, %c0_152] : memref<3136x128xbf16, #tpu.memory_space<vmem>>, vector<96x32xbf16>
    %cst_153 = arith.constant dense<0.000000e+00> : vector<16x32xf32>
    %448 = tpu.matmul %446, %447, %cst_153 {dimension_numbers = #tpu.dot_dimension_numbers<[1], [0], [0], [1], [0, 0, 1, 1], [], []>} : vector<16x96xbf16>, vector<96x32xbf16>, vector<16x32xf32> -> vector<16x32xf32>
    %c136 = arith.constant 136 : index
    %c0_154 = arith.constant 0 : index
    %449 = vector.load %arg6[%c136, %c0_154] : memref<768x128xf32, #tpu.memory_space<vmem>>, vector<1x32xf32>
    %450 = vector.broadcast %449 : vector<1x32xf32> to vector<16x32xf32>
    %451 = arith.addf %448, %450 : vector<16x32xf32>
    %452 = vector.extract_strided_slice %42 {offsets = [0, 256], sizes = [2, 64], strides = [1, 1]} : vector<2x768xf32> to vector<2x64xf32>
    %c192 = arith.constant 192 : index
    %c0_155 = arith.constant 0 : index
    %453 = vector.load %arg6[%c192, %c0_155] : memref<768x128xf32, #tpu.memory_space<vmem>>, vector<1x64xf32>
    %454 = vector.broadcast %453 : vector<1x64xf32> to vector<2x64xf32>
    %455 = arith.addf %452, %454 : vector<2x64xf32>
    %c1_i32_156 = arith.constant 1 : i32
    %456 = tpu.dynamic_rotate %451 by %c1_i32_156 dim 0 : vector<16x32xf32>, i32 -> vector<16x32xf32>
    %c472 = arith.constant 472 : index
    %c0_157 = arith.constant 0 : index
    %457 = vector.load %arg6[%c472, %c0_157] : memref<768x128xf32, #tpu.memory_space<vmem>>, vector<16x32xf32>
    %458 = arith.mulf %456, %457 : vector<16x32xf32>
    %c15_i32 = arith.constant 15 : i32
    %459 = tpu.dynamic_rotate %451 by %c15_i32 dim 0 : vector<16x32xf32>, i32 -> vector<16x32xf32>
    %c488 = arith.constant 488 : index
    %c0_158 = arith.constant 0 : index
    %460 = vector.load %arg6[%c488, %c0_158] : memref<768x128xf32, #tpu.memory_space<vmem>>, vector<16x32xf32>
    %461 = arith.mulf %459, %460 : vector<16x32xf32>
    %462 = tpu.concatenate %458, %451, %461 in 1 : vector<16x32xf32>, vector<16x32xf32>, vector<16x32xf32> -> vector<16x96xf32>
    %463 = arith.truncf %462 : vector<16x96xf32> to vector<16x96xbf16>
    %c576 = arith.constant 576 : index
    %c0_159 = arith.constant 0 : index
    %464 = vector.load %arg4[%c576, %c0_159] : memref<3136x128xbf16, #tpu.memory_space<vmem>>, vector<96x64xbf16>
    %cst_160 = arith.constant dense<0.000000e+00> : vector<16x64xf32>
    %465 = tpu.matmul %463, %464, %cst_160 {dimension_numbers = #tpu.dot_dimension_numbers<[1], [0], [0], [1], [0, 0, 1, 1], [], []>} : vector<16x96xbf16>, vector<96x64xbf16>, vector<16x64xf32> -> vector<16x64xf32>
    %c144 = arith.constant 144 : index
    %c0_161 = arith.constant 0 : index
    %466 = vector.load %arg6[%c144, %c0_161] : memref<768x128xf32, #tpu.memory_space<vmem>>, vector<1x64xf32>
    %467 = vector.broadcast %466 : vector<1x64xf32> to vector<16x64xf32>
    %468 = arith.addf %465, %467 : vector<16x64xf32>
    %c152 = arith.constant 152 : index
    %c0_162 = arith.constant 0 : index
    %469 = vector.load %arg6[%c152, %c0_162] : memref<768x128xf32, #tpu.memory_space<vmem>>, vector<1x64xf32>
    %c160_163 = arith.constant 160 : index
    %c0_164 = arith.constant 0 : index
    %470 = vector.load %arg6[%c160_163, %c0_164] : memref<768x128xf32, #tpu.memory_space<vmem>>, vector<1x64xf32>
    %471 = vector.extract_strided_slice %468 {offsets = [0, 0], sizes = [8, 64], strides = [1, 1]} : vector<16x64xf32> to vector<8x64xf32>
    %cst_165 = arith.constant dense<0.000000e+00> : vector<64xf32>
    %472 = vector.multi_reduction <add>, %471, %cst_165 [0] : vector<8x64xf32> to vector<64xf32>
    %473 = vector.shape_cast %472 : vector<64xf32> to vector<1x64xf32>
    %474 = arith.mulf %471, %471 : vector<8x64xf32>
    %cst_166 = arith.constant dense<0.000000e+00> : vector<64xf32>
    %475 = vector.multi_reduction <add>, %474, %cst_166 [0] : vector<8x64xf32> to vector<64xf32>
    %476 = vector.shape_cast %475 : vector<64xf32> to vector<1x64xf32>
    %477 = vector.extract_strided_slice %468 {offsets = [8, 0], sizes = [8, 64], strides = [1, 1]} : vector<16x64xf32> to vector<8x64xf32>
    %cst_167 = arith.constant dense<0.000000e+00> : vector<64xf32>
    %478 = vector.multi_reduction <add>, %477, %cst_167 [0] : vector<8x64xf32> to vector<64xf32>
    %479 = vector.shape_cast %478 : vector<64xf32> to vector<1x64xf32>
    %480 = arith.mulf %477, %477 : vector<8x64xf32>
    %cst_168 = arith.constant dense<0.000000e+00> : vector<64xf32>
    %481 = vector.multi_reduction <add>, %480, %cst_168 [0] : vector<8x64xf32> to vector<64xf32>
    %482 = vector.shape_cast %481 : vector<64xf32> to vector<1x64xf32>
    %483 = tpu.concatenate %473, %476, %479, %482 in 0 : vector<1x64xf32>, vector<1x64xf32>, vector<1x64xf32>, vector<1x64xf32> -> vector<4x64xf32>
    %c576_169 = arith.constant 576 : index
    %c0_170 = arith.constant 0 : index
    %484 = vector.load %arg6[%c576_169, %c0_170] : memref<768x128xf32, #tpu.memory_space<vmem>>, vector<64x64xf32>
    %cst_171 = arith.constant dense<0.000000e+00> : vector<4x64xf32>
    %485 = tpu.matmul %483, %484, %cst_171 {dimension_numbers = #tpu.dot_dimension_numbers<[1], [0], [0], [1], [0, 0, 1, 1], [], []>} : vector<4x64xf32>, vector<64x64xf32>, vector<4x64xf32> -> vector<4x64xf32>
    %486 = vector.extract_strided_slice %485 {offsets = [0, 0], sizes = [1, 64], strides = [1, 1]} : vector<4x64xf32> to vector<1x64xf32>
    %487 = vector.extract_strided_slice %485 {offsets = [1, 0], sizes = [1, 64], strides = [1, 1]} : vector<4x64xf32> to vector<1x64xf32>
    %488 = arith.mulf %486, %486 : vector<1x64xf32>
    %489 = arith.subf %487, %488 : vector<1x64xf32>
    %cst_172 = arith.constant 0.000000e+00 : f32
    %490 = vector.broadcast %cst_172 : f32 to vector<1x64xf32>
    %491 = arith.maximumf %489, %490 : vector<1x64xf32>
    %cst_173 = arith.constant 9.99999974E-6 : f32
    %492 = vector.broadcast %cst_173 : f32 to vector<1x64xf32>
    %493 = arith.addf %491, %492 : vector<1x64xf32>
    %494 = math.rsqrt %493 : vector<1x64xf32>
    %495 = arith.mulf %469, %494 : vector<1x64xf32>
    %496 = arith.mulf %486, %495 : vector<1x64xf32>
    %497 = arith.subf %470, %496 : vector<1x64xf32>
    %498 = vector.extract_strided_slice %468 {offsets = [0, 0], sizes = [8, 64], strides = [1, 1]} : vector<16x64xf32> to vector<8x64xf32>
    %499 = vector.broadcast %495 : vector<1x64xf32> to vector<8x64xf32>
    %500 = arith.mulf %498, %499 : vector<8x64xf32>
    %501 = vector.broadcast %497 : vector<1x64xf32> to vector<8x64xf32>
    %502 = arith.addf %500, %501 : vector<8x64xf32>
    %cst_174 = arith.constant 2.000000e+01 : f32
    %503 = vector.broadcast %cst_174 : f32 to vector<8x64xf32>
    %504 = arith.minimumf %502, %503 : vector<8x64xf32>
    %505 = math.exp %504 : vector<8x64xf32>
    %cst_175 = arith.constant 1.000000e+00 : f32
    %506 = vector.broadcast %cst_175 : f32 to vector<8x64xf32>
    %507 = arith.addf %506, %505 : vector<8x64xf32>
    %508 = arith.mulf %507, %507 : vector<8x64xf32>
    %cst_176 = arith.constant 1.000000e+00 : f32
    %509 = vector.broadcast %cst_176 : f32 to vector<8x64xf32>
    %510 = arith.subf %508, %509 : vector<8x64xf32>
    %511 = arith.mulf %502, %510 : vector<8x64xf32>
    %cst_177 = arith.constant 1.000000e+00 : f32
    %512 = vector.broadcast %cst_177 : f32 to vector<8x64xf32>
    %513 = arith.addf %508, %512 : vector<8x64xf32>
    %514 = tpu.reciprocal %513 {approx = true} : vector<8x64xf32> -> vector<8x64xf32>
    %515 = arith.mulf %511, %514 : vector<8x64xf32>
    %516 = vector.extract_strided_slice %455 {offsets = [0, 0], sizes = [1, 64], strides = [1, 1]} : vector<2x64xf32> to vector<1x64xf32>
    %517 = vector.broadcast %516 : vector<1x64xf32> to vector<8x64xf32>
    %518 = arith.addf %515, %517 : vector<8x64xf32>
    %519 = vector.extract_strided_slice %485 {offsets = [2, 0], sizes = [1, 64], strides = [1, 1]} : vector<4x64xf32> to vector<1x64xf32>
    %520 = vector.extract_strided_slice %485 {offsets = [3, 0], sizes = [1, 64], strides = [1, 1]} : vector<4x64xf32> to vector<1x64xf32>
    %521 = arith.mulf %519, %519 : vector<1x64xf32>
    %522 = arith.subf %520, %521 : vector<1x64xf32>
    %cst_178 = arith.constant 0.000000e+00 : f32
    %523 = vector.broadcast %cst_178 : f32 to vector<1x64xf32>
    %524 = arith.maximumf %522, %523 : vector<1x64xf32>
    %cst_179 = arith.constant 9.99999974E-6 : f32
    %525 = vector.broadcast %cst_179 : f32 to vector<1x64xf32>
    %526 = arith.addf %524, %525 : vector<1x64xf32>
    %527 = math.rsqrt %526 : vector<1x64xf32>
    %528 = arith.mulf %469, %527 : vector<1x64xf32>
    %529 = arith.mulf %519, %528 : vector<1x64xf32>
    %530 = arith.subf %470, %529 : vector<1x64xf32>
    %531 = vector.extract_strided_slice %468 {offsets = [8, 0], sizes = [8, 64], strides = [1, 1]} : vector<16x64xf32> to vector<8x64xf32>
    %532 = vector.broadcast %528 : vector<1x64xf32> to vector<8x64xf32>
    %533 = arith.mulf %531, %532 : vector<8x64xf32>
    %534 = vector.broadcast %530 : vector<1x64xf32> to vector<8x64xf32>
    %535 = arith.addf %533, %534 : vector<8x64xf32>
    %cst_180 = arith.constant 2.000000e+01 : f32
    %536 = vector.broadcast %cst_180 : f32 to vector<8x64xf32>
    %537 = arith.minimumf %535, %536 : vector<8x64xf32>
    %538 = math.exp %537 : vector<8x64xf32>
    %cst_181 = arith.constant 1.000000e+00 : f32
    %539 = vector.broadcast %cst_181 : f32 to vector<8x64xf32>
    %540 = arith.addf %539, %538 : vector<8x64xf32>
    %541 = arith.mulf %540, %540 : vector<8x64xf32>
    %cst_182 = arith.constant 1.000000e+00 : f32
    %542 = vector.broadcast %cst_182 : f32 to vector<8x64xf32>
    %543 = arith.subf %541, %542 : vector<8x64xf32>
    %544 = arith.mulf %535, %543 : vector<8x64xf32>
    %cst_183 = arith.constant 1.000000e+00 : f32
    %545 = vector.broadcast %cst_183 : f32 to vector<8x64xf32>
    %546 = arith.addf %541, %545 : vector<8x64xf32>
    %547 = tpu.reciprocal %546 {approx = true} : vector<8x64xf32> -> vector<8x64xf32>
    %548 = arith.mulf %544, %547 : vector<8x64xf32>
    %549 = vector.extract_strided_slice %455 {offsets = [1, 0], sizes = [1, 64], strides = [1, 1]} : vector<2x64xf32> to vector<1x64xf32>
    %550 = vector.broadcast %549 : vector<1x64xf32> to vector<8x64xf32>
    %551 = arith.addf %548, %550 : vector<8x64xf32>
    %552 = tpu.concatenate %518, %551 in 0 : vector<8x64xf32>, vector<8x64xf32> -> vector<16x64xf32>
    %c1_i32_184 = arith.constant 1 : i32
    %553 = tpu.dynamic_rotate %552 by %c1_i32_184 dim 0 : vector<16x64xf32>, i32 -> vector<16x64xf32>
    %c472_185 = arith.constant 472 : index
    %c0_186 = arith.constant 0 : index
    %554 = vector.load %arg6[%c472_185, %c0_186] : memref<768x128xf32, #tpu.memory_space<vmem>>, vector<16x64xf32>
    %555 = arith.mulf %553, %554 : vector<16x64xf32>
    %c15_i32_187 = arith.constant 15 : i32
    %556 = tpu.dynamic_rotate %552 by %c15_i32_187 dim 0 : vector<16x64xf32>, i32 -> vector<16x64xf32>
    %c488_188 = arith.constant 488 : index
    %c0_189 = arith.constant 0 : index
    %557 = vector.load %arg6[%c488_188, %c0_189] : memref<768x128xf32, #tpu.memory_space<vmem>>, vector<16x64xf32>
    %558 = arith.mulf %556, %557 : vector<16x64xf32>
    %559 = tpu.concatenate %555, %552, %558 in 1 : vector<16x64xf32>, vector<16x64xf32>, vector<16x64xf32> -> vector<16x192xf32>
    %560 = arith.truncf %559 : vector<16x192xf32> to vector<16x192xbf16>
    %c672 = arith.constant 672 : index
    %c0_190 = arith.constant 0 : index
    %561 = vector.load %arg4[%c672, %c0_190] : memref<3136x128xbf16, #tpu.memory_space<vmem>>, vector<192x64xbf16>
    %cst_191 = arith.constant dense<0.000000e+00> : vector<16x64xf32>
    %562 = tpu.matmul %560, %561, %cst_191 {dimension_numbers = #tpu.dot_dimension_numbers<[1], [0], [0], [1], [0, 0, 1, 1], [], []>} : vector<16x192xbf16>, vector<192x64xbf16>, vector<16x64xf32> -> vector<16x64xf32>
    %c168 = arith.constant 168 : index
    %c0_192 = arith.constant 0 : index
    %563 = vector.load %arg6[%c168, %c0_192] : memref<768x128xf32, #tpu.memory_space<vmem>>, vector<1x64xf32>
    %564 = vector.broadcast %563 : vector<1x64xf32> to vector<16x64xf32>
    %565 = arith.addf %562, %564 : vector<16x64xf32>
    %c176_193 = arith.constant 176 : index
    %c0_194 = arith.constant 0 : index
    %566 = vector.load %arg6[%c176_193, %c0_194] : memref<768x128xf32, #tpu.memory_space<vmem>>, vector<1x64xf32>
    %c184 = arith.constant 184 : index
    %c0_195 = arith.constant 0 : index
    %567 = vector.load %arg6[%c184, %c0_195] : memref<768x128xf32, #tpu.memory_space<vmem>>, vector<1x64xf32>
    %568 = vector.extract_strided_slice %565 {offsets = [0, 0], sizes = [8, 64], strides = [1, 1]} : vector<16x64xf32> to vector<8x64xf32>
    %cst_196 = arith.constant dense<0.000000e+00> : vector<64xf32>
    %569 = vector.multi_reduction <add>, %568, %cst_196 [0] : vector<8x64xf32> to vector<64xf32>
    %570 = vector.shape_cast %569 : vector<64xf32> to vector<1x64xf32>
    %571 = arith.mulf %568, %568 : vector<8x64xf32>
    %cst_197 = arith.constant dense<0.000000e+00> : vector<64xf32>
    %572 = vector.multi_reduction <add>, %571, %cst_197 [0] : vector<8x64xf32> to vector<64xf32>
    %573 = vector.shape_cast %572 : vector<64xf32> to vector<1x64xf32>
    %574 = vector.extract_strided_slice %565 {offsets = [8, 0], sizes = [8, 64], strides = [1, 1]} : vector<16x64xf32> to vector<8x64xf32>
    %cst_198 = arith.constant dense<0.000000e+00> : vector<64xf32>
    %575 = vector.multi_reduction <add>, %574, %cst_198 [0] : vector<8x64xf32> to vector<64xf32>
    %576 = vector.shape_cast %575 : vector<64xf32> to vector<1x64xf32>
    %577 = arith.mulf %574, %574 : vector<8x64xf32>
    %cst_199 = arith.constant dense<0.000000e+00> : vector<64xf32>
    %578 = vector.multi_reduction <add>, %577, %cst_199 [0] : vector<8x64xf32> to vector<64xf32>
    %579 = vector.shape_cast %578 : vector<64xf32> to vector<1x64xf32>
    %580 = tpu.concatenate %570, %573, %576, %579 in 0 : vector<1x64xf32>, vector<1x64xf32>, vector<1x64xf32>, vector<1x64xf32> -> vector<4x64xf32>
    %c576_200 = arith.constant 576 : index
    %c0_201 = arith.constant 0 : index
    %581 = vector.load %arg6[%c576_200, %c0_201] : memref<768x128xf32, #tpu.memory_space<vmem>>, vector<64x64xf32>
    %cst_202 = arith.constant dense<0.000000e+00> : vector<4x64xf32>
    %582 = tpu.matmul %580, %581, %cst_202 {dimension_numbers = #tpu.dot_dimension_numbers<[1], [0], [0], [1], [0, 0, 1, 1], [], []>} : vector<4x64xf32>, vector<64x64xf32>, vector<4x64xf32> -> vector<4x64xf32>
    %583 = vector.extract_strided_slice %582 {offsets = [0, 0], sizes = [1, 64], strides = [1, 1]} : vector<4x64xf32> to vector<1x64xf32>
    %584 = vector.extract_strided_slice %582 {offsets = [1, 0], sizes = [1, 64], strides = [1, 1]} : vector<4x64xf32> to vector<1x64xf32>
    %585 = arith.mulf %583, %583 : vector<1x64xf32>
    %586 = arith.subf %584, %585 : vector<1x64xf32>
    %cst_203 = arith.constant 0.000000e+00 : f32
    %587 = vector.broadcast %cst_203 : f32 to vector<1x64xf32>
    %588 = arith.maximumf %586, %587 : vector<1x64xf32>
    %cst_204 = arith.constant 9.99999974E-6 : f32
    %589 = vector.broadcast %cst_204 : f32 to vector<1x64xf32>
    %590 = arith.addf %588, %589 : vector<1x64xf32>
    %591 = math.rsqrt %590 : vector<1x64xf32>
    %592 = arith.mulf %566, %591 : vector<1x64xf32>
    %593 = arith.mulf %583, %592 : vector<1x64xf32>
    %594 = arith.subf %567, %593 : vector<1x64xf32>
    %595 = vector.extract_strided_slice %565 {offsets = [0, 0], sizes = [8, 64], strides = [1, 1]} : vector<16x64xf32> to vector<8x64xf32>
    %596 = vector.broadcast %592 : vector<1x64xf32> to vector<8x64xf32>
    %597 = arith.mulf %595, %596 : vector<8x64xf32>
    %598 = vector.broadcast %594 : vector<1x64xf32> to vector<8x64xf32>
    %599 = arith.addf %597, %598 : vector<8x64xf32>
    %cst_205 = arith.constant 2.000000e+01 : f32
    %600 = vector.broadcast %cst_205 : f32 to vector<8x64xf32>
    %601 = arith.minimumf %599, %600 : vector<8x64xf32>
    %602 = math.exp %601 : vector<8x64xf32>
    %cst_206 = arith.constant 1.000000e+00 : f32
    %603 = vector.broadcast %cst_206 : f32 to vector<8x64xf32>
    %604 = arith.addf %603, %602 : vector<8x64xf32>
    %605 = arith.mulf %604, %604 : vector<8x64xf32>
    %cst_207 = arith.constant 1.000000e+00 : f32
    %606 = vector.broadcast %cst_207 : f32 to vector<8x64xf32>
    %607 = arith.subf %605, %606 : vector<8x64xf32>
    %608 = arith.mulf %599, %607 : vector<8x64xf32>
    %cst_208 = arith.constant 1.000000e+00 : f32
    %609 = vector.broadcast %cst_208 : f32 to vector<8x64xf32>
    %610 = arith.addf %605, %609 : vector<8x64xf32>
    %611 = tpu.reciprocal %610 {approx = true} : vector<8x64xf32> -> vector<8x64xf32>
    %612 = arith.mulf %608, %611 : vector<8x64xf32>
    %613 = vector.extract_strided_slice %582 {offsets = [2, 0], sizes = [1, 64], strides = [1, 1]} : vector<4x64xf32> to vector<1x64xf32>
    %614 = vector.extract_strided_slice %582 {offsets = [3, 0], sizes = [1, 64], strides = [1, 1]} : vector<4x64xf32> to vector<1x64xf32>
    %615 = arith.mulf %613, %613 : vector<1x64xf32>
    %616 = arith.subf %614, %615 : vector<1x64xf32>
    %cst_209 = arith.constant 0.000000e+00 : f32
    %617 = vector.broadcast %cst_209 : f32 to vector<1x64xf32>
    %618 = arith.maximumf %616, %617 : vector<1x64xf32>
    %cst_210 = arith.constant 9.99999974E-6 : f32
    %619 = vector.broadcast %cst_210 : f32 to vector<1x64xf32>
    %620 = arith.addf %618, %619 : vector<1x64xf32>
    %621 = math.rsqrt %620 : vector<1x64xf32>
    %622 = arith.mulf %566, %621 : vector<1x64xf32>
    %623 = arith.mulf %613, %622 : vector<1x64xf32>
    %624 = arith.subf %567, %623 : vector<1x64xf32>
    %625 = vector.extract_strided_slice %565 {offsets = [8, 0], sizes = [8, 64], strides = [1, 1]} : vector<16x64xf32> to vector<8x64xf32>
    %626 = vector.broadcast %622 : vector<1x64xf32> to vector<8x64xf32>
    %627 = arith.mulf %625, %626 : vector<8x64xf32>
    %628 = vector.broadcast %624 : vector<1x64xf32> to vector<8x64xf32>
    %629 = arith.addf %627, %628 : vector<8x64xf32>
    %cst_211 = arith.constant 2.000000e+01 : f32
    %630 = vector.broadcast %cst_211 : f32 to vector<8x64xf32>
    %631 = arith.minimumf %629, %630 : vector<8x64xf32>
    %632 = math.exp %631 : vector<8x64xf32>
    %cst_212 = arith.constant 1.000000e+00 : f32
    %633 = vector.broadcast %cst_212 : f32 to vector<8x64xf32>
    %634 = arith.addf %633, %632 : vector<8x64xf32>
    %635 = arith.mulf %634, %634 : vector<8x64xf32>
    %cst_213 = arith.constant 1.000000e+00 : f32
    %636 = vector.broadcast %cst_213 : f32 to vector<8x64xf32>
    %637 = arith.subf %635, %636 : vector<8x64xf32>
    %638 = arith.mulf %629, %637 : vector<8x64xf32>
    %cst_214 = arith.constant 1.000000e+00 : f32
    %639 = vector.broadcast %cst_214 : f32 to vector<8x64xf32>
    %640 = arith.addf %635, %639 : vector<8x64xf32>
    %641 = tpu.reciprocal %640 {approx = true} : vector<8x64xf32> -> vector<8x64xf32>
    %642 = arith.mulf %638, %641 : vector<8x64xf32>
    %643 = tpu.concatenate %612, %642 in 0 : vector<8x64xf32>, vector<8x64xf32> -> vector<16x64xf32>
    %644 = arith.truncf %451 : vector<16x32xf32> to vector<16x32xbf16>
    %c864 = arith.constant 864 : index
    %c0_215 = arith.constant 0 : index
    %645 = vector.load %arg4[%c864, %c0_215] : memref<3136x128xbf16, #tpu.memory_space<vmem>>, vector<32x64xbf16>
    %cst_216 = arith.constant dense<0.000000e+00> : vector<16x64xf32>
    %646 = tpu.matmul %644, %645, %cst_216 {dimension_numbers = #tpu.dot_dimension_numbers<[1], [0], [0], [1], [0, 0, 1, 1], [], []>} : vector<16x32xbf16>, vector<32x64xbf16>, vector<16x64xf32> -> vector<16x64xf32>
    %c200 = arith.constant 200 : index
    %c0_217 = arith.constant 0 : index
    %647 = vector.load %arg6[%c200, %c0_217] : memref<768x128xf32, #tpu.memory_space<vmem>>, vector<1x64xf32>
    %648 = vector.broadcast %647 : vector<1x64xf32> to vector<16x64xf32>
    %649 = arith.addf %646, %648 : vector<16x64xf32>
    %650 = arith.addf %643, %649 : vector<16x64xf32>
    %651 = vector.extract_strided_slice %42 {offsets = [0, 384], sizes = [2, 64], strides = [1, 1]} : vector<2x768xf32> to vector<2x64xf32>
    %c256 = arith.constant 256 : index
    %c0_218 = arith.constant 0 : index
    %652 = vector.load %arg6[%c256, %c0_218] : memref<768x128xf32, #tpu.memory_space<vmem>>, vector<1x64xf32>
    %653 = vector.broadcast %652 : vector<1x64xf32> to vector<2x64xf32>
    %654 = arith.addf %651, %653 : vector<2x64xf32>
    %c1_i32_219 = arith.constant 1 : i32
    %655 = tpu.dynamic_rotate %650 by %c1_i32_219 dim 0 : vector<16x64xf32>, i32 -> vector<16x64xf32>
    %c472_220 = arith.constant 472 : index
    %c0_221 = arith.constant 0 : index
    %656 = vector.load %arg6[%c472_220, %c0_221] : memref<768x128xf32, #tpu.memory_space<vmem>>, vector<16x64xf32>
    %657 = arith.mulf %655, %656 : vector<16x64xf32>
    %c15_i32_222 = arith.constant 15 : i32
    %658 = tpu.dynamic_rotate %650 by %c15_i32_222 dim 0 : vector<16x64xf32>, i32 -> vector<16x64xf32>
    %c488_223 = arith.constant 488 : index
    %c0_224 = arith.constant 0 : index
    %659 = vector.load %arg6[%c488_223, %c0_224] : memref<768x128xf32, #tpu.memory_space<vmem>>, vector<16x64xf32>
    %660 = arith.mulf %658, %659 : vector<16x64xf32>
    %661 = tpu.concatenate %657, %650, %660 in 1 : vector<16x64xf32>, vector<16x64xf32>, vector<16x64xf32> -> vector<16x192xf32>
    %662 = arith.truncf %661 : vector<16x192xf32> to vector<16x192xbf16>
    %c896 = arith.constant 896 : index
    %c0_225 = arith.constant 0 : index
    %663 = vector.load %arg4[%c896, %c0_225] : memref<3136x128xbf16, #tpu.memory_space<vmem>>, vector<192x64xbf16>
    %cst_226 = arith.constant dense<0.000000e+00> : vector<16x64xf32>
    %664 = tpu.matmul %662, %663, %cst_226 {dimension_numbers = #tpu.dot_dimension_numbers<[1], [0], [0], [1], [0, 0, 1, 1], [], []>} : vector<16x192xbf16>, vector<192x64xbf16>, vector<16x64xf32> -> vector<16x64xf32>
    %c208 = arith.constant 208 : index
    %c0_227 = arith.constant 0 : index
    %665 = vector.load %arg6[%c208, %c0_227] : memref<768x128xf32, #tpu.memory_space<vmem>>, vector<1x64xf32>
    %666 = vector.broadcast %665 : vector<1x64xf32> to vector<16x64xf32>
    %667 = arith.addf %664, %666 : vector<16x64xf32>
    %c216 = arith.constant 216 : index
    %c0_228 = arith.constant 0 : index
    %668 = vector.load %arg6[%c216, %c0_228] : memref<768x128xf32, #tpu.memory_space<vmem>>, vector<1x64xf32>
    %c224 = arith.constant 224 : index
    %c0_229 = arith.constant 0 : index
    %669 = vector.load %arg6[%c224, %c0_229] : memref<768x128xf32, #tpu.memory_space<vmem>>, vector<1x64xf32>
    %670 = vector.extract_strided_slice %667 {offsets = [0, 0], sizes = [8, 64], strides = [1, 1]} : vector<16x64xf32> to vector<8x64xf32>
    %cst_230 = arith.constant dense<0.000000e+00> : vector<64xf32>
    %671 = vector.multi_reduction <add>, %670, %cst_230 [0] : vector<8x64xf32> to vector<64xf32>
    %672 = vector.shape_cast %671 : vector<64xf32> to vector<1x64xf32>
    %673 = arith.mulf %670, %670 : vector<8x64xf32>
    %cst_231 = arith.constant dense<0.000000e+00> : vector<64xf32>
    %674 = vector.multi_reduction <add>, %673, %cst_231 [0] : vector<8x64xf32> to vector<64xf32>
    %675 = vector.shape_cast %674 : vector<64xf32> to vector<1x64xf32>
    %676 = vector.extract_strided_slice %667 {offsets = [8, 0], sizes = [8, 64], strides = [1, 1]} : vector<16x64xf32> to vector<8x64xf32>
    %cst_232 = arith.constant dense<0.000000e+00> : vector<64xf32>
    %677 = vector.multi_reduction <add>, %676, %cst_232 [0] : vector<8x64xf32> to vector<64xf32>
    %678 = vector.shape_cast %677 : vector<64xf32> to vector<1x64xf32>
    %679 = arith.mulf %676, %676 : vector<8x64xf32>
    %cst_233 = arith.constant dense<0.000000e+00> : vector<64xf32>
    %680 = vector.multi_reduction <add>, %679, %cst_233 [0] : vector<8x64xf32> to vector<64xf32>
    %681 = vector.shape_cast %680 : vector<64xf32> to vector<1x64xf32>
    %682 = tpu.concatenate %672, %675, %678, %681 in 0 : vector<1x64xf32>, vector<1x64xf32>, vector<1x64xf32>, vector<1x64xf32> -> vector<4x64xf32>
    %c576_234 = arith.constant 576 : index
    %c0_235 = arith.constant 0 : index
    %683 = vector.load %arg6[%c576_234, %c0_235] : memref<768x128xf32, #tpu.memory_space<vmem>>, vector<64x64xf32>
    %cst_236 = arith.constant dense<0.000000e+00> : vector<4x64xf32>
    %684 = tpu.matmul %682, %683, %cst_236 {dimension_numbers = #tpu.dot_dimension_numbers<[1], [0], [0], [1], [0, 0, 1, 1], [], []>} : vector<4x64xf32>, vector<64x64xf32>, vector<4x64xf32> -> vector<4x64xf32>
    %685 = vector.extract_strided_slice %684 {offsets = [0, 0], sizes = [1, 64], strides = [1, 1]} : vector<4x64xf32> to vector<1x64xf32>
    %686 = vector.extract_strided_slice %684 {offsets = [1, 0], sizes = [1, 64], strides = [1, 1]} : vector<4x64xf32> to vector<1x64xf32>
    %687 = arith.mulf %685, %685 : vector<1x64xf32>
    %688 = arith.subf %686, %687 : vector<1x64xf32>
    %cst_237 = arith.constant 0.000000e+00 : f32
    %689 = vector.broadcast %cst_237 : f32 to vector<1x64xf32>
    %690 = arith.maximumf %688, %689 : vector<1x64xf32>
    %cst_238 = arith.constant 9.99999974E-6 : f32
    %691 = vector.broadcast %cst_238 : f32 to vector<1x64xf32>
    %692 = arith.addf %690, %691 : vector<1x64xf32>
    %693 = math.rsqrt %692 : vector<1x64xf32>
    %694 = arith.mulf %668, %693 : vector<1x64xf32>
    %695 = arith.mulf %685, %694 : vector<1x64xf32>
    %696 = arith.subf %669, %695 : vector<1x64xf32>
    %697 = vector.extract_strided_slice %667 {offsets = [0, 0], sizes = [8, 64], strides = [1, 1]} : vector<16x64xf32> to vector<8x64xf32>
    %698 = vector.broadcast %694 : vector<1x64xf32> to vector<8x64xf32>
    %699 = arith.mulf %697, %698 : vector<8x64xf32>
    %700 = vector.broadcast %696 : vector<1x64xf32> to vector<8x64xf32>
    %701 = arith.addf %699, %700 : vector<8x64xf32>
    %cst_239 = arith.constant 2.000000e+01 : f32
    %702 = vector.broadcast %cst_239 : f32 to vector<8x64xf32>
    %703 = arith.minimumf %701, %702 : vector<8x64xf32>
    %704 = math.exp %703 : vector<8x64xf32>
    %cst_240 = arith.constant 1.000000e+00 : f32
    %705 = vector.broadcast %cst_240 : f32 to vector<8x64xf32>
    %706 = arith.addf %705, %704 : vector<8x64xf32>
    %707 = arith.mulf %706, %706 : vector<8x64xf32>
    %cst_241 = arith.constant 1.000000e+00 : f32
    %708 = vector.broadcast %cst_241 : f32 to vector<8x64xf32>
    %709 = arith.subf %707, %708 : vector<8x64xf32>
    %710 = arith.mulf %701, %709 : vector<8x64xf32>
    %cst_242 = arith.constant 1.000000e+00 : f32
    %711 = vector.broadcast %cst_242 : f32 to vector<8x64xf32>
    %712 = arith.addf %707, %711 : vector<8x64xf32>
    %713 = tpu.reciprocal %712 {approx = true} : vector<8x64xf32> -> vector<8x64xf32>
    %714 = arith.mulf %710, %713 : vector<8x64xf32>
    %715 = vector.extract_strided_slice %654 {offsets = [0, 0], sizes = [1, 64], strides = [1, 1]} : vector<2x64xf32> to vector<1x64xf32>
    %716 = vector.broadcast %715 : vector<1x64xf32> to vector<8x64xf32>
    %717 = arith.addf %714, %716 : vector<8x64xf32>
    %718 = vector.extract_strided_slice %684 {offsets = [2, 0], sizes = [1, 64], strides = [1, 1]} : vector<4x64xf32> to vector<1x64xf32>
    %719 = vector.extract_strided_slice %684 {offsets = [3, 0], sizes = [1, 64], strides = [1, 1]} : vector<4x64xf32> to vector<1x64xf32>
    %720 = arith.mulf %718, %718 : vector<1x64xf32>
    %721 = arith.subf %719, %720 : vector<1x64xf32>
    %cst_243 = arith.constant 0.000000e+00 : f32
    %722 = vector.broadcast %cst_243 : f32 to vector<1x64xf32>
    %723 = arith.maximumf %721, %722 : vector<1x64xf32>
    %cst_244 = arith.constant 9.99999974E-6 : f32
    %724 = vector.broadcast %cst_244 : f32 to vector<1x64xf32>
    %725 = arith.addf %723, %724 : vector<1x64xf32>
    %726 = math.rsqrt %725 : vector<1x64xf32>
    %727 = arith.mulf %668, %726 : vector<1x64xf32>
    %728 = arith.mulf %718, %727 : vector<1x64xf32>
    %729 = arith.subf %669, %728 : vector<1x64xf32>
    %730 = vector.extract_strided_slice %667 {offsets = [8, 0], sizes = [8, 64], strides = [1, 1]} : vector<16x64xf32> to vector<8x64xf32>
    %731 = vector.broadcast %727 : vector<1x64xf32> to vector<8x64xf32>
    %732 = arith.mulf %730, %731 : vector<8x64xf32>
    %733 = vector.broadcast %729 : vector<1x64xf32> to vector<8x64xf32>
    %734 = arith.addf %732, %733 : vector<8x64xf32>
    %cst_245 = arith.constant 2.000000e+01 : f32
    %735 = vector.broadcast %cst_245 : f32 to vector<8x64xf32>
    %736 = arith.minimumf %734, %735 : vector<8x64xf32>
    %737 = math.exp %736 : vector<8x64xf32>
    %cst_246 = arith.constant 1.000000e+00 : f32
    %738 = vector.broadcast %cst_246 : f32 to vector<8x64xf32>
    %739 = arith.addf %738, %737 : vector<8x64xf32>
    %740 = arith.mulf %739, %739 : vector<8x64xf32>
    %cst_247 = arith.constant 1.000000e+00 : f32
    %741 = vector.broadcast %cst_247 : f32 to vector<8x64xf32>
    %742 = arith.subf %740, %741 : vector<8x64xf32>
    %743 = arith.mulf %734, %742 : vector<8x64xf32>
    %cst_248 = arith.constant 1.000000e+00 : f32
    %744 = vector.broadcast %cst_248 : f32 to vector<8x64xf32>
    %745 = arith.addf %740, %744 : vector<8x64xf32>
    %746 = tpu.reciprocal %745 {approx = true} : vector<8x64xf32> -> vector<8x64xf32>
    %747 = arith.mulf %743, %746 : vector<8x64xf32>
    %748 = vector.extract_strided_slice %654 {offsets = [1, 0], sizes = [1, 64], strides = [1, 1]} : vector<2x64xf32> to vector<1x64xf32>
    %749 = vector.broadcast %748 : vector<1x64xf32> to vector<8x64xf32>
    %750 = arith.addf %747, %749 : vector<8x64xf32>
    %751 = tpu.concatenate %717, %750 in 0 : vector<8x64xf32>, vector<8x64xf32> -> vector<16x64xf32>
    %c1_i32_249 = arith.constant 1 : i32
    %752 = tpu.dynamic_rotate %751 by %c1_i32_249 dim 0 : vector<16x64xf32>, i32 -> vector<16x64xf32>
    %c472_250 = arith.constant 472 : index
    %c0_251 = arith.constant 0 : index
    %753 = vector.load %arg6[%c472_250, %c0_251] : memref<768x128xf32, #tpu.memory_space<vmem>>, vector<16x64xf32>
    %754 = arith.mulf %752, %753 : vector<16x64xf32>
    %c15_i32_252 = arith.constant 15 : i32
    %755 = tpu.dynamic_rotate %751 by %c15_i32_252 dim 0 : vector<16x64xf32>, i32 -> vector<16x64xf32>
    %c488_253 = arith.constant 488 : index
    %c0_254 = arith.constant 0 : index
    %756 = vector.load %arg6[%c488_253, %c0_254] : memref<768x128xf32, #tpu.memory_space<vmem>>, vector<16x64xf32>
    %757 = arith.mulf %755, %756 : vector<16x64xf32>
    %758 = tpu.concatenate %754, %751, %757 in 1 : vector<16x64xf32>, vector<16x64xf32>, vector<16x64xf32> -> vector<16x192xf32>
    %759 = arith.truncf %758 : vector<16x192xf32> to vector<16x192xbf16>
    %c1088 = arith.constant 1088 : index
    %c0_255 = arith.constant 0 : index
    %760 = vector.load %arg4[%c1088, %c0_255] : memref<3136x128xbf16, #tpu.memory_space<vmem>>, vector<192x64xbf16>
    %cst_256 = arith.constant dense<0.000000e+00> : vector<16x64xf32>
    %761 = tpu.matmul %759, %760, %cst_256 {dimension_numbers = #tpu.dot_dimension_numbers<[1], [0], [0], [1], [0, 0, 1, 1], [], []>} : vector<16x192xbf16>, vector<192x64xbf16>, vector<16x64xf32> -> vector<16x64xf32>
    %c232 = arith.constant 232 : index
    %c0_257 = arith.constant 0 : index
    %762 = vector.load %arg6[%c232, %c0_257] : memref<768x128xf32, #tpu.memory_space<vmem>>, vector<1x64xf32>
    %763 = vector.broadcast %762 : vector<1x64xf32> to vector<16x64xf32>
    %764 = arith.addf %761, %763 : vector<16x64xf32>
    %c240 = arith.constant 240 : index
    %c0_258 = arith.constant 0 : index
    %765 = vector.load %arg6[%c240, %c0_258] : memref<768x128xf32, #tpu.memory_space<vmem>>, vector<1x64xf32>
    %c248 = arith.constant 248 : index
    %c0_259 = arith.constant 0 : index
    %766 = vector.load %arg6[%c248, %c0_259] : memref<768x128xf32, #tpu.memory_space<vmem>>, vector<1x64xf32>
    %767 = vector.extract_strided_slice %764 {offsets = [0, 0], sizes = [8, 64], strides = [1, 1]} : vector<16x64xf32> to vector<8x64xf32>
    %cst_260 = arith.constant dense<0.000000e+00> : vector<64xf32>
    %768 = vector.multi_reduction <add>, %767, %cst_260 [0] : vector<8x64xf32> to vector<64xf32>
    %769 = vector.shape_cast %768 : vector<64xf32> to vector<1x64xf32>
    %770 = arith.mulf %767, %767 : vector<8x64xf32>
    %cst_261 = arith.constant dense<0.000000e+00> : vector<64xf32>
    %771 = vector.multi_reduction <add>, %770, %cst_261 [0] : vector<8x64xf32> to vector<64xf32>
    %772 = vector.shape_cast %771 : vector<64xf32> to vector<1x64xf32>
    %773 = vector.extract_strided_slice %764 {offsets = [8, 0], sizes = [8, 64], strides = [1, 1]} : vector<16x64xf32> to vector<8x64xf32>
    %cst_262 = arith.constant dense<0.000000e+00> : vector<64xf32>
    %774 = vector.multi_reduction <add>, %773, %cst_262 [0] : vector<8x64xf32> to vector<64xf32>
    %775 = vector.shape_cast %774 : vector<64xf32> to vector<1x64xf32>
    %776 = arith.mulf %773, %773 : vector<8x64xf32>
    %cst_263 = arith.constant dense<0.000000e+00> : vector<64xf32>
    %777 = vector.multi_reduction <add>, %776, %cst_263 [0] : vector<8x64xf32> to vector<64xf32>
    %778 = vector.shape_cast %777 : vector<64xf32> to vector<1x64xf32>
    %779 = tpu.concatenate %769, %772, %775, %778 in 0 : vector<1x64xf32>, vector<1x64xf32>, vector<1x64xf32>, vector<1x64xf32> -> vector<4x64xf32>
    %c576_264 = arith.constant 576 : index
    %c0_265 = arith.constant 0 : index
    %780 = vector.load %arg6[%c576_264, %c0_265] : memref<768x128xf32, #tpu.memory_space<vmem>>, vector<64x64xf32>
    %cst_266 = arith.constant dense<0.000000e+00> : vector<4x64xf32>
    %781 = tpu.matmul %779, %780, %cst_266 {dimension_numbers = #tpu.dot_dimension_numbers<[1], [0], [0], [1], [0, 0, 1, 1], [], []>} : vector<4x64xf32>, vector<64x64xf32>, vector<4x64xf32> -> vector<4x64xf32>
    %782 = vector.extract_strided_slice %781 {offsets = [0, 0], sizes = [1, 64], strides = [1, 1]} : vector<4x64xf32> to vector<1x64xf32>
    %783 = vector.extract_strided_slice %781 {offsets = [1, 0], sizes = [1, 64], strides = [1, 1]} : vector<4x64xf32> to vector<1x64xf32>
    %784 = arith.mulf %782, %782 : vector<1x64xf32>
    %785 = arith.subf %783, %784 : vector<1x64xf32>
    %cst_267 = arith.constant 0.000000e+00 : f32
    %786 = vector.broadcast %cst_267 : f32 to vector<1x64xf32>
    %787 = arith.maximumf %785, %786 : vector<1x64xf32>
    %cst_268 = arith.constant 9.99999974E-6 : f32
    %788 = vector.broadcast %cst_268 : f32 to vector<1x64xf32>
    %789 = arith.addf %787, %788 : vector<1x64xf32>
    %790 = math.rsqrt %789 : vector<1x64xf32>
    %791 = arith.mulf %765, %790 : vector<1x64xf32>
    %792 = arith.mulf %782, %791 : vector<1x64xf32>
    %793 = arith.subf %766, %792 : vector<1x64xf32>
    %794 = vector.extract_strided_slice %764 {offsets = [0, 0], sizes = [8, 64], strides = [1, 1]} : vector<16x64xf32> to vector<8x64xf32>
    %795 = vector.broadcast %791 : vector<1x64xf32> to vector<8x64xf32>
    %796 = arith.mulf %794, %795 : vector<8x64xf32>
    %797 = vector.broadcast %793 : vector<1x64xf32> to vector<8x64xf32>
    %798 = arith.addf %796, %797 : vector<8x64xf32>
    %cst_269 = arith.constant 2.000000e+01 : f32
    %799 = vector.broadcast %cst_269 : f32 to vector<8x64xf32>
    %800 = arith.minimumf %798, %799 : vector<8x64xf32>
    %801 = math.exp %800 : vector<8x64xf32>
    %cst_270 = arith.constant 1.000000e+00 : f32
    %802 = vector.broadcast %cst_270 : f32 to vector<8x64xf32>
    %803 = arith.addf %802, %801 : vector<8x64xf32>
    %804 = arith.mulf %803, %803 : vector<8x64xf32>
    %cst_271 = arith.constant 1.000000e+00 : f32
    %805 = vector.broadcast %cst_271 : f32 to vector<8x64xf32>
    %806 = arith.subf %804, %805 : vector<8x64xf32>
    %807 = arith.mulf %798, %806 : vector<8x64xf32>
    %cst_272 = arith.constant 1.000000e+00 : f32
    %808 = vector.broadcast %cst_272 : f32 to vector<8x64xf32>
    %809 = arith.addf %804, %808 : vector<8x64xf32>
    %810 = tpu.reciprocal %809 {approx = true} : vector<8x64xf32> -> vector<8x64xf32>
    %811 = arith.mulf %807, %810 : vector<8x64xf32>
    %812 = vector.extract_strided_slice %781 {offsets = [2, 0], sizes = [1, 64], strides = [1, 1]} : vector<4x64xf32> to vector<1x64xf32>
    %813 = vector.extract_strided_slice %781 {offsets = [3, 0], sizes = [1, 64], strides = [1, 1]} : vector<4x64xf32> to vector<1x64xf32>
    %814 = arith.mulf %812, %812 : vector<1x64xf32>
    %815 = arith.subf %813, %814 : vector<1x64xf32>
    %cst_273 = arith.constant 0.000000e+00 : f32
    %816 = vector.broadcast %cst_273 : f32 to vector<1x64xf32>
    %817 = arith.maximumf %815, %816 : vector<1x64xf32>
    %cst_274 = arith.constant 9.99999974E-6 : f32
    %818 = vector.broadcast %cst_274 : f32 to vector<1x64xf32>
    %819 = arith.addf %817, %818 : vector<1x64xf32>
    %820 = math.rsqrt %819 : vector<1x64xf32>
    %821 = arith.mulf %765, %820 : vector<1x64xf32>
    %822 = arith.mulf %812, %821 : vector<1x64xf32>
    %823 = arith.subf %766, %822 : vector<1x64xf32>
    %824 = vector.extract_strided_slice %764 {offsets = [8, 0], sizes = [8, 64], strides = [1, 1]} : vector<16x64xf32> to vector<8x64xf32>
    %825 = vector.broadcast %821 : vector<1x64xf32> to vector<8x64xf32>
    %826 = arith.mulf %824, %825 : vector<8x64xf32>
    %827 = vector.broadcast %823 : vector<1x64xf32> to vector<8x64xf32>
    %828 = arith.addf %826, %827 : vector<8x64xf32>
    %cst_275 = arith.constant 2.000000e+01 : f32
    %829 = vector.broadcast %cst_275 : f32 to vector<8x64xf32>
    %830 = arith.minimumf %828, %829 : vector<8x64xf32>
    %831 = math.exp %830 : vector<8x64xf32>
    %cst_276 = arith.constant 1.000000e+00 : f32
    %832 = vector.broadcast %cst_276 : f32 to vector<8x64xf32>
    %833 = arith.addf %832, %831 : vector<8x64xf32>
    %834 = arith.mulf %833, %833 : vector<8x64xf32>
    %cst_277 = arith.constant 1.000000e+00 : f32
    %835 = vector.broadcast %cst_277 : f32 to vector<8x64xf32>
    %836 = arith.subf %834, %835 : vector<8x64xf32>
    %837 = arith.mulf %828, %836 : vector<8x64xf32>
    %cst_278 = arith.constant 1.000000e+00 : f32
    %838 = vector.broadcast %cst_278 : f32 to vector<8x64xf32>
    %839 = arith.addf %834, %838 : vector<8x64xf32>
    %840 = tpu.reciprocal %839 {approx = true} : vector<8x64xf32> -> vector<8x64xf32>
    %841 = arith.mulf %837, %840 : vector<8x64xf32>
    %842 = tpu.concatenate %811, %841 in 0 : vector<8x64xf32>, vector<8x64xf32> -> vector<16x64xf32>
    %843 = arith.addf %842, %650 : vector<16x64xf32>
    %c1_i32_279 = arith.constant 1 : i32
    %844 = tpu.dynamic_rotate %843 by %c1_i32_279 dim 0 : vector<16x64xf32>, i32 -> vector<16x64xf32>
    %c472_280 = arith.constant 472 : index
    %c0_281 = arith.constant 0 : index
    %845 = vector.load %arg6[%c472_280, %c0_281] : memref<768x128xf32, #tpu.memory_space<vmem>>, vector<16x64xf32>
    %846 = arith.mulf %844, %845 : vector<16x64xf32>
    %c15_i32_282 = arith.constant 15 : i32
    %847 = tpu.dynamic_rotate %843 by %c15_i32_282 dim 0 : vector<16x64xf32>, i32 -> vector<16x64xf32>
    %c488_283 = arith.constant 488 : index
    %c0_284 = arith.constant 0 : index
    %848 = vector.load %arg6[%c488_283, %c0_284] : memref<768x128xf32, #tpu.memory_space<vmem>>, vector<16x64xf32>
    %849 = arith.mulf %847, %848 : vector<16x64xf32>
    %850 = tpu.concatenate %846, %843, %849 in 1 : vector<16x64xf32>, vector<16x64xf32>, vector<16x64xf32> -> vector<16x192xf32>
    %c536 = arith.constant 536 : index
    %c0_285 = arith.constant 0 : index
    %851 = vector.load %arg6[%c536, %c0_285] : memref<768x128xf32, #tpu.memory_space<vmem>>, vector<8x16xf32>
    %cst_286 = arith.constant dense<0.000000e+00> : vector<8x192xf32>
    %852 = tpu.matmul %851, %850, %cst_286 {dimension_numbers = #tpu.dot_dimension_numbers<[1], [0], [0], [1], [0, 0, 1, 1], [], []>} : vector<8x16xf32>, vector<16x192xf32>, vector<8x192xf32> -> vector<8x192xf32>
    %853 = arith.truncf %852 : vector<8x192xf32> to vector<8x192xbf16>
    %c1280 = arith.constant 1280 : index
    %c0_287 = arith.constant 0 : index
    %854 = vector.load %arg4[%c1280, %c0_287] : memref<3136x128xbf16, #tpu.memory_space<vmem>>, vector<192x64xbf16>
    %cst_288 = arith.constant dense<0.000000e+00> : vector<8x64xf32>
    %855 = tpu.matmul %853, %854, %cst_288 {dimension_numbers = #tpu.dot_dimension_numbers<[1], [0], [0], [1], [0, 0, 1, 1], [], []>} : vector<8x192xbf16>, vector<192x64xbf16>, vector<8x64xf32> -> vector<8x64xf32>
    %c264 = arith.constant 264 : index
    %c0_289 = arith.constant 0 : index
    %856 = vector.load %arg6[%c264, %c0_289] : memref<768x128xf32, #tpu.memory_space<vmem>>, vector<1x64xf32>
    %857 = vector.broadcast %856 : vector<1x64xf32> to vector<8x64xf32>
    %858 = arith.addf %855, %857 : vector<8x64xf32>
    %859 = vector.extract_strided_slice %42 {offsets = [0, 512], sizes = [2, 128], strides = [1, 1]} : vector<2x768xf32> to vector<2x128xf32>
    %c320 = arith.constant 320 : index
    %c0_290 = arith.constant 0 : index
    %860 = vector.load %arg6[%c320, %c0_290] : memref<768x128xf32, #tpu.memory_space<vmem>>, vector<1x128xf32>
    %861 = vector.broadcast %860 : vector<1x128xf32> to vector<2x128xf32>
    %862 = arith.addf %859, %861 : vector<2x128xf32>
    %c1_i32_291 = arith.constant 1 : i32
    %863 = tpu.dynamic_rotate %858 by %c1_i32_291 dim 0 : vector<8x64xf32>, i32 -> vector<8x64xf32>
    %c504 = arith.constant 504 : index
    %c0_292 = arith.constant 0 : index
    %864 = vector.load %arg6[%c504, %c0_292] : memref<768x128xf32, #tpu.memory_space<vmem>>, vector<8x64xf32>
    %865 = arith.mulf %863, %864 : vector<8x64xf32>
    %c7_i32 = arith.constant 7 : i32
    %866 = tpu.dynamic_rotate %858 by %c7_i32 dim 0 : vector<8x64xf32>, i32 -> vector<8x64xf32>
    %c512 = arith.constant 512 : index
    %c0_293 = arith.constant 0 : index
    %867 = vector.load %arg6[%c512, %c0_293] : memref<768x128xf32, #tpu.memory_space<vmem>>, vector<8x64xf32>
    %868 = arith.mulf %866, %867 : vector<8x64xf32>
    %869 = tpu.concatenate %865, %858, %868 in 1 : vector<8x64xf32>, vector<8x64xf32>, vector<8x64xf32> -> vector<8x192xf32>
    %870 = arith.truncf %869 : vector<8x192xf32> to vector<8x192xbf16>
    %c1472 = arith.constant 1472 : index
    %c0_294 = arith.constant 0 : index
    %871 = vector.load %arg4[%c1472, %c0_294] : memref<3136x128xbf16, #tpu.memory_space<vmem>>, vector<192x128xbf16>
    %cst_295 = arith.constant dense<0.000000e+00> : vector<8x128xf32>
    %872 = tpu.matmul %870, %871, %cst_295 {dimension_numbers = #tpu.dot_dimension_numbers<[1], [0], [0], [1], [0, 0, 1, 1], [], []>} : vector<8x192xbf16>, vector<192x128xbf16>, vector<8x128xf32> -> vector<8x128xf32>
    %c272_296 = arith.constant 272 : index
    %c0_297 = arith.constant 0 : index
    %873 = vector.load %arg6[%c272_296, %c0_297] : memref<768x128xf32, #tpu.memory_space<vmem>>, vector<1x128xf32>
    %874 = vector.broadcast %873 : vector<1x128xf32> to vector<8x128xf32>
    %875 = arith.addf %872, %874 : vector<8x128xf32>
    %c280 = arith.constant 280 : index
    %c0_298 = arith.constant 0 : index
    %876 = vector.load %arg6[%c280, %c0_298] : memref<768x128xf32, #tpu.memory_space<vmem>>, vector<1x128xf32>
    %c288_299 = arith.constant 288 : index
    %c0_300 = arith.constant 0 : index
    %877 = vector.load %arg6[%c288_299, %c0_300] : memref<768x128xf32, #tpu.memory_space<vmem>>, vector<1x128xf32>
    %878 = vector.extract_strided_slice %875 {offsets = [0, 0], sizes = [4, 128], strides = [1, 1]} : vector<8x128xf32> to vector<4x128xf32>
    %cst_301 = arith.constant dense<0.000000e+00> : vector<128xf32>
    %879 = vector.multi_reduction <add>, %878, %cst_301 [0] : vector<4x128xf32> to vector<128xf32>
    %880 = vector.shape_cast %879 : vector<128xf32> to vector<1x128xf32>
    %881 = arith.mulf %878, %878 : vector<4x128xf32>
    %cst_302 = arith.constant dense<0.000000e+00> : vector<128xf32>
    %882 = vector.multi_reduction <add>, %881, %cst_302 [0] : vector<4x128xf32> to vector<128xf32>
    %883 = vector.shape_cast %882 : vector<128xf32> to vector<1x128xf32>
    %884 = vector.extract_strided_slice %875 {offsets = [4, 0], sizes = [4, 128], strides = [1, 1]} : vector<8x128xf32> to vector<4x128xf32>
    %cst_303 = arith.constant dense<0.000000e+00> : vector<128xf32>
    %885 = vector.multi_reduction <add>, %884, %cst_303 [0] : vector<4x128xf32> to vector<128xf32>
    %886 = vector.shape_cast %885 : vector<128xf32> to vector<1x128xf32>
    %887 = arith.mulf %884, %884 : vector<4x128xf32>
    %cst_304 = arith.constant dense<0.000000e+00> : vector<128xf32>
    %888 = vector.multi_reduction <add>, %887, %cst_304 [0] : vector<4x128xf32> to vector<128xf32>
    %889 = vector.shape_cast %888 : vector<128xf32> to vector<1x128xf32>
    %890 = tpu.concatenate %880, %883, %886, %889 in 0 : vector<1x128xf32>, vector<1x128xf32>, vector<1x128xf32>, vector<1x128xf32> -> vector<4x128xf32>
    %c640 = arith.constant 640 : index
    %c0_305 = arith.constant 0 : index
    %891 = vector.load %arg6[%c640, %c0_305] : memref<768x128xf32, #tpu.memory_space<vmem>>, vector<128x128xf32>
    %cst_306 = arith.constant dense<0.000000e+00> : vector<4x128xf32>
    %892 = tpu.matmul %890, %891, %cst_306 {dimension_numbers = #tpu.dot_dimension_numbers<[1], [0], [0], [1], [0, 0, 1, 1], [], []>} : vector<4x128xf32>, vector<128x128xf32>, vector<4x128xf32> -> vector<4x128xf32>
    %893 = vector.extract_strided_slice %892 {offsets = [0, 0], sizes = [1, 128], strides = [1, 1]} : vector<4x128xf32> to vector<1x128xf32>
    %894 = vector.extract_strided_slice %892 {offsets = [1, 0], sizes = [1, 128], strides = [1, 1]} : vector<4x128xf32> to vector<1x128xf32>
    %895 = arith.mulf %893, %893 : vector<1x128xf32>
    %896 = arith.subf %894, %895 : vector<1x128xf32>
    %cst_307 = arith.constant 0.000000e+00 : f32
    %897 = vector.broadcast %cst_307 : f32 to vector<1x128xf32>
    %898 = arith.maximumf %896, %897 : vector<1x128xf32>
    %cst_308 = arith.constant 9.99999974E-6 : f32
    %899 = vector.broadcast %cst_308 : f32 to vector<1x128xf32>
    %900 = arith.addf %898, %899 : vector<1x128xf32>
    %901 = math.rsqrt %900 : vector<1x128xf32>
    %902 = arith.mulf %876, %901 : vector<1x128xf32>
    %903 = arith.mulf %893, %902 : vector<1x128xf32>
    %904 = arith.subf %877, %903 : vector<1x128xf32>
    %905 = vector.extract_strided_slice %875 {offsets = [0, 0], sizes = [4, 128], strides = [1, 1]} : vector<8x128xf32> to vector<4x128xf32>
    %906 = vector.broadcast %902 : vector<1x128xf32> to vector<4x128xf32>
    %907 = arith.mulf %905, %906 : vector<4x128xf32>
    %908 = vector.broadcast %904 : vector<1x128xf32> to vector<4x128xf32>
    %909 = arith.addf %907, %908 : vector<4x128xf32>
    %cst_309 = arith.constant 2.000000e+01 : f32
    %910 = vector.broadcast %cst_309 : f32 to vector<4x128xf32>
    %911 = arith.minimumf %909, %910 : vector<4x128xf32>
    %912 = math.exp %911 : vector<4x128xf32>
    %cst_310 = arith.constant 1.000000e+00 : f32
    %913 = vector.broadcast %cst_310 : f32 to vector<4x128xf32>
    %914 = arith.addf %913, %912 : vector<4x128xf32>
    %915 = arith.mulf %914, %914 : vector<4x128xf32>
    %cst_311 = arith.constant 1.000000e+00 : f32
    %916 = vector.broadcast %cst_311 : f32 to vector<4x128xf32>
    %917 = arith.subf %915, %916 : vector<4x128xf32>
    %918 = arith.mulf %909, %917 : vector<4x128xf32>
    %cst_312 = arith.constant 1.000000e+00 : f32
    %919 = vector.broadcast %cst_312 : f32 to vector<4x128xf32>
    %920 = arith.addf %915, %919 : vector<4x128xf32>
    %921 = tpu.reciprocal %920 {approx = true} : vector<4x128xf32> -> vector<4x128xf32>
    %922 = arith.mulf %918, %921 : vector<4x128xf32>
    %923 = vector.extract_strided_slice %862 {offsets = [0, 0], sizes = [1, 128], strides = [1, 1]} : vector<2x128xf32> to vector<1x128xf32>
    %924 = vector.broadcast %923 : vector<1x128xf32> to vector<4x128xf32>
    %925 = arith.addf %922, %924 : vector<4x128xf32>
    %926 = vector.extract_strided_slice %892 {offsets = [2, 0], sizes = [1, 128], strides = [1, 1]} : vector<4x128xf32> to vector<1x128xf32>
    %927 = vector.extract_strided_slice %892 {offsets = [3, 0], sizes = [1, 128], strides = [1, 1]} : vector<4x128xf32> to vector<1x128xf32>
    %928 = arith.mulf %926, %926 : vector<1x128xf32>
    %929 = arith.subf %927, %928 : vector<1x128xf32>
    %cst_313 = arith.constant 0.000000e+00 : f32
    %930 = vector.broadcast %cst_313 : f32 to vector<1x128xf32>
    %931 = arith.maximumf %929, %930 : vector<1x128xf32>
    %cst_314 = arith.constant 9.99999974E-6 : f32
    %932 = vector.broadcast %cst_314 : f32 to vector<1x128xf32>
    %933 = arith.addf %931, %932 : vector<1x128xf32>
    %934 = math.rsqrt %933 : vector<1x128xf32>
    %935 = arith.mulf %876, %934 : vector<1x128xf32>
    %936 = arith.mulf %926, %935 : vector<1x128xf32>
    %937 = arith.subf %877, %936 : vector<1x128xf32>
    %938 = vector.extract_strided_slice %875 {offsets = [4, 0], sizes = [4, 128], strides = [1, 1]} : vector<8x128xf32> to vector<4x128xf32>
    %939 = vector.broadcast %935 : vector<1x128xf32> to vector<4x128xf32>
    %940 = arith.mulf %938, %939 : vector<4x128xf32>
    %941 = vector.broadcast %937 : vector<1x128xf32> to vector<4x128xf32>
    %942 = arith.addf %940, %941 : vector<4x128xf32>
    %cst_315 = arith.constant 2.000000e+01 : f32
    %943 = vector.broadcast %cst_315 : f32 to vector<4x128xf32>
    %944 = arith.minimumf %942, %943 : vector<4x128xf32>
    %945 = math.exp %944 : vector<4x128xf32>
    %cst_316 = arith.constant 1.000000e+00 : f32
    %946 = vector.broadcast %cst_316 : f32 to vector<4x128xf32>
    %947 = arith.addf %946, %945 : vector<4x128xf32>
    %948 = arith.mulf %947, %947 : vector<4x128xf32>
    %cst_317 = arith.constant 1.000000e+00 : f32
    %949 = vector.broadcast %cst_317 : f32 to vector<4x128xf32>
    %950 = arith.subf %948, %949 : vector<4x128xf32>
    %951 = arith.mulf %942, %950 : vector<4x128xf32>
    %cst_318 = arith.constant 1.000000e+00 : f32
    %952 = vector.broadcast %cst_318 : f32 to vector<4x128xf32>
    %953 = arith.addf %948, %952 : vector<4x128xf32>
    %954 = tpu.reciprocal %953 {approx = true} : vector<4x128xf32> -> vector<4x128xf32>
    %955 = arith.mulf %951, %954 : vector<4x128xf32>
    %956 = vector.extract_strided_slice %862 {offsets = [1, 0], sizes = [1, 128], strides = [1, 1]} : vector<2x128xf32> to vector<1x128xf32>
    %957 = vector.broadcast %956 : vector<1x128xf32> to vector<4x128xf32>
    %958 = arith.addf %955, %957 : vector<4x128xf32>
    %959 = tpu.concatenate %925, %958 in 0 : vector<4x128xf32>, vector<4x128xf32> -> vector<8x128xf32>
    %c1_i32_319 = arith.constant 1 : i32
    %960 = tpu.dynamic_rotate %959 by %c1_i32_319 dim 0 : vector<8x128xf32>, i32 -> vector<8x128xf32>
    %c504_320 = arith.constant 504 : index
    %c0_321 = arith.constant 0 : index
    %961 = vector.load %arg6[%c504_320, %c0_321] : memref<768x128xf32, #tpu.memory_space<vmem>>, vector<8x128xf32>
    %962 = arith.mulf %960, %961 : vector<8x128xf32>
    %c7_i32_322 = arith.constant 7 : i32
    %963 = tpu.dynamic_rotate %959 by %c7_i32_322 dim 0 : vector<8x128xf32>, i32 -> vector<8x128xf32>
    %c512_323 = arith.constant 512 : index
    %c0_324 = arith.constant 0 : index
    %964 = vector.load %arg6[%c512_323, %c0_324] : memref<768x128xf32, #tpu.memory_space<vmem>>, vector<8x128xf32>
    %965 = arith.mulf %963, %964 : vector<8x128xf32>
    %966 = tpu.concatenate %962, %959, %965 in 1 : vector<8x128xf32>, vector<8x128xf32>, vector<8x128xf32> -> vector<8x384xf32>
    %967 = arith.truncf %966 : vector<8x384xf32> to vector<8x384xbf16>
    %c1664 = arith.constant 1664 : index
    %c0_325 = arith.constant 0 : index
    %968 = vector.load %arg4[%c1664, %c0_325] : memref<3136x128xbf16, #tpu.memory_space<vmem>>, vector<384x128xbf16>
    %cst_326 = arith.constant dense<0.000000e+00> : vector<8x128xf32>
    %969 = tpu.matmul %967, %968, %cst_326 {dimension_numbers = #tpu.dot_dimension_numbers<[1], [0], [0], [1], [0, 0, 1, 1], [], []>} : vector<8x384xbf16>, vector<384x128xbf16>, vector<8x128xf32> -> vector<8x128xf32>
    %c296 = arith.constant 296 : index
    %c0_327 = arith.constant 0 : index
    %970 = vector.load %arg6[%c296, %c0_327] : memref<768x128xf32, #tpu.memory_space<vmem>>, vector<1x128xf32>
    %971 = vector.broadcast %970 : vector<1x128xf32> to vector<8x128xf32>
    %972 = arith.addf %969, %971 : vector<8x128xf32>
    %c304 = arith.constant 304 : index
    %c0_328 = arith.constant 0 : index
    %973 = vector.load %arg6[%c304, %c0_328] : memref<768x128xf32, #tpu.memory_space<vmem>>, vector<1x128xf32>
    %c312 = arith.constant 312 : index
    %c0_329 = arith.constant 0 : index
    %974 = vector.load %arg6[%c312, %c0_329] : memref<768x128xf32, #tpu.memory_space<vmem>>, vector<1x128xf32>
    %975 = vector.extract_strided_slice %972 {offsets = [0, 0], sizes = [4, 128], strides = [1, 1]} : vector<8x128xf32> to vector<4x128xf32>
    %cst_330 = arith.constant dense<0.000000e+00> : vector<128xf32>
    %976 = vector.multi_reduction <add>, %975, %cst_330 [0] : vector<4x128xf32> to vector<128xf32>
    %977 = vector.shape_cast %976 : vector<128xf32> to vector<1x128xf32>
    %978 = arith.mulf %975, %975 : vector<4x128xf32>
    %cst_331 = arith.constant dense<0.000000e+00> : vector<128xf32>
    %979 = vector.multi_reduction <add>, %978, %cst_331 [0] : vector<4x128xf32> to vector<128xf32>
    %980 = vector.shape_cast %979 : vector<128xf32> to vector<1x128xf32>
    %981 = vector.extract_strided_slice %972 {offsets = [4, 0], sizes = [4, 128], strides = [1, 1]} : vector<8x128xf32> to vector<4x128xf32>
    %cst_332 = arith.constant dense<0.000000e+00> : vector<128xf32>
    %982 = vector.multi_reduction <add>, %981, %cst_332 [0] : vector<4x128xf32> to vector<128xf32>
    %983 = vector.shape_cast %982 : vector<128xf32> to vector<1x128xf32>
    %984 = arith.mulf %981, %981 : vector<4x128xf32>
    %cst_333 = arith.constant dense<0.000000e+00> : vector<128xf32>
    %985 = vector.multi_reduction <add>, %984, %cst_333 [0] : vector<4x128xf32> to vector<128xf32>
    %986 = vector.shape_cast %985 : vector<128xf32> to vector<1x128xf32>
    %987 = tpu.concatenate %977, %980, %983, %986 in 0 : vector<1x128xf32>, vector<1x128xf32>, vector<1x128xf32>, vector<1x128xf32> -> vector<4x128xf32>
    %c640_334 = arith.constant 640 : index
    %c0_335 = arith.constant 0 : index
    %988 = vector.load %arg6[%c640_334, %c0_335] : memref<768x128xf32, #tpu.memory_space<vmem>>, vector<128x128xf32>
    %cst_336 = arith.constant dense<0.000000e+00> : vector<4x128xf32>
    %989 = tpu.matmul %987, %988, %cst_336 {dimension_numbers = #tpu.dot_dimension_numbers<[1], [0], [0], [1], [0, 0, 1, 1], [], []>} : vector<4x128xf32>, vector<128x128xf32>, vector<4x128xf32> -> vector<4x128xf32>
    %990 = vector.extract_strided_slice %989 {offsets = [0, 0], sizes = [1, 128], strides = [1, 1]} : vector<4x128xf32> to vector<1x128xf32>
    %991 = vector.extract_strided_slice %989 {offsets = [1, 0], sizes = [1, 128], strides = [1, 1]} : vector<4x128xf32> to vector<1x128xf32>
    %992 = arith.mulf %990, %990 : vector<1x128xf32>
    %993 = arith.subf %991, %992 : vector<1x128xf32>
    %cst_337 = arith.constant 0.000000e+00 : f32
    %994 = vector.broadcast %cst_337 : f32 to vector<1x128xf32>
    %995 = arith.maximumf %993, %994 : vector<1x128xf32>
    %cst_338 = arith.constant 9.99999974E-6 : f32
    %996 = vector.broadcast %cst_338 : f32 to vector<1x128xf32>
    %997 = arith.addf %995, %996 : vector<1x128xf32>
    %998 = math.rsqrt %997 : vector<1x128xf32>
    %999 = arith.mulf %973, %998 : vector<1x128xf32>
    %1000 = arith.mulf %990, %999 : vector<1x128xf32>
    %1001 = arith.subf %974, %1000 : vector<1x128xf32>
    %1002 = vector.extract_strided_slice %972 {offsets = [0, 0], sizes = [4, 128], strides = [1, 1]} : vector<8x128xf32> to vector<4x128xf32>
    %1003 = vector.broadcast %999 : vector<1x128xf32> to vector<4x128xf32>
    %1004 = arith.mulf %1002, %1003 : vector<4x128xf32>
    %1005 = vector.broadcast %1001 : vector<1x128xf32> to vector<4x128xf32>
    %1006 = arith.addf %1004, %1005 : vector<4x128xf32>
    %cst_339 = arith.constant 2.000000e+01 : f32
    %1007 = vector.broadcast %cst_339 : f32 to vector<4x128xf32>
    %1008 = arith.minimumf %1006, %1007 : vector<4x128xf32>
    %1009 = math.exp %1008 : vector<4x128xf32>
    %cst_340 = arith.constant 1.000000e+00 : f32
    %1010 = vector.broadcast %cst_340 : f32 to vector<4x128xf32>
    %1011 = arith.addf %1010, %1009 : vector<4x128xf32>
    %1012 = arith.mulf %1011, %1011 : vector<4x128xf32>
    %cst_341 = arith.constant 1.000000e+00 : f32
    %1013 = vector.broadcast %cst_341 : f32 to vector<4x128xf32>
    %1014 = arith.subf %1012, %1013 : vector<4x128xf32>
    %1015 = arith.mulf %1006, %1014 : vector<4x128xf32>
    %cst_342 = arith.constant 1.000000e+00 : f32
    %1016 = vector.broadcast %cst_342 : f32 to vector<4x128xf32>
    %1017 = arith.addf %1012, %1016 : vector<4x128xf32>
    %1018 = tpu.reciprocal %1017 {approx = true} : vector<4x128xf32> -> vector<4x128xf32>
    %1019 = arith.mulf %1015, %1018 : vector<4x128xf32>
    %1020 = vector.extract_strided_slice %989 {offsets = [2, 0], sizes = [1, 128], strides = [1, 1]} : vector<4x128xf32> to vector<1x128xf32>
    %1021 = vector.extract_strided_slice %989 {offsets = [3, 0], sizes = [1, 128], strides = [1, 1]} : vector<4x128xf32> to vector<1x128xf32>
    %1022 = arith.mulf %1020, %1020 : vector<1x128xf32>
    %1023 = arith.subf %1021, %1022 : vector<1x128xf32>
    %cst_343 = arith.constant 0.000000e+00 : f32
    %1024 = vector.broadcast %cst_343 : f32 to vector<1x128xf32>
    %1025 = arith.maximumf %1023, %1024 : vector<1x128xf32>
    %cst_344 = arith.constant 9.99999974E-6 : f32
    %1026 = vector.broadcast %cst_344 : f32 to vector<1x128xf32>
    %1027 = arith.addf %1025, %1026 : vector<1x128xf32>
    %1028 = math.rsqrt %1027 : vector<1x128xf32>
    %1029 = arith.mulf %973, %1028 : vector<1x128xf32>
    %1030 = arith.mulf %1020, %1029 : vector<1x128xf32>
    %1031 = arith.subf %974, %1030 : vector<1x128xf32>
    %1032 = vector.extract_strided_slice %972 {offsets = [4, 0], sizes = [4, 128], strides = [1, 1]} : vector<8x128xf32> to vector<4x128xf32>
    %1033 = vector.broadcast %1029 : vector<1x128xf32> to vector<4x128xf32>
    %1034 = arith.mulf %1032, %1033 : vector<4x128xf32>
    %1035 = vector.broadcast %1031 : vector<1x128xf32> to vector<4x128xf32>
    %1036 = arith.addf %1034, %1035 : vector<4x128xf32>
    %cst_345 = arith.constant 2.000000e+01 : f32
    %1037 = vector.broadcast %cst_345 : f32 to vector<4x128xf32>
    %1038 = arith.minimumf %1036, %1037 : vector<4x128xf32>
    %1039 = math.exp %1038 : vector<4x128xf32>
    %cst_346 = arith.constant 1.000000e+00 : f32
    %1040 = vector.broadcast %cst_346 : f32 to vector<4x128xf32>
    %1041 = arith.addf %1040, %1039 : vector<4x128xf32>
    %1042 = arith.mulf %1041, %1041 : vector<4x128xf32>
    %cst_347 = arith.constant 1.000000e+00 : f32
    %1043 = vector.broadcast %cst_347 : f32 to vector<4x128xf32>
    %1044 = arith.subf %1042, %1043 : vector<4x128xf32>
    %1045 = arith.mulf %1036, %1044 : vector<4x128xf32>
    %cst_348 = arith.constant 1.000000e+00 : f32
    %1046 = vector.broadcast %cst_348 : f32 to vector<4x128xf32>
    %1047 = arith.addf %1042, %1046 : vector<4x128xf32>
    %1048 = tpu.reciprocal %1047 {approx = true} : vector<4x128xf32> -> vector<4x128xf32>
    %1049 = arith.mulf %1045, %1048 : vector<4x128xf32>
    %1050 = tpu.concatenate %1019, %1049 in 0 : vector<4x128xf32>, vector<4x128xf32> -> vector<8x128xf32>
    %1051 = arith.truncf %858 : vector<8x64xf32> to vector<8x64xbf16>
    %c2048 = arith.constant 2048 : index
    %c0_349 = arith.constant 0 : index
    %1052 = vector.load %arg4[%c2048, %c0_349] : memref<3136x128xbf16, #tpu.memory_space<vmem>>, vector<64x128xbf16>
    %cst_350 = arith.constant dense<0.000000e+00> : vector<8x128xf32>
    %1053 = tpu.matmul %1051, %1052, %cst_350 {dimension_numbers = #tpu.dot_dimension_numbers<[1], [0], [0], [1], [0, 0, 1, 1], [], []>} : vector<8x64xbf16>, vector<64x128xbf16>, vector<8x128xf32> -> vector<8x128xf32>
    %c328 = arith.constant 328 : index
    %c0_351 = arith.constant 0 : index
    %1054 = vector.load %arg6[%c328, %c0_351] : memref<768x128xf32, #tpu.memory_space<vmem>>, vector<1x128xf32>
    %1055 = vector.broadcast %1054 : vector<1x128xf32> to vector<8x128xf32>
    %1056 = arith.addf %1053, %1055 : vector<8x128xf32>
    %1057 = arith.addf %1050, %1056 : vector<8x128xf32>
    %1058 = vector.extract_strided_slice %42 {offsets = [0, 640], sizes = [2, 128], strides = [1, 1]} : vector<2x768xf32> to vector<2x128xf32>
    %c384_352 = arith.constant 384 : index
    %c0_353 = arith.constant 0 : index
    %1059 = vector.load %arg6[%c384_352, %c0_353] : memref<768x128xf32, #tpu.memory_space<vmem>>, vector<1x128xf32>
    %1060 = vector.broadcast %1059 : vector<1x128xf32> to vector<2x128xf32>
    %1061 = arith.addf %1058, %1060 : vector<2x128xf32>
    %c1_i32_354 = arith.constant 1 : i32
    %1062 = tpu.dynamic_rotate %1057 by %c1_i32_354 dim 0 : vector<8x128xf32>, i32 -> vector<8x128xf32>
    %c504_355 = arith.constant 504 : index
    %c0_356 = arith.constant 0 : index
    %1063 = vector.load %arg6[%c504_355, %c0_356] : memref<768x128xf32, #tpu.memory_space<vmem>>, vector<8x128xf32>
    %1064 = arith.mulf %1062, %1063 : vector<8x128xf32>
    %c7_i32_357 = arith.constant 7 : i32
    %1065 = tpu.dynamic_rotate %1057 by %c7_i32_357 dim 0 : vector<8x128xf32>, i32 -> vector<8x128xf32>
    %c512_358 = arith.constant 512 : index
    %c0_359 = arith.constant 0 : index
    %1066 = vector.load %arg6[%c512_358, %c0_359] : memref<768x128xf32, #tpu.memory_space<vmem>>, vector<8x128xf32>
    %1067 = arith.mulf %1065, %1066 : vector<8x128xf32>
    %1068 = tpu.concatenate %1064, %1057, %1067 in 1 : vector<8x128xf32>, vector<8x128xf32>, vector<8x128xf32> -> vector<8x384xf32>
    %1069 = arith.truncf %1068 : vector<8x384xf32> to vector<8x384xbf16>
    %c2112 = arith.constant 2112 : index
    %c0_360 = arith.constant 0 : index
    %1070 = vector.load %arg4[%c2112, %c0_360] : memref<3136x128xbf16, #tpu.memory_space<vmem>>, vector<384x128xbf16>
    %cst_361 = arith.constant dense<0.000000e+00> : vector<8x128xf32>
    %1071 = tpu.matmul %1069, %1070, %cst_361 {dimension_numbers = #tpu.dot_dimension_numbers<[1], [0], [0], [1], [0, 0, 1, 1], [], []>} : vector<8x384xbf16>, vector<384x128xbf16>, vector<8x128xf32> -> vector<8x128xf32>
    %c336 = arith.constant 336 : index
    %c0_362 = arith.constant 0 : index
    %1072 = vector.load %arg6[%c336, %c0_362] : memref<768x128xf32, #tpu.memory_space<vmem>>, vector<1x128xf32>
    %1073 = vector.broadcast %1072 : vector<1x128xf32> to vector<8x128xf32>
    %1074 = arith.addf %1071, %1073 : vector<8x128xf32>
    %c344 = arith.constant 344 : index
    %c0_363 = arith.constant 0 : index
    %1075 = vector.load %arg6[%c344, %c0_363] : memref<768x128xf32, #tpu.memory_space<vmem>>, vector<1x128xf32>
    %c352 = arith.constant 352 : index
    %c0_364 = arith.constant 0 : index
    %1076 = vector.load %arg6[%c352, %c0_364] : memref<768x128xf32, #tpu.memory_space<vmem>>, vector<1x128xf32>
    %1077 = vector.extract_strided_slice %1074 {offsets = [0, 0], sizes = [4, 128], strides = [1, 1]} : vector<8x128xf32> to vector<4x128xf32>
    %cst_365 = arith.constant dense<0.000000e+00> : vector<128xf32>
    %1078 = vector.multi_reduction <add>, %1077, %cst_365 [0] : vector<4x128xf32> to vector<128xf32>
    %1079 = vector.shape_cast %1078 : vector<128xf32> to vector<1x128xf32>
    %1080 = arith.mulf %1077, %1077 : vector<4x128xf32>
    %cst_366 = arith.constant dense<0.000000e+00> : vector<128xf32>
    %1081 = vector.multi_reduction <add>, %1080, %cst_366 [0] : vector<4x128xf32> to vector<128xf32>
    %1082 = vector.shape_cast %1081 : vector<128xf32> to vector<1x128xf32>
    %1083 = vector.extract_strided_slice %1074 {offsets = [4, 0], sizes = [4, 128], strides = [1, 1]} : vector<8x128xf32> to vector<4x128xf32>
    %cst_367 = arith.constant dense<0.000000e+00> : vector<128xf32>
    %1084 = vector.multi_reduction <add>, %1083, %cst_367 [0] : vector<4x128xf32> to vector<128xf32>
    %1085 = vector.shape_cast %1084 : vector<128xf32> to vector<1x128xf32>
    %1086 = arith.mulf %1083, %1083 : vector<4x128xf32>
    %cst_368 = arith.constant dense<0.000000e+00> : vector<128xf32>
    %1087 = vector.multi_reduction <add>, %1086, %cst_368 [0] : vector<4x128xf32> to vector<128xf32>
    %1088 = vector.shape_cast %1087 : vector<128xf32> to vector<1x128xf32>
    %1089 = tpu.concatenate %1079, %1082, %1085, %1088 in 0 : vector<1x128xf32>, vector<1x128xf32>, vector<1x128xf32>, vector<1x128xf32> -> vector<4x128xf32>
    %c640_369 = arith.constant 640 : index
    %c0_370 = arith.constant 0 : index
    %1090 = vector.load %arg6[%c640_369, %c0_370] : memref<768x128xf32, #tpu.memory_space<vmem>>, vector<128x128xf32>
    %cst_371 = arith.constant dense<0.000000e+00> : vector<4x128xf32>
    %1091 = tpu.matmul %1089, %1090, %cst_371 {dimension_numbers = #tpu.dot_dimension_numbers<[1], [0], [0], [1], [0, 0, 1, 1], [], []>} : vector<4x128xf32>, vector<128x128xf32>, vector<4x128xf32> -> vector<4x128xf32>
    %1092 = vector.extract_strided_slice %1091 {offsets = [0, 0], sizes = [1, 128], strides = [1, 1]} : vector<4x128xf32> to vector<1x128xf32>
    %1093 = vector.extract_strided_slice %1091 {offsets = [1, 0], sizes = [1, 128], strides = [1, 1]} : vector<4x128xf32> to vector<1x128xf32>
    %1094 = arith.mulf %1092, %1092 : vector<1x128xf32>
    %1095 = arith.subf %1093, %1094 : vector<1x128xf32>
    %cst_372 = arith.constant 0.000000e+00 : f32
    %1096 = vector.broadcast %cst_372 : f32 to vector<1x128xf32>
    %1097 = arith.maximumf %1095, %1096 : vector<1x128xf32>
    %cst_373 = arith.constant 9.99999974E-6 : f32
    %1098 = vector.broadcast %cst_373 : f32 to vector<1x128xf32>
    %1099 = arith.addf %1097, %1098 : vector<1x128xf32>
    %1100 = math.rsqrt %1099 : vector<1x128xf32>
    %1101 = arith.mulf %1075, %1100 : vector<1x128xf32>
    %1102 = arith.mulf %1092, %1101 : vector<1x128xf32>
    %1103 = arith.subf %1076, %1102 : vector<1x128xf32>
    %1104 = vector.extract_strided_slice %1074 {offsets = [0, 0], sizes = [4, 128], strides = [1, 1]} : vector<8x128xf32> to vector<4x128xf32>
    %1105 = vector.broadcast %1101 : vector<1x128xf32> to vector<4x128xf32>
    %1106 = arith.mulf %1104, %1105 : vector<4x128xf32>
    %1107 = vector.broadcast %1103 : vector<1x128xf32> to vector<4x128xf32>
    %1108 = arith.addf %1106, %1107 : vector<4x128xf32>
    %cst_374 = arith.constant 2.000000e+01 : f32
    %1109 = vector.broadcast %cst_374 : f32 to vector<4x128xf32>
    %1110 = arith.minimumf %1108, %1109 : vector<4x128xf32>
    %1111 = math.exp %1110 : vector<4x128xf32>
    %cst_375 = arith.constant 1.000000e+00 : f32
    %1112 = vector.broadcast %cst_375 : f32 to vector<4x128xf32>
    %1113 = arith.addf %1112, %1111 : vector<4x128xf32>
    %1114 = arith.mulf %1113, %1113 : vector<4x128xf32>
    %cst_376 = arith.constant 1.000000e+00 : f32
    %1115 = vector.broadcast %cst_376 : f32 to vector<4x128xf32>
    %1116 = arith.subf %1114, %1115 : vector<4x128xf32>
    %1117 = arith.mulf %1108, %1116 : vector<4x128xf32>
    %cst_377 = arith.constant 1.000000e+00 : f32
    %1118 = vector.broadcast %cst_377 : f32 to vector<4x128xf32>
    %1119 = arith.addf %1114, %1118 : vector<4x128xf32>
    %1120 = tpu.reciprocal %1119 {approx = true} : vector<4x128xf32> -> vector<4x128xf32>
    %1121 = arith.mulf %1117, %1120 : vector<4x128xf32>
    %1122 = vector.extract_strided_slice %1061 {offsets = [0, 0], sizes = [1, 128], strides = [1, 1]} : vector<2x128xf32> to vector<1x128xf32>
    %1123 = vector.broadcast %1122 : vector<1x128xf32> to vector<4x128xf32>
    %1124 = arith.addf %1121, %1123 : vector<4x128xf32>
    %1125 = vector.extract_strided_slice %1091 {offsets = [2, 0], sizes = [1, 128], strides = [1, 1]} : vector<4x128xf32> to vector<1x128xf32>
    %1126 = vector.extract_strided_slice %1091 {offsets = [3, 0], sizes = [1, 128], strides = [1, 1]} : vector<4x128xf32> to vector<1x128xf32>
    %1127 = arith.mulf %1125, %1125 : vector<1x128xf32>
    %1128 = arith.subf %1126, %1127 : vector<1x128xf32>
    %cst_378 = arith.constant 0.000000e+00 : f32
    %1129 = vector.broadcast %cst_378 : f32 to vector<1x128xf32>
    %1130 = arith.maximumf %1128, %1129 : vector<1x128xf32>
    %cst_379 = arith.constant 9.99999974E-6 : f32
    %1131 = vector.broadcast %cst_379 : f32 to vector<1x128xf32>
    %1132 = arith.addf %1130, %1131 : vector<1x128xf32>
    %1133 = math.rsqrt %1132 : vector<1x128xf32>
    %1134 = arith.mulf %1075, %1133 : vector<1x128xf32>
    %1135 = arith.mulf %1125, %1134 : vector<1x128xf32>
    %1136 = arith.subf %1076, %1135 : vector<1x128xf32>
    %1137 = vector.extract_strided_slice %1074 {offsets = [4, 0], sizes = [4, 128], strides = [1, 1]} : vector<8x128xf32> to vector<4x128xf32>
    %1138 = vector.broadcast %1134 : vector<1x128xf32> to vector<4x128xf32>
    %1139 = arith.mulf %1137, %1138 : vector<4x128xf32>
    %1140 = vector.broadcast %1136 : vector<1x128xf32> to vector<4x128xf32>
    %1141 = arith.addf %1139, %1140 : vector<4x128xf32>
    %cst_380 = arith.constant 2.000000e+01 : f32
    %1142 = vector.broadcast %cst_380 : f32 to vector<4x128xf32>
    %1143 = arith.minimumf %1141, %1142 : vector<4x128xf32>
    %1144 = math.exp %1143 : vector<4x128xf32>
    %cst_381 = arith.constant 1.000000e+00 : f32
    %1145 = vector.broadcast %cst_381 : f32 to vector<4x128xf32>
    %1146 = arith.addf %1145, %1144 : vector<4x128xf32>
    %1147 = arith.mulf %1146, %1146 : vector<4x128xf32>
    %cst_382 = arith.constant 1.000000e+00 : f32
    %1148 = vector.broadcast %cst_382 : f32 to vector<4x128xf32>
    %1149 = arith.subf %1147, %1148 : vector<4x128xf32>
    %1150 = arith.mulf %1141, %1149 : vector<4x128xf32>
    %cst_383 = arith.constant 1.000000e+00 : f32
    %1151 = vector.broadcast %cst_383 : f32 to vector<4x128xf32>
    %1152 = arith.addf %1147, %1151 : vector<4x128xf32>
    %1153 = tpu.reciprocal %1152 {approx = true} : vector<4x128xf32> -> vector<4x128xf32>
    %1154 = arith.mulf %1150, %1153 : vector<4x128xf32>
    %1155 = vector.extract_strided_slice %1061 {offsets = [1, 0], sizes = [1, 128], strides = [1, 1]} : vector<2x128xf32> to vector<1x128xf32>
    %1156 = vector.broadcast %1155 : vector<1x128xf32> to vector<4x128xf32>
    %1157 = arith.addf %1154, %1156 : vector<4x128xf32>
    %1158 = tpu.concatenate %1124, %1157 in 0 : vector<4x128xf32>, vector<4x128xf32> -> vector<8x128xf32>
    %c1_i32_384 = arith.constant 1 : i32
    %1159 = tpu.dynamic_rotate %1158 by %c1_i32_384 dim 0 : vector<8x128xf32>, i32 -> vector<8x128xf32>
    %c504_385 = arith.constant 504 : index
    %c0_386 = arith.constant 0 : index
    %1160 = vector.load %arg6[%c504_385, %c0_386] : memref<768x128xf32, #tpu.memory_space<vmem>>, vector<8x128xf32>
    %1161 = arith.mulf %1159, %1160 : vector<8x128xf32>
    %c7_i32_387 = arith.constant 7 : i32
    %1162 = tpu.dynamic_rotate %1158 by %c7_i32_387 dim 0 : vector<8x128xf32>, i32 -> vector<8x128xf32>
    %c512_388 = arith.constant 512 : index
    %c0_389 = arith.constant 0 : index
    %1163 = vector.load %arg6[%c512_388, %c0_389] : memref<768x128xf32, #tpu.memory_space<vmem>>, vector<8x128xf32>
    %1164 = arith.mulf %1162, %1163 : vector<8x128xf32>
    %1165 = tpu.concatenate %1161, %1158, %1164 in 1 : vector<8x128xf32>, vector<8x128xf32>, vector<8x128xf32> -> vector<8x384xf32>
    %1166 = arith.truncf %1165 : vector<8x384xf32> to vector<8x384xbf16>
    %c2496 = arith.constant 2496 : index
    %c0_390 = arith.constant 0 : index
    %1167 = vector.load %arg4[%c2496, %c0_390] : memref<3136x128xbf16, #tpu.memory_space<vmem>>, vector<384x128xbf16>
    %cst_391 = arith.constant dense<0.000000e+00> : vector<8x128xf32>
    %1168 = tpu.matmul %1166, %1167, %cst_391 {dimension_numbers = #tpu.dot_dimension_numbers<[1], [0], [0], [1], [0, 0, 1, 1], [], []>} : vector<8x384xbf16>, vector<384x128xbf16>, vector<8x128xf32> -> vector<8x128xf32>
    %c360 = arith.constant 360 : index
    %c0_392 = arith.constant 0 : index
    %1169 = vector.load %arg6[%c360, %c0_392] : memref<768x128xf32, #tpu.memory_space<vmem>>, vector<1x128xf32>
    %1170 = vector.broadcast %1169 : vector<1x128xf32> to vector<8x128xf32>
    %1171 = arith.addf %1168, %1170 : vector<8x128xf32>
    %c368 = arith.constant 368 : index
    %c0_393 = arith.constant 0 : index
    %1172 = vector.load %arg6[%c368, %c0_393] : memref<768x128xf32, #tpu.memory_space<vmem>>, vector<1x128xf32>
    %c376 = arith.constant 376 : index
    %c0_394 = arith.constant 0 : index
    %1173 = vector.load %arg6[%c376, %c0_394] : memref<768x128xf32, #tpu.memory_space<vmem>>, vector<1x128xf32>
    %1174 = vector.extract_strided_slice %1171 {offsets = [0, 0], sizes = [4, 128], strides = [1, 1]} : vector<8x128xf32> to vector<4x128xf32>
    %cst_395 = arith.constant dense<0.000000e+00> : vector<128xf32>
    %1175 = vector.multi_reduction <add>, %1174, %cst_395 [0] : vector<4x128xf32> to vector<128xf32>
    %1176 = vector.shape_cast %1175 : vector<128xf32> to vector<1x128xf32>
    %1177 = arith.mulf %1174, %1174 : vector<4x128xf32>
    %cst_396 = arith.constant dense<0.000000e+00> : vector<128xf32>
    %1178 = vector.multi_reduction <add>, %1177, %cst_396 [0] : vector<4x128xf32> to vector<128xf32>
    %1179 = vector.shape_cast %1178 : vector<128xf32> to vector<1x128xf32>
    %1180 = vector.extract_strided_slice %1171 {offsets = [4, 0], sizes = [4, 128], strides = [1, 1]} : vector<8x128xf32> to vector<4x128xf32>
    %cst_397 = arith.constant dense<0.000000e+00> : vector<128xf32>
    %1181 = vector.multi_reduction <add>, %1180, %cst_397 [0] : vector<4x128xf32> to vector<128xf32>
    %1182 = vector.shape_cast %1181 : vector<128xf32> to vector<1x128xf32>
    %1183 = arith.mulf %1180, %1180 : vector<4x128xf32>
    %cst_398 = arith.constant dense<0.000000e+00> : vector<128xf32>
    %1184 = vector.multi_reduction <add>, %1183, %cst_398 [0] : vector<4x128xf32> to vector<128xf32>
    %1185 = vector.shape_cast %1184 : vector<128xf32> to vector<1x128xf32>
    %1186 = tpu.concatenate %1176, %1179, %1182, %1185 in 0 : vector<1x128xf32>, vector<1x128xf32>, vector<1x128xf32>, vector<1x128xf32> -> vector<4x128xf32>
    %c640_399 = arith.constant 640 : index
    %c0_400 = arith.constant 0 : index
    %1187 = vector.load %arg6[%c640_399, %c0_400] : memref<768x128xf32, #tpu.memory_space<vmem>>, vector<128x128xf32>
    %cst_401 = arith.constant dense<0.000000e+00> : vector<4x128xf32>
    %1188 = tpu.matmul %1186, %1187, %cst_401 {dimension_numbers = #tpu.dot_dimension_numbers<[1], [0], [0], [1], [0, 0, 1, 1], [], []>} : vector<4x128xf32>, vector<128x128xf32>, vector<4x128xf32> -> vector<4x128xf32>
    %1189 = vector.extract_strided_slice %1188 {offsets = [0, 0], sizes = [1, 128], strides = [1, 1]} : vector<4x128xf32> to vector<1x128xf32>
    %1190 = vector.extract_strided_slice %1188 {offsets = [1, 0], sizes = [1, 128], strides = [1, 1]} : vector<4x128xf32> to vector<1x128xf32>
    %1191 = arith.mulf %1189, %1189 : vector<1x128xf32>
    %1192 = arith.subf %1190, %1191 : vector<1x128xf32>
    %cst_402 = arith.constant 0.000000e+00 : f32
    %1193 = vector.broadcast %cst_402 : f32 to vector<1x128xf32>
    %1194 = arith.maximumf %1192, %1193 : vector<1x128xf32>
    %cst_403 = arith.constant 9.99999974E-6 : f32
    %1195 = vector.broadcast %cst_403 : f32 to vector<1x128xf32>
    %1196 = arith.addf %1194, %1195 : vector<1x128xf32>
    %1197 = math.rsqrt %1196 : vector<1x128xf32>
    %1198 = arith.mulf %1172, %1197 : vector<1x128xf32>
    %1199 = arith.mulf %1189, %1198 : vector<1x128xf32>
    %1200 = arith.subf %1173, %1199 : vector<1x128xf32>
    %1201 = vector.extract_strided_slice %1171 {offsets = [0, 0], sizes = [4, 128], strides = [1, 1]} : vector<8x128xf32> to vector<4x128xf32>
    %1202 = vector.broadcast %1198 : vector<1x128xf32> to vector<4x128xf32>
    %1203 = arith.mulf %1201, %1202 : vector<4x128xf32>
    %1204 = vector.broadcast %1200 : vector<1x128xf32> to vector<4x128xf32>
    %1205 = arith.addf %1203, %1204 : vector<4x128xf32>
    %cst_404 = arith.constant 2.000000e+01 : f32
    %1206 = vector.broadcast %cst_404 : f32 to vector<4x128xf32>
    %1207 = arith.minimumf %1205, %1206 : vector<4x128xf32>
    %1208 = math.exp %1207 : vector<4x128xf32>
    %cst_405 = arith.constant 1.000000e+00 : f32
    %1209 = vector.broadcast %cst_405 : f32 to vector<4x128xf32>
    %1210 = arith.addf %1209, %1208 : vector<4x128xf32>
    %1211 = arith.mulf %1210, %1210 : vector<4x128xf32>
    %cst_406 = arith.constant 1.000000e+00 : f32
    %1212 = vector.broadcast %cst_406 : f32 to vector<4x128xf32>
    %1213 = arith.subf %1211, %1212 : vector<4x128xf32>
    %1214 = arith.mulf %1205, %1213 : vector<4x128xf32>
    %cst_407 = arith.constant 1.000000e+00 : f32
    %1215 = vector.broadcast %cst_407 : f32 to vector<4x128xf32>
    %1216 = arith.addf %1211, %1215 : vector<4x128xf32>
    %1217 = tpu.reciprocal %1216 {approx = true} : vector<4x128xf32> -> vector<4x128xf32>
    %1218 = arith.mulf %1214, %1217 : vector<4x128xf32>
    %1219 = vector.extract_strided_slice %1188 {offsets = [2, 0], sizes = [1, 128], strides = [1, 1]} : vector<4x128xf32> to vector<1x128xf32>
    %1220 = vector.extract_strided_slice %1188 {offsets = [3, 0], sizes = [1, 128], strides = [1, 1]} : vector<4x128xf32> to vector<1x128xf32>
    %1221 = arith.mulf %1219, %1219 : vector<1x128xf32>
    %1222 = arith.subf %1220, %1221 : vector<1x128xf32>
    %cst_408 = arith.constant 0.000000e+00 : f32
    %1223 = vector.broadcast %cst_408 : f32 to vector<1x128xf32>
    %1224 = arith.maximumf %1222, %1223 : vector<1x128xf32>
    %cst_409 = arith.constant 9.99999974E-6 : f32
    %1225 = vector.broadcast %cst_409 : f32 to vector<1x128xf32>
    %1226 = arith.addf %1224, %1225 : vector<1x128xf32>
    %1227 = math.rsqrt %1226 : vector<1x128xf32>
    %1228 = arith.mulf %1172, %1227 : vector<1x128xf32>
    %1229 = arith.mulf %1219, %1228 : vector<1x128xf32>
    %1230 = arith.subf %1173, %1229 : vector<1x128xf32>
    %1231 = vector.extract_strided_slice %1171 {offsets = [4, 0], sizes = [4, 128], strides = [1, 1]} : vector<8x128xf32> to vector<4x128xf32>
    %1232 = vector.broadcast %1228 : vector<1x128xf32> to vector<4x128xf32>
    %1233 = arith.mulf %1231, %1232 : vector<4x128xf32>
    %1234 = vector.broadcast %1230 : vector<1x128xf32> to vector<4x128xf32>
    %1235 = arith.addf %1233, %1234 : vector<4x128xf32>
    %cst_410 = arith.constant 2.000000e+01 : f32
    %1236 = vector.broadcast %cst_410 : f32 to vector<4x128xf32>
    %1237 = arith.minimumf %1235, %1236 : vector<4x128xf32>
    %1238 = math.exp %1237 : vector<4x128xf32>
    %cst_411 = arith.constant 1.000000e+00 : f32
    %1239 = vector.broadcast %cst_411 : f32 to vector<4x128xf32>
    %1240 = arith.addf %1239, %1238 : vector<4x128xf32>
    %1241 = arith.mulf %1240, %1240 : vector<4x128xf32>
    %cst_412 = arith.constant 1.000000e+00 : f32
    %1242 = vector.broadcast %cst_412 : f32 to vector<4x128xf32>
    %1243 = arith.subf %1241, %1242 : vector<4x128xf32>
    %1244 = arith.mulf %1235, %1243 : vector<4x128xf32>
    %cst_413 = arith.constant 1.000000e+00 : f32
    %1245 = vector.broadcast %cst_413 : f32 to vector<4x128xf32>
    %1246 = arith.addf %1241, %1245 : vector<4x128xf32>
    %1247 = tpu.reciprocal %1246 {approx = true} : vector<4x128xf32> -> vector<4x128xf32>
    %1248 = arith.mulf %1244, %1247 : vector<4x128xf32>
    %1249 = tpu.concatenate %1218, %1248 in 0 : vector<4x128xf32>, vector<4x128xf32> -> vector<8x128xf32>
    %1250 = arith.addf %1249, %1057 : vector<8x128xf32>
    %1251 = vector.extract_strided_slice %1250 {offsets = [0, 0], sizes = [4, 128], strides = [1, 1]} : vector<8x128xf32> to vector<4x128xf32>
    %cst_414 = arith.constant dense<0.000000e+00> : vector<128xf32>
    %1252 = vector.multi_reduction <add>, %1251, %cst_414 [0] : vector<4x128xf32> to vector<128xf32>
    %1253 = vector.shape_cast %1252 : vector<128xf32> to vector<1x128xf32>
    %cst_415 = arith.constant 4.000000e+00 : f32
    %1254 = vector.broadcast %cst_415 : f32 to vector<1x128xf32>
    %1255 = arith.divf %1253, %1254 : vector<1x128xf32>
    %1256 = vector.extract_strided_slice %1250 {offsets = [4, 0], sizes = [4, 128], strides = [1, 1]} : vector<8x128xf32> to vector<4x128xf32>
    %cst_416 = arith.constant dense<0.000000e+00> : vector<128xf32>
    %1257 = vector.multi_reduction <add>, %1256, %cst_416 [0] : vector<4x128xf32> to vector<128xf32>
    %1258 = vector.shape_cast %1257 : vector<128xf32> to vector<1x128xf32>
    %cst_417 = arith.constant 4.000000e+00 : f32
    %1259 = vector.broadcast %cst_417 : f32 to vector<1x128xf32>
    %1260 = arith.divf %1258, %1259 : vector<1x128xf32>
    %1261 = tpu.concatenate %1255, %1260 in 0 : vector<1x128xf32>, vector<1x128xf32> -> vector<2x128xf32>
    %c0_418 = arith.constant 0 : index
    %c0_419 = arith.constant 0 : index
    %c0_420 = arith.constant 0 : index
    %1262 = vector.load %arg3[%c0_418, %c0_419, %c0_420] : memref<1x2x32xf32, #tpu.memory_space<vmem>>, vector<1x2x32xf32>
    %1263 = vector.shape_cast %1262 : vector<1x2x32xf32> to vector<2x32xf32>
    %1264 = arith.truncf %1261 : vector<2x128xf32> to vector<2x128xbf16>
    %c2880 = arith.constant 2880 : index
    %c0_421 = arith.constant 0 : index
    %1265 = vector.load %arg4[%c2880, %c0_421] : memref<3136x128xbf16, #tpu.memory_space<vmem>>, vector<128x64xbf16>
    %cst_422 = arith.constant dense<0.000000e+00> : vector<2x64xf32>
    %1266 = tpu.matmul %1264, %1265, %cst_422 {dimension_numbers = #tpu.dot_dimension_numbers<[1], [0], [0], [1], [0, 0, 1, 1], [], []>} : vector<2x128xbf16>, vector<128x64xbf16>, vector<2x64xf32> -> vector<2x64xf32>
    %1267 = arith.truncf %1263 : vector<2x32xf32> to vector<2x32xbf16>
    %c3008 = arith.constant 3008 : index
    %c0_423 = arith.constant 0 : index
    %1268 = vector.load %arg4[%c3008, %c0_423] : memref<3136x128xbf16, #tpu.memory_space<vmem>>, vector<32x64xbf16>
    %cst_424 = arith.constant dense<0.000000e+00> : vector<2x64xf32>
    %1269 = tpu.matmul %1267, %1268, %cst_424 {dimension_numbers = #tpu.dot_dimension_numbers<[1], [0], [0], [1], [0, 0, 1, 1], [], []>} : vector<2x32xbf16>, vector<32x64xbf16>, vector<2x64xf32> -> vector<2x64xf32>
    %1270 = arith.addf %1266, %1269 : vector<2x64xf32>
    %1271 = arith.truncf %26 : vector<2x32xf32> to vector<2x32xbf16>
    %c3040 = arith.constant 3040 : index
    %c0_425 = arith.constant 0 : index
    %1272 = vector.load %arg4[%c3040, %c0_425] : memref<3136x128xbf16, #tpu.memory_space<vmem>>, vector<32x64xbf16>
    %cst_426 = arith.constant dense<0.000000e+00> : vector<2x64xf32>
    %1273 = tpu.matmul %1271, %1272, %cst_426 {dimension_numbers = #tpu.dot_dimension_numbers<[1], [0], [0], [1], [0, 0, 1, 1], [], []>} : vector<2x32xbf16>, vector<32x64xbf16>, vector<2x64xf32> -> vector<2x64xf32>
    %1274 = arith.addf %1270, %1273 : vector<2x64xf32>
    %c392 = arith.constant 392 : index
    %c0_427 = arith.constant 0 : index
    %1275 = vector.load %arg6[%c392, %c0_427] : memref<768x128xf32, #tpu.memory_space<vmem>>, vector<1x64xf32>
    %1276 = vector.broadcast %1275 : vector<1x64xf32> to vector<2x64xf32>
    %1277 = arith.addf %1274, %1276 : vector<2x64xf32>
    %cst_428 = arith.constant 2.000000e+01 : f32
    %1278 = vector.broadcast %cst_428 : f32 to vector<2x64xf32>
    %1279 = arith.minimumf %1277, %1278 : vector<2x64xf32>
    %1280 = math.exp %1279 : vector<2x64xf32>
    %cst_429 = arith.constant 1.000000e+00 : f32
    %1281 = vector.broadcast %cst_429 : f32 to vector<2x64xf32>
    %1282 = arith.addf %1281, %1280 : vector<2x64xf32>
    %1283 = arith.mulf %1282, %1282 : vector<2x64xf32>
    %cst_430 = arith.constant 1.000000e+00 : f32
    %1284 = vector.broadcast %cst_430 : f32 to vector<2x64xf32>
    %1285 = arith.subf %1283, %1284 : vector<2x64xf32>
    %1286 = arith.mulf %1277, %1285 : vector<2x64xf32>
    %cst_431 = arith.constant 1.000000e+00 : f32
    %1287 = vector.broadcast %cst_431 : f32 to vector<2x64xf32>
    %1288 = arith.addf %1283, %1287 : vector<2x64xf32>
    %1289 = tpu.reciprocal %1288 {approx = true} : vector<2x64xf32> -> vector<2x64xf32>
    %1290 = arith.mulf %1286, %1289 : vector<2x64xf32>
    %1291 = arith.truncf %1290 : vector<2x64xf32> to vector<2x64xbf16>
    %c3072 = arith.constant 3072 : index
    %c0_432 = arith.constant 0 : index
    %1292 = vector.load %arg4[%c3072, %c0_432] : memref<3136x128xbf16, #tpu.memory_space<vmem>>, vector<64x128xbf16>
    %cst_433 = arith.constant dense<0.000000e+00> : vector<2x128xf32>
    %1293 = tpu.matmul %1291, %1292, %cst_433 {dimension_numbers = #tpu.dot_dimension_numbers<[1], [0], [0], [1], [0, 0, 1, 1], [], []>} : vector<2x64xbf16>, vector<64x128xbf16>, vector<2x128xf32> -> vector<2x128xf32>
    %c400 = arith.constant 400 : index
    %c0_434 = arith.constant 0 : index
    %1294 = vector.load %arg6[%c400, %c0_434] : memref<768x128xf32, #tpu.memory_space<vmem>>, vector<1x128xf32>
    %1295 = vector.broadcast %1294 : vector<1x128xf32> to vector<2x128xf32>
    %1296 = arith.addf %1293, %1295 : vector<2x128xf32>
    %c0_435 = arith.constant 0 : index
    %c0_436 = arith.constant 0 : index
    %c0_437 = arith.constant 0 : index
    %1297 = vector.load %arg7[%c0_435, %c0_436, %c0_437] : memref<1x2x128xf32, #tpu.memory_space<vmem>>, vector<1x2x128xf32>
    %1298 = vector.shape_cast %1297 : vector<1x2x128xf32> to vector<2x128xf32>
    %1299 = vector.shape_cast %1296 : vector<2x128xf32> to vector<1x2x128xf32>
    tpu.vector_store %arg7[%c0_435, %c0_436, %c0_437], %1299 {strides = array<i32>} : memref<1x2x128xf32, #tpu.memory_space<vmem>>, vector<1x2x128xf32>,
    return
  }
  func.func @transform_0(%arg0: i32) -> (i32, i32, i32) {
    %c0_i32 = arith.constant 0 : i32
    %c0_i32_0 = arith.constant 0 : i32
    %c0_i32_1 = arith.constant 0 : i32
    return %arg0, %c0_i32, %c0_i32_0 : i32, i32, i32
  }
  func.func @transform_1(%arg0: i32) -> (i32, i32, i32) {
    %c0_i32 = arith.constant 0 : i32
    %c0_i32_0 = arith.constant 0 : i32
    %c0_i32_1 = arith.constant 0 : i32
    return %arg0, %c0_i32, %c0_i32_0 : i32, i32, i32
  }
  func.func @transform_2(%arg0: i32) -> (i32, i32, i32) {
    %c0_i32 = arith.constant 0 : i32
    %c0_i32_0 = arith.constant 0 : i32
    %c0_i32_1 = arith.constant 0 : i32
    return %arg0, %c0_i32, %c0_i32_0 : i32, i32, i32
  }
  func.func @transform_3(%arg0: i32) -> (i32, i32) {
    %c0_i32 = arith.constant 0 : i32
    %c0_i32_0 = arith.constant 0 : i32
    %c0_i32_1 = arith.constant 0 : i32
    return %c0_i32, %c0_i32_0 : i32, i32
  }
  func.func @transform_4(%arg0: i32) -> (i32, i32) {
    %c0_i32 = arith.constant 0 : i32
    %c0_i32_0 = arith.constant 0 : i32
    %c0_i32_1 = arith.constant 0 : i32
    return %c0_i32, %c0_i32_0 : i32, i32
  }
  func.func @transform_5(%arg0: i32) -> (i32, i32) {
    %c0_i32 = arith.constant 0 : i32
    %c0_i32_0 = arith.constant 0 : i32
    %c0_i32_1 = arith.constant 0 : i32
    return %c0_i32, %c0_i32_0 : i32, i32
  }
  func.func @transform_6(%arg0: i32) -> (i32, i32, i32) {
    %c0_i32 = arith.constant 0 : i32
    %c0_i32_0 = arith.constant 0 : i32
    %c0_i32_1 = arith.constant 0 : i32
    return %arg0, %c0_i32, %c0_i32_0 : i32, i32, i32
  }
}

</mosaic_0001>

<bundles_post_ra>
// kernel: forward.1
= control target key start
LH: loop header
LB: loop body
LE: loop exit
PB: predicated region body
PF: predicated region fallthrough
CT: control target
= control target key end

     0   :  { %11 = vsyncpa [#allocation3], 0  ;;  %s9430_s0 = inlined_call_operand.vmem [shape: f32[1,32,4], index: 0, kind: input, shape index: {}]   ;;  %s9431_s1 = inlined_call_operand.vmem [shape: f32[1,2,32], index: 1, kind: input, shape index: {}]   ;;  %s9432_s2 = inlined_call_operand.vmem [shape: f32[1,2,32], index: 2, kind: input, shape index: {}]   ;;  %s9433_s3 = inlined_call_operand.hbm [shape: bf16[3136,128], index: 3, kind: input, shape index: {}]   ;;  %s9434_s4 = inlined_call_operand.hbm [shape: bf16[32,768], index: 4, kind: input, shape index: {}]   ;;  %s9435_s5 = inlined_call_operand.hbm [shape: f32[768,128], index: 5, kind: input, shape index: {}]   ;;  %s9436_s6 = inlined_call_operand.vmem [shape: f32[1,2,128], index: 6, kind: output, shape index: {}]  }
   0x1   :  { %12 = vsyncpa [#allocation5], 0  ;;  %s8134_s21 = smov [#allocation4]   ;;  %s8064_s25 = scalar_lea.hbm %s9434_s4, 1536 }
   0x2   :  { %s36_s22 = sshll.u32 %s8134_s21, 4  ;;  %p8065_p0 = scmp.ne.s32.totalorder %s9434_s4, %s8064_s25  ;;  %s37_s22 = int_to_ptr.vmem [resolvable:$true] %s36_s22 }
   0x3   :  { %p8068_p1 = scmp.lt.u32.totalorder %s8064_s25, %s9434_s4 }
   0x5   :  { %p8070_p2 = pnand %p8068_p1, %p8065_p0 }
   0x7   :  { %8073 = shalt.err (!%p8070_p2)
}
   0x8   :  { %s8074_s30 = scalar_lea.vmem %s37_s22, 1536  ;;  %p8079_p4 = scmp.lt.s32.totalorder %s37_s22, %s37_s22 }
   0x9   :  { %p8075_p3 = scmp.ne.s32.totalorder %s37_s22, %s8074_s30  ;;  %p8080_p5 = scmp.lt.s32.totalorder %s8074_s30, %s8074_s30 }
   0xb   :  { %p8081_p6 = por %p8080_p5, %p8079_p4 }
   0xd   :  { %p8082_p7 = pnand %p8081_p6, %p8075_p3 }
   0xf   :  { %8085 = shalt.err (!%p8082_p7)
}
  0x10   :  { %s8135_s7 = smov 384   ;;  %s8136_s8 = smov 24  }
  0x11   :  { %42 = dma.hbm_to_vmem [thread:$0]  %s9434_s4, 1536, %s37_s22, [#allocation5], %s8135_s7, %s8135_s7, %s8136_s8  }
  0x12   :  { %s8137_s11 = smov [#allocation2]   ;;  %s8086_s15 = scalar_lea.hbm %s9433_s3, 25088 }
  0x13   :  { %s24_s12 = sshll.u32 %s8137_s11, 4  ;;  %p8087_p8 = scmp.ne.s32.totalorder %s9433_s3, %s8086_s15  ;;  %s25_s12 = int_to_ptr.vmem [resolvable:$true] %s24_s12 }
  0x14   :  { %p8090_p9 = scmp.lt.u32.totalorder %s8086_s15, %s9433_s3 }
  0x16   :  { %p8092_p10 = pnand %p8090_p9, %p8087_p8 }
  0x18   :  { %8095 = shalt.err (!%p8092_p10)
}
  0x19   :  { %s8096_s20 = scalar_lea.vmem %s25_s12, 25088  ;;  %p8101_p12 = scmp.lt.s32.totalorder %s25_s12, %s25_s12 }
  0x1a   :  { %p8097_p11 = scmp.ne.s32.totalorder %s25_s12, %s8096_s20  ;;  %p8102_p13 = scmp.lt.s32.totalorder %s8096_s20, %s8096_s20 }
  0x1c   :  { %p8103_p0 = por %p8102_p13, %p8101_p12 }
  0x1e   :  { %p8104_p1 = pnand %p8103_p0, %p8097_p11 }
  0x20   :  { %8107 = shalt.err (!%p8104_p1)
}
  0x21   :  { %s8138_s4 = smov 64   ;;  %s8139_s21 = smov 4  }
  0x22   :  { %30 = dma.hbm_to_vmem [thread:$0]  %s9433_s3, 25088, %s25_s12, [#allocation3], %s8138_s4, %s8138_s4, %s8139_s21  }
  0x23   :  { %s8140_s24 = smov [#allocation6]   ;;  %s8108_s28 = scalar_lea.hbm %s9435_s5, 12288 }
  0x24   :  { %s48_s25 = sshll.u32 %s8140_s24, 4  ;;  %p8109_p2 = scmp.ne.s32.totalorder %s9435_s5, %s8108_s28  ;;  %s49_s25 = int_to_ptr.vmem [resolvable:$true] %s48_s25 }
  0x25   :  { %p8112_p3 = scmp.lt.u32.totalorder %s8108_s28, %s9435_s5 }
  0x27   :  { %p8114_p4 = pnand %p8112_p3, %p8109_p2 }
  0x29   :  { %8117 = shalt.err (!%p8114_p4)
}
  0x2a   :  { %s8118_s9 = scalar_lea.vmem %s49_s25, 12288  ;;  %p8123_p6 = scmp.lt.s32.totalorder %s49_s25, %s49_s25 }
  0x2b   :  { %p8119_p5 = scmp.ne.s32.totalorder %s49_s25, %s8118_s9  ;;  %p8124_p7 = scmp.lt.s32.totalorder %s8118_s9, %s8118_s9 }
  0x2d   :  { %p8125_p8 = por %p8124_p7, %p8123_p6 }
  0x2f   :  { %p8126_p9 = pnand %p8125_p8, %p8119_p5 }
  0x31   :  { %8129 = shalt.err (!%p8126_p9)
}
  0x32   :  { %s8141_s3 = smov 128   ;;  %s8142_s10 = smov 8  }
  0x33   :  { %54 = dma.hbm_to_vmem [thread:$0]  %s9435_s5, 12288, %s49_s25, [#allocation5], %s8141_s3, %s8141_s3, %s8142_s10  }
  0x34   :  { %8130 = dma.done.wait [#allocation3], 25088  }
  0x35   :  { %8131 = vsyncadd [#allocation3], 4294942208 }
  0x36   :  { %8132 = dma.done.wait [#allocation5], 13824  }
  0x37   :  { %8133 = vsyncadd [#allocation5], 4294953472  ;;  %v8143_v0 = vmov 0.0   ;;  %vm8144_vm0 = vmmov 0   ;;  %v7673_v1 = vld [vmem:[#allocation2] sm:$0xff]   ;;  %v7674_v2 = vld [vmem:[#allocation2 + $0x8] sm:$0xff]   ;;  %v475_v16 = vlaneseq }
  0x38   :  { %6828 = vmatprep.subr.bf16.mxu0 %v8143_v0  ;;  %6832 = vmatprep.mubr.msk.bf16.mxu0 %vm8144_vm0, %v8143_v0  ;;  %v65_v3 = vld [vmem:[%s9431_s1] sm:$0x3]  ;;  %vm88_vm1 = vcmask 261120   ;;  %v7675_v5 = vld [vmem:[#allocation2 + $0x10] sm:$0xff]   ;;  %v7676_v6 = vld [vmem:[#allocation2 + $0x18] sm:$0xff]   ;;  %v8145_v62 = vmov 0  }
  0x39   :  { %6836 = vmatprep.subr.bf16.mxu1 %v8143_v0  ;;  %6852 = vmatprep.mubr.msk.bf16.mxu1 %vm8144_vm0, %v8143_v0  ;;  %v66_v4 = vpack.c.bf16 %v65_v3, %v65_v3  ;;  %v7677_v7 = vld [vmem:[#allocation2 + $0x20] sm:$0xff]   ;;  %v7678_v8 = vld [vmem:[#allocation2 + $0x28] sm:$0xff]   ;;  %v7679_v9 = vld [vmem:[#allocation2 + $0x30] sm:$0xff]   ;;  %v8263_v19 = vshrl.u32 %v475_v16, 7  ;;  %vm539_vm4 = vcmask 31744   ;;  %vm544_vm5 = vcmask 64512  }
  0x3a   :  { %6829 = vmatpush3.bf16.msra.mxu0 %v7673_v1  ;;  %6837 = vmatpush3.bf16.msra.mxu1 %v7675_v5  ;;  %v7680_v10 = vld [vmem:[#allocation2 + $0x38] sm:$0xff]   ;;  %v7681_v11 = vld [vmem:[#allocation2 + $0x40] sm:$0xff]   ;;  %v7682_v12 = vld [vmem:[#allocation2 + $0x48] sm:$0xff]   ;;  %vm570_vm6 = vcmask 1045504   ;;  %vm563_vm7 = vcmask 97280   ;;  %vm665_vm8 = vcmask 1040384  }
  0x3b   :  { %6830 = vmatprep.subr.bf16.mxu0 %v8143_v0  ;;  %6838 = vmatprep.subr.bf16.mxu1 %v8143_v0  ;;  %v8244_v13 = vld [vmem:[%s9430_s0] sm:$0xff]  ;;  %v8249_v14 = vld [vmem:[%s9430_s0 + $0x8] sm:$0xff]  ;;  %v8254_v15 = vld [vmem:[%s9430_s0 + $0x10] sm:$0xff]  ;;  %vm494_vm2 = vcmp.lt.s32.totalorder %v8263_v19, 7  ;;  %vm477_vm3 = vcmp.lt.s32.totalorder %v8263_v19, 1  ;;  %vm667_vm9 = vcmask 1041408  }
  0x3c   :  { %v7543_v17 = vpack.i.bf16 %v8249_v14, %v8244_v13  ;;  %v8261_v18 = vld [vmem:[%s9430_s0 + $0x18] sm:$0xff]  ;;  %v490_v20 = vrot.slane %v8244_v13, 1  ;;  %v491_v21 = vrot.slane %v8249_v14, 1  ;;  %v492_v22 = vrot.slane %v8254_v15, 1  ;;  %v8270_v24 = vld [vmem:[#allocation6 + $0x1c0] sm:$0xff]  ;;  %v8278_v28 = vld [vmem:[#allocation6 + $0x1c8] sm:$0xff] }
  0x3d   :  { %v8268_v23 = vld [vmem:[#allocation6 + $0x1b8] sm:$0xff]  ;;  %v7548_v25 = vpack.i.bf16 %v8261_v18, %v8254_v15  ;;  %v1233_v26 = vpack.c.bf16 %v8261_v18, %v8254_v15  ;;  %v493_v27 = vrot.slane %v8261_v18, 1  ;;  %v8280_v29 = vld [vmem:[#allocation6 + $0x1d0] sm:$0xff]  ;;  %v6215_v40 = vld [vmem:[#allocation6] ss:$0 sm:$0xff]  ;;  %v473_v1 = vrot.slane %v8254_v15, 7 }
  0x3e   :  { %6831 = vmatpush3.bf16.msra.mxu0 %v7674_v2  ;;  %6839 = vmatpush3.bf16.msra.mxu1 %v7676_v6  ;;  %v496_v30 = vsel %vm494_vm2, %v491_v21, %v492_v22  ;;  %v497_v31 = vsel %vm494_vm2, %v490_v20, %v491_v21  ;;  %v7685_v57 = vld [vmem:[#allocation4 + $0x4] ss:$24 sps:$4 sm:$0xff]   ;;  %v7683_v58 = vld [vmem:[#allocation4] ss:$24 sps:$4 sm:$0xff]   ;;  %v7688_v59 = vld [vmem:[#allocation4 + $0x34] ss:$24 sps:$4 sm:$0xff]  }
  0x3f   :  { %6840 = vmatprep.subr.bf16.mxu1 %v8143_v0  ;;  %7544 = vrot.lane.b32.xlu0 %v7543_v17, %s8139_s21  ;;  %v495_v32 = vsel %vm494_vm2, %v492_v22, %v493_v27  ;;  %v498_v33 = vsel %vm494_vm2, %v493_v27, %v490_v20  ;;  %v503_v34 = vmul.f32 %v8268_v23, %v497_v31  ;;  %v7686_v60 = vld [vmem:[#allocation4 + $0x30] ss:$24 sps:$4 sm:$0xff]   ;;  %v7691_v61 = vld [vmem:[#allocation4 + $0xc] ss:$24 sps:$4 sm:$0xff]   ;;  %v474_v3 = vrot.slane %v8261_v18, 7  ;;  %s8147_s0 = smov 32  }
  0x40   :  { %v504_v35 = vmul.f32 %v8270_v24, %v496_v30  ;;  %v505_v36 = vmul.f32 %v8278_v28, %v495_v32  ;;  %v506_v37 = vmul.f32 %v8280_v29, %v498_v33  ;;  %338 = vmatprep.subr.bf16.mxu0 %v7685_v57  ;;  %v8311_v6 = vld [vmem:[#allocation6 + $0x1a8] sm:$0xff]  ;;  %vm669_vm10 = vcmask 1042432  }
  0x41   :  { %6833 = vmatmul.mubr.msk.bf16.vlgmr.msra.gmra.mrb[0].mxu0 %vm88_vm1, %v66_v4  ;;  %v472_v4 = vrot.slane %v8249_v14, 7  ;;  %v478_v5 = vsel %vm477_vm3, %v473_v1, %v474_v3  ;;  %v6220_v32 = vld [vmem:[#allocation6 + $0x8] ss:$0 sm:$0xff]  ;;  %v7697_v57 = vld [vmem:[#allocation4 + $0x14] ss:$24 sps:$4 sm:$0xff]   ;;  %vm909_vm11 = vcmask 523264  }
  0x42   :  { %6841 = vmatpush3.bf16.msra.mxu1 %v7677_v7  ;;  %v7553_v38 = vpack.i.bf16 %v504_v35, %v503_v34  ;;  %v7558_v39 = vpack.i.bf16 %v506_v37, %v505_v36  ;;  %339 = vmatpush1.bf16.msra.mxu0 %v7683_v58  ;;  %v8313_v7 = vld [vmem:[#allocation6 + $0x1b0] sm:$0xff]  ;;  %vm969_vm12 = vcmask 785408   ;;  %vm3797_vm13 = vcmask 130048  }
  0x43   :  { %6842 = vmatprep.subr.bf16.mxu1 %v8143_v0  ;;  %7549 = vrot.lane.b32.xlu0 %v7548_v25, %s8139_s21  ;;  %vm4183_vm14 = vcmask 1043456  }
  0x44   :  { %7554 = vrot.lane.b32.xlu1 %v7553_v38, %s8142_s10  ;;  %340 = vmatprep.subr.bf16.mxu0 %v7688_v59 }
  0x45   :  { %370 = vmatprep.mubr.bf16.mxu0 %v8145_v62 }
  0x46   :  { %6843 = vmatpush3.bf16.msra.mxu1 %v7678_v8  ;;  %341 = vmatpush1.bf16.msra.mxu0 %v7686_v60 }
  0x47   :  { %6844 = vmatprep.subr.bf16.mxu1 %v8143_v0  ;;  %379 = vmatprep.subr.bf16.mxu0 %v7691_v61 }
  0x48   :  { %7559 = vrot.lane.b32.xlu1 %v7558_v39, %s8142_s10 }
  0x4a   :  { %6845 = vmatpush3.bf16.msra.mxu1 %v7679_v9  ;;  %v479_v9 = vsel %vm477_vm3, %v472_v4, %v473_v1  ;;  %v7695_v1 = vld [vmem:[#allocation4 + $0x10] ss:$24 sps:$4 sm:$0xff]  }
  0x4b   :  { %6846 = vmatprep.subr.bf16.mxu1 %v8143_v0  ;;  %v488_v16 = vmul.f32 %v8311_v6, %v479_v9 }
  0x4e   :  { %6847 = vmatpush3.bf16.msra.mxu1 %v7680_v10  ;;  %v489_v10 = vmul.f32 %v8313_v7, %v478_v5 }
  0x4f   :  { %6848 = vmatprep.subr.bf16.mxu1 %v8143_v0 }
  0x52   :  { %6849 = vmatpush3.bf16.msra.mxu1 %v7681_v11 }
  0x53   :  { %6850 = vmatprep.subr.bf16.mxu1 %v8143_v0 }
  0x56   :  { %6851 = vmatpush3.bf16.msra.mxu1 %v7682_v12 }
  0xb1   :  { %v8301_v63 = vpop.permute.xlu0 %7544 }
  0xb2   :  { %v7547_v58 = vunpack.i.h.bf16 %v8301_v63  ;;  %v7546_v59 = vunpack.i.l.bf16 %v8301_v63  ;;  %v7698_v63 = vld [vmem:[#allocation4 + $0x40] ss:$24 sps:$4 sm:$0xff]  }
  0xb5   :  { %v7550_v8 = vpop.permute.xlu0 %7549 }
  0xb6   :  { %v8304_v2 = vpop.permute.xlu1 %7554  ;;  %v7552_v11 = vunpack.i.h.bf16 %v7550_v8  ;;  %v7551_v17 = vunpack.i.l.bf16 %v7550_v8 }
  0xb7   :  { %v7556_v5 = vunpack.i.l.bf16 %v8304_v2 }
  0xb8   :  { %v543_v21 = vsel %vm539_vm4, %v489_v10, %v7552_v11  ;;  %v542_v25 = vsel %vm539_vm4, %v488_v16, %v7551_v17  ;;  %v671_v17 = vld [vmem:[#allocation6 + $0x220] sm:$0xff] }
  0xba   :  { %v7560_v12 = vpop.permute.xlu1 %7559 }
  0xbb   :  { %v7562_v20 = vunpack.i.h.bf16 %v7560_v12  ;;  %v7561_v22 = vunpack.i.l.bf16 %v7560_v12  ;;  %v7701_v12 = vld [vmem:[#allocation2 + $0x50] sm:$0x3f]  }
  0xbd   :  { %v8322_v27 = vsel %vm544_vm5, %v543_v21, %v7562_v20  ;;  %v8325_v30 = vsel %vm544_vm5, %v542_v25, %v7561_v22  ;;  %v672_v20 = vld [vmem:[#allocation6 + $0x228] sm:$0xff]  ;;  %v8146_v22 = vmov 0.0|0.0   ;;  %v673_v25 = vld [vmem:[#allocation6 + $0x230] sm:$0xff] }
  0xbe   :  { %v550_v31 = vpack.c.bf16 %v8322_v27, %v8325_v30  ;;  %v8357_v21 = vpack.c.bf16 %v672_v20, %v671_v17  ;;  %7347 = vmatprep.subr.bf16.mxu1 %v8146_v22  ;;  %v674_v27 = vld [vmem:[#allocation6 + $0x238] sm:$0xff] }
  0xbf   :  { %v8362_v30 = vpack.c.bf16 %v674_v27, %v673_v25 }
 0x114   :  { %v126_v41 = vpop.f32.mrb[0].mxu0 }
 0x115   :  { %v127_v42 = vadd.f32 %v6215_v40, %v126_v41  ;;  %v6834_v43 = vpop.f32.mrb[1].mxu0 }
 0x116   :  { %v129_v44 = vpop.f32.mrb[2].mxu0 }
 0x117   :  { %v132_v45 = vmin.f32 %v127_v42, 20.0  ;;  %v6835_v46 = vpop.f32.mrb[3].mxu0 }
 0x119   :  { %v133_v47 = vmul.f32 1.442695, %v132_v45 }
 0x11b   :  { %7886 = vpow2.f32 %v133_v47  ;;  %v471_v47 = vrot.slane %v8244_v13, 7 }
 0x125   :  { %v7887_v48 = vpop.eup %7886 }
 0x126   :  { %v135_v49 = vadd.f32 1.0, %v7887_v48 }
 0x128   :  { %v136_v50 = vmul.f32 %v135_v49, %v135_v49  ;;  %v7689_v49 = vld [vmem:[#allocation4 + $0x8] ss:$24 sps:$4 sm:$0xff]  }
 0x12a   :  { %v139_v51 = vadd.f32 1.0, %v136_v50  ;;  %v6219_v52 = vadd.f32 -1.0, %v136_v50 }
 0x12c   :  { %7888 = vrcp.f32 %v139_v51  ;;  %v138_v53 = vmul.f32 %v6219_v52, %v127_v42  ;;  %v7694_v51 = vld [vmem:[#allocation4 + $0x3c] ss:$24 sps:$4 sm:$0xff]  }
 0x12d   :  { %v8335_v52 = vld [vmem:[#allocation6 + $0x198] sm:$0xff] }
 0x136   :  { %v7889_v54 = vpop.eup %7888 }
 0x137   :  { %v141_v55 = vmul.f32 %v7889_v54, %v138_v53  ;;  %v8337_v53 = vld [vmem:[#allocation6 + $0x1a0] sm:$0xff]  ;;  %v480_v54 = vsel %vm477_vm3, %v471_v47, %v472_v4 }
 0x138   :  { %v487_v61 = vmul.f32 %v8337_v53, %v480_v54  ;;  %v7700_v4 = vld [vmem:[#allocation4 + $0x44] ss:$24 sps:$4 sm:$0xff]  }
 0x139   :  { %v142_v56 = vpack.c.bf16 %v141_v55, %v141_v55  ;;  %v481_v55 = vsel %vm477_vm3, %v474_v3, %v471_v47  ;;  %v7557_v3 = vunpack.i.h.bf16 %v8304_v2  ;;  %v572_v2 = vsel %vm570_vm6, %v7701_v12, 0 }
 0x13a   :  { %v486_v60 = vmul.f32 %v8335_v52, %v481_v55  ;;  %v541_v9 = vsel %vm539_vm4, %v487_v61, %v7547_v58 }
 0x13b   :  { %6853 = vmatmul.mubr.bf16.vlgmr.msra.gmra.mrb[0].mxu1 %v142_v56  ;;  %v7692_v56 = vld [vmem:[#allocation4 + $0x38] ss:$24 sps:$4 sm:$0xff]   ;;  %v546_v11 = vsel %vm544_vm5, %v541_v9, %v7557_v3 }
 0x13c   :  { %6870 = vmatprep.mubr.msk.f32.mxu1 %vm8144_vm0, %v8143_v0  ;;  %v540_v8 = vsel %vm539_vm4, %v486_v60, %v7546_v59  ;;  %7349 = vmatpush3.bf16.msra.mxu1 %v8357_v21 }
 0x13d   :  { %v545_v10 = vsel %vm544_vm5, %v540_v8, %v7556_v5  ;;  %7350 = vmatprep.subr.bf16.mxu1 %v8146_v22 }
 0x13e   :  { %v549_v16 = vpack.c.bf16 %v546_v11, %v545_v10 }
 0x140   :  { %7352 = vmatpush3.bf16.msra.mxu1 %v8362_v30 }
 0x141   :  { %7353 = vmatprep.subr.bf16.mxu1 %v8146_v22 }
 0x20e   :  { %v246_v33 = vpop.f32.mrb[0].mxu1 }
 0x20f   :  { %v8329_v34 = vadd.f32 %v6220_v32, %v246_v33  ;;  %v6854_v35 = vpop.f32.mrb[1].mxu1  ;;  %v8369_v33 = vsub.s32 1, %v8263_v19 }
 0x210   :  { %v249_v36 = vpop.f32.mrb[2].mxu1 }
 0x211   :  { %v252_v37 = vmin.f32 %v8329_v34, 20.0  ;;  %v6855_v38 = vpop.f32.mrb[3].mxu1 }
 0x213   :  { %v253_v39 = vmul.f32 1.442695, %v252_v37 }
 0x215   :  { %7890 = vpow2.f32 %v253_v39 }
 0x21f   :  { %v7891_v40 = vpop.eup %7890 }
 0x220   :  { %v255_v41 = vadd.f32 1.0, %v7891_v40  ;;  %v6311_v40 = vld [vmem:[#allocation6 + $0xc0] ss:$0 sm:$0xff] }
 0x222   :  { %v256_v42 = vmul.f32 %v255_v41, %v255_v41  ;;  %v6344_v41 = vld [vmem:[#allocation6 + $0x100] ss:$0 sm:$0xff] }
 0x224   :  { %v259_v43 = vadd.f32 1.0, %v256_v42  ;;  %v6229_v44 = vadd.f32 -1.0, %v256_v42 }
 0x226   :  { %7892 = vrcp.f32 %v259_v43  ;;  %v258_v45 = vmul.f32 %v6229_v44, %v8329_v34 }
 0x230   :  { %v7893_v46 = vpop.eup %7892 }
 0x231   :  { %v261_v48 = vmul.f32 %v7893_v46, %v258_v45 }
 0x233   :  { %v262_v50 = vpack.c.bf16 %v261_v48, %v261_v48 }
 0x235   :  { %6242 = vmatmul.mubr.msk.bf16.vlgmr.msra.gmra.mrb[4].mxu0 %vm88_vm1, %v262_v50 }
 0x236   :  { %380 = vmatpush1.bf16.msra.mxu0 %v7689_v49  ;;  %411 = vmatprep.mubr.bf16.mxu0 %v8145_v62 }
 0x237   :  { %381 = vmatprep.subr.bf16.mxu0 %v7694_v51  ;;  %v6444_v51 = vld [vmem:[#allocation6 + $0x180] ss:$0 sm:$0xff] }
 0x23a   :  { %382 = vmatpush1.bf16.msra.mxu0 %v7692_v56 }
 0x23b   :  { %420 = vmatprep.subr.bf16.mxu0 %v7697_v57 }
 0x23d   :  { %6243 = vmatmul.mubr.msk.bf16.vlgmr.msra.gmra.mrb[8].mxu0 %vm88_vm1, %v262_v50 }
 0x23e   :  { %421 = vmatpush1.bf16.msra.mxu0 %v7695_v1  ;;  %452 = vmatprep.mubr.bf16.mxu0 %v8145_v62  ;;  %v6246_v1 = vld [vmem:[#allocation6 + $0x10] ss:$0 sm:$0xff] }
 0x23f   :  { %422 = vmatprep.subr.bf16.mxu0 %v7700_v4 }
 0x242   :  { %423 = vmatpush1.bf16.msra.mxu0 %v7698_v63 }
 0x243   :  { %7527 = vmatprep.subr.msk.bf16.mxu0 %vm570_vm6, %v7701_v12 }
 0x245   :  { %6244 = vmatmul.mubr.msk.bf16.vlgmr.msra.gmra.mrb[12].mxu0 %vm88_vm1, %v262_v50  ;;  %v6394_v50 = vld [vmem:[#allocation6 + $0x140] ss:$0 sm:$0xff] }
 0x246   :  { %6857 = vmatpush3.bf16.msra.mxu0 %v572_v2  ;;  %6858 = vmatprep.mubr.msk.bf16.mxu0 %vm563_vm7, %v549_v16 }
 0x24d   :  { %6859 = vmatmul.mubr.msk.bf16.vlgmr.msra.gmra.mrb[16].mxu0 %vm563_vm7, %v550_v31  ;;  %v6272_v31 = vld [vmem:[#allocation6 + $0x80] ss:$0 sm:$0xff] }
 0x308   :  { %v8366_v32 = vpop.f32.mrb[4].mxu0 }
 0x309   :  { %v374_v35 = vpop.f32.mrb[5].mxu0 }
 0x30a   :  { %v8371_v36 = vadd.f32 %v6272_v31, %v374_v35  ;;  %v376_v37 = vpop.f32.mrb[6].mxu0 }
 0x30b   :  { %v377_v38 = vpop.f32.mrb[7].mxu0 }
 0x30c   :  { %v8375_v39 = vrot.slane %v8371_v36, %v8369_v33 }
 0x310   :  { %v413_v42 = vpop.f32.mrb[8].mxu0 }
 0x311   :  { %v8377_v43 = vadd.f32 %v6311_v40, %v413_v42  ;;  %v415_v44 = vpop.f32.mrb[9].mxu0 }
 0x312   :  { %v8379_v45 = vadd.f32 %v6344_v41, %v415_v44  ;;  %v417_v46 = vpop.f32.mrb[10].mxu0 }
 0x313   :  { %v2660_v47 = vrot.slane %v8377_v43, %v8369_v33  ;;  %v418_v48 = vpop.f32.mrb[11].mxu0 }
 0x314   :  { %v3428_v49 = vrot.slane %v8379_v45, %v8369_v33 }
 0x318   :  { %v454_v54 = vpop.f32.mrb[12].mxu0 }
 0x319   :  { %v8385_v55 = vadd.f32 %v6394_v50, %v454_v54  ;;  %v456_v56 = vpop.f32.mrb[13].mxu0 }
 0x31a   :  { %v8387_v57 = vadd.f32 %v6444_v51, %v456_v56  ;;  %v458_v58 = vpop.f32.mrb[14].mxu0 }
 0x31b   :  { %v4381_v59 = vrot.slane %v8385_v55, %v8369_v33  ;;  %v459_v60 = vpop.f32.mrb[15].mxu0 }
 0x31c   :  { %v5399_v61 = vrot.slane %v8387_v57, %v8369_v33 }
 0x320   :  { %v6860_v4 = vpop.f32.mrb[16].mxu0 }
 0x321   :  { %v8393_v3 = vadd.f32 %v6860_v4, %v6246_v1  ;;  %v608_v5 = vpop.f32.mrb[17].mxu0 }
 0x322   :  { %v8395_v8 = vadd.f32 %v6246_v1, %v608_v5  ;;  %v6861_v9 = vpop.f32.mrb[18].mxu0 }
 0x323   :  { %v654_v63 = vmul.f32 %v8393_v3, %v8393_v3  ;;  %v8399_v10 = vadd.f32 %v6861_v9, %v6246_v1  ;;  %v611_v11 = vpop.f32.mrb[19].mxu0  ;;  %v645_v2 = vsel %vm88_vm1, %v8393_v3, 0.0 }
 0x324   :  { %v634_v12 = vmul.f32 %v8395_v8, %v8395_v8  ;;  %v8403_v16 = vadd.f32 %v6246_v1, %v611_v11  ;;  %v625_v25 = vsel %vm88_vm1, %v8395_v8, 0.0 }
 0x325   :  { %v646_v17 = vsel %vm88_vm1, %v8399_v10, 0.0  ;;  %v655_v20 = vmul.f32 %v8399_v10, %v8399_v10  ;;  %v656_v37 = vsel %vm88_vm1, %v654_v63, 0.0 }
 0x326   :  { %v647_v27 = vadd.f32 %v646_v17, %v645_v2  ;;  %v626_v31 = vsel %vm88_vm1, %v8403_v16, 0.0  ;;  %v635_v35 = vmul.f32 %v8403_v16, %v8403_v16  ;;  %v636_v41 = vsel %vm88_vm1, %v634_v12, 0.0 }
 0x327   :  { %v657_v38 = vsel %vm88_vm1, %v655_v20, 0.0  ;;  %v627_v40 = vadd.f32 %v626_v31, %v625_v25 }
 0x328   :  { %v648_v42 = vrot.slane %v647_v27, 4  ;;  %v658_v44 = vadd.f32 %v657_v38, %v656_v37  ;;  %v637_v46 = vsel %vm88_vm1, %v635_v35, 0.0 }
 0x329   :  { %v628_v48 = vrot.slane %v627_v40, 4  ;;  %v638_v50 = vadd.f32 %v637_v46, %v636_v41  ;;  %v7702_v46 = vld [vmem:[#allocation2 + $0x58] sm:$0xff]  }
 0x32a   :  { %v649_v51 = vadd.f32 %v648_v42, %v647_v27  ;;  %v659_v54 = vrot.slane %v658_v44, 4  ;;  %6873 = vmatprep.subr.bf16.mxu0 %v7702_v46 }
 0x32b   :  { %v629_v56 = vadd.f32 %v628_v48, %v627_v40  ;;  %v639_v58 = vrot.slane %v638_v50, 4  ;;  %v7703_v48 = vld [vmem:[#allocation2 + $0x60] sm:$0xff]   ;;  %6874 = vmatpush3.bf16.msra.mxu0 %v7702_v46 }
 0x32c   :  { %v650_v60 = vrot.slane %v649_v51, 2  ;;  %v660_v1 = vadd.f32 %v659_v54, %v658_v44  ;;  %6875 = vmatprep.subr.bf16.mxu0 %v7703_v48 }
 0x32d   :  { %v630_v4 = vrot.slane %v629_v56, 2  ;;  %v640_v5 = vadd.f32 %v639_v58, %v638_v50  ;;  %v7704_v50 = vld [vmem:[#allocation2 + $0x68] sm:$0xff]  }
 0x32e   :  { %v651_v9 = vadd.f32 %v650_v60, %v649_v51  ;;  %v661_v63 = vrot.slane %v660_v1, 2 }
 0x32f   :  { %v631_v11 = vadd.f32 %v630_v4, %v629_v56  ;;  %v641_v2 = vrot.slane %v640_v5, 2  ;;  %6876 = vmatpush3.bf16.msra.mxu0 %v7703_v48 }
 0x330   :  { %v662_v17 = vadd.f32 %v661_v63, %v660_v1  ;;  %v652_v25 = vrot.slane %v651_v9, 1  ;;  %6877 = vmatprep.subr.bf16.mxu0 %v7704_v50 }
 0x331   :  { %v632_v12 = vrot.slane %v631_v11, 1  ;;  %v642_v20 = vadd.f32 %v641_v2, %v640_v5  ;;  %v8431_v2 = vsub.s32 0, %v8263_v19  ;;  %v3796_v19 = vld [vmem:[#allocation6 + $0x218] sm:$0xff] }
 0x332   :  { %v663_v35 = vrot.slane %v662_v17, 1  ;;  %v653_v38 = vadd.f32 %v652_v25, %v651_v9  ;;  %v623_v9 = vld [vmem:[#allocation6 + $0x18] sm:$0x1] }
 0x333   :  { %v643_v31 = vrot.slane %v642_v20, 1  ;;  %v633_v37 = vadd.f32 %v632_v12, %v631_v11  ;;  %6878 = vmatpush3.bf16.msra.mxu0 %v7704_v50 }
 0x334   :  { %v664_v40 = vadd.f32 %v663_v35, %v662_v17 }
 0x335   :  { %v644_v27 = vadd.f32 %v643_v31, %v642_v20  ;;  %v624_v20 = vld [vmem:[#allocation6 + $0x20] sm:$0x1] }
 0x337   :  { %v666_v41 = vsel %vm665_vm8, %v633_v37, %v644_v27 }
 0x338   :  { %v668_v42 = vsel %vm667_vm9, %v666_v41, %v653_v38 }
 0x339   :  { %v670_v44 = vsel %vm669_vm10, %v668_v42, %v664_v40 }
 0x33a   :  { %6871 = vmatmul.mubr.msk.f32.vlgmr.msra.gmra.mrb[4].mxu1 %vm88_vm1, %v670_v44 }
 0x33b   :  { %7355 = vmatpush3.bf16.msra.mxu1 %v8357_v21  ;;  %6897 = vmatprep.mubr.msk.f32.mxu1 %vm8144_vm0, %v8143_v0 }
 0x33c   :  { %7356 = vmatprep.subr.bf16.mxu1 %v8146_v22 }
 0x33f   :  { %7358 = vmatpush3.bf16.msra.mxu1 %v8362_v30 }
 0x40d   :  { %v744_v51 = vpop.f32.mrb[4].mxu1 }
 0x40e   :  { %v748_v54 = vmul.f32 %v744_v51, %v744_v51  ;;  %v6872_v56 = vpop.f32.mrb[5].mxu1 }
 0x410   :  { %v750_v58 = vrot.slane %v748_v54, 7 }
 0x412   :  { %v752_v60 = vsub.f32 %v744_v51, %v750_v58 }
 0x414   :  { %v753_v1 = vmax.f32 %v752_v60, 0.0 }
 0x416   :  { %v754_v4 = vadd.f32 1e-05, %v753_v1 }
 0x418   :  { %7894 = vrsqrt.f32 %v754_v4 }
 0x422   :  { %v7895_v5 = vpop.eup %7894 }
 0x423   :  { %v757_v63 = vrot.slane %v7895_v5, 1  ;;  %v800_v11 = vrot.slane %v7895_v5, 3 }
 0x425   :  { %v759_v17 = vmul.f32 %v757_v63, %v623_v9  ;;  %v802_v12 = vmul.f32 %v800_v11, %v623_v9 }
 0x427   :  { %v760_v25 = vmul.f32 %v759_v17, %v744_v51  ;;  %v765_v31 = vrot.slane %v759_v17, %v8431_v2  ;;  %v804_v35 = vrot.slane %v802_v12, 6  ;;  %v814_v38 = vrot.slane %v802_v12, %v8431_v2 }
 0x429   :  { %v761_v37 = vsub.f32 %v624_v20, %v760_v25  ;;  %v806_v27 = vmul.f32 %v804_v35, %v744_v51  ;;  %v766_v40 = vmul.f32 %v765_v31, %v8395_v8  ;;  %v767_v41 = vmul.f32 %v765_v31, %v8403_v16 }
 0x42a   :  { %v815_v54 = vmul.f32 %v814_v38, %v8393_v3  ;;  %v816_v60 = vmul.f32 %v814_v38, %v8399_v10 }
 0x42b   :  { %v771_v42 = vrot.slane %v761_v37, %v8431_v2  ;;  %v808_v44 = vrot.slane %v806_v27, 2 }
 0x42d   :  { %v772_v46 = vadd.f32 %v771_v42, %v766_v40  ;;  %v773_v48 = vadd.f32 %v771_v42, %v767_v41  ;;  %v810_v50 = vsub.f32 %v624_v20, %v808_v44 }
 0x42f   :  { %v774_v56 = vmin.f32 %v772_v46, 20.0  ;;  %v775_v58 = vmin.f32 %v773_v48, 20.0  ;;  %v820_v51 = vrot.slane %v810_v50, %v8431_v2 }
 0x431   :  { %v776_v1 = vmul.f32 1.442695, %v774_v56  ;;  %v778_v4 = vmul.f32 1.442695, %v775_v58  ;;  %v821_v5 = vadd.f32 %v820_v51, %v815_v54  ;;  %v822_v8 = vadd.f32 %v820_v51, %v816_v60  ;;  %v6245_v54 = vld [vmem:[#allocation6 + $0x40] ss:$0 sm:$0xff] }
 0x432   :  { %v7705_v60 = vld [vmem:[#allocation2 + $0x70] sm:$0xff]   ;;  %v470_v51 = vadd.f32 %v6245_v54, %v8366_v32 }
 0x433   :  { %7896 = vpow2.f32 %v776_v1  ;;  %v823_v16 = vmin.f32 %v821_v5, 20.0  ;;  %v824_v9 = vmin.f32 %v822_v8, 20.0  ;;  %6879 = vmatprep.subr.bf16.mxu0 %v7705_v60 }
 0x434   :  { %7898 = vpow2.f32 %v778_v4  ;;  %6880 = vmatpush3.bf16.msra.mxu0 %v7705_v60 }
 0x435   :  { %v825_v63 = vmul.f32 1.442695, %v823_v16  ;;  %v827_v11 = vmul.f32 1.442695, %v824_v9 }
 0x437   :  { %7900 = vpow2.f32 %v825_v63 }
 0x438   :  { %7902 = vpow2.f32 %v827_v11 }
 0x43d   :  { %v7897_v17 = vpop.eup %7896 }
 0x43e   :  { %v7899_v3 = vpop.eup %7898  ;;  %v780_v12 = vadd.f32 1.0, %v7897_v17  ;;  %v797_v17 = vrot.slane %v470_v51, %v8431_v2 }
 0x43f   :  { %v781_v20 = vadd.f32 1.0, %v7899_v3 }
 0x440   :  { %v782_v25 = vmul.f32 %v780_v12, %v780_v12  ;;  %v7706_v12 = vld [vmem:[#allocation2 + $0x78] sm:$0xff]  }
 0x441   :  { %v7901_v10 = vpop.eup %7900  ;;  %v783_v31 = vmul.f32 %v781_v20, %v781_v20  ;;  %6881 = vmatprep.subr.bf16.mxu0 %v7706_v12 }
 0x442   :  { %v7903_v35 = vpop.eup %7902  ;;  %v788_v37 = vadd.f32 1.0, %v782_v25  ;;  %v829_v27 = vadd.f32 1.0, %v7901_v10  ;;  %v6251_v56 = vadd.f32 -1.0, %v782_v25  ;;  %6882 = vmatpush3.bf16.msra.mxu0 %v7706_v12 }
 0x443   :  { %v789_v38 = vadd.f32 1.0, %v783_v31  ;;  %v830_v40 = vadd.f32 1.0, %v7903_v35  ;;  %v6252_v58 = vadd.f32 -1.0, %v783_v31 }
 0x444   :  { %7904 = vrcp.f32 %v788_v37  ;;  %v831_v41 = vmul.f32 %v829_v27, %v829_v27  ;;  %v786_v1 = vmul.f32 %v6251_v56, %v772_v46  ;;  %v846_v46 = vrot.slane %v470_v51, %v8369_v33 }
 0x445   :  { %7906 = vrcp.f32 %v789_v38  ;;  %v832_v42 = vmul.f32 %v830_v40, %v830_v40  ;;  %v787_v9 = vmul.f32 %v6252_v58, %v773_v48  ;;  %v7707_v40 = vld [vmem:[#allocation2 + $0x80] sm:$0xff]  }
 0x446   :  { %v837_v44 = vadd.f32 1.0, %v831_v41  ;;  %v6253_v4 = vadd.f32 -1.0, %v831_v41  ;;  %6883 = vmatprep.subr.bf16.mxu0 %v7707_v40 }
 0x447   :  { %v838_v50 = vadd.f32 1.0, %v832_v42  ;;  %v6254_v63 = vadd.f32 -1.0, %v832_v42  ;;  %6884 = vmatpush3.bf16.msra.mxu0 %v7707_v40 }
 0x448   :  { %7908 = vrcp.f32 %v837_v44  ;;  %v835_v25 = vmul.f32 %v6253_v4, %v821_v5  ;;  %7359 = vmatprep.subr.bf16.mxu0 %v8146_v22 }
 0x449   :  { %7910 = vrcp.f32 %v838_v50  ;;  %v836_v37 = vmul.f32 %v6254_v63, %v822_v8 }
 0x44e   :  { %v7905_v16 = vpop.eup %7904 }
 0x44f   :  { %v7907_v11 = vpop.eup %7906  ;;  %v792_v3 = vmul.f32 %v7905_v16, %v786_v1 }
 0x450   :  { %v793_v20 = vmul.f32 %v7907_v11, %v787_v9 }
 0x451   :  { %v798_v10 = vadd.f32 %v797_v17, %v792_v3 }
 0x452   :  { %v7909_v31 = vpop.eup %7908  ;;  %v799_v35 = vadd.f32 %v797_v17, %v793_v20 }
 0x453   :  { %v7911_v32 = vpop.eup %7910  ;;  %v849_v27 = vrot.slane %v798_v10, 7  ;;  %v841_v38 = vmul.f32 %v7909_v31, %v835_v25  ;;  %v861_v48 = vrot.slane %v798_v10, 1 }
 0x454   :  { %v850_v41 = vrot.slane %v799_v35, 7  ;;  %v7563_v42 = vpack.i.bf16 %v799_v35, %v798_v10  ;;  %v842_v44 = vmul.f32 %v7911_v32, %v836_v37  ;;  %v862_v50 = vrot.slane %v799_v35, 1 }
 0x455   :  { %v847_v54 = vadd.f32 %v846_v46, %v841_v38 }
 0x456   :  { %7564 = vrot.lane.b32.xlu0 %v7563_v42, %s8147_s0  ;;  %v848_v5 = vadd.f32 %v846_v46, %v842_v44  ;;  %v867_v8 = vsel %vm494_vm2, %v861_v48, %v862_v50  ;;  %v855_v56 = vsel %vm477_vm3, %v849_v27, %v850_v41 }
 0x457   :  { %v851_v58 = vrot.slane %v847_v54, 7  ;;  %v863_v60 = vrot.slane %v847_v54, 1  ;;  %v869_v9 = vmul.f32 %v867_v8, %v8268_v23 }
 0x458   :  { %v852_v51 = vrot.slane %v848_v5, 7  ;;  %v7568_v1 = vpack.i.bf16 %v848_v5, %v847_v54  ;;  %v864_v4 = vrot.slane %v848_v5, 1 }
 0x459   :  { %v866_v16 = vsel %vm494_vm2, %v862_v50, %v863_v60  ;;  %v854_v63 = vsel %vm477_vm3, %v850_v41, %v851_v58 }
 0x45a   :  { %7569 = vrot.lane.b32.xlu1 %v7568_v1, %s8147_s0  ;;  %v865_v11 = vsel %vm494_vm2, %v863_v60, %v864_v4  ;;  %v868_v17 = vsel %vm494_vm2, %v864_v4, %v861_v48  ;;  %v870_v3 = vmul.f32 %v866_v16, %v8270_v24  ;;  %v856_v12 = vsel %vm477_vm3, %v852_v51, %v849_v27  ;;  %v1234_v1 = vld [vmem:[#allocation2 + $0x88] sm:$0x3] }
 0x45b   :  { %v871_v20 = vmul.f32 %v865_v11, %v8278_v28  ;;  %v872_v23 = vmul.f32 %v868_v17, %v8280_v29  ;;  %v853_v10 = vsel %vm477_vm3, %v851_v58, %v852_v51  ;;  %v857_v27 = vmul.f32 %v856_v12, %v8335_v52  ;;  %7528 = vmatprep.subr.msk.bf16.mxu1 %vm667_vm9, %v1234_v1  ;;  %v6255_v4 = vld [vmem:[#allocation6 + $0x28] ss:$0 sm:$0xff] }
 0x45c   :  { %v7573_v25 = vpack.i.bf16 %v870_v3, %v869_v9  ;;  %v858_v28 = vmul.f32 %v855_v56, %v8337_v53  ;;  %v859_v48 = vmul.f32 %v854_v63, %v8311_v6  ;;  %v860_v40 = vmul.f32 %v853_v10, %v8313_v7 }
 0x45d   :  { %v7578_v31 = vpack.i.bf16 %v872_v23, %v871_v20 }
 0x45e   :  { %7574 = vrot.lane.b32.xlu0 %v7573_v25, %s8138_s4 }
 0x45f   :  { %7579 = vrot.lane.b32.xlu1 %v7578_v31, %s8138_s4 }
 0x4c8   :  { %v7565_v35 = vpop.permute.xlu0 %7564 }
 0x4c9   :  { %v7567_v32 = vunpack.i.h.bf16 %v7565_v35  ;;  %v7566_v24 = vunpack.i.l.bf16 %v7565_v35 }
 0x4cb   :  { %v905_v50 = vsel %vm88_vm1, %v857_v27, %v7566_v24  ;;  %v906_v54 = vsel %vm88_vm1, %v858_v28, %v7567_v32 }
 0x4cc   :  { %v7570_v37 = vpop.permute.xlu1 %7569 }
 0x4cd   :  { %v7572_v46 = vunpack.i.h.bf16 %v7570_v37  ;;  %v7571_v38 = vunpack.i.l.bf16 %v7570_v37 }
 0x4cf   :  { %v907_v52 = vsel %vm88_vm1, %v859_v48, %v7571_v38  ;;  %v908_v53 = vsel %vm88_vm1, %v860_v40, %v7572_v46 }
 0x4d0   :  { %v7575_v29 = vpop.permute.xlu0 %7574 }
 0x4d1   :  { %v7580_v41 = vpop.permute.xlu1 %7579  ;;  %v7577_v42 = vunpack.i.h.bf16 %v7575_v29  ;;  %v7576_v44 = vunpack.i.l.bf16 %v7575_v29 }
 0x4d2   :  { %v7582_v5 = vunpack.i.h.bf16 %v7580_v41  ;;  %v7581_v8 = vunpack.i.l.bf16 %v7580_v41 }
 0x4d3   :  { %v910_v56 = vsel %vm909_vm11, %v905_v50, %v7576_v44  ;;  %v911_v58 = vsel %vm909_vm11, %v906_v54, %v7577_v42 }
 0x4d4   :  { %v913_v6 = vsel %vm909_vm11, %v908_v53, %v7582_v5  ;;  %v912_v7 = vsel %vm909_vm11, %v907_v52, %v7581_v8  ;;  %v914_v60 = vpack.c.bf16 %v911_v58, %v910_v56 }
 0x4d5   :  { %v915_v51 = vpack.c.bf16 %v913_v6, %v912_v7 }
 0x4d6   :  { %6885 = vmatprep.mubr.msk.bf16.mxu0 %vm969_vm12, %v914_v60 }
 0x4d7   :  { %6886 = vmatmul.mubr.msk.bf16.vlgmr.msra.gmra.mrb[20].mxu0 %vm969_vm12, %v915_v51 }
 0x4d8   :  { %7361 = vmatpush3.bf16.msra.mxu0 %v8357_v21  ;;  %6930 = vmatprep.mubr.msk.f32.mxu0 %vm8144_vm0, %v8143_v0 }
 0x4d9   :  { %7362 = vmatprep.subr.bf16.mxu0 %v8146_v22 }
 0x4dc   :  { %7364 = vmatpush3.bf16.msra.mxu0 %v8362_v30 }
 0x5aa   :  { %v6887_v16 = vpop.f32.mrb[20].mxu0 }
 0x5ab   :  { %v8489_v9 = vadd.f32 %v6887_v16, %v6255_v4  ;;  %v1010_v63 = vpop.f32.mrb[21].mxu0 }
 0x5ac   :  { %v8491_v11 = vadd.f32 %v6255_v4, %v1010_v63  ;;  %v6888_v17 = vpop.f32.mrb[22].mxu0 }
 0x5ad   :  { %v1056_v3 = vmul.f32 %v8489_v9, %v8489_v9  ;;  %v8495_v12 = vadd.f32 %v6888_v17, %v6255_v4  ;;  %v1013_v20 = vpop.f32.mrb[23].mxu0  ;;  %v1047_v25 = vsel %vm88_vm1, %v8489_v9, 0.0 }
 0x5ae   :  { %v1036_v23 = vmul.f32 %v8491_v11, %v8491_v11  ;;  %v8499_v10 = vadd.f32 %v6255_v4, %v1013_v20  ;;  %v1027_v37 = vsel %vm88_vm1, %v8491_v11, 0.0 }
 0x5af   :  { %v1048_v31 = vsel %vm88_vm1, %v8495_v12, 0.0  ;;  %v1057_v35 = vmul.f32 %v8495_v12, %v8495_v12  ;;  %v1058_v38 = vsel %vm88_vm1, %v1056_v3, 0.0 }
 0x5b0   :  { %v1049_v32 = vadd.f32 %v1048_v31, %v1047_v25  ;;  %v1028_v24 = vsel %vm88_vm1, %v8499_v10, 0.0  ;;  %v1037_v46 = vmul.f32 %v8499_v10, %v8499_v10  ;;  %v1038_v29 = vsel %vm88_vm1, %v1036_v23, 0.0 }
 0x5b1   :  { %v1059_v27 = vsel %vm88_vm1, %v1057_v35, 0.0  ;;  %v1029_v28 = vadd.f32 %v1028_v24, %v1027_v37 }
 0x5b2   :  { %v1050_v48 = vrot.slane %v1049_v32, 4  ;;  %v1060_v40 = vadd.f32 %v1059_v27, %v1058_v38  ;;  %v1039_v41 = vsel %vm88_vm1, %v1037_v46, 0.0  ;;  %v1247_v46 = vsel %vm667_vm9, %v1234_v1, 0  ;;  %v7708_v27 = vld [vmem:[#allocation2 + $0x90] sm:$0xff]  }
 0x5b3   :  { %v1030_v42 = vrot.slane %v1029_v28, 4  ;;  %v1040_v44 = vadd.f32 %v1039_v41, %v1038_v29 }
 0x5b4   :  { %v1051_v50 = vadd.f32 %v1050_v48, %v1049_v32  ;;  %v1061_v54 = vrot.slane %v1060_v40, 4  ;;  %v1232_v32 = vpack.c.bf16 %v8249_v14, %v8244_v13  ;;  %v7710_v13 = vld [vmem:[#allocation2 + $0xa0] sm:$0xff]  }
 0x5b5   :  { %v1031_v5 = vadd.f32 %v1030_v42, %v1029_v28  ;;  %v1041_v8 = vrot.slane %v1040_v44, 4  ;;  %v7709_v28 = vld [vmem:[#allocation2 + $0x98] sm:$0xff]  }
 0x5b6   :  { %v1052_v52 = vrot.slane %v1051_v50, 2  ;;  %v1062_v53 = vadd.f32 %v1061_v54, %v1060_v40  ;;  %v1025_v54 = vld [vmem:[#allocation6 + $0x30] sm:$0x1] }
 0x5b7   :  { %v1032_v56 = vrot.slane %v1031_v5, 2  ;;  %v1042_v58 = vadd.f32 %v1041_v8, %v1040_v44 }
 0x5b8   :  { %v1053_v6 = vadd.f32 %v1052_v52, %v1051_v50  ;;  %v1063_v7 = vrot.slane %v1062_v53, 2 }
 0x5b9   :  { %v1033_v60 = vadd.f32 %v1032_v56, %v1031_v5  ;;  %v1043_v51 = vrot.slane %v1042_v58, 2  ;;  %v1026_v56 = vld [vmem:[#allocation6 + $0x38] sm:$0x1] }
 0x5ba   :  { %v1064_v4 = vadd.f32 %v1063_v7, %v1062_v53  ;;  %v1054_v17 = vrot.slane %v1053_v6, 1 }
 0x5bb   :  { %v1034_v16 = vrot.slane %v1033_v60, 1  ;;  %v1044_v63 = vadd.f32 %v1043_v51, %v1042_v58 }
 0x5bc   :  { %v1065_v20 = vrot.slane %v1064_v4, 1  ;;  %v1055_v31 = vadd.f32 %v1054_v17, %v1053_v6 }
 0x5bd   :  { %v1045_v3 = vrot.slane %v1044_v63, 1  ;;  %v1035_v23 = vadd.f32 %v1034_v16, %v1033_v60 }
 0x5be   :  { %v1066_v35 = vadd.f32 %v1065_v20, %v1064_v4 }
 0x5bf   :  { %v1046_v25 = vadd.f32 %v1045_v3, %v1044_v63 }
 0x5c1   :  { %v1067_v37 = vsel %vm665_vm8, %v1035_v23, %v1046_v25 }
 0x5c2   :  { %v1068_v24 = vsel %vm667_vm9, %v1067_v37, %v1055_v31 }
 0x5c3   :  { %v1069_v38 = vsel %vm669_vm10, %v1068_v24, %v1066_v35 }
 0x5c4   :  { %6898 = vmatmul.mubr.msk.f32.vlgmr.msra.gmra.mrb[6].mxu1 %vm88_vm1, %v1069_v38 }
 0x5c5   :  { %6901 = vmatpush3.bf16.msra.mxu1 %v1247_v46  ;;  %6902 = vmatprep.mubr.msk.bf16.mxu1 %vm539_vm4, %v1232_v32 }
 0x5c6   :  { %6906 = vmatprep.subr.bf16.mxu1 %v7708_v27 }
 0x5c8   :  { %6903 = vmatmul.mubr.msk.bf16.vlgmr.msra.gmra.mrb[8].mxu1 %vm539_vm4, %v1233_v26 }
 0x5c9   :  { %6907 = vmatpush3.bf16.msra.mxu1 %v7708_v27 }
 0x5ca   :  { %6908 = vmatprep.subr.bf16.mxu1 %v7709_v28 }
 0x5cd   :  { %6909 = vmatpush3.bf16.msra.mxu1 %v7709_v28 }
 0x5ce   :  { %6910 = vmatprep.subr.bf16.mxu1 %v7710_v13 }
 0x5d1   :  { %6911 = vmatpush3.bf16.msra.mxu1 %v7710_v13 }
 0x697   :  { %v1139_v14 = vpop.f32.mrb[6].mxu1 }
 0x698   :  { %v1143_v1 = vmul.f32 %v1139_v14, %v1139_v14  ;;  %v6899_v29 = vpop.f32.mrb[7].mxu1 }
 0x69a   :  { %v1145_v48 = vrot.slane %v1143_v1, 7 }
 0x69b   :  { %v8529_v40 = vpop.f32.mrb[8].mxu1 }
 0x69c   :  { %v1147_v41 = vsub.f32 %v1139_v14, %v1145_v48  ;;  %v8531_v42 = vpop.f32.mrb[9].mxu1 }
 0x69d   :  { %v8533_v15 = vpop.f32.mrb[10].mxu1 }
 0x69e   :  { %v1148_v18 = vmax.f32 %v1147_v41, 0.0  ;;  %v8535_v26 = vpop.f32.mrb[11].mxu1 }
 0x6a0   :  { %v1149_v44 = vadd.f32 1e-05, %v1148_v18 }
 0x6a2   :  { %7912 = vrsqrt.f32 %v1149_v44 }
 0x6ac   :  { %v7913_v50 = vpop.eup %7912 }
 0x6ad   :  { %v1152_v5 = vrot.slane %v7913_v50, 1  ;;  %v1189_v8 = vrot.slane %v7913_v50, 3 }
 0x6af   :  { %v1154_v52 = vmul.f32 %v1152_v5, %v1025_v54  ;;  %v1191_v53 = vmul.f32 %v1189_v8, %v1025_v54 }
 0x6b1   :  { %v1155_v58 = vmul.f32 %v1154_v52, %v1139_v14  ;;  %v1160_v6 = vrot.slane %v1154_v52, %v8431_v2  ;;  %v1193_v7 = vrot.slane %v1191_v53, 6  ;;  %v1203_v4 = vrot.slane %v1191_v53, %v8431_v2 }
 0x6b3   :  { %v1156_v60 = vsub.f32 %v1026_v56, %v1155_v58  ;;  %v1195_v51 = vmul.f32 %v1193_v7, %v1139_v14  ;;  %v1161_v17 = vmul.f32 %v1160_v6, %v8491_v11  ;;  %v1162_v3 = vmul.f32 %v1160_v6, %v8499_v10  ;;  %v6269_v7 = vld [vmem:[#allocation6 + $0x48] ss:$0 sm:$0xff] }
 0x6b4   :  { %v1204_v31 = vmul.f32 %v1203_v4, %v8489_v9  ;;  %v1205_v32 = vmul.f32 %v1203_v4, %v8495_v12 }
 0x6b5   :  { %v1166_v16 = vrot.slane %v1156_v60, %v8431_v2  ;;  %v1197_v63 = vrot.slane %v1195_v51, 2  ;;  %v7711_v51 = vld [vmem:[#allocation2 + $0xa8] sm:$0xff]  }
 0x6b6   :  { %6912 = vmatprep.subr.bf16.mxu1 %v7711_v51 }
 0x6b7   :  { %v1199_v20 = vsub.f32 %v1026_v56, %v1197_v63  ;;  %v1167_v23 = vadd.f32 %v1166_v16, %v1161_v17  ;;  %v1168_v25 = vadd.f32 %v1166_v16, %v1162_v3  ;;  %v1284_v63 = vadd.f32 %v6269_v7, %v8531_v42  ;;  %6913 = vmatpush3.bf16.msra.mxu1 %v7711_v51 }
 0x6b9   :  { %v1209_v35 = vrot.slane %v1199_v20, %v8431_v2  ;;  %v1169_v37 = vmin.f32 %v1167_v23, 20.0  ;;  %v1170_v24 = vmin.f32 %v1168_v25, 20.0 }
 0x6bb   :  { %v1210_v46 = vadd.f32 %v1209_v35, %v1204_v31  ;;  %v1171_v38 = vmul.f32 1.442695, %v1169_v37  ;;  %v1211_v27 = vadd.f32 %v1209_v35, %v1205_v32  ;;  %v1173_v28 = vmul.f32 1.442695, %v1170_v24  ;;  %v7712_v32 = vld [vmem:[#allocation2 + $0xb0] sm:$0xff]  }
 0x6bc   :  { %v1287_v31 = vadd.f32 %v6269_v7, %v8535_v26  ;;  %6914 = vmatprep.subr.bf16.mxu1 %v7712_v32 }
 0x6bd   :  { %v1212_v13 = vmin.f32 %v1210_v46, 20.0  ;;  %7914 = vpow2.f32 %v1171_v38  ;;  %v1213_v11 = vmin.f32 %v1211_v27, 20.0  ;;  %6915 = vmatpush3.bf16.msra.mxu1 %v7712_v32 }
 0x6be   :  { %7916 = vpow2.f32 %v1173_v28 }
 0x6bf   :  { %v1214_v10 = vmul.f32 1.442695, %v1212_v13  ;;  %v1216_v14 = vmul.f32 1.442695, %v1213_v11 }
 0x6c1   :  { %7918 = vpow2.f32 %v1214_v10 }
 0x6c2   :  { %7920 = vpow2.f32 %v1216_v14  ;;  %v7713_v14 = vld [vmem:[#allocation2 + $0xb8] sm:$0xff]  }
 0x6c3   :  { %6916 = vmatprep.subr.bf16.mxu1 %v7713_v14 }
 0x6c4   :  { %6917 = vmatpush3.bf16.msra.mxu1 %v7713_v14  ;;  %v8608_v14 = vld [vmem:[#allocation6 + $0x1a8] sm:$0xff] }
 0x6c5   :  { %7365 = vmatprep.subr.bf16.mxu1 %v8146_v22 }
 0x6c7   :  { %v7915_v1 = vpop.eup %7914 }
 0x6c8   :  { %v7917_v9 = vpop.eup %7916  ;;  %v1175_v29 = vadd.f32 1.0, %v7915_v1 }
 0x6c9   :  { %v1176_v48 = vadd.f32 1.0, %v7917_v9  ;;  %v1295_v9 = vadd.f32 %v8533_v15, %v6269_v7 }
 0x6ca   :  { %v1177_v41 = vmul.f32 %v1175_v29, %v1175_v29 }
 0x6cb   :  { %v7919_v18 = vpop.eup %7918  ;;  %v1178_v12 = vmul.f32 %v1176_v48, %v1176_v48 }
 0x6cc   :  { %v7921_v44 = vpop.eup %7920  ;;  %v1218_v50 = vadd.f32 1.0, %v7919_v18  ;;  %v1183_v54 = vadd.f32 1.0, %v1177_v41  ;;  %v6265_v6 = vadd.f32 -1.0, %v1177_v41 }
 0x6cd   :  { %v1219_v5 = vadd.f32 1.0, %v7921_v44  ;;  %v1184_v8 = vadd.f32 1.0, %v1178_v12  ;;  %v6266_v60 = vadd.f32 -1.0, %v1178_v12 }
 0x6ce   :  { %v1220_v52 = vmul.f32 %v1218_v50, %v1218_v50  ;;  %7922 = vrcp.f32 %v1183_v54  ;;  %v1181_v16 = vmul.f32 %v6265_v6, %v1167_v23  ;;  %v8576_v54 = vld [vmem:[#allocation6 + $0x1b8] sm:$0xff] }
 0x6cf   :  { %v1221_v53 = vmul.f32 %v1219_v5, %v1219_v5  ;;  %7924 = vrcp.f32 %v1184_v8  ;;  %v1182_v20 = vmul.f32 %v6266_v60, %v1168_v25  ;;  %v1292_v25 = vadd.f32 %v8529_v40, %v6269_v7  ;;  %v8579_v8 = vld [vmem:[#allocation6 + $0x1c0] sm:$0xff] }
 0x6d0   :  { %v1226_v56 = vadd.f32 1.0, %v1220_v52  ;;  %v6267_v4 = vadd.f32 -1.0, %v1220_v52 }
 0x6d1   :  { %v1227_v58 = vadd.f32 1.0, %v1221_v53  ;;  %v6268_v3 = vadd.f32 -1.0, %v1221_v53  ;;  %v8582_v53 = vld [vmem:[#allocation6 + $0x1c8] sm:$0xff] }
 0x6d2   :  { %7926 = vrcp.f32 %v1226_v56  ;;  %v1224_v38 = vmul.f32 %v6267_v4, %v1210_v46 }
 0x6d3   :  { %7928 = vrcp.f32 %v1227_v58  ;;  %v1225_v11 = vmul.f32 %v6268_v3, %v1211_v27  ;;  %v8585_v58 = vld [vmem:[#allocation6 + $0x1d0] sm:$0xff] }
 0x6d8   :  { %v7923_v17 = vpop.eup %7922 }
 0x6d9   :  { %v7925_v35 = vpop.eup %7924  ;;  %v1187_v37 = vmul.f32 %v7923_v17, %v1181_v16 }
 0x6da   :  { %v1188_v24 = vmul.f32 %v7925_v35, %v1182_v20 }
 0x6db   :  { %v8547_v28 = vadd.f32 %v1284_v63, %v1187_v37 }
 0x6dc   :  { %v7927_v13 = vpop.eup %7926  ;;  %v8549_v23 = vadd.f32 %v1287_v31, %v1188_v24 }
 0x6dd   :  { %v7929_v42 = vpop.eup %7928  ;;  %v1230_v10 = vmul.f32 %v7927_v13, %v1224_v38  ;;  %v1320_v26 = vrot.slane %v8547_v28, 1  ;;  %v1308_v51 = vrot.slane %v8547_v28, 7 }
 0x6de   :  { %v1231_v1 = vmul.f32 %v7929_v42, %v1225_v11  ;;  %v7583_v46 = vpack.i.bf16 %v8549_v23, %v8547_v28  ;;  %v1321_v29 = vrot.slane %v8549_v23, 1  ;;  %v1309_v16 = vrot.slane %v8549_v23, 7  ;;  %v8602_v11 = vld [vmem:[#allocation6 + $0x198] sm:$0xff] }
 0x6df   :  { %v8557_v48 = vadd.f32 %v1292_v25, %v1230_v10  ;;  %v8605_v10 = vld [vmem:[#allocation6 + $0x1a0] sm:$0xff] }
 0x6e0   :  { %v8559_v27 = vadd.f32 %v1295_v9, %v1231_v1  ;;  %7584 = vrot.lane.b32.xlu0 %v7583_v46, %s8147_s0  ;;  %v1326_v41 = vsel %vm494_vm2, %v1320_v26, %v1321_v29  ;;  %v1314_v20 = vsel %vm477_vm3, %v1308_v51, %v1309_v16  ;;  %v8611_v9 = vld [vmem:[#allocation6 + $0x1b0] sm:$0xff] }
 0x6e1   :  { %v1322_v40 = vrot.slane %v8557_v48, 1  ;;  %v1328_v5 = vmul.f32 %v8576_v54, %v1326_v41  ;;  %v1310_v63 = vrot.slane %v8557_v48, 7  ;;  %v1317_v25 = vmul.f32 %v8605_v10, %v1314_v20 }
 0x6e2   :  { %v7588_v15 = vpack.i.bf16 %v8559_v27, %v8557_v48  ;;  %v1323_v18 = vrot.slane %v8559_v27, 1  ;;  %v1311_v4 = vrot.slane %v8559_v27, 7 }
 0x6e3   :  { %v1325_v12 = vsel %vm494_vm2, %v1321_v29, %v1322_v40  ;;  %v1313_v24 = vsel %vm477_vm3, %v1309_v16, %v1310_v63 }
 0x6e4   :  { %7589 = vrot.lane.b32.xlu1 %v7588_v15, %s8147_s0  ;;  %v1324_v44 = vsel %vm494_vm2, %v1322_v40, %v1323_v18  ;;  %v1327_v50 = vsel %vm494_vm2, %v1323_v18, %v1320_v26  ;;  %v1329_v52 = vmul.f32 %v8579_v8, %v1325_v12  ;;  %v1315_v31 = vsel %vm477_vm3, %v1311_v4, %v1308_v51 }
 0x6e5   :  { %v1330_v56 = vmul.f32 %v8582_v53, %v1324_v44  ;;  %v1331_v6 = vmul.f32 %v8585_v58, %v1327_v50  ;;  %v1312_v32 = vsel %vm477_vm3, %v1310_v63, %v1311_v4  ;;  %v1316_v42 = vmul.f32 %v8602_v11, %v1315_v31  ;;  %v6273_v4 = vld [vmem:[#allocation6 + $0x50] ss:$0 sm:$0xff] }
 0x6e6   :  { %v7593_v7 = vpack.i.bf16 %v1329_v52, %v1328_v5  ;;  %v1318_v1 = vmul.f32 %v8608_v14, %v1313_v24  ;;  %v1319_v46 = vmul.f32 %v8611_v9, %v1312_v32 }
 0x6e7   :  { %v7598_v60 = vpack.i.bf16 %v1331_v6, %v1330_v56 }
 0x6e8   :  { %7594 = vrot.lane.b32.xlu0 %v7593_v7, %s8138_s4 }
 0x6e9   :  { %7599 = vrot.lane.b32.xlu1 %v7598_v60, %s8138_s4 }
 0x752   :  { %v7585_v17 = vpop.permute.xlu0 %7584 }
 0x753   :  { %v7587_v35 = vunpack.i.h.bf16 %v7585_v17  ;;  %v7586_v37 = vunpack.i.l.bf16 %v7585_v17 }
 0x755   :  { %v1364_v15 = vsel %vm88_vm1, %v1316_v42, %v7586_v37  ;;  %v1365_v18 = vsel %vm88_vm1, %v1317_v25, %v7587_v35 }
 0x756   :  { %v7590_v3 = vpop.permute.xlu1 %7589 }
 0x757   :  { %v7592_v38 = vunpack.i.h.bf16 %v7590_v3  ;;  %v7591_v13 = vunpack.i.l.bf16 %v7590_v3 }
 0x759   :  { %v1366_v50 = vsel %vm88_vm1, %v1318_v1, %v7591_v13  ;;  %v1367_v5 = vsel %vm88_vm1, %v1319_v46, %v7592_v38 }
 0x75a   :  { %v7595_v26 = vpop.permute.xlu0 %7594 }
 0x75b   :  { %v7600_v29 = vpop.permute.xlu1 %7599  ;;  %v7597_v40 = vunpack.i.h.bf16 %v7595_v26  ;;  %v7596_v41 = vunpack.i.l.bf16 %v7595_v26 }
 0x75c   :  { %v7602_v12 = vunpack.i.h.bf16 %v7600_v29  ;;  %v7601_v44 = vunpack.i.l.bf16 %v7600_v29 }
 0x75d   :  { %v1368_v52 = vsel %vm909_vm11, %v1364_v15, %v7596_v41  ;;  %v1369_v56 = vsel %vm909_vm11, %v1365_v18, %v7597_v40 }
 0x75e   :  { %v1371_v6 = vsel %vm909_vm11, %v1367_v5, %v7602_v12  ;;  %v1370_v7 = vsel %vm909_vm11, %v1366_v50, %v7601_v44  ;;  %v1372_v60 = vpack.c.bf16 %v1369_v56, %v1368_v52 }
 0x75f   :  { %v1373_v51 = vpack.c.bf16 %v1371_v6, %v1370_v7 }
 0x760   :  { %6918 = vmatprep.mubr.msk.bf16.mxu1 %vm969_vm12, %v1372_v60 }
 0x761   :  { %6919 = vmatmul.mubr.msk.bf16.vlgmr.msra.gmra.mrb[12].mxu1 %vm969_vm12, %v1373_v51 }
 0x762   :  { %7367 = vmatpush3.bf16.msra.mxu1 %v8357_v21  ;;  %6957 = vmatprep.mubr.msk.f32.mxu1 %vm8144_vm0, %v8143_v0 }
 0x763   :  { %7368 = vmatprep.subr.bf16.mxu1 %v8146_v22 }
 0x766   :  { %7370 = vmatpush3.bf16.msra.mxu1 %v8362_v30 }
 0x834   :  { %v6920_v16 = vpop.f32.mrb[12].mxu1 }
 0x835   :  { %v8629_v63 = vadd.f32 %v6920_v16, %v6273_v4  ;;  %v1467_v17 = vpop.f32.mrb[13].mxu1 }
 0x836   :  { %v8631_v3 = vadd.f32 %v6273_v4, %v1467_v17  ;;  %v6921_v20 = vpop.f32.mrb[14].mxu1 }
 0x837   :  { %v1513_v31 = vmul.f32 %v8629_v63, %v8629_v63  ;;  %v8635_v35 = vadd.f32 %v6921_v20, %v6273_v4  ;;  %v1470_v21 = vpop.f32.mrb[15].mxu1  ;;  %v1504_v30 = vsel %vm88_vm1, %v8629_v63, 0.0 }
 0x838   :  { %v1493_v37 = vmul.f32 %v8631_v3, %v8631_v3  ;;  %v8639_v32 = vadd.f32 %v6273_v4, %v1470_v21  ;;  %v1484_v13 = vsel %vm88_vm1, %v8631_v3, 0.0 }
 0x839   :  { %v1505_v24 = vsel %vm88_vm1, %v8635_v35, 0.0  ;;  %v1514_v38 = vmul.f32 %v8635_v35, %v8635_v35  ;;  %v1515_v1 = vsel %vm88_vm1, %v1513_v31, 0.0 }
 0x83a   :  { %v1506_v42 = vadd.f32 %v1505_v24, %v1504_v30  ;;  %v1485_v25 = vsel %vm88_vm1, %v8639_v32, 0.0  ;;  %v1494_v26 = vmul.f32 %v8639_v32, %v8639_v32  ;;  %v1495_v40 = vsel %vm88_vm1, %v1493_v37, 0.0 }
 0x83b   :  { %v1516_v46 = vsel %vm88_vm1, %v1514_v38, 0.0  ;;  %v1486_v29 = vadd.f32 %v1485_v25, %v1484_v13 }
 0x83c   :  { %v1507_v41 = vrot.slane %v1506_v42, 4  ;;  %v1517_v15 = vadd.f32 %v1516_v46, %v1515_v1  ;;  %v1496_v18 = vsel %vm88_vm1, %v1494_v26, 0.0 }
 0x83d   :  { %v1487_v12 = vrot.slane %v1486_v29, 4  ;;  %v1497_v44 = vadd.f32 %v1496_v18, %v1495_v40  ;;  %v7714_v40 = vld [vmem:[#allocation2 + $0xc0] sm:$0xff]  }
 0x83e   :  { %v1508_v50 = vadd.f32 %v1507_v41, %v1506_v42  ;;  %v1518_v5 = vrot.slane %v1517_v15, 4  ;;  %v7715_v41 = vld [vmem:[#allocation2 + $0xc8] sm:$0xff]   ;;  %6933 = vmatprep.subr.bf16.mxu0 %v7714_v40 }
 0x83f   :  { %v1488_v52 = vadd.f32 %v1487_v12, %v1486_v29  ;;  %v1498_v56 = vrot.slane %v1497_v44, 4 }
 0x840   :  { %v1509_v6 = vrot.slane %v1508_v50, 2  ;;  %v1519_v7 = vadd.f32 %v1518_v5, %v1517_v15  ;;  %v7716_v15 = vld [vmem:[#allocation2 + $0xd0] sm:$0xff]  }
 0x841   :  { %v1489_v60 = vrot.slane %v1488_v52, 2  ;;  %v1499_v51 = vadd.f32 %v1498_v56, %v1497_v44 }
 0x842   :  { %v1510_v4 = vadd.f32 %v1509_v6, %v1508_v50  ;;  %v1520_v16 = vrot.slane %v1519_v7, 2 }
 0x843   :  { %v1490_v17 = vadd.f32 %v1489_v60, %v1488_v52  ;;  %v1500_v20 = vrot.slane %v1499_v51, 2 }
 0x844   :  { %v1521_v31 = vadd.f32 %v1520_v16, %v1519_v7  ;;  %v1511_v30 = vrot.slane %v1510_v4, 1  ;;  %v1482_v7 = vld [vmem:[#allocation6 + $0x58] sm:$0x1] }
 0x845   :  { %v1491_v21 = vrot.slane %v1490_v17, 1  ;;  %v1501_v37 = vadd.f32 %v1500_v20, %v1499_v51 }
 0x846   :  { %v1522_v38 = vrot.slane %v1521_v31, 1  ;;  %v1512_v42 = vadd.f32 %v1511_v30, %v1510_v4 }
 0x847   :  { %v1502_v24 = vrot.slane %v1501_v37, 1  ;;  %v1492_v13 = vadd.f32 %v1491_v21, %v1490_v17  ;;  %v1483_v17 = vld [vmem:[#allocation6 + $0x60] sm:$0x1] }
 0x848   :  { %v1523_v26 = vadd.f32 %v1522_v38, %v1521_v31 }
 0x849   :  { %v1503_v25 = vadd.f32 %v1502_v24, %v1501_v37 }
 0x84b   :  { %v1524_v1 = vsel %vm665_vm8, %v1492_v13, %v1503_v25 }
 0x84c   :  { %v1525_v46 = vsel %vm667_vm9, %v1524_v1, %v1512_v42 }
 0x84d   :  { %v1526_v29 = vsel %vm669_vm10, %v1525_v46, %v1523_v26 }
 0x84e   :  { %6931 = vmatmul.mubr.msk.f32.vlgmr.msra.gmra.mrb[24].mxu0 %vm88_vm1, %v1526_v29 }
 0x84f   :  { %6934 = vmatpush3.bf16.msra.mxu0 %v7714_v40 }
 0x850   :  { %6935 = vmatprep.subr.bf16.mxu0 %v7715_v41 }
 0x853   :  { %6936 = vmatpush3.bf16.msra.mxu0 %v7715_v41 }
 0x854   :  { %6937 = vmatprep.subr.bf16.mxu0 %v7716_v15 }
 0x857   :  { %6938 = vmatpush3.bf16.msra.mxu0 %v7716_v15 }
 0x921   :  { %v1596_v18 = vpop.f32.mrb[24].mxu0 }
 0x922   :  { %v1600_v12 = vmul.f32 %v1596_v18, %v1596_v18  ;;  %v6932_v44 = vpop.f32.mrb[25].mxu0 }
 0x924   :  { %v1602_v50 = vrot.slane %v1600_v12, 7 }
 0x926   :  { %v1604_v5 = vsub.f32 %v1596_v18, %v1602_v50 }
 0x928   :  { %v1605_v52 = vmax.f32 %v1604_v5, 0.0 }
 0x92a   :  { %v1606_v56 = vadd.f32 1e-05, %v1605_v52 }
 0x92c   :  { %7930 = vrsqrt.f32 %v1606_v56 }
 0x936   :  { %v7931_v6 = vpop.eup %7930 }
 0x937   :  { %v1609_v60 = vrot.slane %v7931_v6, 1  ;;  %v1652_v51 = vrot.slane %v7931_v6, 3 }
 0x939   :  { %v1611_v4 = vmul.f32 %v1609_v60, %v1482_v7  ;;  %v1654_v16 = vmul.f32 %v1652_v51, %v1482_v7 }
 0x93b   :  { %v1612_v20 = vmul.f32 %v1611_v4, %v1596_v18  ;;  %v1617_v31 = vrot.slane %v1611_v4, %v8431_v2  ;;  %v1656_v21 = vrot.slane %v1654_v16, 6  ;;  %v1666_v24 = vrot.slane %v1654_v16, %v8431_v2 }
 0x93d   :  { %v1613_v37 = vsub.f32 %v1483_v17, %v1612_v20  ;;  %v1658_v30 = vmul.f32 %v1656_v21, %v1596_v18  ;;  %v1618_v38 = vmul.f32 %v1617_v31, %v8631_v3  ;;  %v1619_v13 = vmul.f32 %v1617_v31, %v8639_v32 }
 0x93e   :  { %v1667_v29 = vmul.f32 %v1666_v24, %v8629_v63  ;;  %v1668_v15 = vmul.f32 %v1666_v24, %v8635_v35 }
 0x93f   :  { %v1623_v25 = vrot.slane %v1613_v37, %v8431_v2  ;;  %v1660_v42 = vrot.slane %v1658_v30, 2 }
 0x941   :  { %v1624_v26 = vadd.f32 %v1623_v25, %v1618_v38  ;;  %v1625_v1 = vadd.f32 %v1623_v25, %v1619_v13  ;;  %v1662_v46 = vsub.f32 %v1483_v17, %v1660_v42  ;;  %v7717_v42 = vld [vmem:[#allocation2 + $0xd8] sm:$0xff]  }
 0x942   :  { %6939 = vmatprep.subr.bf16.mxu0 %v7717_v42 }
 0x943   :  { %v1626_v40 = vmin.f32 %v1624_v26, 20.0  ;;  %v1627_v41 = vmin.f32 %v1625_v1, 20.0  ;;  %v1672_v18 = vrot.slane %v1662_v46, %v8431_v2  ;;  %6940 = vmatpush3.bf16.msra.mxu0 %v7717_v42 }
 0x945   :  { %v1628_v12 = vmul.f32 1.442695, %v1626_v40  ;;  %v1630_v44 = vmul.f32 1.442695, %v1627_v41  ;;  %v1673_v50 = vadd.f32 %v1672_v18, %v1667_v29  ;;  %v1674_v3 = vadd.f32 %v1672_v18, %v1668_v15 }
 0x947   :  { %7932 = vpow2.f32 %v1628_v12  ;;  %v1675_v32 = vmin.f32 %v1673_v50, 20.0  ;;  %v1676_v5 = vmin.f32 %v1674_v3, 20.0  ;;  %v1649_v12 = vrot.slane %v8371_v36, %v8431_v2 }
 0x948   :  { %7934 = vpow2.f32 %v1630_v44 }
 0x949   :  { %v1677_v52 = vmul.f32 1.442695, %v1675_v32  ;;  %v1679_v56 = vmul.f32 1.442695, %v1676_v5  ;;  %v7718_v32 = vld [vmem:[#allocation2 + $0xe0] sm:$0xff]  }
 0x94a   :  { %6941 = vmatprep.subr.bf16.mxu0 %v7718_v32 }
 0x94b   :  { %7936 = vpow2.f32 %v1677_v52  ;;  %6942 = vmatpush3.bf16.msra.mxu0 %v7718_v32 }
 0x94c   :  { %7938 = vpow2.f32 %v1679_v56 }
 0x951   :  { %v7933_v6 = vpop.eup %7932 }
 0x952   :  { %v7935_v63 = vpop.eup %7934  ;;  %v1632_v7 = vadd.f32 1.0, %v7933_v6 }
 0x953   :  { %v1633_v60 = vadd.f32 1.0, %v7935_v63 }
 0x954   :  { %v1634_v51 = vmul.f32 %v1632_v7, %v1632_v7 }
 0x955   :  { %v7937_v35 = vpop.eup %7936  ;;  %v1635_v4 = vmul.f32 %v1633_v60, %v1633_v60 }
 0x956   :  { %v7939_v16 = vpop.eup %7938  ;;  %v1640_v17 = vadd.f32 1.0, %v1634_v51  ;;  %v1681_v20 = vadd.f32 1.0, %v7937_v35  ;;  %v6283_v13 = vadd.f32 -1.0, %v1634_v51  ;;  %v7719_v35 = vld [vmem:[#allocation2 + $0xe8] sm:$0xff]  }
 0x957   :  { %v1641_v31 = vadd.f32 1.0, %v1635_v4  ;;  %v1682_v21 = vadd.f32 1.0, %v7939_v16  ;;  %v6284_v25 = vadd.f32 -1.0, %v1635_v4  ;;  %6943 = vmatprep.subr.bf16.mxu0 %v7719_v35 }
 0x958   :  { %7940 = vrcp.f32 %v1640_v17  ;;  %v1683_v37 = vmul.f32 %v1681_v20, %v1681_v20  ;;  %v1638_v46 = vmul.f32 %v6283_v13, %v1624_v26  ;;  %6944 = vmatpush3.bf16.msra.mxu0 %v7719_v35 }
 0x959   :  { %7942 = vrcp.f32 %v1641_v31  ;;  %v1684_v30 = vmul.f32 %v1682_v21, %v1682_v21  ;;  %v1639_v41 = vmul.f32 %v6284_v25, %v1625_v1  ;;  %6987 = vmatprep.subr.bf16.mxu0 %v8143_v0 }
 0x95a   :  { %v1689_v24 = vadd.f32 1.0, %v1683_v37  ;;  %v6285_v29 = vadd.f32 -1.0, %v1683_v37 }
 0x95b   :  { %v1690_v38 = vadd.f32 1.0, %v1684_v30  ;;  %v6286_v15 = vadd.f32 -1.0, %v1684_v30 }
 0x95c   :  { %7944 = vrcp.f32 %v1689_v24  ;;  %v1687_v56 = vmul.f32 %v6285_v29, %v1673_v50 }
 0x95d   :  { %7946 = vrcp.f32 %v1690_v38  ;;  %v1688_v7 = vmul.f32 %v6286_v15, %v1674_v3 }
 0x962   :  { %v7941_v40 = vpop.eup %7940 }
 0x963   :  { %v7943_v18 = vpop.eup %7942  ;;  %v1644_v44 = vmul.f32 %v7941_v40, %v1638_v46 }
 0x964   :  { %v1645_v5 = vmul.f32 %v7943_v18, %v1639_v41 }
 0x965   :  { %v1650_v52 = vadd.f32 %v1649_v12, %v1644_v44 }
 0x966   :  { %v7945_v6 = vpop.eup %7944  ;;  %v1651_v63 = vadd.f32 %v1649_v12, %v1645_v5 }
 0x967   :  { %v7947_v26 = vpop.eup %7946  ;;  %v1701_v60 = vrot.slane %v1650_v52, 7  ;;  %v1693_v51 = vmul.f32 %v7945_v6, %v1687_v56  ;;  %v1713_v1 = vrot.slane %v1650_v52, 1 }
 0x968   :  { %v1702_v4 = vrot.slane %v1651_v63, 7  ;;  %v7603_v16 = vpack.i.bf16 %v1651_v63, %v1650_v52  ;;  %v1694_v17 = vmul.f32 %v7947_v26, %v1688_v7  ;;  %v1714_v20 = vrot.slane %v1651_v63, 1 }
 0x969   :  { %v1699_v36 = vadd.f32 %v8375_v39, %v1693_v51 }
 0x96a   :  { %7604 = vrot.lane.b32.xlu0 %v7603_v16, %s8147_s0  ;;  %v1700_v50 = vadd.f32 %v8375_v39, %v1694_v17  ;;  %v1719_v3 = vsel %vm494_vm2, %v1713_v1, %v1714_v20  ;;  %v1707_v31 = vsel %vm477_vm3, %v1701_v60, %v1702_v4 }
 0x96b   :  { %v1703_v21 = vrot.slane %v1699_v36, 7  ;;  %v1715_v37 = vrot.slane %v1699_v36, 1  ;;  %v1721_v25 = vmul.f32 %v8576_v54, %v1719_v3  ;;  %v1710_v26 = vmul.f32 %v8605_v10, %v1707_v31 }
 0x96c   :  { %v1704_v30 = vrot.slane %v1700_v50, 7  ;;  %v7608_v24 = vpack.i.bf16 %v1700_v50, %v1699_v36  ;;  %v1716_v38 = vrot.slane %v1700_v50, 1 }
 0x96d   :  { %v1718_v13 = vsel %vm494_vm2, %v1714_v20, %v1715_v37  ;;  %v1706_v39 = vsel %vm477_vm3, %v1702_v4, %v1703_v21 }
 0x96e   :  { %7609 = vrot.lane.b32.xlu1 %v7608_v24, %s8147_s0  ;;  %v1717_v42 = vsel %vm494_vm2, %v1715_v37, %v1716_v38  ;;  %v1720_v46 = vsel %vm494_vm2, %v1716_v38, %v1713_v1  ;;  %v1722_v29 = vmul.f32 %v8579_v8, %v1718_v13  ;;  %v1708_v40 = vsel %vm477_vm3, %v1704_v30, %v1701_v60 }
 0x96f   :  { %v1723_v41 = vmul.f32 %v8582_v53, %v1717_v42  ;;  %v1724_v15 = vmul.f32 %v8585_v58, %v1720_v46  ;;  %v1705_v18 = vsel %vm477_vm3, %v1703_v21, %v1704_v30  ;;  %v1709_v7 = vmul.f32 %v8602_v11, %v1708_v40 }
 0x970   :  { %v7613_v12 = vpack.i.bf16 %v1722_v29, %v1721_v25  ;;  %v1711_v51 = vmul.f32 %v8608_v14, %v1706_v39  ;;  %v1712_v1 = vmul.f32 %v8611_v9, %v1705_v18  ;;  %v6287_v25 = vld [vmem:[#allocation6 + $0x68] ss:$0 sm:$0xff] }
 0x971   :  { %v7618_v44 = vpack.i.bf16 %v1724_v15, %v1723_v41 }
 0x972   :  { %7614 = vrot.lane.b32.xlu0 %v7613_v12, %s8138_s4 }
 0x973   :  { %7619 = vrot.lane.b32.xlu1 %v7618_v44, %s8138_s4 }
 0x9dc   :  { %v7605_v32 = vpop.permute.xlu0 %7604 }
 0x9dd   :  { %v7607_v52 = vunpack.i.h.bf16 %v7605_v32  ;;  %v7606_v56 = vunpack.i.l.bf16 %v7605_v32 }
 0x9df   :  { %v1757_v17 = vsel %vm88_vm1, %v1709_v7, %v7606_v56  ;;  %v1758_v20 = vsel %vm88_vm1, %v1710_v26, %v7607_v52 }
 0x9e0   :  { %v7610_v5 = vpop.permute.xlu1 %7609 }
 0x9e1   :  { %v7612_v6 = vunpack.i.h.bf16 %v7610_v5  ;;  %v7611_v63 = vunpack.i.l.bf16 %v7610_v5 }
 0x9e3   :  { %v1759_v3 = vsel %vm88_vm1, %v1711_v51, %v7611_v63  ;;  %v1760_v21 = vsel %vm88_vm1, %v1712_v1, %v7612_v6 }
 0x9e4   :  { %v7615_v60 = vpop.permute.xlu0 %7614 }
 0x9e5   :  { %v7620_v35 = vpop.permute.xlu1 %7619  ;;  %v7617_v4 = vunpack.i.h.bf16 %v7615_v60  ;;  %v7616_v16 = vunpack.i.l.bf16 %v7615_v60 }
 0x9e6   :  { %v7622_v36 = vunpack.i.h.bf16 %v7620_v35  ;;  %v7621_v50 = vunpack.i.l.bf16 %v7620_v35 }
 0x9e7   :  { %v1761_v31 = vsel %vm909_vm11, %v1757_v17, %v7616_v16  ;;  %v1762_v37 = vsel %vm909_vm11, %v1758_v20, %v7617_v4 }
 0x9e8   :  { %v1764_v30 = vsel %vm909_vm11, %v1760_v21, %v7622_v36  ;;  %v1763_v24 = vsel %vm909_vm11, %v1759_v3, %v7621_v50  ;;  %v1765_v38 = vpack.c.bf16 %v1762_v37, %v1761_v31 }
 0x9e9   :  { %v1766_v13 = vpack.c.bf16 %v1764_v30, %v1763_v24 }
 0x9ea   :  { %6945 = vmatprep.mubr.msk.bf16.mxu0 %vm969_vm12, %v1765_v38 }
 0x9eb   :  { %6946 = vmatmul.mubr.msk.bf16.vlgmr.msra.gmra.mrb[28].mxu0 %vm969_vm12, %v1766_v13 }
 0x9ec   :  { %6999 = vmatprep.mubr.msk.bf16.mxu0 %vm8144_vm0, %v8143_v0 }
 0xabe   :  { %v6947_v39 = vpop.f32.mrb[28].mxu0 }
 0xabf   :  { %v8714_v42 = vadd.f32 %v6947_v39, %v6287_v25  ;;  %v1860_v46 = vpop.f32.mrb[29].mxu0 }
 0xac0   :  { %v8716_v29 = vadd.f32 %v6287_v25, %v1860_v46  ;;  %v6948_v40 = vpop.f32.mrb[30].mxu0 }
 0xac1   :  { %v1906_v41 = vmul.f32 %v8714_v42, %v8714_v42  ;;  %v8720_v15 = vadd.f32 %v6948_v40, %v6287_v25  ;;  %v1863_v18 = vpop.f32.mrb[31].mxu0  ;;  %v1897_v32 = vsel %vm88_vm1, %v8714_v42, 0.0 }
 0xac2   :  { %v1886_v12 = vmul.f32 %v8716_v29, %v8716_v29  ;;  %v8724_v44 = vadd.f32 %v6287_v25, %v1863_v18  ;;  %v1877_v56 = vsel %vm88_vm1, %v8716_v29, 0.0 }
 0xac3   :  { %v1898_v5 = vsel %vm88_vm1, %v8720_v15, 0.0  ;;  %v1907_v52 = vmul.f32 %v8720_v15, %v8720_v15  ;;  %v1908_v26 = vsel %vm88_vm1, %v1906_v41, 0.0 }
 0xac4   :  { %v1899_v6 = vadd.f32 %v1898_v5, %v1897_v32  ;;  %v1878_v63 = vsel %vm88_vm1, %v8724_v44, 0.0  ;;  %v1887_v7 = vmul.f32 %v8724_v44, %v8724_v44  ;;  %v1888_v1 = vsel %vm88_vm1, %v1886_v12, 0.0 }
 0xac5   :  { %v1909_v60 = vsel %vm88_vm1, %v1907_v52, 0.0  ;;  %v1879_v51 = vadd.f32 %v1878_v63, %v1877_v56 }
 0xac6   :  { %v1900_v35 = vrot.slane %v1899_v6, 4  ;;  %v1910_v4 = vadd.f32 %v1909_v60, %v1908_v26  ;;  %v1889_v16 = vsel %vm88_vm1, %v1887_v7, 0.0 }
 0xac7   :  { %v1880_v17 = vrot.slane %v1879_v51, 4  ;;  %v1890_v20 = vadd.f32 %v1889_v16, %v1888_v1 }
 0xac8   :  { %v1901_v36 = vadd.f32 %v1900_v35, %v1899_v6  ;;  %v1911_v50 = vrot.slane %v1910_v4, 4 }
 0xac9   :  { %v1881_v3 = vadd.f32 %v1880_v17, %v1879_v51  ;;  %v1891_v21 = vrot.slane %v1890_v20, 4 }
 0xaca   :  { %v1902_v31 = vrot.slane %v1901_v36, 2  ;;  %v1912_v37 = vadd.f32 %v1911_v50, %v1910_v4 }
 0xacb   :  { %v1882_v30 = vrot.slane %v1881_v3, 2  ;;  %v1892_v24 = vadd.f32 %v1891_v21, %v1890_v20 }
 0xacc   :  { %v1903_v38 = vadd.f32 %v1902_v31, %v1901_v36  ;;  %v1913_v13 = vrot.slane %v1912_v37, 2  ;;  %v1875_v36 = vld [vmem:[#allocation6 + $0x70] sm:$0x1] }
 0xacd   :  { %v1883_v25 = vadd.f32 %v1882_v30, %v1881_v3  ;;  %v1893_v39 = vrot.slane %v1892_v24, 2 }
 0xace   :  { %v1914_v46 = vadd.f32 %v1913_v13, %v1912_v37  ;;  %v1904_v18 = vrot.slane %v1903_v38, 1  ;;  %v1876_v37 = vld [vmem:[#allocation6 + $0x78] sm:$0x1] }
 0xacf   :  { %v1884_v40 = vrot.slane %v1883_v25, 1  ;;  %v1894_v41 = vadd.f32 %v1893_v39, %v1892_v24 }
 0xad0   :  { %v1915_v32 = vrot.slane %v1914_v46, 1  ;;  %v1905_v56 = vadd.f32 %v1904_v18, %v1903_v38 }
 0xad1   :  { %v1895_v12 = vrot.slane %v1894_v41, 1  ;;  %v1885_v5 = vadd.f32 %v1884_v40, %v1883_v25 }
 0xad2   :  { %v1916_v6 = vadd.f32 %v1915_v32, %v1914_v46 }
 0xad3   :  { %v1896_v52 = vadd.f32 %v1895_v12, %v1894_v41 }
 0xad5   :  { %v1917_v63 = vsel %vm665_vm8, %v1885_v5, %v1896_v52 }
 0xad6   :  { %v1918_v7 = vsel %vm667_vm9, %v1917_v63, %v1905_v56 }
 0xad7   :  { %v1919_v26 = vsel %vm669_vm10, %v1918_v7, %v1916_v6 }
 0xad8   :  { %6958 = vmatmul.mubr.msk.f32.vlgmr.msra.gmra.mrb[16].mxu1 %vm88_vm1, %v1919_v26 }
 0xbab   :  { %v1989_v60 = vpop.f32.mrb[16].mxu1 }
 0xbac   :  { %v1993_v51 = vmul.f32 %v1989_v60, %v1989_v60  ;;  %v6959_v1 = vpop.f32.mrb[17].mxu1 }
 0xbae   :  { %v1995_v35 = vrot.slane %v1993_v51, 7 }
 0xbb0   :  { %v1997_v4 = vsub.f32 %v1989_v60, %v1995_v35 }
 0xbb2   :  { %v1998_v16 = vmax.f32 %v1997_v4, 0.0 }
 0xbb4   :  { %v1999_v17 = vadd.f32 1e-05, %v1998_v16 }
 0xbb6   :  { %7948 = vrsqrt.f32 %v1999_v17 }
 0xbc0   :  { %v7949_v20 = vpop.eup %7948 }
 0xbc1   :  { %v2002_v50 = vrot.slane %v7949_v20, 1  ;;  %v2039_v3 = vrot.slane %v7949_v20, 3 }
 0xbc3   :  { %v2004_v21 = vmul.f32 %v2002_v50, %v1875_v36  ;;  %v2041_v31 = vmul.f32 %v2039_v3, %v1875_v36 }
 0xbc5   :  { %v2005_v30 = vmul.f32 %v2004_v21, %v1989_v60  ;;  %v2010_v24 = vrot.slane %v2004_v21, %v8431_v2  ;;  %v2043_v38 = vrot.slane %v2041_v31, 6  ;;  %v2053_v39 = vrot.slane %v2041_v31, %v8431_v2 }
 0xbc7   :  { %v2006_v13 = vsub.f32 %v1876_v37, %v2005_v30  ;;  %v2045_v25 = vmul.f32 %v2043_v38, %v1989_v60  ;;  %v2011_v46 = vmul.f32 %v2010_v24, %v8716_v29  ;;  %v2012_v40 = vmul.f32 %v2010_v24, %v8724_v44 }
 0xbc8   :  { %v2054_v52 = vmul.f32 %v2053_v39, %v8714_v42  ;;  %v2055_v63 = vmul.f32 %v2053_v39, %v8720_v15 }
 0xbc9   :  { %v2016_v41 = vrot.slane %v2006_v13, %v8431_v2  ;;  %v2047_v18 = vrot.slane %v2045_v25, 2 }
 0xbcb   :  { %v2017_v12 = vadd.f32 %v2016_v41, %v2011_v46  ;;  %v2018_v32 = vadd.f32 %v2016_v41, %v2012_v40  ;;  %v2049_v5 = vsub.f32 %v1876_v37, %v2047_v18 }
 0xbcd   :  { %v2019_v56 = vmin.f32 %v2017_v12, 20.0  ;;  %v2020_v6 = vmin.f32 %v2018_v32, 20.0  ;;  %v2059_v7 = vrot.slane %v2049_v5, %v8431_v2 }
 0xbcf   :  { %v2021_v26 = vmul.f32 1.442695, %v2019_v56  ;;  %v2023_v60 = vmul.f32 1.442695, %v2020_v6  ;;  %v2060_v51 = vadd.f32 %v2059_v7, %v2054_v52  ;;  %v2061_v29 = vadd.f32 %v2059_v7, %v2055_v63 }
 0xbd1   :  { %7950 = vpow2.f32 %v2021_v26  ;;  %v2062_v44 = vmin.f32 %v2060_v51, 20.0  ;;  %v2063_v1 = vmin.f32 %v2061_v29, 20.0 }
 0xbd2   :  { %7952 = vpow2.f32 %v2023_v60 }
 0xbd3   :  { %v2064_v35 = vmul.f32 1.442695, %v2062_v44  ;;  %v2066_v4 = vmul.f32 1.442695, %v2063_v1 }
 0xbd5   :  { %7954 = vpow2.f32 %v2064_v35 }
 0xbd6   :  { %7956 = vpow2.f32 %v2066_v4 }
 0xbdb   :  { %v7951_v16 = vpop.eup %7950 }
 0xbdc   :  { %v7953_v42 = vpop.eup %7952  ;;  %v2025_v17 = vadd.f32 1.0, %v7951_v16 }
 0xbdd   :  { %v2026_v20 = vadd.f32 1.0, %v7953_v42 }
 0xbde   :  { %v2027_v36 = vmul.f32 %v2025_v17, %v2025_v17 }
 0xbdf   :  { %v7955_v15 = vpop.eup %7954  ;;  %v2028_v50 = vmul.f32 %v2026_v20, %v2026_v20 }
 0xbe0   :  { %v7957_v3 = vpop.eup %7956  ;;  %v2033_v21 = vadd.f32 1.0, %v2027_v36  ;;  %v2068_v31 = vadd.f32 1.0, %v7955_v15  ;;  %v6297_v39 = vadd.f32 -1.0, %v2027_v36 }
 0xbe1   :  { %v2034_v37 = vadd.f32 1.0, %v2028_v50  ;;  %v2069_v30 = vadd.f32 1.0, %v7957_v3  ;;  %v6298_v46 = vadd.f32 -1.0, %v2028_v50 }
 0xbe2   :  { %7958 = vrcp.f32 %v2033_v21  ;;  %v2070_v24 = vmul.f32 %v2068_v31, %v2068_v31  ;;  %v2031_v40 = vmul.f32 %v6297_v39, %v2017_v12 }
 0xbe3   :  { %7960 = vrcp.f32 %v2034_v37  ;;  %v2071_v38 = vmul.f32 %v2069_v30, %v2069_v30  ;;  %v2032_v5 = vmul.f32 %v6298_v46, %v2018_v32 }
 0xbe4   :  { %v2076_v13 = vadd.f32 1.0, %v2070_v24  ;;  %v6299_v41 = vadd.f32 -1.0, %v2070_v24 }
 0xbe5   :  { %v2077_v25 = vadd.f32 1.0, %v2071_v38  ;;  %v6300_v52 = vadd.f32 -1.0, %v2071_v38 }
 0xbe6   :  { %7962 = vrcp.f32 %v2076_v13  ;;  %v2074_v26 = vmul.f32 %v6299_v41, %v2060_v51 }
 0xbe7   :  { %7964 = vrcp.f32 %v2077_v25  ;;  %v2075_v1 = vmul.f32 %v6300_v52, %v2061_v29 }
 0xbec   :  { %v7959_v18 = vpop.eup %7958 }
 0xbed   :  { %v7961_v56 = vpop.eup %7960  ;;  %v2037_v6 = vmul.f32 %v7959_v18, %v2031_v40 }
 0xbee   :  { %v2038_v63 = vmul.f32 %v7961_v56, %v2032_v5 }
 0xbef   :  { %v2082_v7 = vadd.f32 %v2037_v6, %v8547_v28 }
 0xbf0   :  { %v7963_v60 = vpop.eup %7962  ;;  %v2083_v44 = vadd.f32 %v2038_v63, %v8549_v23 }
 0xbf1   :  { %v7965_v35 = vpop.eup %7964  ;;  %v2086_v4 = vrot.slane %v2082_v7, 7  ;;  %v2080_v16 = vmul.f32 %v7963_v60, %v2074_v26  ;;  %v2098_v42 = vrot.slane %v2082_v7, 1 }
 0xbf2   :  { %v2087_v17 = vrot.slane %v2083_v44, 7  ;;  %v7623_v12 = vpack.i.bf16 %v2083_v44, %v2082_v7  ;;  %v2081_v20 = vmul.f32 %v7965_v35, %v2075_v1  ;;  %v2099_v36 = vrot.slane %v2083_v44, 1 }
 0xbf3   :  { %v2084_v32 = vadd.f32 %v2080_v16, %v8557_v48 }
 0xbf4   :  { %7624 = vrot.lane.b32.xlu0 %v7623_v12, %s8147_s0  ;;  %v2085_v15 = vadd.f32 %v2081_v20, %v8559_v27  ;;  %v2104_v28 = vsel %vm494_vm2, %v2098_v42, %v2099_v36  ;;  %v2092_v23 = vsel %vm477_vm3, %v2086_v4, %v2087_v17 }
 0xbf5   :  { %v2088_v51 = vrot.slane %v2084_v32, 7  ;;  %v2100_v29 = vrot.slane %v2084_v32, 1  ;;  %v2106_v48 = vmul.f32 %v8576_v54, %v2104_v28  ;;  %v2150_v54 = vld [vmem:[#allocation6 + $0x208] sm:$0xff]  ;;  %v2095_v56 = vmul.f32 %v8605_v10, %v2092_v23  ;;  %v7722_v28 = vld [vmem:[#allocation2 + $0x100] sm:$0xff]  }
 0xbf6   :  { %v2089_v50 = vrot.slane %v2085_v15, 7  ;;  %v7628_v3 = vpack.i.bf16 %v2085_v15, %v2084_v32  ;;  %v2101_v21 = vrot.slane %v2085_v15, 1  ;;  %6968 = vmatprep.mubr.msk.f32.mxu1 %vm88_vm1, %v2150_v54  ;;  %v7720_v15 = vld [vmem:[#allocation2 + $0xf0] sm:$0xff]   ;;  %v7723_v23 = vld [vmem:[#allocation2 + $0x108] sm:$0xff]  }
 0xbf7   :  { %v2103_v31 = vsel %vm494_vm2, %v2099_v36, %v2100_v29  ;;  %v2091_v37 = vsel %vm477_vm3, %v2087_v17, %v2088_v51 }
 0xbf8   :  { %7629 = vrot.lane.b32.xlu0 %v7628_v3, %s8147_s0  ;;  %v2107_v27 = vmul.f32 %v8579_v8, %v2103_v31  ;;  %v2102_v30 = vsel %vm494_vm2, %v2100_v29, %v2101_v21  ;;  %v2105_v24 = vsel %vm494_vm2, %v2101_v21, %v2098_v42  ;;  %v2093_v38 = vsel %vm477_vm3, %v2089_v50, %v2086_v4  ;;  %v7725_v29 = vld [vmem:[#allocation2 + $0x118] sm:$0xff]   ;;  %v7726_v31 = vld [vmem:[#allocation2 + $0x120] sm:$0xff]  }
 0xbf9   :  { %v2090_v13 = vsel %vm477_vm3, %v2088_v51, %v2089_v50  ;;  %v2108_v39 = vmul.f32 %v8582_v53, %v2102_v30  ;;  %v2109_v46 = vmul.f32 %v8585_v58, %v2105_v24  ;;  %v2094_v52 = vmul.f32 %v8602_v11, %v2093_v38  ;;  %v7724_v51 = vld [vmem:[#allocation2 + $0x110] sm:$0xff]   ;;  %6988 = vmatpush3.bf16.msra.mxu0 %v7726_v31  ;;  %v7730_v30 = vld [vmem:[#allocation2 + $0x140] sm:$0xff]   ;;  %v6303_v24 = vld [vmem:[#allocation6 + $0x88] ss:$0 sm:$0xff] }
 0xbfa   :  { %v7633_v25 = vpack.i.bf16 %v2107_v27, %v2106_v48  ;;  %v2096_v35 = vmul.f32 %v8608_v14, %v2091_v37  ;;  %v2097_v4 = vmul.f32 %v8611_v9, %v2090_v13  ;;  %v2151_v14 = vld [vmem:[#allocation6 + $0x210] sm:$0xff]  ;;  %v7721_v9 = vld [vmem:[#allocation2 + $0xf8] sm:$0xff]   ;;  %v7727_v48 = vld [vmem:[#allocation2 + $0x128] sm:$0xff]   ;;  %6989 = vmatprep.subr.bf16.mxu0 %v8143_v0 }
 0xbfb   :  { %v7638_v8 = vpack.i.bf16 %v2109_v46, %v2108_v39  ;;  %v7728_v37 = vld [vmem:[#allocation2 + $0x130] sm:$0xff]   ;;  %v7729_v27 = vld [vmem:[#allocation2 + $0x138] sm:$0xff]   ;;  %v2510_v31 = vld [vmem:[#allocation6 + $0x260] sm:$0xff] }
 0xbfc   :  { %7634 = vrot.lane.b32.xlu1 %v7633_v25, %s8138_s4  ;;  %v7731_v25 = vld [vmem:[#allocation2 + $0x148] sm:$0xff]  }
 0xbfd   :  { %6990 = vmatpush3.bf16.msra.mxu0 %v7727_v48  ;;  %v2511_v48 = vld [vmem:[#allocation6 + $0x268] sm:$0xff] }
 0xbfe   :  { %6991 = vmatprep.subr.bf16.mxu0 %v8143_v0 }
 0xc00   :  { %7639 = vrot.lane.b32.xlu1 %v7638_v8, %s8138_s4 }
 0xc01   :  { %6992 = vmatpush3.bf16.msra.mxu0 %v7728_v37  ;;  %v8861_v37 = vpack.c.bf16 %v2511_v48, %v2510_v31 }
 0xc02   :  { %6993 = vmatprep.subr.bf16.mxu0 %v8143_v0 }
 0xc05   :  { %6994 = vmatpush3.bf16.msra.mxu0 %v7729_v27  ;;  %v2512_v27 = vld [vmem:[#allocation6 + $0x270] sm:$0xff] }
 0xc06   :  { %6995 = vmatprep.subr.bf16.mxu0 %v8143_v0 }
 0xc09   :  { %6996 = vmatpush3.bf16.msra.mxu0 %v7730_v30  ;;  %v2513_v30 = vld [vmem:[#allocation6 + $0x278] sm:$0xff] }
 0xc0a   :  { %6997 = vmatprep.subr.bf16.mxu0 %v8143_v0 }
 0xc0d   :  { %6998 = vmatpush3.bf16.msra.mxu0 %v7731_v25 }
 0xc0e   :  { %2790 = vmatprep.subr.bf16.mxu0 %v8145_v62 }
 0xc66   :  { %v7625_v40 = vpop.permute.xlu0 %7624 }
 0xc67   :  { %v7627_v41 = vunpack.i.h.bf16 %v7625_v40  ;;  %v7626_v18 = vunpack.i.l.bf16 %v7625_v40 }
 0xc69   :  { %v2142_v58 = vsel %vm88_vm1, %v2094_v52, %v7626_v18  ;;  %v2143_v7 = vsel %vm88_vm1, %v2095_v56, %v7627_v41 }
 0xc6a   :  { %v7630_v5 = vpop.permute.xlu0 %7629 }
 0xc6b   :  { %v7632_v26 = vunpack.i.h.bf16 %v7630_v5  ;;  %v7631_v60 = vunpack.i.l.bf16 %v7630_v5 }
 0xc6d   :  { %v2145_v17 = vsel %vm88_vm1, %v2097_v4, %v7632_v26  ;;  %v2144_v12 = vsel %vm88_vm1, %v2096_v35, %v7631_v60  ;;  %v8842_v4 = vld [vmem:[#allocation6 + $0x1d8] sm:$0xff] }
 0xc6e   :  { %v7635_v6 = vpop.permute.xlu1 %7634 }
 0xc6f   :  { %v7637_v63 = vunpack.i.h.bf16 %v7635_v6  ;;  %v7636_v53 = vunpack.i.l.bf16 %v7635_v6  ;;  %v8826_v6 = vld [vmem:[#allocation6 + $0x1e8] sm:$0xff] }
 0xc71   :  { %v2146_v44 = vsel %vm909_vm11, %v2142_v58, %v7636_v53  ;;  %v2147_v1 = vsel %vm909_vm11, %v2143_v7, %v7637_v63  ;;  %v8828_v63 = vld [vmem:[#allocation6 + $0x1f0] sm:$0xff] }
 0xc72   :  { %v7640_v11 = vpop.permute.xlu1 %7639  ;;  %v7371_v16 = vpack.c.bf16 %v2147_v1, %v2146_v44 }
 0xc73   :  { %v7642_v10 = vunpack.i.h.bf16 %v7640_v11  ;;  %v7641_v42 = vunpack.i.l.bf16 %v7640_v11  ;;  %v8844_v11 = vld [vmem:[#allocation6 + $0x1e0] sm:$0xff] }
 0xc74   :  { %7372 = vmatprep.subr.bf16.mxu1 %v7371_v16 }
 0xc75   :  { %7374 = vmatpush3.bf16.msra.mxu1 %v7371_v16  ;;  %v2148_v20 = vsel %vm909_vm11, %v2144_v12, %v7641_v42  ;;  %v2149_v36 = vsel %vm909_vm11, %v2145_v17, %v7642_v10 }
 0xc76   :  { %v7375_v32 = vpack.c.bf16 %v2149_v36, %v2148_v20 }
 0xc78   :  { %7376 = vmatprep.subr.bf16.mxu1 %v7375_v32 }
 0xc79   :  { %7378 = vmatpush3.bf16.msra.mxu1 %v7375_v32 }
 0xc7a   :  { %6971 = vmatprep.subr.bf16.mxu1 %v8143_v0 }
 0xc7c   :  { %6969 = vmatmul.mubr.msk.f32.vlgmr.msra.gmra.mrb[18].mxu1 %vm88_vm1, %v2151_v14 }
 0xc7d   :  { %6972 = vmatpush3.bf16.msra.mxu1 %v7720_v15  ;;  %6983 = vmatprep.mubr.msk.bf16.mxu1 %vm8144_vm0, %v8143_v0 }
 0xc7e   :  { %6973 = vmatprep.subr.bf16.mxu1 %v8143_v0 }
 0xc81   :  { %6974 = vmatpush3.bf16.msra.mxu1 %v7721_v9 }
 0xc82   :  { %6975 = vmatprep.subr.bf16.mxu1 %v8143_v0 }
 0xc85   :  { %6976 = vmatpush3.bf16.msra.mxu1 %v7722_v28 }
 0xc86   :  { %6977 = vmatprep.subr.bf16.mxu1 %v8143_v0 }
 0xc89   :  { %6978 = vmatpush3.bf16.msra.mxu1 %v7723_v23  ;;  %v2506_v23 = vld [vmem:[#allocation6 + $0x240] sm:$0xff] }
 0xc8a   :  { %6979 = vmatprep.subr.bf16.mxu1 %v8143_v0 }
 0xc8d   :  { %6980 = vmatpush3.bf16.msra.mxu1 %v7724_v51  ;;  %v2507_v51 = vld [vmem:[#allocation6 + $0x248] sm:$0xff] }
 0xc8e   :  { %6981 = vmatprep.subr.bf16.mxu1 %v8143_v0 }
 0xc91   :  { %6982 = vmatpush3.bf16.msra.mxu1 %v7725_v29  ;;  %v8853_v29 = vpack.c.bf16 %v2507_v51, %v2506_v23 }
 0xc92   :  { %7379 = vmatprep.subr.bf16.mxu1 %v8146_v22 }
 0xd4f   :  { %v6970_v50 = vpop.f32.mrb[18].mxu1 }
 0xd50   :  { %v2224_v3 = vpop.f32.mrb[19].mxu1 }
 0xd51   :  { %v2233_v21 = vpack.c.bf16 %v6970_v50, %v2224_v3  ;;  %v2508_v50 = vld [vmem:[#allocation6 + $0x250] sm:$0xff]  ;;  %v2509_v3 = vld [vmem:[#allocation6 + $0x258] sm:$0xff] }
 0xd53   :  { %6984 = vmatmul.mubr.msk.bf16.vlgmr.msra.gmra.mrb[20].mxu1 %vm969_vm12, %v2233_v21  ;;  %v8857_v21 = vpack.c.bf16 %v2509_v3, %v2508_v50 }
 0xd54   :  { %7019 = vmatprep.mubr.msk.f32.mxu1 %vm8144_vm0, %v8143_v0  ;;  %7381 = vmatpush3.bf16.msra.mxu1 %v8853_v29 }
 0xd55   :  { %7382 = vmatprep.subr.bf16.mxu1 %v8146_v22 }
 0xd58   :  { %7384 = vmatpush3.bf16.msra.mxu1 %v8857_v21 }
 0xd59   :  { %7385 = vmatprep.subr.bf16.mxu1 %v8146_v22 }
 0xd5c   :  { %7387 = vmatpush3.bf16.msra.mxu1 %v8861_v37 }
 0xd5d   :  { %7388 = vmatprep.subr.bf16.mxu1 %v8146_v22 }
 0xe26   :  { %v2324_v38 = vpop.f32.mrb[20].mxu1 }
 0xe27   :  { %v8813_v13 = vadd.f32 %v6303_v24, %v2324_v38  ;;  %v6985_v54 = vpop.f32.mrb[21].mxu1  ;;  %v6312_v38 = vld [vmem:[#allocation6 + $0x90] ss:$0 sm:$0xff] }
 0xe28   :  { %v2327_v39 = vpop.f32.mrb[22].mxu1 }
 0xe29   :  { %v8815_v46 = vadd.f32 %v6303_v24, %v2327_v39  ;;  %v6986_v8 = vpop.f32.mrb[23].mxu1  ;;  %v2337_v40 = vrot.slane %v8813_v13, 7  ;;  %v2345_v41 = vrot.slane %v8813_v13, 1  ;;  %v8865_v24 = vpack.c.bf16 %v2513_v30, %v2512_v27 }
 0xe2b   :  { %v2338_v18 = vrot.slane %v8815_v46, 7  ;;  %v2346_v5 = vrot.slane %v8815_v46, 1  ;;  %v3004_v52 = vpack.c.bf16 %v8815_v46, %v8813_v13  ;;  %v7643_v56 = vpack.i.bf16 %v8815_v46, %v8813_v13  ;;  %7390 = vmatpush3.bf16.msra.mxu1 %v8865_v24  ;;  %v7751_v13 = vld [vmem:[#allocation2 + $0x1e8] sm:$0xff]   ;;  %v7752_v46 = vld [vmem:[#allocation2 + $0x1f0] sm:$0xff]  }
 0xe2c   :  { %7391 = vmatprep.subr.bf16.mxu1 %v8146_v22 }
 0xe2d   :  { %7644 = vrot.lane.b32.xlu0 %v7643_v56, %s8147_s0  ;;  %v2347_v53 = vsel %vm494_vm2, %v2345_v41, %v2346_v5  ;;  %v2348_v58 = vsel %vm494_vm2, %v2346_v5, %v2345_v41  ;;  %v2339_v7 = vsel %vm477_vm3, %v2337_v40, %v2338_v18  ;;  %v2340_v26 = vsel %vm477_vm3, %v2338_v18, %v2337_v40 }
 0xe2e   :  { %v2351_v60 = vmul.f32 %v8826_v6, %v2347_v53  ;;  %v2352_v44 = vmul.f32 %v8828_v63, %v2348_v58  ;;  %v2343_v42 = vmul.f32 %v8842_v4, %v2340_v26  ;;  %v2344_v17 = vmul.f32 %v8844_v11, %v2339_v7 }
 0xe30   :  { %v7648_v1 = vpack.i.bf16 %v2352_v44, %v2351_v60 }
 0xe32   :  { %7649 = vrot.lane.b32.xlu1 %v7648_v1, %s8138_s4 }
 0xe9f   :  { %v7645_v35 = vpop.permute.xlu0 %7644 }
 0xea0   :  { %v7647_v16 = vunpack.i.h.bf16 %v7645_v35  ;;  %v7646_v10 = vunpack.i.l.bf16 %v7645_v35 }
 0xea2   :  { %v2369_v32 = vsel %vm88_vm1, %v2343_v42, %v7646_v10  ;;  %v2370_v14 = vsel %vm88_vm1, %v2344_v17, %v7647_v16 }
 0xea4   :  { %v7650_v12 = vpop.permute.xlu1 %7649 }
 0xea5   :  { %v7652_v20 = vunpack.i.h.bf16 %v7650_v12  ;;  %v7651_v36 = vunpack.i.l.bf16 %v7650_v12 }
 0xea7   :  { %v2371_v15 = vsel %vm909_vm11, %v2369_v32, %v7651_v36  ;;  %v2372_v9 = vsel %vm909_vm11, %v2370_v14, %v7652_v20 }
 0xea8   :  { %v2373_v28 = vpack.c.bf16 %v2372_v9, %v2371_v15 }
 0xeaa   :  { %7000 = vmatmul.mubr.msk.bf16.vlgmr.msra.gmra.mrb[32].mxu0 %vm969_vm12, %v2373_v28 }
 0xf7d   :  { %v2464_v54 = vpop.f32.mrb[32].mxu0 }
 0xf7e   :  { %v8869_v25 = vadd.f32 %v6312_v38, %v2464_v54  ;;  %v7001_v39 = vpop.f32.mrb[33].mxu0 }
 0xf7f   :  { %v2467_v8 = vpop.f32.mrb[34].mxu0  ;;  %v7732_v39 = vld [vmem:[#allocation2 + $0x150] sm:$0xff]  }
 0xf80   :  { %v2473_v40 = vsel %vm909_vm11, %v8869_v25, 0.0  ;;  %v2480_v41 = vmul.f32 %v8869_v25, %v8869_v25  ;;  %v8875_v18 = vadd.f32 %v6312_v38, %v2467_v8  ;;  %v7002_v5 = vpop.f32.mrb[35].mxu0  ;;  %2791 = vmatpush1.bf16.msra.mxu0 %v7732_v39  ;;  %v7733_v8 = vld [vmem:[#allocation2 + $0x158] sm:$0xff]  }
 0xf81   :  { %v2474_v56 = vrot.slane %v2473_v40, 4  ;;  %2792 = vmatprep.subr.bf16.mxu0 %v8145_v62  ;;  %v7736_v5 = vld [vmem:[#allocation2 + $0x170] sm:$0xff]  }
 0xf82   :  { %v2481_v53 = vsel %vm909_vm11, %v2480_v41, 0.0  ;;  %v2488_v58 = vsel %vm909_vm11, %v8875_v18, 0.0  ;;  %v2495_v7 = vmul.f32 %v8875_v18, %v8875_v18  ;;  %v7735_v41 = vld [vmem:[#allocation2 + $0x168] sm:$0xff]  }
 0xf83   :  { %v2475_v26 = vadd.f32 %v2474_v56, %v2473_v40  ;;  %v2482_v60 = vrot.slane %v2481_v53, 4  ;;  %v2489_v44 = vrot.slane %v2488_v58, 4  ;;  %v7734_v40 = vld [vmem:[#allocation2 + $0x160] sm:$0xff]   ;;  %v7737_v56 = vld [vmem:[#allocation2 + $0x178] sm:$0xff]  }
 0xf84   :  { %v2496_v1 = vsel %vm909_vm11, %v2495_v7, 0.0  ;;  %2793 = vmatpush1.bf16.msra.mxu0 %v7733_v8  ;;  %v7740_v7 = vld [vmem:[#allocation2 + $0x190] sm:$0xff]  }
 0xf85   :  { %v2476_v35 = vrot.slane %v2475_v26, 2  ;;  %v2483_v16 = vadd.f32 %v2482_v60, %v2481_v53  ;;  %v2490_v10 = vadd.f32 %v2489_v44, %v2488_v58  ;;  %v2497_v42 = vrot.slane %v2496_v1, 4  ;;  %2794 = vmatprep.subr.bf16.mxu0 %v8145_v62  ;;  %v7738_v53 = vld [vmem:[#allocation2 + $0x180] sm:$0xff]   ;;  %v7739_v58 = vld [vmem:[#allocation2 + $0x188] sm:$0xff]  }
 0xf86   :  { %v7742_v60 = vld [vmem:[#allocation2 + $0x1a0] sm:$0xff]  }
 0xf87   :  { %v2477_v17 = vadd.f32 %v2476_v35, %v2475_v26  ;;  %v2484_v12 = vrot.slane %v2483_v16, 2  ;;  %v2491_v20 = vrot.slane %v2490_v10, 2  ;;  %v2498_v36 = vadd.f32 %v2497_v42, %v2496_v1  ;;  %v7741_v26 = vld [vmem:[#allocation2 + $0x198] sm:$0xff]  }
 0xf88   :  { %2795 = vmatpush1.bf16.msra.mxu0 %v7734_v40 }
 0xf89   :  { %v2478_v32 = vrot.slane %v2477_v17, 1  ;;  %v2485_v14 = vadd.f32 %v2484_v12, %v2483_v16  ;;  %v2492_v15 = vadd.f32 %v2491_v20, %v2490_v10  ;;  %v2499_v9 = vrot.slane %v2498_v36, 2  ;;  %2796 = vmatprep.subr.bf16.mxu0 %v8145_v62  ;;  %v2471_v20 = vld [vmem:[#allocation6 + $0x98] sm:$0x1] }
 0xf8b   :  { %v2486_v28 = vrot.slane %v2485_v14, 1  ;;  %v2493_v23 = vrot.slane %v2492_v15, 1  ;;  %v2500_v51 = vadd.f32 %v2499_v9, %v2498_v36  ;;  %v2479_v50 = vadd.f32 %v2478_v32, %v2477_v17  ;;  %v2472_v9 = vld [vmem:[#allocation6 + $0xa0] sm:$0x1] }
 0xf8c   :  { %2797 = vmatpush1.bf16.msra.mxu0 %v7735_v41 }
 0xf8d   :  { %v2487_v3 = vadd.f32 %v2486_v28, %v2485_v14  ;;  %v2494_v31 = vadd.f32 %v2493_v23, %v2492_v15  ;;  %v2501_v48 = vrot.slane %v2500_v51, 1  ;;  %2798 = vmatprep.subr.bf16.mxu0 %v8145_v62 }
 0xf8f   :  { %v2502_v27 = vadd.f32 %v2501_v48, %v2500_v51  ;;  %v2503_v30 = vsel %vm665_vm8, %v2479_v50, %v2487_v3 }
 0xf90   :  { %v2504_v38 = vsel %vm667_vm9, %v2503_v30, %v2494_v31  ;;  %2799 = vmatpush1.bf16.msra.mxu0 %v7736_v5 }
 0xf91   :  { %v2505_v54 = vsel %vm669_vm10, %v2504_v38, %v2502_v27  ;;  %2800 = vmatprep.subr.bf16.mxu0 %v8145_v62 }
 0xf92   :  { %7020 = vmatmul.mubr.msk.f32.vlgmr.msra.gmra.mrb[24].mxu1 %vm909_vm11, %v2505_v54 }
 0xf93   :  { %7393 = vmatpush3.bf16.msra.mxu1 %v8853_v29  ;;  %7038 = vmatprep.mubr.msk.f32.mxu1 %vm8144_vm0, %v8143_v0 }
 0xf94   :  { %7394 = vmatprep.subr.bf16.mxu1 %v8146_v22  ;;  %2801 = vmatpush1.bf16.msra.mxu0 %v7737_v56 }
 0xf95   :  { %2802 = vmatprep.subr.bf16.mxu0 %v8145_v62 }
 0xf97   :  { %7396 = vmatpush3.bf16.msra.mxu1 %v8857_v21 }
 0xf98   :  { %7397 = vmatprep.subr.bf16.mxu1 %v8146_v22  ;;  %2803 = vmatpush1.bf16.msra.mxu0 %v7738_v53 }
 0xf99   :  { %2804 = vmatprep.subr.bf16.mxu0 %v8145_v62 }
 0xf9b   :  { %7399 = vmatpush3.bf16.msra.mxu1 %v8861_v37 }
 0xf9c   :  { %7400 = vmatprep.subr.bf16.mxu1 %v8146_v22  ;;  %2805 = vmatpush1.bf16.msra.mxu0 %v7739_v58 }
 0xf9d   :  { %2806 = vmatprep.subr.bf16.mxu0 %v8145_v62 }
 0xf9f   :  { %7402 = vmatpush3.bf16.msra.mxu1 %v8865_v24 }
 0xfa0   :  { %7041 = vmatprep.subr.bf16.mxu1 %v8143_v0  ;;  %2807 = vmatpush1.bf16.msra.mxu0 %v7740_v7 }
 0xfa1   :  { %2808 = vmatprep.subr.bf16.mxu0 %v8145_v62 }
 0xfa4   :  { %2809 = vmatpush1.bf16.msra.mxu0 %v7741_v26 }
 0xfa5   :  { %2810 = vmatprep.subr.bf16.mxu0 %v8145_v62 }
 0xfa8   :  { %2811 = vmatpush1.bf16.msra.mxu0 %v7742_v60 }
 0xfa9   :  { %2812 = vmatprep.subr.bf16.mxu0 %v8145_v62 }
0x1065   :  { %v2583_v44 = vpop.f32.mrb[24].mxu1 }
0x1066   :  { %v2587_v1 = vmul.f32 %v2583_v44, %v2583_v44  ;;  %v7021_v35 = vpop.f32.mrb[25].mxu1 }
0x1068   :  { %v2589_v16 = vrot.slane %v2587_v1, 7 }
0x106a   :  { %v2591_v10 = vsub.f32 %v2583_v44, %v2589_v16 }
0x106c   :  { %v2592_v42 = vmax.f32 %v2591_v10, 0.0 }
0x106e   :  { %v2593_v17 = vadd.f32 1e-05, %v2592_v42 }
0x1070   :  { %7966 = vrsqrt.f32 %v2593_v17  ;;  %v7743_v17 = vld [vmem:[#allocation2 + $0x1a8] sm:$0xff]  }
0x1071   :  { %2813 = vmatpush1.bf16.msra.mxu0 %v7743_v17 }
0x1072   :  { %7403 = vmatprep.subr.bf16.mxu0 %v8146_v22 }
0x107a   :  { %v7967_v12 = vpop.eup %7966 }
0x107b   :  { %v2596_v36 = vrot.slane %v7967_v12, 1  ;;  %v2626_v32 = vrot.slane %v7967_v12, 3  ;;  %v2624_v12 = vrot.slane %v8377_v43, %v8431_v2 }
0x107d   :  { %v2598_v14 = vmul.f32 %v2596_v36, %v2471_v20  ;;  %v2628_v15 = vmul.f32 %v2626_v32, %v2471_v20 }
0x107f   :  { %v2599_v28 = vmul.f32 %v2598_v14, %v2583_v44  ;;  %v2604_v23 = vrot.slane %v2598_v14, %v8431_v2  ;;  %v2630_v51 = vrot.slane %v2628_v15, 6  ;;  %v2640_v30 = vrot.slane %v2628_v15, %v8431_v2 }
0x1081   :  { %v2600_v50 = vsub.f32 %v2472_v9, %v2599_v28  ;;  %v2632_v3 = vmul.f32 %v2630_v51, %v2583_v44  ;;  %v2605_v31 = vmul.f32 %v2604_v23, %v8869_v25  ;;  %v2641_v8 = vmul.f32 %v2640_v30, %v8875_v18 }
0x1083   :  { %v2609_v48 = vrot.slane %v2600_v50, %v8431_v2  ;;  %v2634_v27 = vrot.slane %v2632_v3, 2 }
0x1085   :  { %v2610_v38 = vadd.f32 %v2609_v48, %v2605_v31  ;;  %v2636_v54 = vsub.f32 %v2472_v9, %v2634_v27 }
0x1087   :  { %v2611_v39 = vmin.f32 %v2610_v38, 20.0  ;;  %v2645_v40 = vrot.slane %v2636_v54, %v8431_v2 }
0x1089   :  { %v2612_v41 = vmul.f32 1.442695, %v2611_v39  ;;  %v2646_v5 = vadd.f32 %v2645_v40, %v2641_v8 }
0x108b   :  { %7968 = vpow2.f32 %v2612_v41  ;;  %v2647_v56 = vmin.f32 %v2646_v5, 20.0 }
0x108d   :  { %v2648_v53 = vmul.f32 1.442695, %v2647_v56 }
0x108f   :  { %7970 = vpow2.f32 %v2648_v53 }
0x1095   :  { %v7969_v58 = vpop.eup %7968 }
0x1096   :  { %v2614_v25 = vadd.f32 1.0, %v7969_v58  ;;  %v6323_v58 = vld [vmem:[#allocation6 + $0xa8] ss:$0 sm:$0xff] }
0x1098   :  { %v2615_v7 = vmul.f32 %v2614_v25, %v2614_v25 }
0x1099   :  { %v7971_v26 = vpop.eup %7970 }
0x109a   :  { %v2618_v60 = vadd.f32 1.0, %v2615_v7  ;;  %v2650_v44 = vadd.f32 1.0, %v7971_v26  ;;  %v6321_v16 = vadd.f32 -1.0, %v2615_v7 }
0x109c   :  { %7972 = vrcp.f32 %v2618_v60  ;;  %v2651_v1 = vmul.f32 %v2650_v44, %v2650_v44  ;;  %v2617_v18 = vmul.f32 %v6321_v16, %v2610_v38 }
0x109e   :  { %v2654_v35 = vadd.f32 1.0, %v2651_v1  ;;  %v6322_v10 = vadd.f32 -1.0, %v2651_v1 }
0x10a0   :  { %7974 = vrcp.f32 %v2654_v35  ;;  %v2653_v32 = vmul.f32 %v6322_v10, %v2646_v5 }
0x10a6   :  { %v7973_v42 = vpop.eup %7972 }
0x10a7   :  { %v2620_v20 = vmul.f32 %v7973_v42, %v2617_v18 }
0x10a9   :  { %v2625_v36 = vadd.f32 %v2624_v12, %v2620_v20 }
0x10aa   :  { %v7975_v14 = vpop.eup %7974 }
0x10ab   :  { %v2656_v15 = vmul.f32 %v7975_v14, %v2653_v32  ;;  %v2662_v28 = vrot.slane %v2625_v36, 7  ;;  %v2668_v3 = vrot.slane %v2625_v36, 1 }
0x10ad   :  { %v2661_v9 = vadd.f32 %v2660_v47, %v2656_v15 }
0x10af   :  { %v2663_v23 = vrot.slane %v2661_v9, 7  ;;  %v2669_v51 = vrot.slane %v2661_v9, 1  ;;  %v7653_v50 = vpack.i.bf16 %v2661_v9, %v2625_v36 }
0x10b1   :  { %7654 = vrot.lane.b32.xlu0 %v7653_v50, %s8138_s4  ;;  %v2670_v31 = vsel %vm494_vm2, %v2668_v3, %v2669_v51  ;;  %v2671_v48 = vsel %vm494_vm2, %v2669_v51, %v2668_v3  ;;  %v2664_v27 = vsel %vm477_vm3, %v2662_v28, %v2663_v23  ;;  %v2665_v43 = vsel %vm477_vm3, %v2663_v23, %v2662_v28 }
0x10b2   :  { %v2672_v47 = vmul.f32 %v2670_v31, %v8826_v6  ;;  %v2673_v30 = vmul.f32 %v2671_v48, %v8828_v63  ;;  %v2666_v40 = vmul.f32 %v2665_v43, %v8842_v4  ;;  %v2667_v41 = vmul.f32 %v2664_v27, %v8844_v11 }
0x10b4   :  { %v2685_v38 = vpack.c.bf16 %v2673_v30, %v2672_v47 }
0x10b6   :  { %6336 = vmatprep.mubr.msk.bf16.mxu0 %vm909_vm11, %v2685_v38 }
0x1123   :  { %v7655_v54 = vpop.permute.xlu0 %7654 }
0x1124   :  { %v7657_v39 = vunpack.i.h.bf16 %v7655_v54  ;;  %v7656_v8 = vunpack.i.l.bf16 %v7655_v54 }
0x1126   :  { %v2682_v5 = vsel %vm909_vm11, %v2666_v40, %v7656_v8  ;;  %v2683_v56 = vsel %vm909_vm11, %v2667_v41, %v7657_v39 }
0x1127   :  { %v2684_v53 = vpack.c.bf16 %v2683_v56, %v2682_v5  ;;  %v7744_v56 = vld [vmem:[#allocation2 + $0x1b0] sm:$0xff]  }
0x1129   :  { %2823 = vmatmul.mubr.bf16.vlgmr.msra.gmra.mrb[36].mxu0 %v2684_v53 }
0x112a   :  { %7405 = vmatpush3.bf16.msra.mxu0 %v8853_v29  ;;  %7065 = vmatprep.mubr.msk.f32.mxu0 %vm8144_vm0, %v8143_v0 }
0x112b   :  { %7406 = vmatprep.subr.bf16.mxu0 %v8146_v22 }
0x112e   :  { %7408 = vmatpush3.bf16.msra.mxu0 %v8857_v21 }
0x112f   :  { %7409 = vmatprep.subr.bf16.mxu0 %v8146_v22 }
0x1132   :  { %7411 = vmatpush3.bf16.msra.mxu0 %v8861_v37 }
0x1133   :  { %7412 = vmatprep.subr.bf16.mxu0 %v8146_v22 }
0x1136   :  { %7414 = vmatpush3.bf16.msra.mxu0 %v8865_v24 }
0x1137   :  { %3558 = vmatprep.subr.bf16.mxu0 %v8145_v62 }
0x11fc   :  { %v2824_v25 = vpop.f32.mrb[36].mxu0 }
0x11fd   :  { %v8946_v7 = vadd.f32 %v6323_v58, %v2824_v25  ;;  %v2826_v26 = vpop.f32.mrb[37].mxu0  ;;  %v7745_v25 = vld [vmem:[#allocation2 + $0x1b8] sm:$0xff]  }
0x11fe   :  { %v2827_v60 = vpop.f32.mrb[38].mxu0  ;;  %v7746_v26 = vld [vmem:[#allocation2 + $0x1c0] sm:$0xff]  }
0x11ff   :  { %v2833_v44 = vsel %vm909_vm11, %v8946_v7, 0.0  ;;  %v2840_v1 = vmul.f32 %v8946_v7, %v8946_v7  ;;  %v8952_v35 = vadd.f32 %v6323_v58, %v2827_v60  ;;  %v2829_v16 = vpop.f32.mrb[39].mxu0  ;;  %v7747_v60 = vld [vmem:[#allocation2 + $0x1c8] sm:$0xff]  }
0x1200   :  { %v2834_v18 = vrot.slane %v2833_v44, 4  ;;  %v7750_v16 = vld [vmem:[#allocation2 + $0x1e0] sm:$0xff]  }
0x1201   :  { %v2841_v10 = vsel %vm909_vm11, %v2840_v1, 0.0  ;;  %v2848_v42 = vsel %vm909_vm11, %v8952_v35, 0.0  ;;  %v2855_v17 = vmul.f32 %v8952_v35, %v8952_v35  ;;  %v7749_v1 = vld [vmem:[#allocation2 + $0x1d8] sm:$0xff]  }
0x1202   :  { %v2835_v12 = vadd.f32 %v2834_v18, %v2833_v44  ;;  %v2842_v20 = vrot.slane %v2841_v10, 4  ;;  %v2849_v36 = vrot.slane %v2848_v42, 4  ;;  %v7748_v44 = vld [vmem:[#allocation2 + $0x1d0] sm:$0xff]   ;;  %v7754_v18 = vld [vmem:[#allocation2 + $0x200] sm:$0xff]  }
0x1203   :  { %v2856_v32 = vsel %vm909_vm11, %v2855_v17, 0.0 }
0x1204   :  { %v2836_v14 = vrot.slane %v2835_v12, 2  ;;  %v2843_v15 = vadd.f32 %v2842_v20, %v2841_v10  ;;  %v2850_v9 = vadd.f32 %v2849_v36, %v2848_v42  ;;  %v2857_v28 = vrot.slane %v2856_v32, 4  ;;  %v7755_v10 = vld [vmem:[#allocation2 + $0x208] sm:$0xff]   ;;  %v7756_v42 = vld [vmem:[#allocation2 + $0x210] sm:$0xff]  }
0x1206   :  { %v2837_v23 = vadd.f32 %v2836_v14, %v2835_v12  ;;  %v2844_v51 = vrot.slane %v2843_v15, 2  ;;  %v2851_v50 = vrot.slane %v2850_v9, 2  ;;  %v2858_v3 = vadd.f32 %v2857_v28, %v2856_v32 }
0x1208   :  { %v2838_v31 = vrot.slane %v2837_v23, 1  ;;  %v2845_v48 = vadd.f32 %v2844_v51, %v2843_v15  ;;  %v2852_v27 = vadd.f32 %v2851_v50, %v2850_v9  ;;  %v2859_v43 = vrot.slane %v2858_v3, 2 }
0x120a   :  { %v2846_v47 = vrot.slane %v2845_v48, 1  ;;  %v2853_v30 = vrot.slane %v2852_v27, 1  ;;  %v2860_v38 = vadd.f32 %v2859_v43, %v2858_v3  ;;  %v2839_v54 = vadd.f32 %v2838_v31, %v2837_v23  ;;  %v2831_v3 = vld [vmem:[#allocation6 + $0xb0] sm:$0x1] }
0x120c   :  { %v2847_v39 = vadd.f32 %v2846_v47, %v2845_v48  ;;  %v2854_v8 = vadd.f32 %v2853_v30, %v2852_v27  ;;  %v2861_v40 = vrot.slane %v2860_v38, 1  ;;  %v2832_v47 = vld [vmem:[#allocation6 + $0xb8] sm:$0x1] }
0x120e   :  { %v2862_v41 = vadd.f32 %v2861_v40, %v2860_v38  ;;  %v2863_v5 = vsel %vm665_vm8, %v2839_v54, %v2847_v39 }
0x120f   :  { %v2864_v53 = vsel %vm667_vm9, %v2863_v5, %v2854_v8 }
0x1210   :  { %v2865_v58 = vsel %vm669_vm10, %v2864_v53, %v2862_v41 }
0x1211   :  { %7039 = vmatmul.mubr.msk.f32.vlgmr.msra.gmra.mrb[26].mxu1 %vm909_vm11, %v2865_v58 }
0x1212   :  { %7042 = vmatpush3.bf16.msra.mxu1 %v7744_v56  ;;  %7045 = vmatprep.mubr.msk.bf16.mxu1 %vm8144_vm0, %v8143_v0 }
0x1213   :  { %7043 = vmatprep.subr.bf16.mxu1 %v8143_v0 }
0x1216   :  { %7044 = vmatpush3.bf16.msra.mxu1 %v7745_v25 }
0x1217   :  { %3206 = vmatprep.subr.bf16.mxu1 %v8145_v62 }
0x1219   :  { %7046 = vmatmul.mubr.msk.bf16.vlgmr.msra.gmra.mrb[28].mxu1 %vm88_vm1, %v3004_v52  ;;  %v7753_v52 = vld [vmem:[#allocation2 + $0x1f8] sm:$0xff]  }
0x121a   :  { %3207 = vmatpush1.bf16.msra.mxu1 %v7746_v26 }
0x121b   :  { %3208 = vmatprep.subr.bf16.mxu1 %v8145_v62 }
0x121e   :  { %3209 = vmatpush1.bf16.msra.mxu1 %v7747_v60 }
0x121f   :  { %3210 = vmatprep.subr.bf16.mxu1 %v8145_v62 }
0x1222   :  { %3211 = vmatpush1.bf16.msra.mxu1 %v7748_v44 }
0x1223   :  { %3212 = vmatprep.subr.bf16.mxu1 %v8145_v62 }
0x1226   :  { %3213 = vmatpush1.bf16.msra.mxu1 %v7749_v1 }
0x1227   :  { %3214 = vmatprep.subr.bf16.mxu1 %v8145_v62 }
0x122a   :  { %3215 = vmatpush1.bf16.msra.mxu1 %v7750_v16 }
0x122b   :  { %3216 = vmatprep.subr.bf16.mxu1 %v8145_v62 }
0x122e   :  { %3217 = vmatpush1.bf16.msra.mxu1 %v7751_v13 }
0x122f   :  { %3218 = vmatprep.subr.bf16.mxu1 %v8145_v62 }
0x1232   :  { %3219 = vmatpush1.bf16.msra.mxu1 %v7752_v46 }
0x1233   :  { %3220 = vmatprep.subr.bf16.mxu1 %v8145_v62 }
0x1236   :  { %3221 = vmatpush1.bf16.msra.mxu1 %v7753_v52 }
0x1237   :  { %3222 = vmatprep.subr.bf16.mxu1 %v8145_v62 }
0x123a   :  { %3223 = vmatpush1.bf16.msra.mxu1 %v7754_v18 }
0x123b   :  { %3224 = vmatprep.subr.bf16.mxu1 %v8145_v62 }
0x123e   :  { %3225 = vmatpush1.bf16.msra.mxu1 %v7755_v10 }
0x123f   :  { %3226 = vmatprep.subr.bf16.mxu1 %v8145_v62 }
0x1242   :  { %3227 = vmatpush1.bf16.msra.mxu1 %v7756_v42 }
0x1243   :  { %3228 = vmatprep.subr.bf16.mxu1 %v8145_v62 }
0x12e4   :  { %v2935_v17 = vpop.f32.mrb[26].mxu1 }
0x12e5   :  { %v2939_v12 = vmul.f32 %v2935_v17, %v2935_v17  ;;  %v7040_v20 = vpop.f32.mrb[27].mxu1 }
0x12e7   :  { %v2941_v36 = vrot.slane %v2939_v12, 7 }
0x12e9   :  { %v2943_v32 = vsub.f32 %v2935_v17, %v2941_v36  ;;  %v6340_v36 = vld [vmem:[#allocation6 + $0xc8] ss:$0 sm:$0xff] }
0x12eb   :  { %v2944_v14 = vmax.f32 %v2943_v32, 0.0 }
0x12ec   :  { %v3063_v15 = vpop.f32.mrb[28].mxu1 }
0x12ed   :  { %v2945_v9 = vadd.f32 1e-05, %v2944_v14  ;;  %v7047_v28 = vpop.f32.mrb[29].mxu1 }
0x12ee   :  { %v3066_v23 = vpop.f32.mrb[30].mxu1 }
0x12ef   :  { %7976 = vrsqrt.f32 %v2945_v9  ;;  %v7048_v51 = vpop.f32.mrb[31].mxu1  ;;  %v7757_v9 = vld [vmem:[#allocation2 + $0x218] sm:$0xff]  }
0x12f0   :  { %v3064_v51 = vadd.f32 %v6340_v36, %v3063_v15  ;;  %3229 = vmatpush1.bf16.msra.mxu1 %v7757_v9 }
0x12f1   :  { %7415 = vmatprep.subr.bf16.mxu1 %v8146_v22 }
0x12f9   :  { %v7977_v50 = vpop.eup %7976 }
0x12fa   :  { %v2948_v31 = vrot.slane %v7977_v50, 1  ;;  %v2973_v48 = vrot.slane %v7977_v50, 3 }
0x12fc   :  { %v2950_v27 = vmul.f32 %v2948_v31, %v2831_v3  ;;  %v2975_v43 = vmul.f32 %v2973_v48, %v2831_v3 }
0x12fe   :  { %v2951_v30 = vmul.f32 %v2950_v27, %v2935_v17  ;;  %v2956_v38 = vrot.slane %v2950_v27, %v8431_v2  ;;  %v2977_v54 = vrot.slane %v2975_v43, 6  ;;  %v2987_v5 = vrot.slane %v2975_v43, %v8431_v2 }
0x12ff   :  { %v3067_v27 = vadd.f32 %v6340_v36, %v3066_v23 }
0x1300   :  { %v2952_v39 = vsub.f32 %v2832_v47, %v2951_v30  ;;  %v2979_v8 = vmul.f32 %v2977_v54, %v2935_v17  ;;  %v2957_v56 = vmul.f32 %v2956_v38, %v8946_v7  ;;  %v2988_v60 = vmul.f32 %v2987_v5, %v8952_v35 }
0x1302   :  { %v2961_v40 = vrot.slane %v2952_v39, %v8431_v2  ;;  %v2981_v41 = vrot.slane %v2979_v8, 2 }
0x1304   :  { %v2983_v53 = vsub.f32 %v2832_v47, %v2981_v41  ;;  %v2962_v58 = vadd.f32 %v2961_v40, %v2957_v56 }
0x1306   :  { %v2992_v25 = vrot.slane %v2983_v53, %v8431_v2  ;;  %v2963_v26 = vmin.f32 %v2962_v58, 20.0 }
0x1308   :  { %v2964_v44 = vmul.f32 1.442695, %v2963_v26  ;;  %v2993_v1 = vadd.f32 %v2992_v25, %v2988_v60 }
0x130a   :  { %7978 = vpow2.f32 %v2964_v44  ;;  %v2994_v16 = vmin.f32 %v2993_v1, 20.0 }
0x130c   :  { %v2995_v13 = vmul.f32 1.442695, %v2994_v16 }
0x130e   :  { %7980 = vpow2.f32 %v2995_v13 }
0x1314   :  { %v7979_v46 = vpop.eup %7978 }
0x1315   :  { %v2966_v52 = vadd.f32 1.0, %v7979_v46 }
0x1317   :  { %v2967_v18 = vmul.f32 %v2966_v52, %v2966_v52 }
0x1318   :  { %v7981_v10 = vpop.eup %7980 }
0x1319   :  { %v2970_v42 = vadd.f32 1.0, %v2967_v18  ;;  %v2997_v17 = vadd.f32 1.0, %v7981_v10  ;;  %v6338_v20 = vadd.f32 -1.0, %v2967_v18 }
0x131b   :  { %7982 = vrcp.f32 %v2970_v42  ;;  %v2998_v7 = vmul.f32 %v2997_v17, %v2997_v17  ;;  %v2969_v32 = vmul.f32 %v6338_v20, %v2962_v58 }
0x131d   :  { %v3001_v12 = vadd.f32 1.0, %v2998_v7  ;;  %v6339_v35 = vadd.f32 -1.0, %v2998_v7 }
0x131f   :  { %7984 = vrcp.f32 %v3001_v12  ;;  %v3000_v3 = vmul.f32 %v6339_v35, %v2993_v1 }
0x1325   :  { %v7983_v14 = vpop.eup %7982 }
0x1326   :  { %v2972_v28 = vmul.f32 %v7983_v14, %v2969_v32 }
0x1328   :  { %v8989_v50 = vadd.f32 %v3064_v51, %v2972_v28 }
0x1329   :  { %v7985_v31 = vpop.eup %7984 }
0x132a   :  { %v3003_v48 = vmul.f32 %v7985_v31, %v3000_v3  ;;  %v3084_v47 = vrot.slane %v8989_v50, 1  ;;  %v3078_v41 = vrot.slane %v8989_v50, 7 }
0x132c   :  { %v8992_v43 = vadd.f32 %v3067_v27, %v3003_v48 }
0x132e   :  { %v3085_v30 = vrot.slane %v8992_v43, 1  ;;  %v7658_v38 = vpack.i.bf16 %v8992_v43, %v8989_v50  ;;  %v3079_v40 = vrot.slane %v8992_v43, 7 }
0x1330   :  { %7659 = vrot.lane.b32.xlu1 %v7658_v38, %s8138_s4  ;;  %v3086_v15 = vsel %vm494_vm2, %v3084_v47, %v3085_v30  ;;  %v3087_v54 = vsel %vm494_vm2, %v3085_v30, %v3084_v47  ;;  %v3080_v5 = vsel %vm477_vm3, %v3078_v41, %v3079_v40  ;;  %v3081_v56 = vsel %vm477_vm3, %v3079_v40, %v3078_v41 }
0x1331   :  { %v3088_v39 = vmul.f32 %v3086_v15, %v8826_v6  ;;  %v3089_v23 = vmul.f32 %v3087_v54, %v8828_v63  ;;  %v3082_v6 = vmul.f32 %v3081_v56, %v8842_v4  ;;  %v3083_v63 = vmul.f32 %v3080_v5, %v8844_v11  ;;  %v6345_v4 = vld [vmem:[#allocation6 + $0xd0] ss:$0 sm:$0xff]  ;;  %v7758_v56 = vld [vmem:[#allocation2 + $0x220] sm:$0xff]  }
0x1333   :  { %v3101_v8 = vpack.c.bf16 %v3089_v23, %v3088_v39 }
0x1335   :  { %6358 = vmatprep.mubr.msk.bf16.mxu1 %vm909_vm11, %v3101_v8 }
0x13a2   :  { %v7660_v53 = vpop.permute.xlu1 %7659 }
0x13a3   :  { %v7662_v58 = vunpack.i.h.bf16 %v7660_v53  ;;  %v7661_v25 = vunpack.i.l.bf16 %v7660_v53  ;;  %v7759_v53 = vld [vmem:[#allocation2 + $0x228] sm:$0xff]  }
0x13a5   :  { %v3098_v26 = vsel %vm909_vm11, %v3082_v6, %v7661_v25  ;;  %v3099_v60 = vsel %vm909_vm11, %v3083_v63, %v7662_v58  ;;  %v7760_v58 = vld [vmem:[#allocation2 + $0x230] sm:$0xff]   ;;  %v7761_v25 = vld [vmem:[#allocation2 + $0x238] sm:$0xff]   ;;  %v7762_v6 = vld [vmem:[#allocation2 + $0x240] sm:$0xff]  }
0x13a6   :  { %v3100_v44 = vpack.c.bf16 %v3099_v60, %v3098_v26  ;;  %v7763_v63 = vld [vmem:[#allocation2 + $0x248] sm:$0xff]   ;;  %v7764_v26 = vld [vmem:[#allocation2 + $0x250] sm:$0xff]   ;;  %v7765_v60 = vld [vmem:[#allocation2 + $0x258] sm:$0xff]  }
0x13a8   :  { %3239 = vmatmul.mubr.bf16.vlgmr.msra.gmra.mrb[32].mxu1 %v3100_v44  ;;  %v7766_v44 = vld [vmem:[#allocation2 + $0x260] sm:$0xff]  }
0x13a9   :  { %7417 = vmatpush3.bf16.msra.mxu1 %v8853_v29  ;;  %7084 = vmatprep.mubr.msk.f32.mxu1 %vm8144_vm0, %v8143_v0 }
0x13aa   :  { %7418 = vmatprep.subr.bf16.mxu1 %v8146_v22 }
0x13ad   :  { %7420 = vmatpush3.bf16.msra.mxu1 %v8857_v21 }
0x13ae   :  { %7421 = vmatprep.subr.bf16.mxu1 %v8146_v22 }
0x13b1   :  { %7423 = vmatpush3.bf16.msra.mxu1 %v8861_v37 }
0x13b2   :  { %7424 = vmatprep.subr.bf16.mxu1 %v8146_v22 }
0x13b5   :  { %7426 = vmatpush3.bf16.msra.mxu1 %v8865_v24 }
0x147b   :  { %v3240_v11 = vpop.f32.mrb[32].mxu1 }
0x147c   :  { %v9025_v1 = vadd.f32 %v6345_v4, %v3240_v11  ;;  %v3242_v29 = vpop.f32.mrb[33].mxu1  ;;  %v7768_v11 = vld [vmem:[#allocation2 + $0x270] sm:$0xff]  }
0x147d   :  { %v3243_v16 = vpop.f32.mrb[34].mxu1 }
0x147e   :  { %v3249_v13 = vsel %vm909_vm11, %v9025_v1, 0.0  ;;  %v3256_v21 = vmul.f32 %v9025_v1, %v9025_v1  ;;  %v9031_v46 = vadd.f32 %v6345_v4, %v3243_v16  ;;  %v3245_v52 = vpop.f32.mrb[35].mxu1  ;;  %v7767_v4 = vld [vmem:[#allocation2 + $0x268] sm:$0xff]  }
0x147f   :  { %v3250_v37 = vrot.slane %v3249_v13, 4 }
0x1480   :  { %v3257_v18 = vsel %vm909_vm11, %v3256_v21, 0.0  ;;  %v3264_v24 = vsel %vm909_vm11, %v9031_v46, 0.0  ;;  %v3271_v10 = vmul.f32 %v9031_v46, %v9031_v46 }
0x1481   :  { %v3251_v42 = vadd.f32 %v3250_v37, %v3249_v13  ;;  %v3258_v17 = vrot.slane %v3257_v18, 4  ;;  %v3265_v7 = vrot.slane %v3264_v24, 4 }
0x1482   :  { %v3272_v12 = vsel %vm909_vm11, %v3271_v10, 0.0  ;;  %v3247_v10 = vld [vmem:[#allocation6 + $0xd8] sm:$0x1] }
0x1483   :  { %v3252_v20 = vrot.slane %v3251_v42, 2  ;;  %v3259_v36 = vadd.f32 %v3258_v17, %v3257_v18  ;;  %v3266_v32 = vadd.f32 %v3265_v7, %v3264_v24  ;;  %v3273_v35 = vrot.slane %v3272_v12, 4 }
0x1485   :  { %v3253_v14 = vadd.f32 %v3252_v20, %v3251_v42  ;;  %v3260_v9 = vrot.slane %v3259_v36, 2  ;;  %v3267_v28 = vrot.slane %v3266_v32, 2  ;;  %v3274_v51 = vadd.f32 %v3273_v35, %v3272_v12  ;;  %v3248_v20 = vld [vmem:[#allocation6 + $0xe0] sm:$0x1] }
0x1487   :  { %v3254_v3 = vrot.slane %v3253_v14, 1  ;;  %v3261_v31 = vadd.f32 %v3260_v9, %v3259_v36  ;;  %v3268_v48 = vadd.f32 %v3267_v28, %v3266_v32  ;;  %v3275_v27 = vrot.slane %v3274_v51, 2 }
0x1489   :  { %v3262_v47 = vrot.slane %v3261_v31, 1  ;;  %v3269_v30 = vrot.slane %v3268_v48, 1  ;;  %v3276_v38 = vadd.f32 %v3275_v27, %v3274_v51  ;;  %v3255_v15 = vadd.f32 %v3254_v3, %v3253_v14 }
0x148b   :  { %v3263_v54 = vadd.f32 %v3262_v47, %v3261_v31  ;;  %v3270_v39 = vadd.f32 %v3269_v30, %v3268_v48  ;;  %v3277_v23 = vrot.slane %v3276_v38, 1 }
0x148d   :  { %v3278_v8 = vadd.f32 %v3277_v23, %v3276_v38  ;;  %v3279_v40 = vsel %vm665_vm8, %v3255_v15, %v3263_v54 }
0x148e   :  { %v3280_v41 = vsel %vm667_vm9, %v3279_v40, %v3270_v39 }
0x148f   :  { %v3281_v5 = vsel %vm669_vm10, %v3280_v41, %v3278_v8 }
0x1490   :  { %7066 = vmatmul.mubr.msk.f32.vlgmr.msra.gmra.mrb[26].mxu0 %vm909_vm11, %v3281_v5 }
0x1491   :  { %3559 = vmatpush1.bf16.msra.mxu0 %v7758_v56 }
0x1492   :  { %3560 = vmatprep.subr.bf16.mxu0 %v8145_v62 }
0x1495   :  { %3561 = vmatpush1.bf16.msra.mxu0 %v7759_v53 }
0x1496   :  { %3562 = vmatprep.subr.bf16.mxu0 %v8145_v62 }
0x1499   :  { %3563 = vmatpush1.bf16.msra.mxu0 %v7760_v58 }
0x149a   :  { %3564 = vmatprep.subr.bf16.mxu0 %v8145_v62 }
0x149d   :  { %3565 = vmatpush1.bf16.msra.mxu0 %v7761_v25 }
0x149e   :  { %3566 = vmatprep.subr.bf16.mxu0 %v8145_v62 }
0x14a1   :  { %3567 = vmatpush1.bf16.msra.mxu0 %v7762_v6 }
0x14a2   :  { %3568 = vmatprep.subr.bf16.mxu0 %v8145_v62 }
0x14a5   :  { %3569 = vmatpush1.bf16.msra.mxu0 %v7763_v63 }
0x14a6   :  { %3570 = vmatprep.subr.bf16.mxu0 %v8145_v62 }
0x14a9   :  { %3571 = vmatpush1.bf16.msra.mxu0 %v7764_v26  ;;  %v7769_v26 = vld [vmem:[#allocation2 + $0x278] sm:$0xff]  }
0x14aa   :  { %3572 = vmatprep.subr.bf16.mxu0 %v8145_v62 }
0x14ad   :  { %3573 = vmatpush1.bf16.msra.mxu0 %v7765_v60  ;;  %v3392_v60 = vrot.slane %v8379_v45, %v8431_v2 }
0x14ae   :  { %3574 = vmatprep.subr.bf16.mxu0 %v8145_v62 }
0x14b1   :  { %3575 = vmatpush1.bf16.msra.mxu0 %v7766_v44 }
0x14b2   :  { %3576 = vmatprep.subr.bf16.mxu0 %v8145_v62 }
0x14b5   :  { %3577 = vmatpush1.bf16.msra.mxu0 %v7767_v4 }
0x14b6   :  { %3578 = vmatprep.subr.bf16.mxu0 %v8145_v62 }
0x14b9   :  { %3579 = vmatpush1.bf16.msra.mxu0 %v7768_v11 }
0x14ba   :  { %3580 = vmatprep.subr.bf16.mxu0 %v8145_v62 }
0x14bd   :  { %3581 = vmatpush1.bf16.msra.mxu0 %v7769_v26 }
0x14be   :  { %4141 = vmatprep.subr.bf16.mxu0 %v8145_v62 }
0x1563   :  { %v3351_v29 = vpop.f32.mrb[26].mxu0 }
0x1564   :  { %v3355_v16 = vmul.f32 %v3351_v29, %v3351_v29  ;;  %v7067_v13 = vpop.f32.mrb[27].mxu0 }
0x1566   :  { %v3357_v21 = vrot.slane %v3355_v16, 7 }
0x1568   :  { %v3359_v52 = vsub.f32 %v3351_v29, %v3357_v21 }
0x156a   :  { %v3360_v37 = vmax.f32 %v3359_v52, 0.0 }
0x156c   :  { %v3361_v18 = vadd.f32 1e-05, %v3360_v37 }
0x156e   :  { %7986 = vrsqrt.f32 %v3361_v18 }
0x1578   :  { %v7987_v24 = vpop.eup %7986 }
0x1579   :  { %v3364_v42 = vrot.slane %v7987_v24, 1  ;;  %v3394_v17 = vrot.slane %v7987_v24, 3 }
0x157b   :  { %v3366_v7 = vmul.f32 %v3364_v42, %v3247_v10  ;;  %v3396_v12 = vmul.f32 %v3394_v17, %v3247_v10 }
0x157d   :  { %v3367_v36 = vmul.f32 %v3366_v7, %v3351_v29  ;;  %v3372_v32 = vrot.slane %v3366_v7, %v8431_v2  ;;  %v3398_v35 = vrot.slane %v3396_v12, 6  ;;  %v3408_v31 = vrot.slane %v3396_v12, %v8431_v2  ;;  %v9078_v12 = vld [vmem:[#allocation6 + $0x1f0] sm:$0xff] }
0x157f   :  { %v3368_v14 = vsub.f32 %v3248_v20, %v3367_v36  ;;  %v3400_v9 = vmul.f32 %v3398_v35, %v3351_v29  ;;  %v3373_v28 = vmul.f32 %v3372_v32, %v9025_v1  ;;  %v3409_v30 = vmul.f32 %v3408_v31, %v9031_v46 }
0x1581   :  { %v3377_v51 = vrot.slane %v3368_v14, %v8431_v2  ;;  %v3402_v3 = vrot.slane %v3400_v9, 2  ;;  %v9082_v9 = vld [vmem:[#allocation6 + $0x1d8] sm:$0xff] }
0x1583   :  { %v3378_v48 = vadd.f32 %v3377_v51, %v3373_v28  ;;  %v3404_v27 = vsub.f32 %v3248_v20, %v3402_v3  ;;  %v9085_v51 = vld [vmem:[#allocation6 + $0x1e0] sm:$0xff] }
0x1585   :  { %v3379_v47 = vmin.f32 %v3378_v48, 20.0  ;;  %v3413_v38 = vrot.slane %v3404_v27, %v8431_v2 }
0x1587   :  { %v3380_v15 = vmul.f32 1.442695, %v3379_v47  ;;  %v3414_v54 = vadd.f32 %v3413_v38, %v3409_v30  ;;  %v6362_v47 = vld [vmem:[#allocation6 + $0xe8] ss:$0 sm:$0xff] }
0x1589   :  { %7988 = vpow2.f32 %v3380_v15  ;;  %v3415_v39 = vmin.f32 %v3414_v54, 20.0 }
0x158b   :  { %v3416_v23 = vmul.f32 1.442695, %v3415_v39 }
0x158d   :  { %7990 = vpow2.f32 %v3416_v23 }
0x1593   :  { %v7989_v8 = vpop.eup %7988 }
0x1594   :  { %v3382_v1 = vadd.f32 1.0, %v7989_v8 }
0x1596   :  { %v3383_v40 = vmul.f32 %v3382_v1, %v3382_v1 }
0x1597   :  { %v7991_v41 = vpop.eup %7990 }
0x1598   :  { %v3386_v5 = vadd.f32 1.0, %v3383_v40  ;;  %v3418_v56 = vadd.f32 1.0, %v7991_v41  ;;  %v6360_v25 = vadd.f32 -1.0, %v3383_v40 }
0x159a   :  { %7992 = vrcp.f32 %v3386_v5  ;;  %v3419_v53 = vmul.f32 %v3418_v56, %v3418_v56  ;;  %v3385_v46 = vmul.f32 %v6360_v25, %v3378_v48 }
0x159c   :  { %v3422_v58 = vadd.f32 1.0, %v3419_v53  ;;  %v6361_v6 = vadd.f32 -1.0, %v3419_v53 }
0x159e   :  { %7994 = vrcp.f32 %v3422_v58  ;;  %v3421_v11 = vmul.f32 %v6361_v6, %v3414_v54 }
0x15a4   :  { %v7993_v63 = vpop.eup %7992 }
0x15a5   :  { %v3388_v44 = vmul.f32 %v7993_v63, %v3385_v46 }
0x15a7   :  { %v3393_v4 = vadd.f32 %v3392_v60, %v3388_v44 }
0x15a8   :  { %v7995_v29 = vpop.eup %7994 }
0x15a9   :  { %v3424_v16 = vmul.f32 %v7995_v29, %v3421_v11  ;;  %v3430_v21 = vrot.slane %v3393_v4, 7  ;;  %v3436_v24 = vrot.slane %v3393_v4, 1 }
0x15ab   :  { %v3429_v13 = vadd.f32 %v3428_v49, %v3424_v16  ;;  %v9075_v49 = vld [vmem:[#allocation6 + $0x1e8] sm:$0xff] }
0x15ad   :  { %v3431_v52 = vrot.slane %v3429_v13, 7  ;;  %v3437_v37 = vrot.slane %v3429_v13, 1  ;;  %v7663_v18 = vpack.i.bf16 %v3429_v13, %v3393_v4 }
0x15af   :  { %7664 = vrot.lane.b32.xlu0 %v7663_v18, %s8138_s4  ;;  %v3438_v10 = vsel %vm494_vm2, %v3436_v24, %v3437_v37  ;;  %v3439_v42 = vsel %vm494_vm2, %v3437_v37, %v3436_v24  ;;  %v3432_v17 = vsel %vm477_vm3, %v3430_v21, %v3431_v52  ;;  %v3433_v45 = vsel %vm477_vm3, %v3431_v52, %v3430_v21 }
0x15b0   :  { %v3440_v7 = vmul.f32 %v9075_v49, %v3438_v10  ;;  %v3441_v20 = vmul.f32 %v9078_v12, %v3439_v42  ;;  %v3434_v28 = vmul.f32 %v9082_v9, %v3433_v45  ;;  %v3435_v3 = vmul.f32 %v9085_v51, %v3432_v17 }
0x15b2   :  { %v3453_v36 = vpack.c.bf16 %v3441_v20, %v3440_v7 }
0x15b4   :  { %6375 = vmatprep.mubr.msk.bf16.mxu0 %vm909_vm11, %v3453_v36 }
0x1621   :  { %v7665_v32 = vpop.permute.xlu0 %7664 }
0x1622   :  { %v7667_v35 = vunpack.i.h.bf16 %v7665_v32  ;;  %v7666_v14 = vunpack.i.l.bf16 %v7665_v32 }
0x1624   :  { %v3450_v31 = vsel %vm909_vm11, %v3434_v28, %v7666_v14  ;;  %v3451_v48 = vsel %vm909_vm11, %v3435_v3, %v7667_v35 }
0x1625   :  { %v3452_v27 = vpack.c.bf16 %v3451_v48, %v3450_v31 }
0x1627   :  { %3591 = vmatmul.mubr.bf16.vlgmr.msra.gmra.mrb[40].mxu0 %v3452_v27 }
0x16fa   :  { %v3592_v30 = vpop.f32.mrb[40].mxu0 }
0x16fb   :  { %v3593_v38 = vadd.f32 %v6362_v47, %v3592_v30  ;;  %v3594_v15 = vpop.f32.mrb[41].mxu0  ;;  %v3599_v30 = vld [vmem:[#allocation6 + $0xf0] sm:$0x1] }
0x16fc   :  { %v3595_v54 = vpop.f32.mrb[42].mxu0 }
0x16fd   :  { %v3601_v39 = vsel %vm909_vm11, %v3593_v38, 0.0  ;;  %v3608_v23 = vmul.f32 %v3593_v38, %v3593_v38  ;;  %v3596_v8 = vadd.f32 %v6362_v47, %v3595_v54  ;;  %v3597_v1 = vpop.f32.mrb[43].mxu0 }
0x16fe   :  { %v3602_v40 = vrot.slane %v3601_v39, 4  ;;  %v3600_v1 = vld [vmem:[#allocation6 + $0xf8] sm:$0x1] }
0x16ff   :  { %v3609_v41 = vsel %vm909_vm11, %v3608_v23, 0.0  ;;  %v3616_v5 = vsel %vm909_vm11, %v3596_v8, 0.0  ;;  %v3623_v56 = vmul.f32 %v3596_v8, %v3596_v8 }
0x1700   :  { %v3603_v53 = vadd.f32 %v3602_v40, %v3601_v39  ;;  %v3610_v58 = vrot.slane %v3609_v41, 4  ;;  %v3617_v25 = vrot.slane %v3616_v5, 4 }
0x1701   :  { %v3624_v46 = vsel %vm909_vm11, %v3623_v56, 0.0 }
0x1702   :  { %v3604_v6 = vrot.slane %v3603_v53, 2  ;;  %v3611_v63 = vadd.f32 %v3610_v58, %v3609_v41  ;;  %v3618_v26 = vadd.f32 %v3617_v25, %v3616_v5  ;;  %v3625_v60 = vrot.slane %v3624_v46, 4 }
0x1704   :  { %v3605_v44 = vadd.f32 %v3604_v6, %v3603_v53  ;;  %v3612_v4 = vrot.slane %v3611_v63, 2  ;;  %v3619_v11 = vrot.slane %v3618_v26, 2  ;;  %v3626_v29 = vadd.f32 %v3625_v60, %v3624_v46 }
0x1706   :  { %v3606_v16 = vrot.slane %v3605_v44, 1  ;;  %v3613_v13 = vadd.f32 %v3612_v4, %v3611_v63  ;;  %v3620_v21 = vadd.f32 %v3619_v11, %v3618_v26  ;;  %v3627_v52 = vrot.slane %v3626_v29, 2 }
0x1708   :  { %v3614_v37 = vrot.slane %v3613_v13, 1  ;;  %v3621_v18 = vrot.slane %v3620_v21, 1  ;;  %v3628_v24 = vadd.f32 %v3627_v52, %v3626_v29  ;;  %v3607_v10 = vadd.f32 %v3606_v16, %v3605_v44 }
0x170a   :  { %v3615_v42 = vadd.f32 %v3614_v37, %v3613_v13  ;;  %v3622_v17 = vadd.f32 %v3621_v18, %v3620_v21  ;;  %v3629_v45 = vrot.slane %v3628_v24, 1 }
0x170c   :  { %v3630_v7 = vadd.f32 %v3629_v45, %v3628_v24  ;;  %v3631_v20 = vsel %vm665_vm8, %v3607_v10, %v3615_v42 }
0x170d   :  { %v3632_v36 = vsel %vm667_vm9, %v3631_v20, %v3622_v17 }
0x170e   :  { %v3633_v32 = vsel %vm669_vm10, %v3632_v36, %v3630_v7 }
0x170f   :  { %7085 = vmatmul.mubr.msk.f32.vlgmr.msra.gmra.mrb[36].mxu1 %vm909_vm11, %v3633_v32 }
0x1710   :  { %3865 = vmatprep.mubr.f32.mxu1 %v8143_v0 }
0x17e2   :  { %v3703_v35 = vpop.f32.mrb[36].mxu1 }
0x17e3   :  { %v3707_v14 = vmul.f32 %v3703_v35, %v3703_v35  ;;  %v7086_v28 = vpop.f32.mrb[37].mxu1 }
0x17e5   :  { %v3709_v3 = vrot.slane %v3707_v14, 7 }
0x17e7   :  { %v3711_v31 = vsub.f32 %v3703_v35, %v3709_v3 }
0x17e9   :  { %v3712_v48 = vmax.f32 %v3711_v31, 0.0 }
0x17eb   :  { %v3713_v27 = vadd.f32 1e-05, %v3712_v48 }
0x17ed   :  { %7996 = vrsqrt.f32 %v3713_v27 }
0x17f7   :  { %v7997_v47 = vpop.eup %7996 }
0x17f8   :  { %v3716_v15 = vrot.slane %v7997_v47, 1  ;;  %v3741_v54 = vrot.slane %v7997_v47, 3 }
0x17fa   :  { %v3718_v39 = vmul.f32 %v3716_v15, %v3599_v30  ;;  %v3743_v23 = vmul.f32 %v3741_v54, %v3599_v30 }
0x17fc   :  { %v3719_v40 = vmul.f32 %v3718_v39, %v3703_v35  ;;  %v3724_v41 = vrot.slane %v3718_v39, %v8431_v2  ;;  %v3745_v5 = vrot.slane %v3743_v23, 6  ;;  %v3755_v6 = vrot.slane %v3743_v23, %v8431_v2 }
0x17fe   :  { %v3720_v56 = vsub.f32 %v3600_v1, %v3719_v40  ;;  %v3747_v53 = vmul.f32 %v3745_v5, %v3703_v35  ;;  %v3725_v58 = vmul.f32 %v3724_v41, %v3593_v38  ;;  %v3756_v44 = vmul.f32 %v3755_v6, %v3596_v8  ;;  %v7775_v6 = vld [vmem:[#allocation2 + $0x2a8] sm:$0xff]  }
0x1800   :  { %v3729_v25 = vrot.slane %v3720_v56, %v8431_v2  ;;  %v3749_v46 = vrot.slane %v3747_v53, 2 }
0x1802   :  { %v3730_v63 = vadd.f32 %v3729_v25, %v3725_v58  ;;  %v3751_v26 = vsub.f32 %v3600_v1, %v3749_v46  ;;  %v7774_v46 = vld [vmem:[#allocation2 + $0x2a0] sm:$0xff]  }
0x1804   :  { %v3731_v60 = vmin.f32 %v3730_v63, 20.0  ;;  %v3760_v4 = vrot.slane %v3751_v26, %v8431_v2  ;;  %v7777_v26 = vld [vmem:[#allocation2 + $0x2b8] sm:$0xff]  }
0x1806   :  { %v3732_v11 = vmul.f32 1.442695, %v3731_v60  ;;  %v3761_v29 = vadd.f32 %v3760_v4, %v3756_v44  ;;  %v7778_v60 = vld [vmem:[#allocation2 + $0x2c0] sm:$0xff]   ;;  %v7779_v44 = vld [vmem:[#allocation2 + $0x2c8] sm:$0xff]   ;;  %v7780_v4 = vld [vmem:[#allocation2 + $0x2d0] sm:$0xff]  }
0x1808   :  { %7998 = vpow2.f32 %v3732_v11  ;;  %v3762_v16 = vmin.f32 %v3761_v29, 20.0  ;;  %v7781_v11 = vld [vmem:[#allocation2 + $0x2d8] sm:$0xff]  }
0x180a   :  { %v3763_v13 = vmul.f32 1.442695, %v3762_v16 }
0x180c   :  { %8000 = vpow2.f32 %v3763_v13 }
0x1812   :  { %v7999_v21 = vpop.eup %7998 }
0x1813   :  { %v3734_v52 = vadd.f32 1.0, %v7999_v21 }
0x1815   :  { %v3735_v38 = vmul.f32 %v3734_v52, %v3734_v52  ;;  %v7782_v52 = vld [vmem:[#allocation2 + $0x2e0] sm:$0xff]  }
0x1816   :  { %v8001_v37 = vpop.eup %8000  ;;  %4142 = vmatpush1.bf16.msra.mxu0 %v7782_v52 }
0x1817   :  { %v3738_v18 = vadd.f32 1.0, %v3735_v38  ;;  %v3765_v24 = vadd.f32 1.0, %v8001_v37  ;;  %v6377_v17 = vadd.f32 -1.0, %v3735_v38  ;;  %v7783_v38 = vld [vmem:[#allocation2 + $0x2e8] sm:$0xff]   ;;  %4143 = vmatprep.subr.bf16.mxu0 %v8145_v62  ;;  %v7784_v37 = vld [vmem:[#allocation2 + $0x2f0] sm:$0xff]  }
0x1819   :  { %8002 = vrcp.f32 %v3738_v18  ;;  %v3766_v10 = vmul.f32 %v3765_v24, %v3765_v24  ;;  %v3737_v8 = vmul.f32 %v6377_v17, %v3730_v63  ;;  %v7776_v63 = vld [vmem:[#allocation2 + $0x2b0] sm:$0xff]   ;;  %v7785_v18 = vld [vmem:[#allocation2 + $0x2f8] sm:$0xff]   ;;  %v7786_v24 = vld [vmem:[#allocation2 + $0x300] sm:$0xff]  }
0x181a   :  { %4144 = vmatpush1.bf16.msra.mxu0 %v7783_v38  ;;  %v7789_v17 = vld [vmem:[#allocation2 + $0x318] sm:$0xff]  }
0x181b   :  { %v3769_v42 = vadd.f32 1.0, %v3766_v10  ;;  %v6378_v45 = vadd.f32 -1.0, %v3766_v10  ;;  %4145 = vmatprep.subr.bf16.mxu0 %v8145_v62  ;;  %v7787_v10 = vld [vmem:[#allocation2 + $0x308] sm:$0xff]  }
0x181d   :  { %8004 = vrcp.f32 %v3769_v42  ;;  %v3768_v36 = vmul.f32 %v6378_v45, %v3761_v29  ;;  %v7788_v42 = vld [vmem:[#allocation2 + $0x310] sm:$0xff]   ;;  %v7791_v45 = vld [vmem:[#allocation2 + $0x328] sm:$0xff]  }
0x181e   :  { %4146 = vmatpush1.bf16.msra.mxu0 %v7784_v37 }
0x181f   :  { %4147 = vmatprep.subr.bf16.mxu0 %v8145_v62 }
0x1822   :  { %4148 = vmatpush1.bf16.msra.mxu0 %v7785_v18 }
0x1823   :  { %v8003_v7 = vpop.eup %8002  ;;  %4149 = vmatprep.subr.bf16.mxu0 %v8145_v62 }
0x1824   :  { %v3740_v20 = vmul.f32 %v8003_v7, %v3737_v8  ;;  %v7790_v8 = vld [vmem:[#allocation2 + $0x320] sm:$0xff]   ;;  %v7792_v7 = vld [vmem:[#allocation2 + $0x330] sm:$0xff]  }
0x1826   :  { %v3772_v35 = vadd.f32 %v3740_v20, %v8989_v50  ;;  %4150 = vmatpush1.bf16.msra.mxu0 %v7786_v24  ;;  %v7793_v20 = vld [vmem:[#allocation2 + $0x338] sm:$0xff]  }
0x1827   :  { %v8005_v32 = vpop.eup %8004  ;;  %4151 = vmatprep.subr.bf16.mxu0 %v8145_v62 }
0x1828   :  { %v3771_v14 = vmul.f32 %v8005_v32, %v3768_v36  ;;  %v3774_v3 = vrot.slane %v3772_v35, 7  ;;  %v3780_v47 = vrot.slane %v3772_v35, 1  ;;  %v4222_v36 = vld [vmem:[#allocation6 + $0x280] sm:$0xff]  ;;  %v4223_v32 = vld [vmem:[#allocation6 + $0x288] sm:$0xff] }
0x182a   :  { %v3773_v28 = vadd.f32 %v3771_v14, %v8992_v43  ;;  %4152 = vmatpush1.bf16.msra.mxu0 %v7787_v10  ;;  %v9147_v14 = vpack.c.bf16 %v4223_v32, %v4222_v36 }
0x182b   :  { %4153 = vmatprep.subr.bf16.mxu0 %v8145_v62 }
0x182c   :  { %v3775_v31 = vrot.slane %v3773_v28, 7  ;;  %v3781_v48 = vrot.slane %v3773_v28, 1  ;;  %v7668_v27 = vpack.i.bf16 %v3773_v28, %v3772_v35  ;;  %v4224_v35 = vld [vmem:[#allocation6 + $0x290] sm:$0xff]  ;;  %v4225_v28 = vld [vmem:[#allocation6 + $0x298] sm:$0xff] }
0x182e   :  { %7669 = vrot.lane.b32.xlu1 %v7668_v27, %s8138_s4  ;;  %v3782_v30 = vsel %vm494_vm2, %v3780_v47, %v3781_v48  ;;  %v3783_v15 = vsel %vm494_vm2, %v3781_v48, %v3780_v47  ;;  %v3776_v54 = vsel %vm477_vm3, %v3774_v3, %v3775_v31  ;;  %v3777_v50 = vsel %vm477_vm3, %v3775_v31, %v3774_v3  ;;  %v4226_v31 = vld [vmem:[#allocation6 + $0x2a0] sm:$0xff]  ;;  %v4227_v48 = vld [vmem:[#allocation6 + $0x2a8] sm:$0xff] }
0x182f   :  { %v3784_v43 = vmul.f32 %v9075_v49, %v3782_v30  ;;  %v3785_v39 = vmul.f32 %v9078_v12, %v3783_v15  ;;  %v3778_v5 = vmul.f32 %v9082_v9, %v3777_v50  ;;  %v3779_v56 = vmul.f32 %v9085_v51, %v3776_v54  ;;  %v7770_v49 = vld [vmem:[#allocation2 + $0x280] sm:$0xff]   ;;  %v7771_v12 = vld [vmem:[#allocation2 + $0x288] sm:$0xff]   ;;  %v7772_v9 = vld [vmem:[#allocation2 + $0x290] sm:$0xff]   ;;  %4154 = vmatpush1.bf16.msra.mxu0 %v7788_v42 }
0x1830   :  { %v7773_v51 = vld [vmem:[#allocation2 + $0x298] sm:$0xff]   ;;  %4155 = vmatprep.subr.bf16.mxu0 %v8145_v62  ;;  %v9150_v3 = vpack.c.bf16 %v4225_v28, %v4224_v35  ;;  %v6380_v27 = vld [vmem:[#allocation6 + $0x108] ss:$0 sm:$0xff]  ;;  %v9159_v50 = vld [vmem:[#allocation6 + $0x200] sm:$0xff] }
0x1831   :  { %v7427_v23 = vpack.c.bf16 %v3785_v39, %v3784_v43 }
0x1833   :  { %7428 = vmatprep.subr.bf16.mxu1 %v7427_v23  ;;  %4156 = vmatpush1.bf16.msra.mxu0 %v7789_v17 }
0x1834   :  { %4157 = vmatprep.subr.bf16.mxu0 %v8145_v62 }
0x1837   :  { %4158 = vmatpush1.bf16.msra.mxu0 %v7790_v8 }
0x1838   :  { %4159 = vmatprep.subr.bf16.mxu0 %v8145_v62 }
0x183b   :  { %4160 = vmatpush1.bf16.msra.mxu0 %v7791_v45 }
0x183c   :  { %4161 = vmatprep.subr.bf16.mxu0 %v8145_v62 }
0x183f   :  { %4162 = vmatpush1.bf16.msra.mxu0 %v7792_v7 }
0x1840   :  { %4163 = vmatprep.subr.bf16.mxu0 %v8145_v62 }
0x1843   :  { %4164 = vmatpush1.bf16.msra.mxu0 %v7793_v20 }
0x18a0   :  { %v7670_v1 = vpop.permute.xlu1 %7669 }
0x18a1   :  { %v7672_v40 = vunpack.i.h.bf16 %v7670_v1  ;;  %v7671_v41 = vunpack.i.l.bf16 %v7670_v1 }
0x18a3   :  { %v3794_v53 = vsel %vm909_vm11, %v3778_v5, %v7671_v41  ;;  %v3795_v58 = vsel %vm909_vm11, %v3779_v56, %v7672_v40  ;;  %v9169_v41 = vld [vmem:[#allocation6 + $0x1f8] sm:$0xff] }
0x18a4   :  { %v7429_v25 = vpack.c.bf16 %v3795_v58, %v3794_v53 }
0x18a6   :  { %7430 = vmatpush1.bf16.msra.mxu1 %v7429_v25  ;;  %v4228_v25 = vld [vmem:[#allocation6 + $0x2b0] sm:$0xff] }
0x18a7   :  { %3978 = vmatprep.subr.bf16.mxu1 %v8145_v62 }
0x18a9   :  { %6379 = vmatmul.mubr.msk.f32.vlgmr.msra.gmra.mrb[38].mxu1 %vm3797_vm13, %v3796_v19  ;;  %v4229_v19 = vld [vmem:[#allocation6 + $0x2b8] sm:$0xff] }
0x18aa   :  { %3979 = vmatpush1.bf16.msra.mxu1 %v7770_v49  ;;  %v9173_v49 = vpack.c.bf16 %v4229_v19, %v4228_v25 }
0x18ab   :  { %3980 = vmatprep.subr.bf16.mxu1 %v8145_v62 }
0x18ae   :  { %3981 = vmatpush1.bf16.msra.mxu1 %v7771_v12  ;;  %v4230_v12 = vld [vmem:[#allocation6 + $0x2c0] sm:$0xff] }
0x18af   :  { %3982 = vmatprep.subr.bf16.mxu1 %v8145_v62 }
0x18b2   :  { %3983 = vmatpush1.bf16.msra.mxu1 %v7772_v9  ;;  %v4231_v9 = vld [vmem:[#allocation6 + $0x2c8] sm:$0xff] }
0x18b3   :  { %3984 = vmatprep.subr.bf16.mxu1 %v8145_v62 }
0x18b6   :  { %3985 = vmatpush1.bf16.msra.mxu1 %v7773_v51  ;;  %v9177_v51 = vpack.c.bf16 %v4231_v9, %v4230_v12 }
0x18b7   :  { %3986 = vmatprep.subr.bf16.mxu1 %v8145_v62 }
0x18ba   :  { %3987 = vmatpush1.bf16.msra.mxu1 %v7774_v46  ;;  %v4232_v46 = vld [vmem:[#allocation6 + $0x2d0] sm:$0xff] }
0x18bb   :  { %3988 = vmatprep.subr.bf16.mxu1 %v8145_v62 }
0x18be   :  { %3989 = vmatpush1.bf16.msra.mxu1 %v7775_v6  ;;  %v4233_v6 = vld [vmem:[#allocation6 + $0x2d8] sm:$0xff] }
0x18bf   :  { %3990 = vmatprep.subr.bf16.mxu1 %v8145_v62 }
0x18c2   :  { %3991 = vmatpush1.bf16.msra.mxu1 %v7776_v63  ;;  %v9181_v63 = vpack.c.bf16 %v4233_v6, %v4232_v46 }
0x18c3   :  { %3992 = vmatprep.subr.bf16.mxu1 %v8145_v62 }
0x18c6   :  { %3993 = vmatpush1.bf16.msra.mxu1 %v7777_v26  ;;  %v4234_v26 = vld [vmem:[#allocation6 + $0x2e0] sm:$0xff] }
0x18c7   :  { %3994 = vmatprep.subr.bf16.mxu1 %v8145_v62 }
0x18ca   :  { %3995 = vmatpush1.bf16.msra.mxu1 %v7778_v60  ;;  %v4235_v60 = vld [vmem:[#allocation6 + $0x2e8] sm:$0xff] }
0x18cb   :  { %3996 = vmatprep.subr.bf16.mxu1 %v8145_v62 }
0x18ce   :  { %3997 = vmatpush1.bf16.msra.mxu1 %v7779_v44  ;;  %v9184_v44 = vpack.c.bf16 %v4235_v60, %v4234_v26  ;;  %v7794_v26 = vld [vmem:[#allocation2 + $0x380] sm:$0xff]  }
0x18cf   :  { %3998 = vmatprep.subr.bf16.mxu1 %v8145_v62  ;;  %v7795_v60 = vld [vmem:[#allocation2 + $0x3c0] sm:$0xff]   ;;  %6659 = vmatprep.subr.bf16.mxu0 %v7794_v26 }
0x18d2   :  { %3999 = vmatpush1.bf16.msra.mxu1 %v7780_v4  ;;  %v4236_v4 = vld [vmem:[#allocation6 + $0x2f0] sm:$0xff] }
0x18d3   :  { %4000 = vmatprep.subr.bf16.mxu1 %v8145_v62  ;;  %v9154_v62 = vpack.c.bf16 %v4227_v48, %v4226_v31 }
0x18d6   :  { %4001 = vmatpush1.bf16.msra.mxu1 %v7781_v11  ;;  %v4237_v11 = vld [vmem:[#allocation6 + $0x2f8] sm:$0xff] }
0x18d7   :  { %7431 = vmatprep.subr.bf16.mxu1 %v8146_v22 }
0x197c   :  { %v3867_v29 = vpop.f32.mrb[38].mxu1 }
0x197d   :  { %v3869_v16 = vpop.f32.mrb[39].mxu1  ;;  %v3872_v21 = vpack.c.bf16 %v3867_v29, %v3867_v29  ;;  %v9188_v29 = vpack.c.bf16 %v4237_v11, %v4236_v4  ;;  %v7796_v4 = vld [vmem:[#allocation2 + $0x340] sm:$0xff]   ;;  %v7797_v11 = vld [vmem:[#allocation2 + $0x388] sm:$0xff]  }
0x197e   :  { %v3873_v13 = vpack.c.bf16 %v3869_v16, %v3869_v16  ;;  %v6395_v16 = vld [vmem:[#allocation6 + $0x110] ss:$0 sm:$0xff] }
0x1980   :  { %6393 = vmatprep.mubr.msk.bf16.mxu1 %vm909_vm11, %v3873_v13 }
0x1981   :  { %4011 = vmatmul.mubr.bf16.vlgmr.msra.gmra.mrb[40].mxu1 %v3872_v21 }
0x1982   :  { %7119 = vmatprep.mubr.msk.f32.mxu1 %vm8144_vm0, %v8143_v0  ;;  %7433 = vmatpush3.bf16.msra.mxu1 %v9147_v14 }
0x1983   :  { %7434 = vmatprep.subr.bf16.mxu1 %v8146_v22 }
0x1986   :  { %7436 = vmatpush3.bf16.msra.mxu1 %v9150_v3 }
0x1987   :  { %7437 = vmatprep.subr.bf16.mxu1 %v8146_v22 }
0x198a   :  { %7439 = vmatpush3.bf16.msra.mxu1 %v9154_v62 }
0x198b   :  { %7440 = vmatprep.subr.bf16.mxu1 %v8146_v22 }
0x198e   :  { %7442 = vmatpush3.bf16.msra.mxu1 %v9173_v49 }
0x198f   :  { %7443 = vmatprep.subr.bf16.mxu1 %v8146_v22 }
0x1992   :  { %7445 = vmatpush3.bf16.msra.mxu1 %v9177_v51 }
0x1993   :  { %7446 = vmatprep.subr.bf16.mxu1 %v8146_v22 }
0x1996   :  { %7448 = vmatpush3.bf16.msra.mxu1 %v9181_v63 }
0x1997   :  { %7449 = vmatprep.subr.bf16.mxu1 %v8146_v22 }
0x199a   :  { %7451 = vmatpush3.bf16.msra.mxu1 %v9184_v44 }
0x199b   :  { %7452 = vmatprep.subr.bf16.mxu1 %v8146_v22 }
0x199e   :  { %7454 = vmatpush3.bf16.msra.mxu1 %v9188_v29 }
0x199f   :  { %7122 = vmatprep.subr.bf16.mxu1 %v8143_v0 }
0x1a54   :  { %v4012_v47 = vpop.f32.mrb[40].mxu1 }
0x1a55   :  { %v9156_v30 = vadd.f32 %v6380_v27, %v4012_v47  ;;  %v4014_v15 = vpop.f32.mrb[41].mxu1 }
0x1a56   :  { %v4015_v54 = vpop.f32.mrb[42].mxu1 }
0x1a57   :  { %v4027_v43 = vrot.slane %v9156_v30, 1  ;;  %v4016_v39 = vpop.f32.mrb[43].mxu1  ;;  %4031 = vrot.lane.b32.xlu0 %v9156_v30, %s8138_s4  ;;  %v4024_v40 = vrot.slane %v9156_v30, 7 }
0x1a59   :  { %v4029_v23 = vmul.f32 %v9159_v50, %v4027_v43  ;;  %v4026_v5 = vmul.f32 %v9169_v41, %v4024_v40 }
0x1a5b   :  { %v4036_v1 = vpack.c.bf16 %v4029_v23, %v4029_v23 }
0x1a5d   :  { %6408 = vmatprep.mubr.msk.bf16.mxu0 %vm909_vm11, %v4036_v1 }
0x1ac9   :  { %v4032_v56 = vpop.permute.xlu0 %4031 }
0x1aca   :  { %v4034_v53 = vsel %vm909_vm11, %v4026_v5, %v4032_v56 }
0x1acb   :  { %v4035_v58 = vpack.c.bf16 %v4034_v53, %v4034_v53 }
0x1acd   :  { %4174 = vmatmul.mubr.bf16.vlgmr.msra.gmra.mrb[44].mxu0 %v4035_v58 }
0x1ace   :  { %6660 = vmatpush3.bf16.msra.mxu0 %v7796_v4 }
0x1acf   :  { %6661 = vmatprep.subr.bf16.mxu0 %v7797_v11 }
0x1ba0   :  { %v4175_v13 = vpop.f32.mrb[44].mxu0 }
0x1ba1   :  { %v9193_v21 = vadd.f32 %v6395_v16, %v4175_v13  ;;  %v4177_v52 = vpop.f32.mrb[45].mxu0  ;;  %v7798_v16 = vld [vmem:[#allocation2 + $0x3c8] sm:$0xff]  }
0x1ba2   :  { %v4178_v38 = vpop.f32.mrb[46].mxu0  ;;  %v7799_v13 = vld [vmem:[#allocation2 + $0x348] sm:$0xff]   ;;  %v7800_v52 = vld [vmem:[#allocation2 + $0x390] sm:$0xff]  }
0x1ba3   :  { %v4184_v37 = vsel %vm4183_vm14, %v9193_v21, 0.0  ;;  %v4191_v18 = vmul.f32 %v9193_v21, %v9193_v21  ;;  %v4200_v24 = vrot.slane %v9193_v21, 4  ;;  %v4179_v10 = vpop.f32.mrb[47].mxu0  ;;  %6662 = vmatpush3.bf16.msra.mxu0 %v7799_v13  ;;  %v7801_v38 = vld [vmem:[#allocation2 + $0x3d0] sm:$0xff]  }
0x1ba4   :  { %v4185_v42 = vrot.slane %v4184_v37, 4  ;;  %6663 = vmatprep.subr.bf16.mxu0 %v7800_v52  ;;  %v7805_v10 = vld [vmem:[#allocation2 + $0x358] sm:$0xff]  }
0x1ba5   :  { %v4192_v17 = vsel %vm4183_vm14, %v4191_v18, 0.0  ;;  %v4202_v8 = vsel %vm4183_vm14, %v4200_v24, 0.0  ;;  %v4210_v45 = vrot.slane %v4191_v18, 4  ;;  %v7803_v18 = vld [vmem:[#allocation2 + $0x398] sm:$0xff]  }
0x1ba6   :  { %v4186_v7 = vadd.f32 %v4185_v42, %v4184_v37  ;;  %v4193_v20 = vrot.slane %v4192_v17, 4  ;;  %v4203_v36 = vrot.slane %v4202_v8, 4  ;;  %v7802_v37 = vld [vmem:[#allocation2 + $0x350] sm:$0xff]   ;;  %v7804_v24 = vld [vmem:[#allocation2 + $0x3d8] sm:$0xff]   ;;  %v7806_v42 = vld [vmem:[#allocation2 + $0x3a0] sm:$0xff]  }
0x1ba7   :  { %v4212_v32 = vsel %vm4183_vm14, %v4210_v45, 0.0  ;;  %6664 = vmatpush3.bf16.msra.mxu0 %v7802_v37  ;;  %v7809_v45 = vld [vmem:[#allocation2 + $0x3a8] sm:$0xff]  }
0x1ba8   :  { %v4187_v35 = vrot.slane %v4186_v7, 2  ;;  %v4194_v28 = vadd.f32 %v4193_v20, %v4192_v17  ;;  %v4204_v31 = vadd.f32 %v4203_v36, %v4202_v8  ;;  %v4213_v48 = vrot.slane %v4212_v32, 4  ;;  %6665 = vmatprep.subr.bf16.mxu0 %v7803_v18  ;;  %v7807_v17 = vld [vmem:[#allocation2 + $0x3e0] sm:$0xff]   ;;  %v7811_v20 = vld [vmem:[#allocation2 + $0x368] sm:$0xff]   ;;  %v7812_v36 = vld [vmem:[#allocation2 + $0x3b0] sm:$0xff]  }
0x1ba9   :  { %v7808_v8 = vld [vmem:[#allocation2 + $0x360] sm:$0xff]  }
0x1baa   :  { %v4188_v27 = vadd.f32 %v4187_v35, %v4186_v7  ;;  %v4195_v47 = vrot.slane %v4194_v28, 2  ;;  %v4205_v15 = vrot.slane %v4204_v31, 2  ;;  %v4214_v54 = vadd.f32 %v4213_v48, %v4212_v32  ;;  %v7810_v7 = vld [vmem:[#allocation2 + $0x3e8] sm:$0xff]   ;;  %v7813_v32 = vld [vmem:[#allocation2 + $0x3f0] sm:$0xff]   ;;  %v7817_v48 = vld [vmem:[#allocation2 + $0x378] sm:$0xff]  }
0x1bab   :  { %6666 = vmatpush3.bf16.msra.mxu0 %v7805_v10  ;;  %v7814_v35 = vld [vmem:[#allocation2 + $0x370] sm:$0xff]  }
0x1bac   :  { %v4189_v43 = vrot.slane %v4188_v27, 1  ;;  %v4196_v39 = vadd.f32 %v4195_v47, %v4194_v28  ;;  %v4206_v23 = vadd.f32 %v4205_v15, %v4204_v31  ;;  %v4215_v1 = vrot.slane %v4214_v54, 2  ;;  %6667 = vmatprep.subr.bf16.mxu0 %v7806_v42  ;;  %v7815_v28 = vld [vmem:[#allocation2 + $0x3b8] sm:$0xff]  }
0x1bad   :  { %v7816_v31 = vld [vmem:[#allocation2 + $0x3f8] sm:$0xff]  }
0x1bae   :  { %v4197_v40 = vrot.slane %v4196_v39, 1  ;;  %v4207_v5 = vrot.slane %v4206_v23, 1  ;;  %v4216_v56 = vadd.f32 %v4215_v1, %v4214_v54  ;;  %v4190_v53 = vadd.f32 %v4189_v43, %v4188_v27 }
0x1baf   :  { %6668 = vmatpush3.bf16.msra.mxu0 %v7808_v8 }
0x1bb0   :  { %v4198_v58 = vadd.f32 %v4197_v40, %v4196_v39  ;;  %v4208_v25 = vadd.f32 %v4207_v5, %v4206_v23  ;;  %v4217_v19 = vrot.slane %v4216_v56, 1  ;;  %6669 = vmatprep.subr.bf16.mxu0 %v7809_v45  ;;  %v4181_v40 = vld [vmem:[#allocation6 + $0x118] sm:$0x1] }
0x1bb2   :  { %v4218_v12 = vadd.f32 %v4217_v19, %v4216_v56  ;;  %v4219_v9 = vsel %vm665_vm8, %v4190_v53, %v4198_v58 }
0x1bb3   :  { %v4220_v46 = vsel %vm667_vm9, %v4219_v9, %v4208_v25  ;;  %6670 = vmatpush3.bf16.msra.mxu0 %v7811_v20  ;;  %v4182_v25 = vld [vmem:[#allocation6 + $0x120] sm:$0x1] }
0x1bb4   :  { %v4221_v6 = vsel %vm669_vm10, %v4220_v46, %v4218_v12  ;;  %6671 = vmatprep.subr.bf16.mxu0 %v7812_v36 }
0x1bb5   :  { %7120 = vmatmul.mubr.f32.vlgmr.msra.gmra.mrb[44].mxu1 %v4221_v6 }
0x1bb6   :  { %7138 = vmatprep.mubr.msk.bf16.mxu1 %vm8144_vm0, %v8143_v0  ;;  %7123 = vmatpush3.bf16.msra.mxu1 %v7795_v60 }
0x1bb7   :  { %7124 = vmatprep.subr.bf16.mxu1 %v8143_v0  ;;  %6672 = vmatpush3.bf16.msra.mxu0 %v7814_v35 }
0x1bb8   :  { %6673 = vmatprep.subr.bf16.mxu0 %v7815_v28 }
0x1bba   :  { %7125 = vmatpush3.bf16.msra.mxu1 %v7798_v16 }
0x1bbb   :  { %7126 = vmatprep.subr.bf16.mxu1 %v8143_v0  ;;  %6674 = vmatpush3.bf16.msra.mxu0 %v7817_v48 }
0x1bbc   :  { %7455 = vmatprep.subr.bf16.mxu0 %v8146_v22 }
0x1bbe   :  { %7127 = vmatpush3.bf16.msra.mxu1 %v7801_v38 }
0x1bbf   :  { %7128 = vmatprep.subr.bf16.mxu1 %v8143_v0 }
0x1bc2   :  { %7129 = vmatpush3.bf16.msra.mxu1 %v7804_v24 }
0x1bc3   :  { %7130 = vmatprep.subr.bf16.mxu1 %v8143_v0 }
0x1bc6   :  { %7131 = vmatpush3.bf16.msra.mxu1 %v7807_v17 }
0x1bc7   :  { %7132 = vmatprep.subr.bf16.mxu1 %v8143_v0 }
0x1bca   :  { %7133 = vmatpush3.bf16.msra.mxu1 %v7810_v7 }
0x1bcb   :  { %7134 = vmatprep.subr.bf16.mxu1 %v8143_v0 }
0x1bce   :  { %7135 = vmatpush3.bf16.msra.mxu1 %v7813_v32 }
0x1bcf   :  { %7136 = vmatprep.subr.bf16.mxu1 %v8143_v0 }
0x1bd2   :  { %7137 = vmatpush3.bf16.msra.mxu1 %v7816_v31 }
0x1bd3   :  { %7177 = vmatprep.subr.bf16.mxu1 %v8143_v0 }
0x1c88   :  { %v4304_v27 = vpop.f32.mrb[44].mxu1 }
0x1c89   :  { %v4308_v47 = vmul.f32 %v4304_v27, %v4304_v27  ;;  %v7121_v15 = vpop.f32.mrb[45].mxu1 }
0x1c8b   :  { %v4310_v54 = vrot.slane %v4308_v47, 7 }
0x1c8d   :  { %v4312_v43 = vsub.f32 %v4304_v27, %v4310_v54 }
0x1c8f   :  { %v4313_v39 = vmax.f32 %v4312_v43, 0.0 }
0x1c91   :  { %v4314_v23 = vadd.f32 1e-05, %v4313_v39 }
0x1c93   :  { %8006 = vrsqrt.f32 %v4314_v23 }
0x1c9d   :  { %v8007_v1 = vpop.eup %8006 }
0x1c9e   :  { %v4317_v5 = vrot.slane %v8007_v1, 1  ;;  %v4347_v56 = vrot.slane %v8007_v1, 3 }
0x1ca0   :  { %v4319_v53 = vmul.f32 %v4317_v5, %v4181_v40  ;;  %v4349_v58 = vmul.f32 %v4347_v56, %v4181_v40 }
0x1ca2   :  { %v4320_v19 = vmul.f32 %v4319_v53, %v4304_v27  ;;  %v4325_v12 = vrot.slane %v4319_v53, %v8431_v2  ;;  %v4351_v9 = vrot.slane %v4349_v58, 6  ;;  %v4361_v11 = vrot.slane %v4349_v58, %v8431_v2 }
0x1ca4   :  { %v4321_v46 = vsub.f32 %v4182_v25, %v4320_v19  ;;  %v4353_v6 = vmul.f32 %v4351_v9, %v4304_v27  ;;  %v4326_v26 = vmul.f32 %v4325_v12, %v9193_v21  ;;  %v4362_v38 = vmul.f32 %v4361_v11, %v9193_v21  ;;  %v7819_v9 = vld [vmem:[#allocation2 + $0x408] sm:$0xff]  }
0x1ca5   :  { %v4345_v27 = vrot.slane %v8385_v55, %v8431_v2  ;;  %v7820_v55 = vld [vmem:[#allocation2 + $0x410] sm:$0xff]  }
0x1ca6   :  { %v4330_v60 = vrot.slane %v4321_v46, %v8431_v2  ;;  %v4355_v4 = vrot.slane %v4353_v6, 2  ;;  %v4844_v46 = vpack.c.bf16 %v9156_v30, %v9156_v30 }
0x1ca8   :  { %v4331_v16 = vadd.f32 %v4330_v60, %v4326_v26  ;;  %v4357_v13 = vsub.f32 %v4182_v25, %v4355_v4  ;;  %v7818_v25 = vld [vmem:[#allocation2 + $0x400] sm:$0xff]   ;;  %v6411_v26 = vld [vmem:[#allocation6 + $0x128] ss:$0 sm:$0xff] }
0x1caa   :  { %v4332_v52 = vmin.f32 %v4331_v16, 20.0  ;;  %v4366_v37 = vrot.slane %v4357_v13, %v8431_v2 }
0x1cac   :  { %v4333_v18 = vmul.f32 1.442695, %v4332_v52  ;;  %v4367_v24 = vadd.f32 %v4366_v37, %v4362_v38 }
0x1cae   :  { %8008 = vpow2.f32 %v4333_v18  ;;  %v4368_v10 = vmin.f32 %v4367_v24, 20.0 }
0x1cb0   :  { %v4369_v42 = vmul.f32 1.442695, %v4368_v10 }
0x1cb2   :  { %8010 = vpow2.f32 %v4369_v42 }
0x1cb8   :  { %v8009_v17 = vpop.eup %8008 }
0x1cb9   :  { %v4335_v8 = vadd.f32 1.0, %v8009_v17 }
0x1cbb   :  { %v4336_v45 = vmul.f32 %v4335_v8, %v4335_v8 }
0x1cbc   :  { %v8011_v7 = vpop.eup %8010 }
0x1cbd   :  { %v4339_v20 = vadd.f32 1.0, %v4336_v45  ;;  %v4371_v36 = vadd.f32 1.0, %v8011_v7  ;;  %v6409_v28 = vadd.f32 -1.0, %v4336_v45 }
0x1cbf   :  { %8012 = vrcp.f32 %v4339_v20  ;;  %v4372_v32 = vmul.f32 %v4371_v36, %v4371_v36  ;;  %v4338_v21 = vmul.f32 %v6409_v28, %v4331_v16 }
0x1cc1   :  { %v4375_v35 = vadd.f32 1.0, %v4372_v32  ;;  %v6410_v31 = vadd.f32 -1.0, %v4372_v32 }
0x1cc3   :  { %8014 = vrcp.f32 %v4375_v35  ;;  %v4374_v15 = vmul.f32 %v6410_v31, %v4367_v24 }
0x1cc9   :  { %v8013_v48 = vpop.eup %8012 }
0x1cca   :  { %v4341_v47 = vmul.f32 %v8013_v48, %v4338_v21 }
0x1ccc   :  { %v4346_v54 = vadd.f32 %v4345_v27, %v4341_v47 }
0x1ccd   :  { %v8015_v43 = vpop.eup %8014 }
0x1cce   :  { %v4377_v39 = vmul.f32 %v8015_v43, %v4374_v15 }
0x1cd0   :  { %v4382_v23 = vadd.f32 %v4381_v59, %v4377_v39  ;;  %v7821_v59 = vld [vmem:[#allocation2 + $0x418] sm:$0xff]  }
0x1cd2   :  { %v4383_v1 = vsel %vm4183_vm14, %v4346_v54, %v4382_v23 }
0x1cd3   :  { %v4384_v40 = vrot.slane %v4383_v1, 7  ;;  %v4386_v5 = vrot.slane %v4383_v1, 1  ;;  %v4389_v56 = vpack.c.bf16 %v4383_v1, %v4383_v1 }
0x1cd5   :  { %4620 = vmatprep.mubr.bf16.mxu0 %v4389_v56  ;;  %v4385_v53 = vmul.f32 %v4384_v40, %v9169_v41  ;;  %v4387_v58 = vmul.f32 %v4386_v5, %v9159_v50 }
0x1cd7   :  { %v4388_v19 = vpack.c.bf16 %v4385_v53, %v4385_v53  ;;  %v4390_v12 = vpack.c.bf16 %v4387_v58, %v4387_v58 }
0x1cd9   :  { %4621 = vmatmul.mubr.bf16.vlgmr.msra.gmra.mrb[48].mxu0 %v4388_v19  ;;  %7139 = vmatmul.mubr.bf16.vlgmr.msra.gmra.mrb[48].mxu1 %v4390_v12 }
0x1cda   :  { %7178 = vmatpush3.bf16.msra.mxu1 %v7818_v25  ;;  %7185 = vmatprep.mubr.msk.bf16.mxu1 %vm8144_vm0, %v8143_v0 }
0x1cdb   :  { %7179 = vmatprep.subr.bf16.mxu1 %v8143_v0  ;;  %7457 = vmatpush3.bf16.msra.mxu0 %v9147_v14 }
0x1cdc   :  { %7458 = vmatprep.subr.bf16.mxu0 %v8146_v22  ;;  %7174 = vmatprep.mubr.msk.f32.mxu0 %vm8144_vm0, %v8143_v0 }
0x1cde   :  { %7180 = vmatpush3.bf16.msra.mxu1 %v7819_v9 }
0x1cdf   :  { %7181 = vmatprep.subr.bf16.mxu1 %v8143_v0  ;;  %7460 = vmatpush3.bf16.msra.mxu0 %v9150_v3 }
0x1ce0   :  { %7461 = vmatprep.subr.bf16.mxu0 %v8146_v22 }
0x1ce2   :  { %7182 = vmatpush3.bf16.msra.mxu1 %v7820_v55 }
0x1ce3   :  { %7183 = vmatprep.subr.bf16.mxu1 %v8143_v0  ;;  %7463 = vmatpush3.bf16.msra.mxu0 %v9154_v62 }
0x1ce4   :  { %7464 = vmatprep.subr.bf16.mxu0 %v8146_v22 }
0x1ce6   :  { %7184 = vmatpush3.bf16.msra.mxu1 %v7821_v59 }
0x1ce7   :  { %7466 = vmatpush3.bf16.msra.mxu0 %v9173_v49  ;;  %7189 = vmatprep.subr.bf16.mxu1 %v8143_v0 }
0x1ce8   :  { %7467 = vmatprep.subr.bf16.mxu0 %v8146_v22 }
0x1ce9   :  { %7186 = vmatmul.mubr.msk.bf16.vlgmr.msra.gmra.mrb[52].mxu1 %vm909_vm11, %v4844_v46 }
0x1cea   :  { %7205 = vmatprep.mubr.msk.bf16.mxu1 %vm8144_vm0, %v8143_v0 }
0x1ceb   :  { %7469 = vmatpush3.bf16.msra.mxu0 %v9177_v51 }
0x1cec   :  { %7470 = vmatprep.subr.bf16.mxu0 %v8146_v22 }
0x1cef   :  { %7472 = vmatpush3.bf16.msra.mxu0 %v9181_v63 }
0x1cf0   :  { %7473 = vmatprep.subr.bf16.mxu0 %v8146_v22 }
0x1cf3   :  { %7475 = vmatpush3.bf16.msra.mxu0 %v9184_v44 }
0x1cf4   :  { %7476 = vmatprep.subr.bf16.mxu0 %v8146_v22 }
0x1cf7   :  { %7478 = vmatpush3.bf16.msra.mxu0 %v9188_v29 }
0x1dac   :  { %v6675_v30 = vpop.f32.mrb[48].mxu0  ;;  %v4662_v6 = vpop.f32.mrb[48].mxu1 }
0x1dad   :  { %v6676_v60 = vpop.f32.mrb[49].mxu0  ;;  %v7140_v4 = vpop.f32.mrb[49].mxu1 }
0x1dae   :  { %v6677_v11 = vadd.f32 %v6676_v60, %v6675_v30  ;;  %v6678_v16 = vpop.f32.mrb[50].mxu0  ;;  %v4665_v13 = vpop.f32.mrb[50].mxu1  ;;  %v7822_v60 = vld [vmem:[#allocation2 + $0x460] sm:$0xff]  }
0x1daf   :  { %v6679_v52 = vpop.f32.mrb[51].mxu0  ;;  %v7141_v38 = vpop.f32.mrb[51].mxu1  ;;  %v7823_v4 = vld [vmem:[#allocation2 + $0x420] sm:$0xff]   ;;  %6712 = vmatprep.subr.bf16.mxu0 %v7822_v60  ;;  %v7825_v16 = vld [vmem:[#allocation2 + $0x468] sm:$0xff]  }
0x1db0   :  { %v4623_v37 = vadd.f32 %v6677_v11, %v6411_v26  ;;  %v7824_v11 = vld [vmem:[#allocation2 + $0x4a0] sm:$0xff]   ;;  %v7826_v13 = vld [vmem:[#allocation2 + $0x428] sm:$0xff]   ;;  %v7828_v38 = vld [vmem:[#allocation2 + $0x470] sm:$0xff]  }
0x1db1   :  { %7190 = vmatpush3.bf16.msra.mxu1 %v7824_v11  ;;  %v7827_v52 = vld [vmem:[#allocation2 + $0x4a8] sm:$0xff]  }
0x1db2   :  { %v9259_v18 = vadd.f32 %v4662_v6, %v4623_v37  ;;  %7191 = vmatprep.subr.bf16.mxu1 %v8143_v0  ;;  %v7829_v37 = vld [vmem:[#allocation2 + $0x430] sm:$0xff]  }
0x1db4   :  { %v4670_v24 = vsel %vm4183_vm14, %v9259_v18, 0.0  ;;  %v4686_v10 = vrot.slane %v9259_v18, 4  ;;  %v4677_v42 = vmul.f32 %v9259_v18, %v9259_v18 }
0x1db5   :  { %v4671_v17 = vrot.slane %v4670_v24, 4  ;;  %7192 = vmatpush3.bf16.msra.mxu1 %v7827_v52 }
0x1db6   :  { %v4678_v8 = vsel %vm4183_vm14, %v4677_v42, 0.0  ;;  %v4688_v45 = vsel %vm4183_vm14, %v4686_v10, 0.0  ;;  %v4696_v7 = vrot.slane %v4677_v42, 4  ;;  %7193 = vmatprep.subr.bf16.mxu1 %v8143_v0  ;;  %v7831_v10 = vld [vmem:[#allocation2 + $0x478] sm:$0xff]  }
0x1db7   :  { %v4672_v20 = vadd.f32 %v4671_v17, %v4670_v24  ;;  %v4679_v36 = vrot.slane %v4678_v8, 4  ;;  %v4689_v32 = vrot.slane %v4688_v45, 4  ;;  %v7830_v24 = vld [vmem:[#allocation2 + $0x4b0] sm:$0xff]   ;;  %v7832_v42 = vld [vmem:[#allocation2 + $0x438] sm:$0xff]  }
0x1db8   :  { %v4698_v35 = vsel %vm4183_vm14, %v4696_v7, 0.0  ;;  %v7833_v17 = vld [vmem:[#allocation2 + $0x4b8] sm:$0xff]   ;;  %v7836_v7 = vld [vmem:[#allocation2 + $0x4c0] sm:$0xff]  }
0x1db9   :  { %v4673_v28 = vrot.slane %v4672_v20, 2  ;;  %v4680_v21 = vadd.f32 %v4679_v36, %v4678_v8  ;;  %v4690_v31 = vadd.f32 %v4689_v32, %v4688_v45  ;;  %v4699_v48 = vrot.slane %v4698_v35, 4  ;;  %7194 = vmatpush3.bf16.msra.mxu1 %v7830_v24  ;;  %v7834_v8 = vld [vmem:[#allocation2 + $0x480] sm:$0xff]   ;;  %v7838_v36 = vld [vmem:[#allocation2 + $0x448] sm:$0xff]  }
0x1dba   :  { %7195 = vmatprep.subr.bf16.mxu1 %v8143_v0  ;;  %v7835_v45 = vld [vmem:[#allocation2 + $0x440] sm:$0xff]   ;;  %v7839_v32 = vld [vmem:[#allocation2 + $0x4c8] sm:$0xff]  }
0x1dbb   :  { %v4674_v27 = vadd.f32 %v4673_v28, %v4672_v20  ;;  %v4681_v47 = vrot.slane %v4680_v21, 2  ;;  %v4691_v15 = vrot.slane %v4690_v31, 2  ;;  %v4700_v54 = vadd.f32 %v4699_v48, %v4698_v35  ;;  %v7837_v20 = vld [vmem:[#allocation2 + $0x488] sm:$0xff]   ;;  %v7840_v35 = vld [vmem:[#allocation2 + $0x490] sm:$0xff]   ;;  %v7844_v48 = vld [vmem:[#allocation2 + $0x458] sm:$0xff]  }
0x1dbc   :  { %v9269_v43 = vpop.f32.mrb[52].mxu1  ;;  %v7841_v28 = vld [vmem:[#allocation2 + $0x450] sm:$0xff]  }
0x1dbd   :  { %v7187_v39 = vpop.f32.mrb[53].mxu1  ;;  %v4675_v23 = vrot.slane %v4674_v27, 1  ;;  %v4682_v1 = vadd.f32 %v4681_v47, %v4680_v21  ;;  %v4692_v40 = vadd.f32 %v4691_v15, %v4690_v31  ;;  %v4701_v56 = vrot.slane %v4700_v54, 2  ;;  %7196 = vmatpush3.bf16.msra.mxu1 %v7833_v17  ;;  %v7842_v21 = vld [vmem:[#allocation2 + $0x4d0] sm:$0xff]   ;;  %v7843_v31 = vld [vmem:[#allocation2 + $0x498] sm:$0xff]  }
0x1dbe   :  { %v4922_v5 = vpop.f32.mrb[54].mxu1  ;;  %7197 = vmatprep.subr.bf16.mxu1 %v8143_v0 }
0x1dbf   :  { %v7188_v53 = vpop.f32.mrb[55].mxu1  ;;  %v4683_v58 = vrot.slane %v4682_v1, 1  ;;  %v4693_v25 = vrot.slane %v4692_v40, 1  ;;  %v4702_v19 = vadd.f32 %v4701_v56, %v4700_v54  ;;  %v4676_v12 = vadd.f32 %v4675_v23, %v4674_v27  ;;  %v7845_v27 = vld [vmem:[#allocation2 + $0x4d8] sm:$0xff]   ;;  %v4668_v56 = vld [vmem:[#allocation6 + $0x130] sm:$0x1] }
0x1dc1   :  { %v4684_v9 = vadd.f32 %v4683_v58, %v4682_v1  ;;  %v4694_v55 = vadd.f32 %v4693_v25, %v4692_v40  ;;  %v4703_v59 = vrot.slane %v4702_v19, 1  ;;  %7198 = vmatpush3.bf16.msra.mxu1 %v7836_v7 }
0x1dc2   :  { %7199 = vmatprep.subr.bf16.mxu1 %v8143_v0 }
0x1dc3   :  { %v4705_v46 = vsel %vm665_vm8, %v4676_v12, %v4684_v9  ;;  %v4704_v30 = vadd.f32 %v4703_v59, %v4702_v19  ;;  %v4669_v12 = vld [vmem:[#allocation6 + $0x138] sm:$0x1] }
0x1dc4   :  { %v4706_v6 = vsel %vm667_vm9, %v4705_v46, %v4694_v55 }
0x1dc5   :  { %v4707_v26 = vsel %vm669_vm10, %v4706_v6, %v4704_v30  ;;  %7200 = vmatpush3.bf16.msra.mxu1 %v7839_v32 }
0x1dc6   :  { %7175 = vmatmul.mubr.f32.vlgmr.msra.gmra.mrb[52].mxu0 %v4707_v26  ;;  %7201 = vmatprep.subr.bf16.mxu1 %v8143_v0 }
0x1dc7   :  { %6713 = vmatpush3.bf16.msra.mxu0 %v7823_v4 }
0x1dc8   :  { %6714 = vmatprep.subr.bf16.mxu0 %v7825_v16 }
0x1dc9   :  { %7202 = vmatpush3.bf16.msra.mxu1 %v7842_v21 }
0x1dca   :  { %7203 = vmatprep.subr.bf16.mxu1 %v8143_v0 }
0x1dcb   :  { %6715 = vmatpush3.bf16.msra.mxu0 %v7826_v13 }
0x1dcc   :  { %6716 = vmatprep.subr.bf16.mxu0 %v7828_v38 }
0x1dcd   :  { %7204 = vmatpush3.bf16.msra.mxu1 %v7845_v27 }
0x1dcf   :  { %6717 = vmatpush3.bf16.msra.mxu0 %v7829_v37 }
0x1dd0   :  { %6718 = vmatprep.subr.bf16.mxu0 %v7831_v10 }
0x1dd3   :  { %6719 = vmatpush3.bf16.msra.mxu0 %v7832_v42 }
0x1dd4   :  { %6720 = vmatprep.subr.bf16.mxu0 %v7834_v8 }
0x1dd7   :  { %6721 = vmatpush3.bf16.msra.mxu0 %v7835_v45 }
0x1dd8   :  { %6722 = vmatprep.subr.bf16.mxu0 %v7837_v20 }
0x1ddb   :  { %6723 = vmatpush3.bf16.msra.mxu0 %v7838_v36 }
0x1ddc   :  { %6724 = vmatprep.subr.bf16.mxu0 %v7840_v35 }
0x1ddf   :  { %6725 = vmatpush3.bf16.msra.mxu0 %v7841_v28 }
0x1de0   :  { %6726 = vmatprep.subr.bf16.mxu0 %v7843_v31  ;;  %v6438_v31 = vld [vmem:[#allocation6 + $0x148] ss:$0 sm:$0xff] }
0x1de3   :  { %6727 = vmatpush3.bf16.msra.mxu0 %v7844_v48 }
0x1de4   :  { %7479 = vmatprep.subr.bf16.mxu0 %v8146_v22 }
0x1e99   :  { %v4774_v47 = vpop.f32.mrb[52].mxu0 }
0x1e9a   :  { %v4778_v15 = vmul.f32 %v4774_v47, %v4774_v47  ;;  %v7176_v54 = vpop.f32.mrb[53].mxu0 }
0x1e9c   :  { %v4780_v39 = vrot.slane %v4778_v15, 7 }
0x1e9e   :  { %v4782_v23 = vsub.f32 %v4774_v47, %v4780_v39  ;;  %v4920_v39 = vadd.f32 %v6438_v31, %v9269_v43  ;;  %v6445_v43 = vld [vmem:[#allocation6 + $0x150] ss:$0 sm:$0xff] }
0x1ea0   :  { %v4783_v1 = vmax.f32 %v4782_v23, 0.0 }
0x1ea2   :  { %v4784_v40 = vadd.f32 1e-05, %v4783_v1 }
0x1ea4   :  { %8016 = vrsqrt.f32 %v4784_v40 }
0x1eae   :  { %v8017_v5 = vpop.eup %8016 }
0x1eaf   :  { %v4787_v53 = vrot.slane %v8017_v5, 1  ;;  %v4812_v58 = vrot.slane %v8017_v5, 3 }
0x1eb1   :  { %v4789_v25 = vmul.f32 %v4787_v53, %v4668_v56  ;;  %v4814_v19 = vmul.f32 %v4812_v58, %v4668_v56 }
0x1eb3   :  { %v4790_v9 = vmul.f32 %v4789_v25, %v4774_v47  ;;  %v4795_v55 = vrot.slane %v4789_v25, %v8431_v2  ;;  %v4816_v59 = vrot.slane %v4814_v19, 6  ;;  %v4826_v4 = vrot.slane %v4814_v19, %v8431_v2 }
0x1eb5   :  { %v4791_v46 = vsub.f32 %v4669_v12, %v4790_v9  ;;  %v4818_v30 = vmul.f32 %v4816_v59, %v4774_v47  ;;  %v4796_v6 = vmul.f32 %v4795_v55, %v9259_v18  ;;  %v4827_v52 = vmul.f32 %v4826_v4, %v9259_v18 }
0x1eb7   :  { %v4800_v26 = vrot.slane %v4791_v46, %v8431_v2  ;;  %v4820_v60 = vrot.slane %v4818_v30, 2 }
0x1eb9   :  { %v4801_v11 = vadd.f32 %v4800_v26, %v4796_v6  ;;  %v4822_v16 = vsub.f32 %v4669_v12, %v4820_v60 }
0x1ebb   :  { %v4802_v13 = vmin.f32 %v4801_v11, 20.0  ;;  %v4831_v38 = vrot.slane %v4822_v16, %v8431_v2 }
0x1ebd   :  { %v4803_v37 = vmul.f32 1.442695, %v4802_v13  ;;  %v4832_v24 = vadd.f32 %v4831_v38, %v4827_v52 }
0x1ebf   :  { %8018 = vpow2.f32 %v4803_v37  ;;  %v4833_v10 = vmin.f32 %v4832_v24, 20.0 }
0x1ec1   :  { %v4834_v42 = vmul.f32 1.442695, %v4833_v10 }
0x1ec3   :  { %8020 = vpow2.f32 %v4834_v42 }
0x1ec9   :  { %v8019_v17 = vpop.eup %8018 }
0x1eca   :  { %v4805_v8 = vadd.f32 1.0, %v8019_v17 }
0x1ecc   :  { %v4806_v45 = vmul.f32 %v4805_v8, %v4805_v8 }
0x1ecd   :  { %v8021_v7 = vpop.eup %8020 }
0x1ece   :  { %v4809_v20 = vadd.f32 1.0, %v4806_v45  ;;  %v4836_v36 = vadd.f32 1.0, %v8021_v7  ;;  %v6436_v28 = vadd.f32 -1.0, %v4806_v45 }
0x1ed0   :  { %v4837_v32 = vmul.f32 %v4836_v36, %v4836_v36  ;;  %8022 = vrcp.f32 %v4809_v20  ;;  %v4808_v48 = vmul.f32 %v6436_v28, %v4801_v11 }
0x1ed2   :  { %v4840_v35 = vadd.f32 1.0, %v4837_v32  ;;  %v6437_v18 = vadd.f32 -1.0, %v4837_v32 }
0x1ed4   :  { %8024 = vrcp.f32 %v4840_v35  ;;  %v4839_v27 = vmul.f32 %v6437_v18, %v4832_v24 }
0x1eda   :  { %v8023_v21 = vpop.eup %8022 }
0x1edb   :  { %v4811_v15 = vmul.f32 %v8023_v21, %v4808_v48 }
0x1ede   :  { %v8025_v47 = vpop.eup %8024 }
0x1edf   :  { %v4842_v54 = vmul.f32 %v8025_v47, %v4839_v27 }
0x1ee1   :  { %v4843_v23 = vsel %vm4183_vm14, %v4811_v15, %v4842_v54 }
0x1ee2   :  { %v9290_v1 = vadd.f32 %v4920_v39, %v4843_v23 }
0x1ee4   :  { %v4937_v40 = vpack.c.bf16 %v9290_v1, %v9290_v1  ;;  %v4932_v5 = vrot.slane %v9290_v1, 7  ;;  %v4934_v56 = vrot.slane %v9290_v1, 1 }
0x1ee6   :  { %5168 = vmatprep.mubr.bf16.mxu0 %v4937_v40  ;;  %v4933_v53 = vmul.f32 %v4932_v5, %v9169_v41  ;;  %v4935_v58 = vmul.f32 %v4934_v56, %v9159_v50 }
0x1ee8   :  { %v4936_v25 = vpack.c.bf16 %v4933_v53, %v4933_v53  ;;  %v4938_v19 = vpack.c.bf16 %v4935_v58, %v4935_v58 }
0x1eea   :  { %5169 = vmatmul.mubr.bf16.vlgmr.msra.gmra.mrb[56].mxu0 %v4936_v25  ;;  %7206 = vmatmul.mubr.bf16.vlgmr.msra.gmra.mrb[56].mxu1 %v4938_v19  ;;  %v7846_v25 = vld [vmem:[#allocation2 + $0x520] sm:$0xff]  }
0x1eeb   :  { %7481 = vmatpush3.bf16.msra.mxu0 %v9147_v14  ;;  %7241 = vmatprep.mubr.msk.f32.mxu0 %vm8144_vm0, %v8143_v0  ;;  %v7847_v19 = vld [vmem:[#allocation2 + $0x4e0] sm:$0xff]  }
0x1eec   :  { %7482 = vmatprep.subr.bf16.mxu0 %v8146_v22  ;;  %6760 = vmatprep.subr.bf16.mxu1 %v7846_v25 }
0x1eed   :  { %6761 = vmatpush3.bf16.msra.mxu1 %v7847_v19 }
0x1eef   :  { %7484 = vmatpush3.bf16.msra.mxu0 %v9150_v3 }
0x1ef0   :  { %7485 = vmatprep.subr.bf16.mxu0 %v8146_v22 }
0x1ef3   :  { %7487 = vmatpush3.bf16.msra.mxu0 %v9154_v62 }
0x1ef4   :  { %7488 = vmatprep.subr.bf16.mxu0 %v8146_v22 }
0x1ef7   :  { %7490 = vmatpush3.bf16.msra.mxu0 %v9173_v49 }
0x1ef8   :  { %7491 = vmatprep.subr.bf16.mxu0 %v8146_v22 }
0x1efb   :  { %7493 = vmatpush3.bf16.msra.mxu0 %v9177_v51 }
0x1efc   :  { %7494 = vmatprep.subr.bf16.mxu0 %v8146_v22 }
0x1eff   :  { %7496 = vmatpush3.bf16.msra.mxu0 %v9181_v63 }
0x1f00   :  { %7497 = vmatprep.subr.bf16.mxu0 %v8146_v22 }
0x1f03   :  { %7499 = vmatpush3.bf16.msra.mxu0 %v9184_v44 }
0x1f04   :  { %7500 = vmatprep.subr.bf16.mxu0 %v8146_v22 }
0x1f07   :  { %7502 = vmatpush3.bf16.msra.mxu0 %v9188_v29 }
0x1f08   :  { %7244 = vmatprep.subr.bf16.mxu0 %v8143_v0 }
0x1fbd   :  { %v6728_v50 = vpop.f32.mrb[56].mxu0  ;;  %v5210_v41 = vpop.f32.mrb[56].mxu1 }
0x1fbe   :  { %v6729_v12 = vpop.f32.mrb[57].mxu0  ;;  %v7207_v9 = vpop.f32.mrb[57].mxu1 }
0x1fbf   :  { %v6730_v55 = vadd.f32 %v6729_v12, %v6728_v50  ;;  %v6731_v59 = vpop.f32.mrb[58].mxu0  ;;  %v5213_v46 = vpop.f32.mrb[58].mxu1  ;;  %v7848_v50 = vld [vmem:[#allocation2 + $0x560] sm:$0xff]   ;;  %v7851_v12 = vld [vmem:[#allocation2 + $0x568] sm:$0xff]   ;;  %v7852_v9 = vld [vmem:[#allocation2 + $0x530] sm:$0xff]  }
0x1fc0   :  { %v6732_v30 = vpop.f32.mrb[59].mxu0  ;;  %v7208_v6 = vpop.f32.mrb[59].mxu1  ;;  %v7854_v59 = vld [vmem:[#allocation2 + $0x570] sm:$0xff]   ;;  %v7855_v46 = vld [vmem:[#allocation2 + $0x538] sm:$0xff]  }
0x1fc1   :  { %v5171_v26 = vadd.f32 %v6730_v55, %v6445_v43  ;;  %v7850_v43 = vld [vmem:[#allocation2 + $0x4e8] sm:$0xff]   ;;  %v7853_v55 = vld [vmem:[#allocation2 + $0x4f0] sm:$0xff]   ;;  %v7856_v30 = vld [vmem:[#allocation2 + $0x4f8] sm:$0xff]  }
0x1fc2   :  { %v7857_v6 = vld [vmem:[#allocation2 + $0x578] sm:$0xff]  }
0x1fc3   :  { %v9316_v60 = vadd.f32 %v5210_v41, %v5171_v26  ;;  %v7849_v41 = vld [vmem:[#allocation2 + $0x528] sm:$0xff]   ;;  %v7858_v26 = vld [vmem:[#allocation2 + $0x540] sm:$0xff]  }
0x1fc4   :  { %6762 = vmatprep.subr.bf16.mxu1 %v7849_v41 }
0x1fc5   :  { %v5218_v4 = vsel %vm4183_vm14, %v9316_v60, 0.0  ;;  %v5234_v11 = vrot.slane %v9316_v60, 4  ;;  %v5225_v16 = vmul.f32 %v9316_v60, %v9316_v60  ;;  %6763 = vmatpush3.bf16.msra.mxu1 %v7850_v43 }
0x1fc6   :  { %v5219_v13 = vrot.slane %v5218_v4, 4  ;;  %6764 = vmatprep.subr.bf16.mxu1 %v7852_v9 }
0x1fc7   :  { %v5226_v52 = vsel %vm4183_vm14, %v5225_v16, 0.0  ;;  %v5236_v38 = vsel %vm4183_vm14, %v5234_v11, 0.0  ;;  %v5244_v37 = vrot.slane %v5225_v16, 4  ;;  %v7860_v11 = vld [vmem:[#allocation2 + $0x580] sm:$0xff]   ;;  %v7861_v16 = vld [vmem:[#allocation2 + $0x548] sm:$0xff]  }
0x1fc8   :  { %v5220_v24 = vadd.f32 %v5219_v13, %v5218_v4  ;;  %v5227_v10 = vrot.slane %v5226_v52, 4  ;;  %v5237_v42 = vrot.slane %v5236_v38, 4  ;;  %v7859_v4 = vld [vmem:[#allocation2 + $0x500] sm:$0xff]   ;;  %v7862_v13 = vld [vmem:[#allocation2 + $0x508] sm:$0xff]  }
0x1fc9   :  { %v5246_v17 = vsel %vm4183_vm14, %v5244_v37, 0.0  ;;  %6765 = vmatpush3.bf16.msra.mxu1 %v7853_v55  ;;  %v7865_v37 = vld [vmem:[#allocation2 + $0x510] sm:$0xff]  }
0x1fca   :  { %v5221_v8 = vrot.slane %v5220_v24, 2  ;;  %v5228_v45 = vadd.f32 %v5227_v10, %v5226_v52  ;;  %v5238_v7 = vadd.f32 %v5237_v42, %v5236_v38  ;;  %v5247_v20 = vrot.slane %v5246_v17, 4  ;;  %6766 = vmatprep.subr.bf16.mxu1 %v7855_v46  ;;  %v7863_v52 = vld [vmem:[#allocation2 + $0x588] sm:$0xff]   ;;  %v7864_v38 = vld [vmem:[#allocation2 + $0x550] sm:$0xff]   ;;  %v7867_v10 = vld [vmem:[#allocation2 + $0x558] sm:$0xff]  }
0x1fcb   :  { %v7868_v42 = vld [vmem:[#allocation2 + $0x518] sm:$0xff]  }
0x1fcc   :  { %v5222_v36 = vadd.f32 %v5221_v8, %v5220_v24  ;;  %v5229_v32 = vrot.slane %v5228_v45, 2  ;;  %v5239_v35 = vrot.slane %v5238_v7, 2  ;;  %v5248_v28 = vadd.f32 %v5247_v20, %v5246_v17  ;;  %v7866_v24 = vld [vmem:[#allocation2 + $0x590] sm:$0xff]   ;;  %v7869_v17 = vld [vmem:[#allocation2 + $0x598] sm:$0xff]  }
0x1fcd   :  { %6767 = vmatpush3.bf16.msra.mxu1 %v7856_v30 }
0x1fce   :  { %v5223_v18 = vrot.slane %v5222_v36, 1  ;;  %v5230_v21 = vadd.f32 %v5229_v32, %v5228_v45  ;;  %v5240_v31 = vadd.f32 %v5239_v35, %v5238_v7  ;;  %v5249_v48 = vrot.slane %v5248_v28, 2  ;;  %6768 = vmatprep.subr.bf16.mxu1 %v7858_v26 }
0x1fd0   :  { %v5231_v27 = vrot.slane %v5230_v21, 1  ;;  %v5241_v47 = vrot.slane %v5240_v31, 1  ;;  %v5250_v15 = vadd.f32 %v5249_v48, %v5248_v28  ;;  %v5224_v54 = vadd.f32 %v5223_v18, %v5222_v36  ;;  %v5216_v18 = vld [vmem:[#allocation6 + $0x158] sm:$0x1] }
0x1fd1   :  { %6769 = vmatpush3.bf16.msra.mxu1 %v7859_v4 }
0x1fd2   :  { %v5232_v39 = vadd.f32 %v5231_v27, %v5230_v21  ;;  %v5242_v23 = vadd.f32 %v5241_v47, %v5240_v31  ;;  %v5251_v40 = vrot.slane %v5250_v15, 1  ;;  %6770 = vmatprep.subr.bf16.mxu1 %v7861_v16  ;;  %v5217_v47 = vld [vmem:[#allocation6 + $0x160] sm:$0x1] }
0x1fd4   :  { %v5252_v5 = vadd.f32 %v5251_v40, %v5250_v15  ;;  %v5253_v56 = vsel %vm665_vm8, %v5224_v54, %v5232_v39 }
0x1fd5   :  { %v5254_v53 = vsel %vm667_vm9, %v5253_v56, %v5242_v23  ;;  %6771 = vmatpush3.bf16.msra.mxu1 %v7862_v13 }
0x1fd6   :  { %v5255_v58 = vsel %vm669_vm10, %v5254_v53, %v5252_v5  ;;  %6772 = vmatprep.subr.bf16.mxu1 %v7864_v38 }
0x1fd7   :  { %7242 = vmatmul.mubr.f32.vlgmr.msra.gmra.mrb[54].mxu0 %v5255_v58 }
0x1fd8   :  { %7260 = vmatprep.mubr.msk.bf16.mxu0 %vm8144_vm0, %v8143_v0  ;;  %7245 = vmatpush3.bf16.msra.mxu0 %v7848_v50 }
0x1fd9   :  { %7246 = vmatprep.subr.bf16.mxu0 %v8143_v0  ;;  %6773 = vmatpush3.bf16.msra.mxu1 %v7865_v37 }
0x1fda   :  { %6774 = vmatprep.subr.bf16.mxu1 %v7867_v10 }
0x1fdc   :  { %7247 = vmatpush3.bf16.msra.mxu0 %v7851_v12 }
0x1fdd   :  { %7248 = vmatprep.subr.bf16.mxu0 %v8143_v0  ;;  %6775 = vmatpush3.bf16.msra.mxu1 %v7868_v42 }
0x1fde   :  { %7503 = vmatprep.subr.bf16.mxu1 %v8146_v22 }
0x1fe0   :  { %7249 = vmatpush3.bf16.msra.mxu0 %v7854_v59 }
0x1fe1   :  { %7250 = vmatprep.subr.bf16.mxu0 %v8143_v0 }
0x1fe4   :  { %7251 = vmatpush3.bf16.msra.mxu0 %v7857_v6 }
0x1fe5   :  { %7252 = vmatprep.subr.bf16.mxu0 %v8143_v0 }
0x1fe8   :  { %7253 = vmatpush3.bf16.msra.mxu0 %v7860_v11 }
0x1fe9   :  { %7254 = vmatprep.subr.bf16.mxu0 %v8143_v0 }
0x1fec   :  { %7255 = vmatpush3.bf16.msra.mxu0 %v7863_v52 }
0x1fed   :  { %7256 = vmatprep.subr.bf16.mxu0 %v8143_v0 }
0x1ff0   :  { %7257 = vmatpush3.bf16.msra.mxu0 %v7866_v24  ;;  %v5363_v24 = vrot.slane %v8387_v57, %v8431_v2 }
0x1ff1   :  { %7258 = vmatprep.subr.bf16.mxu0 %v8143_v0 }
0x1ff4   :  { %7259 = vmatpush3.bf16.msra.mxu0 %v7869_v17 }
0x1ff5   :  { %7299 = vmatprep.subr.bf16.mxu0 %v8143_v0 }
0x20aa   :  { %v5322_v8 = vpop.f32.mrb[54].mxu0 }
0x20ab   :  { %v5326_v45 = vmul.f32 %v5322_v8, %v5322_v8  ;;  %v7243_v7 = vpop.f32.mrb[55].mxu0 }
0x20ad   :  { %v5328_v20 = vrot.slane %v5326_v45, 7 }
0x20af   :  { %v5330_v36 = vsub.f32 %v5322_v8, %v5328_v20 }
0x20b1   :  { %v5331_v32 = vmax.f32 %v5330_v36, 0.0 }
0x20b3   :  { %v5332_v35 = vadd.f32 1e-05, %v5331_v32 }
0x20b5   :  { %8026 = vrsqrt.f32 %v5332_v35 }
0x20bf   :  { %v8027_v28 = vpop.eup %8026 }
0x20c0   :  { %v5335_v21 = vrot.slane %v8027_v28, 1  ;;  %v5365_v31 = vrot.slane %v8027_v28, 3  ;;  %v8062_v28 = vld [vmem:[#allocation6 + $0x1f8] sm:$0xff] }
0x20c2   :  { %v5337_v48 = vmul.f32 %v5335_v21, %v5216_v18  ;;  %v5367_v27 = vmul.f32 %v5365_v31, %v5216_v18  ;;  %v8063_v21 = vld [vmem:[#allocation6 + $0x200] sm:$0xff] }
0x20c4   :  { %v5338_v15 = vmul.f32 %v5337_v48, %v5322_v8  ;;  %v5343_v54 = vrot.slane %v5337_v48, %v8431_v2  ;;  %v5369_v39 = vrot.slane %v5367_v27, 6  ;;  %v5379_v58 = vrot.slane %v5367_v27, %v8431_v2 }
0x20c6   :  { %v5339_v23 = vsub.f32 %v5217_v47, %v5338_v15  ;;  %v5371_v40 = vmul.f32 %v5369_v39, %v5322_v8  ;;  %v5344_v5 = vmul.f32 %v5343_v54, %v9316_v60  ;;  %v5380_v41 = vmul.f32 %v5379_v58, %v9316_v60 }
0x20c8   :  { %v5348_v56 = vrot.slane %v5339_v23, %v8431_v2  ;;  %v5373_v53 = vrot.slane %v5371_v40, 2 }
0x20ca   :  { %v5349_v25 = vadd.f32 %v5348_v56, %v5344_v5  ;;  %v5375_v19 = vsub.f32 %v5217_v47, %v5373_v53 }
0x20cc   :  { %v5350_v50 = vmin.f32 %v5349_v25, 20.0  ;;  %v5384_v43 = vrot.slane %v5375_v19, %v8431_v2 }
0x20ce   :  { %v5351_v12 = vmul.f32 1.442695, %v5350_v50  ;;  %v5385_v9 = vadd.f32 %v5384_v43, %v5380_v41 }
0x20d0   :  { %8028 = vpow2.f32 %v5351_v12  ;;  %v5386_v55 = vmin.f32 %v5385_v9, 20.0 }
0x20d2   :  { %v5387_v59 = vmul.f32 1.442695, %v5386_v55 }
0x20d4   :  { %8030 = vpow2.f32 %v5387_v59 }
0x20da   :  { %v8029_v46 = vpop.eup %8028 }
0x20db   :  { %v5353_v30 = vadd.f32 1.0, %v8029_v46 }
0x20dd   :  { %v5354_v6 = vmul.f32 %v5353_v30, %v5353_v30 }
0x20de   :  { %v8031_v26 = vpop.eup %8030 }
0x20df   :  { %v5357_v4 = vadd.f32 1.0, %v5354_v6  ;;  %v5389_v11 = vadd.f32 1.0, %v8031_v26  ;;  %v6470_v52 = vadd.f32 -1.0, %v5354_v6 }
0x20e1   :  { %8032 = vrcp.f32 %v5357_v4  ;;  %v5390_v16 = vmul.f32 %v5389_v11, %v5389_v11  ;;  %v5356_v60 = vmul.f32 %v6470_v52, %v5349_v25 }
0x20e3   :  { %v5393_v13 = vadd.f32 1.0, %v5390_v16  ;;  %v6471_v38 = vadd.f32 -1.0, %v5390_v16 }
0x20e5   :  { %8034 = vrcp.f32 %v5393_v13  ;;  %v5392_v42 = vmul.f32 %v6471_v38, %v5385_v9 }
0x20eb   :  { %v8033_v37 = vpop.eup %8032 }
0x20ec   :  { %v5359_v10 = vmul.f32 %v8033_v37, %v5356_v60 }
0x20ee   :  { %v5364_v17 = vadd.f32 %v5363_v24, %v5359_v10  ;;  %v7870_v10 = vld [vmem:[#allocation2 + $0x5f0] sm:$0xff]  }
0x20ef   :  { %v8035_v8 = vpop.eup %8034 }
0x20f0   :  { %v5395_v45 = vmul.f32 %v8035_v8, %v5392_v42  ;;  %v7871_v8 = vld [vmem:[#allocation2 + $0x5f8] sm:$0xff]  }
0x20f2   :  { %v5400_v7 = vadd.f32 %v5399_v61, %v5395_v45  ;;  %v6472_v61 = vld [vmem:[#allocation6 + $0x168] ss:$0 sm:$0xff]  ;;  %v6050_v45 = vpack.c.bf16 %v8329_v34, %v8329_v34  ;;  %v7874_v34 = vld [vmem:[#allocation2 + $0x5a0] sm:$0xff]  }
0x20f4   :  { %v5401_v20 = vsel %vm4183_vm14, %v5364_v17, %v5400_v7  ;;  %v7872_v7 = vld [vmem:[#allocation2 + $0x5e0] sm:$0xff]  }
0x20f5   :  { %v5402_v36 = vrot.slane %v5401_v20, 7  ;;  %v5404_v32 = vrot.slane %v5401_v20, 1  ;;  %v5407_v35 = vpack.c.bf16 %v5401_v20, %v5401_v20  ;;  %v7873_v20 = vld [vmem:[#allocation2 + $0x5e8] sm:$0xff]  }
0x20f7   :  { %5638 = vmatprep.mubr.bf16.mxu1 %v5407_v35  ;;  %v5403_v18 = vmul.f32 %v8062_v28, %v5402_v36  ;;  %v5405_v31 = vmul.f32 %v8063_v21, %v5404_v32  ;;  %v5884_v36 = vld [vmem:[%s9432_s2] sm:$0x3]  ;;  %v7875_v35 = vld [vmem:[#allocation2 + $0x5a8] sm:$0xff]   ;;  %v7876_v28 = vld [vmem:[#allocation2 + $0x5b0] sm:$0xff]  }
0x20f8   :  { %v5902_v32 = vpack.c.bf16 %v5884_v36, %v5884_v36  ;;  %v7878_v21 = vld [vmem:[#allocation2 + $0x5c0] sm:$0xff]  }
0x20f9   :  { %v5406_v48 = vpack.c.bf16 %v5403_v18, %v5403_v18  ;;  %v5408_v27 = vpack.c.bf16 %v5405_v31, %v5405_v31  ;;  %v7877_v18 = vld [vmem:[#allocation2 + $0x5b8] sm:$0xff]   ;;  %v7879_v31 = vld [vmem:[#allocation2 + $0x5c8] sm:$0xff]  }
0x20fb   :  { %5639 = vmatmul.mubr.bf16.vlgmr.msra.gmra.mrb[60].mxu1 %v5406_v48  ;;  %7261 = vmatmul.mubr.bf16.vlgmr.msra.gmra.mrb[60].mxu0 %v5408_v27  ;;  %v7880_v48 = vld [vmem:[#allocation2 + $0x5d0] sm:$0xff]   ;;  %v7881_v27 = vld [vmem:[#allocation2 + $0x5d8] sm:$0xff]  }
0x20fc   :  { %7505 = vmatpush3.bf16.msra.mxu1 %v9147_v14  ;;  %7296 = vmatprep.mubr.msk.f32.mxu1 %vm8144_vm0, %v8143_v0 }
0x20fd   :  { %7506 = vmatprep.subr.bf16.mxu1 %v8146_v22  ;;  %7303 = vmatprep.mubr.msk.bf16.mxu0 %vm8144_vm0, %v8143_v0 }
0x20fe   :  { %7300 = vmatpush3.bf16.msra.mxu0 %v7872_v7 }
0x20ff   :  { %7301 = vmatprep.subr.bf16.mxu0 %v8143_v0 }
0x2100   :  { %7508 = vmatpush3.bf16.msra.mxu1 %v9150_v3 }
0x2101   :  { %7509 = vmatprep.subr.bf16.mxu1 %v8146_v22 }
0x2102   :  { %7302 = vmatpush3.bf16.msra.mxu0 %v7873_v20 }
0x2103   :  { %7307 = vmatprep.subr.bf16.mxu0 %v8143_v0 }
0x2104   :  { %7511 = vmatpush3.bf16.msra.mxu1 %v9154_v62 }
0x2105   :  { %7512 = vmatprep.subr.bf16.mxu1 %v8146_v22  ;;  %7304 = vmatmul.mubr.msk.bf16.vlgmr.msra.gmra.mrb[64].mxu0 %vm88_vm1, %v5902_v32 }
0x2106   :  { %7323 = vmatprep.mubr.msk.bf16.mxu0 %vm8144_vm0, %v8143_v0  ;;  %7308 = vmatpush3.bf16.msra.mxu0 %v7874_v34 }
0x2107   :  { %7309 = vmatprep.subr.bf16.mxu0 %v8143_v0 }
0x2108   :  { %7514 = vmatpush3.bf16.msra.mxu1 %v9173_v49 }
0x2109   :  { %7515 = vmatprep.subr.bf16.mxu1 %v8146_v22 }
0x210a   :  { %7310 = vmatpush3.bf16.msra.mxu0 %v7875_v35 }
0x210b   :  { %7311 = vmatprep.subr.bf16.mxu0 %v8143_v0 }
0x210c   :  { %7517 = vmatpush3.bf16.msra.mxu1 %v9177_v51 }
0x210d   :  { %7518 = vmatprep.subr.bf16.mxu1 %v8146_v22 }
0x210e   :  { %7312 = vmatpush3.bf16.msra.mxu0 %v7876_v28 }
0x210f   :  { %7313 = vmatprep.subr.bf16.mxu0 %v8143_v0 }
0x2110   :  { %7520 = vmatpush3.bf16.msra.mxu1 %v9181_v63 }
0x2111   :  { %7521 = vmatprep.subr.bf16.mxu1 %v8146_v22 }
0x2112   :  { %7314 = vmatpush3.bf16.msra.mxu0 %v7877_v18 }
0x2113   :  { %7315 = vmatprep.subr.bf16.mxu0 %v8143_v0 }
0x2114   :  { %7523 = vmatpush3.bf16.msra.mxu1 %v9184_v44 }
0x2115   :  { %7524 = vmatprep.subr.bf16.mxu1 %v8146_v22 }
0x2116   :  { %7316 = vmatpush3.bf16.msra.mxu0 %v7878_v21 }
0x2117   :  { %7317 = vmatprep.subr.bf16.mxu0 %v8143_v0 }
0x2118   :  { %7526 = vmatpush3.bf16.msra.mxu1 %v9188_v29 }
0x2119   :  { %7327 = vmatprep.subr.bf16.mxu1 %v8143_v0 }
0x211a   :  { %7318 = vmatpush3.bf16.msra.mxu0 %v7879_v31 }
0x211b   :  { %7319 = vmatprep.subr.bf16.mxu0 %v8143_v0 }
0x211e   :  { %7320 = vmatpush3.bf16.msra.mxu0 %v7880_v48 }
0x211f   :  { %7321 = vmatprep.subr.bf16.mxu0 %v8143_v0 }
0x2122   :  { %7322 = vmatpush3.bf16.msra.mxu0 %v7881_v27 }
0x21ce   :  { %v6776_v33 = vpop.f32.mrb[60].mxu1  ;;  %v5680_v57 = vpop.f32.mrb[60].mxu0 }
0x21cf   :  { %v6777_v14 = vpop.f32.mrb[61].mxu1  ;;  %v7262_v3 = vpop.f32.mrb[61].mxu0 }
0x21d0   :  { %v6778_v62 = vadd.f32 %v6777_v14, %v6776_v33  ;;  %v6779_v49 = vpop.f32.mrb[62].mxu1  ;;  %v5683_v51 = vpop.f32.mrb[62].mxu0 }
0x21d1   :  { %v6780_v47 = vpop.f32.mrb[63].mxu1  ;;  %v7263_v63 = vpop.f32.mrb[63].mxu0 }
0x21d2   :  { %v5641_v15 = vadd.f32 %v6778_v62, %v6472_v61 }
0x21d4   :  { %v9372_v54 = vadd.f32 %v5680_v57, %v5641_v15 }
0x21d6   :  { %v5688_v22 = vsel %vm4183_vm14, %v9372_v54, 0.0  ;;  %v5704_v44 = vrot.slane %v9372_v54, 4  ;;  %v5695_v29 = vmul.f32 %v9372_v54, %v9372_v54 }
0x21d7   :  { %v5689_v39 = vrot.slane %v5688_v22, 4 }
0x21d8   :  { %v5696_v23 = vsel %vm4183_vm14, %v5695_v29, 0.0  ;;  %v5706_v40 = vsel %vm4183_vm14, %v5704_v44, 0.0  ;;  %v5714_v5 = vrot.slane %v5695_v29, 4  ;;  %v5686_v44 = vld [vmem:[#allocation6 + $0x170] sm:$0x1] }
0x21d9   :  { %v5690_v56 = vadd.f32 %v5689_v39, %v5688_v22  ;;  %v5697_v53 = vrot.slane %v5696_v23, 4  ;;  %v5707_v58 = vrot.slane %v5706_v40, 4 }
0x21da   :  { %v5716_v25 = vsel %vm4183_vm14, %v5714_v5, 0.0  ;;  %v5687_v5 = vld [vmem:[#allocation6 + $0x178] sm:$0x1] }
0x21db   :  { %v5691_v19 = vrot.slane %v5690_v56, 2  ;;  %v5698_v50 = vadd.f32 %v5697_v53, %v5696_v23  ;;  %v5708_v41 = vadd.f32 %v5707_v58, %v5706_v40  ;;  %v5717_v43 = vrot.slane %v5716_v25, 4 }
0x21dd   :  { %v5692_v12 = vadd.f32 %v5691_v19, %v5690_v56  ;;  %v5699_v9 = vrot.slane %v5698_v50, 2  ;;  %v5709_v55 = vrot.slane %v5708_v41, 2  ;;  %v5718_v59 = vadd.f32 %v5717_v43, %v5716_v25 }
0x21df   :  { %v5693_v46 = vrot.slane %v5692_v12, 1  ;;  %v5700_v30 = vadd.f32 %v5699_v9, %v5698_v50  ;;  %v5710_v6 = vadd.f32 %v5709_v55, %v5708_v41  ;;  %v5719_v26 = vrot.slane %v5718_v59, 2 }
0x21e1   :  { %v5701_v4 = vrot.slane %v5700_v30, 1  ;;  %v5711_v11 = vrot.slane %v5710_v6, 1  ;;  %v5720_v16 = vadd.f32 %v5719_v26, %v5718_v59  ;;  %v5694_v13 = vadd.f32 %v5693_v46, %v5692_v12 }
0x21e3   :  { %v5702_v52 = vadd.f32 %v5701_v4, %v5700_v30  ;;  %v5712_v60 = vadd.f32 %v5711_v11, %v5710_v6  ;;  %v5721_v38 = vrot.slane %v5720_v16, 1 }
0x21e5   :  { %v5722_v37 = vadd.f32 %v5721_v38, %v5720_v16  ;;  %v5723_v24 = vsel %vm665_vm8, %v5694_v13, %v5702_v52 }
0x21e6   :  { %v5724_v42 = vsel %vm667_vm9, %v5723_v24, %v5712_v60 }
0x21e7   :  { %v5725_v17 = vsel %vm669_vm10, %v5724_v42, %v5722_v37 }
0x21e8   :  { %7297 = vmatmul.mubr.f32.vlgmr.msra.gmra.mrb[46].mxu1 %v5725_v17 }
0x21e9   :  { %7328 = vmatpush3.bf16.msra.mxu1 %v7870_v10  ;;  %7331 = vmatprep.mubr.msk.bf16.mxu1 %vm8144_vm0, %v8143_v0 }
0x21ea   :  { %7329 = vmatprep.subr.bf16.mxu1 %v8143_v0 }
0x21ed   :  { %7330 = vmatpush3.bf16.msra.mxu1 %v7871_v8 }
0x21ee   :  { %7335 = vmatprep.subr.bf16.mxu1 %v8143_v0 }
0x21f0   :  { %7332 = vmatmul.mubr.msk.bf16.vlgmr.msra.gmra.mrb[64].mxu1 %vm88_vm1, %v6050_v45 }
0x21f1   :  { %7343 = vmatprep.mubr.msk.bf16.mxu1 %vm8144_vm0, %v8143_v0 }
0x22bb   :  { %v5792_v33 = vpop.f32.mrb[46].mxu1 }
0x22bc   :  { %v5796_v57 = vmul.f32 %v5792_v33, %v5792_v33  ;;  %v7298_v61 = vpop.f32.mrb[47].mxu1 }
0x22be   :  { %v5798_v14 = vrot.slane %v5796_v57, 7 }
0x22c0   :  { %v5800_v3 = vsub.f32 %v5792_v33, %v5798_v14 }
0x22c2   :  { %v5801_v62 = vmax.f32 %v5800_v3, 0.0 }
0x22c3   :  { %v9409_v49 = vpop.f32.mrb[64].mxu1 }
0x22c4   :  { %v5802_v51 = vadd.f32 1e-05, %v5801_v62  ;;  %v7333_v47 = vpop.f32.mrb[65].mxu1 }
0x22c5   :  { %v6107_v63 = vpop.f32.mrb[66].mxu1 }
0x22c6   :  { %8036 = vrsqrt.f32 %v5802_v51  ;;  %v7334_v15 = vpop.f32.mrb[67].mxu1 }
0x22d0   :  { %v8037_v22 = vpop.eup %8036 }
0x22d1   :  { %v5805_v29 = vrot.slane %v8037_v22, 1  ;;  %v5830_v39 = vrot.slane %v8037_v22, 3  ;;  %v5956_v22 = vpop.f32.mrb[64].mxu0 }
0x22d3   :  { %v5807_v23 = vmul.f32 %v5805_v29, %v5686_v44  ;;  %v5832_v40 = vmul.f32 %v5830_v39, %v5686_v44  ;;  %v7305_v44 = vpop.f32.mrb[65].mxu0 }
0x22d4   :  { %v5959_v29 = vpop.f32.mrb[66].mxu0 }
0x22d5   :  { %v5808_v56 = vmul.f32 %v5807_v23, %v5792_v33  ;;  %v5813_v53 = vrot.slane %v5807_v23, %v8431_v2  ;;  %v5834_v58 = vrot.slane %v5832_v40, 6  ;;  %v5844_v12 = vrot.slane %v5832_v40, %v8431_v2  ;;  %v7306_v39 = vpop.f32.mrb[67].mxu0  ;;  %v7882_v23 = vld [vmem:[#allocation2 + $0x600] sm:$0xff]   ;;  %v7883_v40 = vld [vmem:[#allocation2 + $0x608] sm:$0xff]  }
0x22d6   :  { %7336 = vmatpush3.bf16.msra.mxu1 %v7882_v23 }
0x22d7   :  { %v5809_v25 = vsub.f32 %v5687_v5, %v5808_v56  ;;  %v5836_v19 = vmul.f32 %v5834_v58, %v5792_v33  ;;  %v5814_v50 = vmul.f32 %v5813_v53, %v9372_v54  ;;  %v5845_v46 = vmul.f32 %v5844_v12, %v9372_v54  ;;  %7337 = vmatprep.subr.bf16.mxu1 %v8143_v0  ;;  %v7885_v56 = vld [vmem:[#allocation2 + $0x618] sm:$0xff]  }
0x22d9   :  { %v5818_v41 = vrot.slane %v5809_v25, %v8431_v2  ;;  %v5838_v43 = vrot.slane %v5836_v19, 2  ;;  %v6513_v19 = vld [vmem:[#allocation6 + $0x188] ss:$0 sm:$0xff] }
0x22da   :  { %7338 = vmatpush3.bf16.msra.mxu1 %v7883_v40 }
0x22db   :  { %v5819_v9 = vadd.f32 %v5818_v41, %v5814_v50  ;;  %v5840_v55 = vsub.f32 %v5687_v5, %v5838_v43  ;;  %7339 = vmatprep.subr.bf16.mxu1 %v8143_v0  ;;  %v7884_v5 = vld [vmem:[#allocation2 + $0x610] sm:$0xff]  }
0x22dd   :  { %v5820_v59 = vmin.f32 %v5819_v9, 20.0  ;;  %v5849_v30 = vrot.slane %v5840_v55, %v8431_v2 }
0x22de   :  { %7340 = vmatpush3.bf16.msra.mxu1 %v7884_v5 }
0x22df   :  { %v5821_v6 = vmul.f32 1.442695, %v5820_v59  ;;  %v5850_v26 = vadd.f32 %v5849_v30, %v5845_v46  ;;  %7341 = vmatprep.subr.bf16.mxu1 %v8143_v0 }
0x22e1   :  { %8038 = vpow2.f32 %v5821_v6  ;;  %v5851_v4 = vmin.f32 %v5850_v26, 20.0 }
0x22e2   :  { %7342 = vmatpush3.bf16.msra.mxu1 %v7885_v56 }
0x22e3   :  { %v5852_v11 = vmul.f32 1.442695, %v5851_v4 }
0x22e5   :  { %8040 = vpow2.f32 %v5852_v11 }
0x22eb   :  { %v8039_v16 = vpop.eup %8038 }
0x22ec   :  { %v5823_v13 = vadd.f32 1.0, %v8039_v16 }
0x22ee   :  { %v5824_v52 = vmul.f32 %v5823_v13, %v5823_v13  ;;  %v6515_v13 = vld [vmem:[#allocation6 + $0x190] ss:$0 sm:$0xff] }
0x22ef   :  { %v8041_v60 = vpop.eup %8040 }
0x22f0   :  { %v5827_v38 = vadd.f32 1.0, %v5824_v52  ;;  %v5854_v37 = vadd.f32 1.0, %v8041_v60  ;;  %v6497_v42 = vadd.f32 -1.0, %v5824_v52 }
0x22f2   :  { %v5855_v24 = vmul.f32 %v5854_v37, %v5854_v37  ;;  %8042 = vrcp.f32 %v5827_v38  ;;  %v5826_v2 = vmul.f32 %v6497_v42, %v5819_v9 }
0x22f4   :  { %v5858_v10 = vadd.f32 1.0, %v5855_v24  ;;  %v6498_v54 = vadd.f32 -1.0, %v5855_v24 }
0x22f6   :  { %8044 = vrcp.f32 %v5858_v10  ;;  %v5857_v8 = vmul.f32 %v6498_v54, %v5850_v26 }
0x22fc   :  { %v8043_v17 = vpop.eup %8042 }
0x22fd   :  { %v5829_v7 = vmul.f32 %v8043_v17, %v5826_v2 }
0x2300   :  { %v8045_v45 = vpop.eup %8044 }
0x2301   :  { %v5860_v20 = vmul.f32 %v8045_v45, %v5857_v8 }
0x2303   :  { %v5861_v36 = vsel %vm4183_vm14, %v5829_v7, %v5860_v20 }
0x2304   :  { %v5862_v32 = vadd.f32 %v5861_v36, %v9290_v1 }
0x2306   :  { %v5863_v34 = vsel %vm4183_vm14, %v5862_v32, 0.0  ;;  %v5873_v35 = vrot.slane %v5862_v32, 4 }
0x2307   :  { %v5864_v28 = vrot.slane %v5863_v34, 4 }
0x2308   :  { %v5875_v18 = vsel %vm4183_vm14, %v5873_v35, 0.0 }
0x2309   :  { %v5865_v21 = vadd.f32 %v5864_v28, %v5863_v34  ;;  %v5876_v31 = vrot.slane %v5875_v18, 4 }
0x230b   :  { %v5866_v48 = vrot.slane %v5865_v21, 2  ;;  %v5877_v27 = vadd.f32 %v5876_v31, %v5875_v18 }
0x230d   :  { %v5867_v33 = vadd.f32 %v5866_v48, %v5865_v21  ;;  %v5878_v57 = vrot.slane %v5877_v27, 2 }
0x230f   :  { %v5868_v61 = vrot.slane %v5867_v33, 1  ;;  %v5879_v14 = vadd.f32 %v5878_v57, %v5877_v27 }
0x2311   :  { %v5869_v3 = vadd.f32 %v5868_v61, %v5867_v33  ;;  %v5880_v62 = vrot.slane %v5879_v14, 1 }
0x2313   :  { %v5881_v51 = vadd.f32 %v5880_v62, %v5879_v14  ;;  %v5871_v47 = vmul.f32 0.25, %v5869_v3 }
0x2315   :  { %v5882_v63 = vmul.f32 0.25, %v5881_v51 }
0x2317   :  { %v5883_v1 = vsel %vm665_vm8, %v5871_v47, %v5882_v63 }
0x2318   :  { %v5885_v15 = vpack.c.bf16 %v5883_v1, %v5883_v1 }
0x231a   :  { %7324 = vmatmul.mubr.bf16.vlgmr.msra.gmra.mrb[68].mxu0 %v5885_v15 }
0x23ed   :  { %v6044_v53 = vpop.f32.mrb[68].mxu0 }
0x23ee   :  { %v6045_v58 = vadd.f32 %v6044_v53, %v5956_v22  ;;  %v7325_v25 = vpop.f32.mrb[69].mxu0 }
0x23ef   :  { %v6047_v50 = vpop.f32.mrb[70].mxu0 }
0x23f0   :  { %v6110_v41 = vadd.f32 %v9409_v49, %v6045_v58  ;;  %v7326_v43 = vpop.f32.mrb[71].mxu0 }
0x23f2   :  { %v6116_v12 = vadd.f32 %v6513_v19, %v6110_v41 }
0x23f4   :  { %v6117_v9 = vmin.f32 %v6116_v12, 20.0 }
0x23f6   :  { %v6118_v55 = vmul.f32 1.442695, %v6117_v9 }
0x23f8   :  { %8046 = vpow2.f32 %v6118_v55 }
0x2402   :  { %v8047_v59 = vpop.eup %8046 }
0x2403   :  { %v6120_v46 = vadd.f32 1.0, %v8047_v59 }
0x2405   :  { %v6121_v30 = vmul.f32 %v6120_v46, %v6120_v46 }
0x2407   :  { %v6124_v6 = vadd.f32 1.0, %v6121_v30  ;;  %v6514_v0 = vadd.f32 -1.0, %v6121_v30 }
0x2409   :  { %8048 = vrcp.f32 %v6124_v6  ;;  %v6123_v26 = vmul.f32 %v6514_v0, %v6116_v12 }
0x2413   :  { %v8049_v4 = vpop.eup %8048 }
0x2414   :  { %v6126_v11 = vmul.f32 %v8049_v4, %v6123_v26 }
0x2416   :  { %v6127_v16 = vpack.c.bf16 %v6126_v11, %v6126_v11 }
0x2418   :  { %7344 = vmatmul.mubr.msk.bf16.vlgmr.msra.gmra.mrb[68].mxu1 %vm909_vm11, %v6127_v16 }
0x24eb   :  { %v6202_v52 = vpop.f32.mrb[68].mxu1 }
0x24ec   :  { %v6203_v49 = vadd.f32 %v6515_v13, %v6202_v52  ;;  %v7345_v60 = vpop.f32.mrb[69].mxu1 }
0x24ed   :  { %v6205_v38 = vpop.f32.mrb[70].mxu1 }
0x24ee   :  { %6208 = vst [vmem:[%s9436_s6] sm:$0x3] %v6203_v49  ;;  %v7346_v37 = vpop.f32.mrb[71].mxu1 }
0x24ef   :  { %6213 = vsyncpa [#allocation3], 1 }
0x24f0   :  { %6214 = vsyncpa [#allocation5], 1 }

</bundles_post_ra>
